<compile_context>
chip_gen: v7x
topology: tpu7x:2x2x1
jax: 0.10.0
libtpu: 0.0.40
codegen_flags: <defaults>
</compile_context>

<pallas_src>
import functools

import jax
import jax.numpy as jnp
from jax.experimental import pallas as pl
from jax.experimental.pallas import tpu as pltpu


# ------------------------------ tiling config ------------------------------

_TILE_M, _TILE_N, _TILE_K = 512, 512, 512          # MXU-friendly targets
_VMEM_LIMIT = 48 * 1024 * 1024                      # headroom on v7x (64 MiB)


def _round_up(x, m):
    return (x + m - 1) // m * m


def _choose_row_tile(M, target):
    """Row (second-minor) tile.  Returns (tm, M_pad).

    M <= target -> single full-M block (block dim == array dim is always
    legal).  Otherwise prefer an exact 128-aligned divisor; else pad M to a
    multiple of a 128-aligned tile (waste-minimizing) and slice the tail off
    in the wrapper."""
    if M <= target:
        return M, M
    cands = list(range(target, 127, -128))
    for t in cands:
        if M % t == 0:
            return t, M
    best = min(cands, key=lambda t: (_round_up(M, t) - M, -t))
    return best, _round_up(M, best)


def _choose_col_tile(N, target):
    """Lane / contraction tile: exact 128-aligned divisor or the full dim."""
    if N <= target:
        return N
    for t in range(target, 127, -128):
        if N % t == 0:
            return t
    # TODO(synk): pad non-divisible large N/K dims instead of full-dim fallback.
    return N


def _ln_tiles(M, D, Nout, itemsize):
    """VMEM-aware tiles for the fused LN+matmul kernel (full D stays resident)."""
    budget = int(_VMEM_LIMIT * 0.75)
    tgt_m, tgt_n = _TILE_M, _TILE_N
    while True:
        tm, M_pad = _choose_row_tile(M, tgt_m)
        tn = _choose_col_tile(Nout, tgt_n)
        footprint = 2 * ((tm + tn) * D + tm * tn + 2 * D) * itemsize
        if footprint <= budget or (tgt_m <= 128 and tgt_n <= 128):
            # TODO(synk): for very large D, switch to a two-pass LN (K-tiled D
            # with per-row mu/rsig precomputed into scratch) instead of
            # shrinking tiles.
            return tm, tn, M_pad
        if tgt_n > 128:
            tgt_n //= 2
        else:
            tgt_m //= 2


def _pad_rows(a, M_pad):
    M = a.shape[0]
    if M_pad == M:
        return a
    return jnp.pad(a, ((0, M_pad - M), (0, 0)))


def _gelu(y):
    # exact (erf-based) GELU, matching torch.nn.GELU default
    return 0.5 * y * (1.0 + jax.lax.erf(y * (2.0 ** -0.5)))


# ----------------------------- Pallas kernels ------------------------------

def _ln_linear_kernel(x_ref, lnw_ref, lnb_ref, w_ref, b_ref, o_ref, *,
                      eps, activation):
    """Fused LayerNorm(x) @ W + b [+ GELU] on one (tm, D) x (D, tn) tile."""
    x = x_ref[...]
    xf = x.astype(jnp.float32)                                # LN stats in f32
    mu = jnp.mean(xf, axis=-1, keepdims=True)
    var = jnp.mean((xf - mu) ** 2, axis=-1, keepdims=True)
    xn = (xf - mu) * jax.lax.rsqrt(var + eps)
    xn = xn * lnw_ref[...].astype(jnp.float32) + lnb_ref[...].astype(jnp.float32)
    # feed the MXU in the storage dtype (bf16 fast path for real models)
    y = jnp.dot(xn.astype(x.dtype), w_ref[...],
                preferred_element_type=jnp.float32)           # (tm, tn)
    y = y + b_ref[...].astype(jnp.float32)
    if activation == "gelu":
        y = _gelu(y)
    o_ref[...] = y.astype(o_ref.dtype)


def ln_linear_pallas(x, ln_w, ln_b, w, b, activation=None, eps=1e-5):
    """x: (M, D); ln_w/ln_b: (D,); w: (D, Nout); b: (Nout,) -> (M, Nout)."""
    M, D = x.shape
    Nout = w.shape[1]
    tm, tn, M_pad = _ln_tiles(M, D, Nout, x.dtype.itemsize)
    x_p = _pad_rows(x, M_pad)
    grid = (M_pad // tm, Nout // tn)
    out = pl.pallas_call(
        functools.partial(_ln_linear_kernel, eps=eps, activation=activation),
        out_shape=jax.ShapeDtypeStruct((M_pad, Nout), x.dtype),
        grid=grid,
        in_specs=[
            pl.BlockSpec((tm, D), lambda i, j: (i, 0)),
            pl.BlockSpec((1, D), lambda i, j: (0, 0)),      # LN weight: resident
            pl.BlockSpec((1, D), lambda i, j: (0, 0)),      # LN bias:   resident
            pl.BlockSpec((D, tn), lambda i, j: (0, j)),
            pl.BlockSpec((1, tn), lambda i, j: (0, j)),
        ],
        out_specs=pl.BlockSpec((tm, tn), lambda i, j: (i, j)),
        compiler_params=pltpu.CompilerParams(
            dimension_semantics=("parallel", "parallel"),
            vmem_limit_bytes=_VMEM_LIMIT),
    )(x_p, ln_w.reshape(1, D), ln_b.reshape(1, D), w, b.reshape(1, Nout))
    return out[:M] if M_pad != M else out


def _linear_kernel(x_ref, w_ref, b_ref, *rest, activation, has_residual):
    """K-tiled matmul, f32 accumulator; bias (+GELU) (+residual) fused in finalize."""
    if has_residual:
        res_ref, o_ref, acc_ref = rest
    else:
        o_ref, acc_ref = rest

    @pl.when(pl.program_id(2) == 0)
    def _():
        acc_ref[...] = jnp.zeros_like(acc_ref)

    acc_ref[...] += jnp.dot(x_ref[...], w_ref[...],
                            preferred_element_type=jnp.float32)

    @pl.when(pl.program_id(2) == pl.num_programs(2) - 1)
    def _():
        y = acc_ref[...] + b_ref[...].astype(jnp.float32)
        if activation == "gelu":
            y = _gelu(y)
        if has_residual:
            y = y + res_ref[...].astype(jnp.float32)
        o_ref[...] = y.astype(o_ref.dtype)


def linear_pallas(x, w, b, residual=None, activation=None):
    """x: (M, K); w: (K, Nout); b: (Nout,) [; residual: (M, Nout)] -> (M, Nout)."""
    M, K = x.shape
    Nout = w.shape[1]
    tm, M_pad = _choose_row_tile(M, _TILE_M)
    tn = _choose_col_tile(Nout, _TILE_N)
    tk = _choose_col_tile(K, _TILE_K)
    grid = (M_pad // tm, Nout // tn, K // tk)

    args = [_pad_rows(x, M_pad), w, b.reshape(1, Nout)]
    in_specs = [
        pl.BlockSpec((tm, tk), lambda i, j, k: (i, k)),
        pl.BlockSpec((tk, tn), lambda i, j, k: (k, j)),
        pl.BlockSpec((1, tn), lambda i, j, k: (0, j)),
    ]
    if residual is not None:
        args.append(_pad_rows(residual, M_pad))
        in_specs.append(pl.BlockSpec((tm, tn), lambda i, j, k: (i, j)))

    out = pl.pallas_call(
        functools.partial(_linear_kernel, activation=activation,
                          has_residual=residual is not None),
        out_shape=jax.ShapeDtypeStruct((M_pad, Nout), x.dtype),
        grid=grid,
        in_specs=in_specs,
        out_specs=pl.BlockSpec((tm, tn), lambda i, j, k: (i, j)),
        scratch_shapes=[pltpu.VMEM((tm, tn), jnp.float32)],
        compiler_params=pltpu.CompilerParams(
            dimension_semantics=("parallel", "parallel", "arbitrary"),
            vmem_limit_bytes=_VMEM_LIMIT),
    )(*args)
    return out[:M] if M_pad != M else out


def _var_attn_kernel(qkv_ref, o_ref, *, D, h, dh, f, n, mode, scale):
    """VarAttention core for one batch element.

    Reads the fused QKV buffer (N, 3D), splits heads/groups in VMEM, handles
    the CLS key/value column analytically (no concatenated K/V), and writes
    the output already merged back to the 'n (h d)' layout."""
    x = qkv_ref[0]                                             # (N, 3D)
    for hi in range(h):                                        # static unroll
        q = x[:, hi * dh:(hi + 1) * dh] * scale                # scale folded into q
        k = x[:, D + hi * dh:D + (hi + 1) * dh]
        v = x[:, 2 * D + hi * dh:2 * D + (hi + 1) * dh]

        # --- CLS query attends over the full sequence (Lq = 1, tiny) ---
        sim0 = jnp.einsum("qd,kd->qk", q[0:1], k,
                          preferred_element_type=jnp.float32)  # (1, N)
        m0 = jnp.max(sim0, axis=-1, keepdims=True)
        e0 = jnp.exp(sim0 - m0)
        p0 = e0 / jnp.sum(e0, axis=-1, keepdims=True)          # exact division
        cls_out = jnp.einsum("qk,kd->qd", p0.astype(v.dtype), v,
                             preferred_element_type=jnp.float32)   # (1, dh)

        # --- grouped token attention (space: per-frame; time: per-patch) ---
        qt = q[1:].reshape(f, n, dh)
        kt = k[1:].reshape(f, n, dh)
        vt = v[1:].reshape(f, n, dh)
        if mode == "time":                                     # groups along frames
            qt = qt.transpose(1, 0, 2)                         # (n, f, dh)
            kt = kt.transpose(1, 0, 2)
            vt = vt.transpose(1, 0, 2)
        ck = k[0:1].astype(jnp.float32)                        # CLS key   (1, dh)
        cv = v[0:1].astype(jnp.float32)                        # CLS value (1, dh)

        sim = jnp.einsum("rqd,rkd->rqk", qt, kt,
                         preferred_element_type=jnp.float32)   # (r, L, L)
        sim_c = jnp.sum(qt.astype(jnp.float32) * ck[None], axis=-1,
                        keepdims=True)                         # (r, L, 1)
        m = jnp.maximum(jnp.max(sim, axis=-1, keepdims=True), sim_c)
        p = jnp.exp(sim - m)
        p_c = jnp.exp(sim_c - m)
        denom = jnp.sum(p, axis=-1, keepdims=True) + p_c
        og = jnp.einsum("rqk,rkd->rqd", p.astype(vt.dtype), vt,
                        preferred_element_type=jnp.float32)    # (r, L, dh)
        og = (og + p_c * cv[None]) / denom                     # exact division
        if mode == "time":
            og = og.transpose(1, 0, 2)                         # back to (f, n, dh)
        tok_out = og.reshape(f * n, dh)

        # write directly in 'n (h d)' layout (out block last dim = D, dense DMA)
        o_ref[0, 0:1, hi * dh:(hi + 1) * dh] = cls_out.astype(o_ref.dtype)
        o_ref[0, 1:, hi * dh:(hi + 1) * dh] = tok_out.astype(o_ref.dtype)


def var_attention_core_pallas(qkv3, h, f, n, mode, scale, out_dtype):
    """qkv3: (B, N, 3D) fused QKV -> (B, N, D) attention output ('b n (h d)')."""
    B, N, threeD = qkv3.shape
    D = threeD // 3
    return pl.pallas_call(
        functools.partial(_var_attn_kernel, D=D, h=h, dh=D // h, f=f, n=n,
                          mode=mode, scale=scale),
        out_shape=jax.ShapeDtypeStruct((B, N, D), out_dtype),
        grid=(B,),
        in_specs=[pl.BlockSpec((1, N, threeD), lambda b: (b, 0, 0))],
        out_specs=pl.BlockSpec((1, N, D), lambda b: (b, 0, 0)),
        compiler_params=pltpu.CompilerParams(
            dimension_semantics=("parallel",),
            vmem_limit_bytes=_VMEM_LIMIT),
    )(qkv3)


# ------------------------- model glue (plain JAX) --------------------------

def var_attention_pallas(x2d, ln_w, ln_b, p, mode, f, n, B, N, D, residual2d):
    """LayerNorm + VarAttention + proj, residual fused into the proj matmul."""
    h = p["num_heads"]
    dh = D // h
    scale = dh ** -0.5
    qkv = ln_linear_pallas(x2d, ln_w, ln_b, p["w_qkv"], p["b_qkv"])   # (B*N, 3D)
    attn_out = var_attention_core_pallas(qkv.reshape(B, N, 3 * D), h, f, n,
                                         mode, scale, x2d.dtype)      # (B, N, D)
    return linear_pallas(attn_out.reshape(B * N, D), p["w_proj"], p["b_proj"],
                         residual=residual2d)                          # (B*N, D)


def space_time_block(x, params, time_n, space_f):
    """SpaceTimeBlock.forward (dropout / drop_path rates are 0 -> identities)."""
    B, N, D = x.shape
    assert N == 1 + space_f * time_n
    x2d = x.reshape(B * N, D)

    # time attention on norm3(x); residual (x +) fused into its proj matmul
    time_residual = var_attention_pallas(x2d, params["norm3_w"], params["norm3_b"],
                                         params["timeattn"], "time", space_f,
                                         time_n, B, N, D, residual2d=x2d)

    # space attention on norm1(time_residual); residual from original x
    # ('frozen-in-time'), fused into its proj matmul
    space_residual = var_attention_pallas(time_residual, params["norm1_w"],
                                          params["norm1_b"], params["attn"],
                                          "space", space_f, time_n, B, N, D,
                                          residual2d=x2d)

    # MLP: norm2 fused into fc1 (+GELU); fc2 with the residual fused in
    h1 = ln_linear_pallas(space_residual, params["norm2_w"], params["norm2_b"],
                          params["mlp_w1"], params["mlp_b1"], activation="gelu")
    out = linear_pallas(h1, params["mlp_w2"], params["mlp_b2"],
                        residual=space_residual)
    return out.reshape(B, N, D)


# --------------------------- pure-JAX reference -----------------------------

def _ref_ln(x, w, b, eps=1e-5):
    mu = x.mean(-1, keepdims=True)
    var = ((x - mu) ** 2).mean(-1, keepdims=True)
    return (x - mu) / jnp.sqrt(var + eps) * w + b


def _ref_attn(q, k, v):
    sim = jnp.einsum("bid,bjd->bij", q, k, precision=jax.lax.Precision.HIGHEST)
    p = jax.nn.softmax(sim, axis=-1)
    return jnp.einsum("bij,bjd->bid", p, v, precision=jax.lax.Precision.HIGHEST)


def _ref_var_attention(x, p, mode, f, n):
    B, N, D = x.shape
    h = p["num_heads"]
    dh = D // h
    scale = dh ** -0.5
    qkv = jnp.einsum("bnd,de->bne", x, p["w_qkv"],
                     precision=jax.lax.Precision.HIGHEST) + p["b_qkv"]
    q, k, v = jnp.split(qkv, 3, axis=-1)

    def heads(t):
        return t.reshape(B, N, h, dh).transpose(0, 2, 1, 3).reshape(B * h, N, dh)

    q, k, v = heads(q), heads(k), heads(v)
    q = q * scale
    cls_q, q_ = q[:, :1], q[:, 1:]
    cls_k, k_ = k[:, :1], k[:, 1:]
    cls_v, v_ = v[:, :1], v[:, 1:]
    cls_out = _ref_attn(cls_q, k, v)
    BH = B * h
    if mode == "time":
        fwd = lambda t: t.reshape(BH, f, n, dh).transpose(0, 2, 1, 3).reshape(BH * n, f, dh)
        bwd = lambda t: t.reshape(BH, n, f, dh).transpose(0, 2, 1, 3).reshape(BH, f * n, dh)
        r = n
    else:
        fwd = lambda t: t.reshape(BH * f, n, dh)
        bwd = lambda t: t.reshape(BH, f * n, dh)
        r = f
    q_r, k_r, v_r = fwd(q_), fwd(k_), fwd(v_)
    ck, cv = jnp.repeat(cls_k, r, axis=0), jnp.repeat(cls_v, r, axis=0)
    out = _ref_attn(q_r, jnp.concatenate([ck, k_r], 1), jnp.concatenate([cv, v_r], 1))
    out = jnp.concatenate([cls_out, bwd(out)], axis=1)
    out = out.reshape(B, h, N, dh).transpose(0, 2, 1, 3).reshape(B, N, D)
    return jnp.einsum("bnd,de->bne", out, p["w_proj"],
                      precision=jax.lax.Precision.HIGHEST) + p["b_proj"]


def space_time_block_ref(x, params, time_n, space_f):
    t_in = _ref_ln(x, params["norm3_w"], params["norm3_b"])
    time_residual = x + _ref_var_attention(t_in, params["timeattn"], "time",
                                           space_f, time_n)
    s_in = _ref_ln(time_residual, params["norm1_w"], params["norm1_b"])
    space_residual = x + _ref_var_attention(s_in, params["attn"], "space",
                                            space_f, time_n)
    m_in = _ref_ln(space_residual, params["norm2_w"], params["norm2_b"])
    h1 = _gelu(jnp.dot(m_in.reshape(-1, x.shape[-1]), params["mlp_w1"],
                       precision=jax.lax.Precision.HIGHEST) + params["mlp_b1"])
    h2 = jnp.dot(h1, params["mlp_w2"],
                 precision=jax.lax.Precision.HIGHEST) + params["mlp_b2"]
    return space_residual + h2.reshape(x.shape)


# ------------------------------ parameter init ------------------------------

def init_params(key, dim, num_heads, mlp_ratio=4.0):
    hidden = int(dim * mlp_ratio)
    ks = iter(jax.random.split(key, 16))

    def lin(k, fan_in, fan_out, bias=True):
        w = 0.02 * jax.random.normal(k, (fan_in, fan_out), jnp.float32)
        b = (0.01 * jax.random.normal(jax.random.fold_in(k, 1), (fan_out,), jnp.float32)
             if bias else jnp.zeros((fan_out,), jnp.float32))
        return w, b

    def attn_params(kq, kp):
        # qkv_bias=False in the module -> zero qkv bias
        w_qkv, _ = lin(kq, dim, 3 * dim, bias=False)
        w_proj, b_proj = lin(kp, dim, dim)
        return dict(num_heads=num_heads, w_qkv=w_qkv,
                    b_qkv=jnp.zeros((3 * dim,), jnp.float32),
                    w_proj=w_proj, b_proj=b_proj)

    # NOTE: the PyTorch module zero-inits timeattn.qkv (time_init='zeros'); here
    # we use deterministic random values so the time path is non-trivial.
    params = dict(
        norm1_w=jnp.ones((dim,), jnp.float32), norm1_b=jnp.zeros((dim,), jnp.float32),
        norm2_w=jnp.ones((dim,), jnp.float32), norm2_b=jnp.zeros((dim,), jnp.float32),
        norm3_w=jnp.ones((dim,), jnp.float32), norm3_b=jnp.zeros((dim,), jnp.float32),
        attn=attn_params(next(ks), next(ks)),
        timeattn=attn_params(next(ks), next(ks)),
    )
    params["mlp_w1"], params["mlp_b1"] = lin(next(ks), dim, hidden)
    params["mlp_w2"], params["mlp_b2"] = lin(next(ks), hidden, dim)
    return params


# ----------------------------------- main -----------------------------------

if __name__ == "__main__":
    B, D, H = 2, 32, 4          # batch, embed dim, heads
    space_f, time_n = 2, 8      # frames f, patches-per-frame n
    N = 1 + space_f * time_n    # 17 tokens (cls + f*n)

    key = jax.random.PRNGKey(0)
    kx, kp = jax.random.split(key)
    x = jax.random.normal(kx, (B, N, D), jnp.float32)
    params = init_params(kp, D, H)

    fwd = jax.jit(lambda x: space_time_block(x, params, time_n, space_f))
    out = jax.block_until_ready(fwd(x))

    # sanity check against a pure-JAX reference of the same forward pass
    ref = space_time_block_ref(x, params, time_n, space_f)
    err = float(jnp.max(jnp.abs(out - ref)))
    assert err < 1e-2, f"mismatch vs reference: {err}"

    print("KERNEL_OK")
</pallas_src>

<mosaic_0001>
module attributes {stable_mosaic.version = 11 : i64} {
  func.func @_ln_linear_kernel(%arg0: i32, %arg1: i32, %arg2: memref<34x32xf32, #tpu.memory_space<vmem>>, %arg3: memref<1x32xf32, #tpu.memory_space<vmem>>, %arg4: memref<1x32xf32, #tpu.memory_space<vmem>>, %arg5: memref<32x96xf32, #tpu.memory_space<vmem>>, %arg6: memref<1x96xf32, #tpu.memory_space<vmem>>, %arg7: memref<34x96xf32, #tpu.memory_space<vmem>>) attributes {dimension_semantics = [#tpu.dimension_semantics<parallel>, #tpu.dimension_semantics<parallel>], iteration_bounds = array<i64: 1, 1>, scalar_prefetch = 0 : i64, scratch_operands = 0 : i64, tpu.core_type = #tpu.core_type<tc>, window_params = [{transform_indices = @transform_0, window_bounds = array<i64: 34, 32>}, {pipeline_mode = #tpu.pipeline_mode<synchronous>, transform_indices = @transform_1, window_bounds = array<i64: 1, 32>}, {pipeline_mode = #tpu.pipeline_mode<synchronous>, transform_indices = @transform_2, window_bounds = array<i64: 1, 32>}, {transform_indices = @transform_3, window_bounds = array<i64: 32, 96>}, {transform_indices = @transform_4, window_bounds = array<i64: 1, 96>}, {transform_indices = @transform_5, window_bounds = array<i64: 34, 96>}]} {
    %c0 = arith.constant 0 : index
    %c0_0 = arith.constant 0 : index
    %0 = vector.load %arg2[%c0, %c0_0] : memref<34x32xf32, #tpu.memory_space<vmem>>, vector<34x32xf32>
    %cst = arith.constant dense<0.000000e+00> : vector<34xf32>
    %1 = vector.multi_reduction <add>, %0, %cst [1] : vector<34x32xf32> to vector<34xf32>
    %2 = vector.shape_cast %1 : vector<34xf32> to vector<34x1xf32>
    %cst_1 = arith.constant 3.200000e+01 : f32
    %3 = vector.broadcast %cst_1 : f32 to vector<34x1xf32>
    %4 = arith.divf %2, %3 : vector<34x1xf32>
    %5 = vector.broadcast %4 : vector<34x1xf32> to vector<34x32xf32>
    %6 = arith.subf %0, %5 : vector<34x32xf32>
    %7 = arith.mulf %6, %6 : vector<34x32xf32>
    %cst_2 = arith.constant dense<0.000000e+00> : vector<34xf32>
    %8 = vector.multi_reduction <add>, %7, %cst_2 [1] : vector<34x32xf32> to vector<34xf32>
    %9 = vector.shape_cast %8 : vector<34xf32> to vector<34x1xf32>
    %cst_3 = arith.constant 3.200000e+01 : f32
    %10 = vector.broadcast %cst_3 : f32 to vector<34x1xf32>
    %11 = arith.divf %9, %10 : vector<34x1xf32>
    %12 = vector.broadcast %4 : vector<34x1xf32> to vector<34x32xf32>
    %13 = arith.subf %0, %12 : vector<34x32xf32>
    %cst_4 = arith.constant 9.99999974E-6 : f32
    %14 = vector.broadcast %cst_4 : f32 to vector<34x1xf32>
    %15 = arith.addf %11, %14 : vector<34x1xf32>
    %16 = math.rsqrt %15 : vector<34x1xf32>
    %17 = vector.broadcast %16 : vector<34x1xf32> to vector<34x32xf32>
    %18 = arith.mulf %13, %17 : vector<34x32xf32>
    %c0_5 = arith.constant 0 : index
    %c0_6 = arith.constant 0 : index
    %19 = vector.load %arg3[%c0_5, %c0_6] : memref<1x32xf32, #tpu.memory_space<vmem>>, vector<1x32xf32>
    %20 = vector.broadcast %19 : vector<1x32xf32> to vector<34x32xf32>
    %21 = arith.mulf %18, %20 : vector<34x32xf32>
    %c0_7 = arith.constant 0 : index
    %c0_8 = arith.constant 0 : index
    %22 = vector.load %arg4[%c0_7, %c0_8] : memref<1x32xf32, #tpu.memory_space<vmem>>, vector<1x32xf32>
    %23 = vector.broadcast %22 : vector<1x32xf32> to vector<34x32xf32>
    %24 = arith.addf %21, %23 : vector<34x32xf32>
    %c0_9 = arith.constant 0 : index
    %c0_10 = arith.constant 0 : index
    %25 = vector.load %arg5[%c0_9, %c0_10] : memref<32x96xf32, #tpu.memory_space<vmem>>, vector<32x96xf32>
    %cst_11 = arith.constant dense<0.000000e+00> : vector<34x96xf32>
    %26 = tpu.matmul %24, %25, %cst_11 {dimension_numbers = #tpu.dot_dimension_numbers<[1], [0], [0], [1], [0, 0, 1, 1], [], []>} : vector<34x32xf32>, vector<32x96xf32>, vector<34x96xf32> -> vector<34x96xf32>
    %c0_12 = arith.constant 0 : index
    %c0_13 = arith.constant 0 : index
    %27 = vector.load %arg6[%c0_12, %c0_13] : memref<1x96xf32, #tpu.memory_space<vmem>>, vector<1x96xf32>
    %28 = vector.broadcast %27 : vector<1x96xf32> to vector<34x96xf32>
    %29 = arith.addf %26, %28 : vector<34x96xf32>
    %c0_14 = arith.constant 0 : index
    %c0_15 = arith.constant 0 : index
    %30 = vector.load %arg7[%c0_14, %c0_15] : memref<34x96xf32, #tpu.memory_space<vmem>>, vector<34x96xf32>
    tpu.vector_store %arg7[%c0_14, %c0_15], %29 {strides = array<i32>} : memref<34x96xf32, #tpu.memory_space<vmem>>, vector<34x96xf32>,
    return
  }
  func.func @transform_0(%arg0: i32, %arg1: i32) -> (i32, i32) {
    %c0_i32 = arith.constant 0 : i32
    %c0_i32_0 = arith.constant 0 : i32
    return %arg0, %c0_i32 : i32, i32
  }
  func.func @transform_1(%arg0: i32, %arg1: i32) -> (i32, i32) {
    %c0_i32 = arith.constant 0 : i32
    %c0_i32_0 = arith.constant 0 : i32
    %c0_i32_1 = arith.constant 0 : i32
    return %c0_i32, %c0_i32_0 : i32, i32
  }
  func.func @transform_2(%arg0: i32, %arg1: i32) -> (i32, i32) {
    %c0_i32 = arith.constant 0 : i32
    %c0_i32_0 = arith.constant 0 : i32
    %c0_i32_1 = arith.constant 0 : i32
    return %c0_i32, %c0_i32_0 : i32, i32
  }
  func.func @transform_3(%arg0: i32, %arg1: i32) -> (i32, i32) {
    %c0_i32 = arith.constant 0 : i32
    %c0_i32_0 = arith.constant 0 : i32
    return %c0_i32, %arg1 : i32, i32
  }
  func.func @transform_4(%arg0: i32, %arg1: i32) -> (i32, i32) {
    %c0_i32 = arith.constant 0 : i32
    %c0_i32_0 = arith.constant 0 : i32
    return %c0_i32, %arg1 : i32, i32
  }
  func.func @transform_5(%arg0: i32, %arg1: i32) -> (i32, i32) {
    %c0_i32 = arith.constant 0 : i32
    return %arg0, %arg1 : i32, i32
  }
}

module attributes {stable_mosaic.version = 11 : i64} {
  func.func @_var_attn_kernel(%arg0: i32, %arg1: memref<1x17x96xf32, #tpu.memory_space<vmem>>, %arg2: memref<1x17x32xf32, #tpu.memory_space<vmem>>) attributes {dimension_semantics = [#tpu.dimension_semantics<parallel>], iteration_bounds = array<i64: 2>, scalar_prefetch = 0 : i64, scratch_operands = 0 : i64, tpu.core_type = #tpu.core_type<tc>, window_params = [{transform_indices = @transform_0, window_bounds = array<i64: 1, 17, 96>}, {transform_indices = @transform_1, window_bounds = array<i64: 1, 17, 32>}]} {
    %c0 = arith.constant 0 : index
    %c0_0 = arith.constant 0 : index
    %c0_1 = arith.constant 0 : index
    %0 = vector.load %arg1[%c0, %c0_0, %c0_1] : memref<1x17x96xf32, #tpu.memory_space<vmem>>, vector<1x17x96xf32>
    %1 = vector.shape_cast %0 : vector<1x17x96xf32> to vector<17x96xf32>
    %2 = vector.extract_strided_slice %1 {offsets = [0, 0], sizes = [17, 8], strides = [1, 1]} : vector<17x96xf32> to vector<17x8xf32>
    %cst = arith.constant 0.353553385 : f32
    %3 = vector.broadcast %cst : f32 to vector<17x8xf32>
    %4 = arith.mulf %2, %3 : vector<17x8xf32>
    %5 = vector.extract_strided_slice %1 {offsets = [0, 32], sizes = [17, 8], strides = [1, 1]} : vector<17x96xf32> to vector<17x8xf32>
    %6 = vector.extract_strided_slice %1 {offsets = [0, 64], sizes = [17, 8], strides = [1, 1]} : vector<17x96xf32> to vector<17x8xf32>
    %7 = vector.extract_strided_slice %4 {offsets = [0, 0], sizes = [1, 8], strides = [1, 1]} : vector<17x8xf32> to vector<1x8xf32>
    "tpu.trace_start"() <{level = 10 : i32, message = "qd,kd->qk"}> : () -> ()
    %cst_2 = arith.constant dense<0.000000e+00> : vector<1x17xf32>
    %8 = tpu.matmul %7, %5, %cst_2 {dimension_numbers = #tpu.dot_dimension_numbers<[1], [1], [0], [0], [0, 0, 1, 0], [], []>} : vector<1x8xf32>, vector<17x8xf32>, vector<1x17xf32> -> vector<1x17xf32>
    "tpu.trace_stop"() : () -> ()
    %cst_3 = arith.constant dense<0xFF800000> : vector<1xf32>
    %9 = vector.multi_reduction <maximumf>, %8, %cst_3 [1] : vector<1x17xf32> to vector<1xf32>
    %10 = vector.shape_cast %9 : vector<1xf32> to vector<1x1xf32>
    %11 = vector.broadcast %10 : vector<1x1xf32> to vector<1x17xf32>
    %12 = arith.subf %8, %11 : vector<1x17xf32>
    %13 = math.exp %12 : vector<1x17xf32>
    %cst_4 = arith.constant dense<0.000000e+00> : vector<1xf32>
    %14 = vector.multi_reduction <add>, %13, %cst_4 [1] : vector<1x17xf32> to vector<1xf32>
    %15 = vector.shape_cast %14 : vector<1xf32> to vector<1x1xf32>
    %16 = vector.broadcast %15 : vector<1x1xf32> to vector<1x17xf32>
    %17 = arith.divf %13, %16 : vector<1x17xf32>
    "tpu.trace_start"() <{level = 10 : i32, message = "qk,kd->qd"}> : () -> ()
    %cst_5 = arith.constant dense<0.000000e+00> : vector<1x8xf32>
    %18 = tpu.matmul %17, %6, %cst_5 {dimension_numbers = #tpu.dot_dimension_numbers<[1], [0], [0], [1], [0, 0, 1, 1], [], []>} : vector<1x17xf32>, vector<17x8xf32>, vector<1x8xf32> -> vector<1x8xf32>
    "tpu.trace_stop"() : () -> ()
    %19 = vector.extract_strided_slice %4 {offsets = [1, 0], sizes = [16, 8], strides = [1, 1]} : vector<17x8xf32> to vector<16x8xf32>
    %20 = vector.shape_cast %19 : vector<16x8xf32> to vector<2x8x8xf32>
    %21 = vector.extract_strided_slice %5 {offsets = [1, 0], sizes = [16, 8], strides = [1, 1]} : vector<17x8xf32> to vector<16x8xf32>
    %22 = vector.shape_cast %21 : vector<16x8xf32> to vector<2x8x8xf32>
    %23 = vector.extract_strided_slice %6 {offsets = [1, 0], sizes = [16, 8], strides = [1, 1]} : vector<17x8xf32> to vector<16x8xf32>
    %24 = vector.shape_cast %23 : vector<16x8xf32> to vector<2x8x8xf32>
    %25 = vector.extract_strided_slice %5 {offsets = [0, 0], sizes = [1, 8], strides = [1, 1]} : vector<17x8xf32> to vector<1x8xf32>
    %26 = vector.extract_strided_slice %6 {offsets = [0, 0], sizes = [1, 8], strides = [1, 1]} : vector<17x8xf32> to vector<1x8xf32>
    "tpu.trace_start"() <{level = 10 : i32, message = "rqd,rkd->rqk"}> : () -> ()
    %cst_6 = arith.constant dense<0.000000e+00> : vector<2x8x8xf32>
    %27 = tpu.matmul %20, %22, %cst_6 {dimension_numbers = #tpu.dot_dimension_numbers<[2], [2], [1], [1], [0, 0, 0, 1, 1, 1], [0], [0]>} : vector<2x8x8xf32>, vector<2x8x8xf32>, vector<2x8x8xf32> -> vector<2x8x8xf32>
    "tpu.trace_stop"() : () -> ()
    %28 = vector.shape_cast %25 : vector<1x8xf32> to vector<1x1x8xf32>
    %29 = vector.broadcast %28 : vector<1x1x8xf32> to vector<2x8x8xf32>
    %30 = arith.mulf %20, %29 : vector<2x8x8xf32>
    %cst_7 = arith.constant dense<0.000000e+00> : vector<2x8xf32>
    %31 = vector.multi_reduction <add>, %30, %cst_7 [2] : vector<2x8x8xf32> to vector<2x8xf32>
    %32 = vector.shape_cast %31 : vector<2x8xf32> to vector<2x8x1xf32>
    %cst_8 = arith.constant dense<0xFF800000> : vector<2x8xf32>
    %33 = vector.multi_reduction <maximumf>, %27, %cst_8 [2] : vector<2x8x8xf32> to vector<2x8xf32>
    %34 = vector.shape_cast %33 : vector<2x8xf32> to vector<2x8x1xf32>
    %35 = arith.maximumf %34, %32 : vector<2x8x1xf32>
    %36 = vector.broadcast %35 : vector<2x8x1xf32> to vector<2x8x8xf32>
    %37 = arith.subf %27, %36 : vector<2x8x8xf32>
    %38 = math.exp %37 : vector<2x8x8xf32>
    %39 = arith.subf %32, %35 : vector<2x8x1xf32>
    %40 = math.exp %39 : vector<2x8x1xf32>
    %cst_9 = arith.constant dense<0.000000e+00> : vector<2x8xf32>
    %41 = vector.multi_reduction <add>, %38, %cst_9 [2] : vector<2x8x8xf32> to vector<2x8xf32>
    %42 = vector.shape_cast %41 : vector<2x8xf32> to vector<2x8x1xf32>
    %43 = arith.addf %42, %40 : vector<2x8x1xf32>
    "tpu.trace_start"() <{level = 10 : i32, message = "rqk,rkd->rqd"}> : () -> ()
    %cst_10 = arith.constant dense<0.000000e+00> : vector<2x8x8xf32>
    %44 = tpu.matmul %38, %24, %cst_10 {dimension_numbers = #tpu.dot_dimension_numbers<[2], [1], [1], [2], [0, 0, 0, 1, 1, 2], [0], [0]>} : vector<2x8x8xf32>, vector<2x8x8xf32>, vector<2x8x8xf32> -> vector<2x8x8xf32>
    "tpu.trace_stop"() : () -> ()
    %45 = vector.shape_cast %26 : vector<1x8xf32> to vector<1x1x8xf32>
    %46 = vector.broadcast %40 : vector<2x8x1xf32> to vector<2x8x8xf32>
    %47 = vector.broadcast %45 : vector<1x1x8xf32> to vector<2x8x8xf32>
    %48 = arith.mulf %46, %47 : vector<2x8x8xf32>
    %49 = arith.addf %44, %48 : vector<2x8x8xf32>
    %50 = vector.broadcast %43 : vector<2x8x1xf32> to vector<2x8x8xf32>
    %51 = arith.divf %49, %50 : vector<2x8x8xf32>
    %52 = vector.shape_cast %51 : vector<2x8x8xf32> to vector<16x8xf32>
    %c0_11 = arith.constant 0 : index
    %c0_12 = arith.constant 0 : index
    %c0_13 = arith.constant 0 : index
    %53 = vector.load %arg2[%c0_11, %c0_12, %c0_13] : memref<1x17x32xf32, #tpu.memory_space<vmem>>, vector<1x1x8xf32>
    %54 = vector.shape_cast %53 : vector<1x1x8xf32> to vector<1x8xf32>
    %55 = vector.shape_cast %18 : vector<1x8xf32> to vector<1x1x8xf32>
    tpu.vector_store %arg2[%c0_11, %c0_12, %c0_13], %55 {strides = array<i32>} : memref<1x17x32xf32, #tpu.memory_space<vmem>>, vector<1x1x8xf32>,
    %c0_14 = arith.constant 0 : index
    %c1 = arith.constant 1 : index
    %c0_15 = arith.constant 0 : index
    %56 = vector.load %arg2[%c0_14, %c1, %c0_15] : memref<1x17x32xf32, #tpu.memory_space<vmem>>, vector<1x16x8xf32>
    %57 = vector.shape_cast %56 : vector<1x16x8xf32> to vector<16x8xf32>
    %58 = vector.shape_cast %52 : vector<16x8xf32> to vector<1x16x8xf32>
    tpu.vector_store %arg2[%c0_14, %c1, %c0_15], %58 {strides = array<i32>} : memref<1x17x32xf32, #tpu.memory_space<vmem>>, vector<1x16x8xf32>,
    %59 = vector.extract_strided_slice %1 {offsets = [0, 8], sizes = [17, 8], strides = [1, 1]} : vector<17x96xf32> to vector<17x8xf32>
    %cst_16 = arith.constant 0.353553385 : f32
    %60 = vector.broadcast %cst_16 : f32 to vector<17x8xf32>
    %61 = arith.mulf %59, %60 : vector<17x8xf32>
    %62 = vector.extract_strided_slice %1 {offsets = [0, 40], sizes = [17, 8], strides = [1, 1]} : vector<17x96xf32> to vector<17x8xf32>
    %63 = vector.extract_strided_slice %1 {offsets = [0, 72], sizes = [17, 8], strides = [1, 1]} : vector<17x96xf32> to vector<17x8xf32>
    %64 = vector.extract_strided_slice %61 {offsets = [0, 0], sizes = [1, 8], strides = [1, 1]} : vector<17x8xf32> to vector<1x8xf32>
    "tpu.trace_start"() <{level = 10 : i32, message = "qd,kd->qk"}> : () -> ()
    %cst_17 = arith.constant dense<0.000000e+00> : vector<1x17xf32>
    %65 = tpu.matmul %64, %62, %cst_17 {dimension_numbers = #tpu.dot_dimension_numbers<[1], [1], [0], [0], [0, 0, 1, 0], [], []>} : vector<1x8xf32>, vector<17x8xf32>, vector<1x17xf32> -> vector<1x17xf32>
    "tpu.trace_stop"() : () -> ()
    %cst_18 = arith.constant dense<0xFF800000> : vector<1xf32>
    %66 = vector.multi_reduction <maximumf>, %65, %cst_18 [1] : vector<1x17xf32> to vector<1xf32>
    %67 = vector.shape_cast %66 : vector<1xf32> to vector<1x1xf32>
    %68 = vector.broadcast %67 : vector<1x1xf32> to vector<1x17xf32>
    %69 = arith.subf %65, %68 : vector<1x17xf32>
    %70 = math.exp %69 : vector<1x17xf32>
    %cst_19 = arith.constant dense<0.000000e+00> : vector<1xf32>
    %71 = vector.multi_reduction <add>, %70, %cst_19 [1] : vector<1x17xf32> to vector<1xf32>
    %72 = vector.shape_cast %71 : vector<1xf32> to vector<1x1xf32>
    %73 = vector.broadcast %72 : vector<1x1xf32> to vector<1x17xf32>
    %74 = arith.divf %70, %73 : vector<1x17xf32>
    "tpu.trace_start"() <{level = 10 : i32, message = "qk,kd->qd"}> : () -> ()
    %cst_20 = arith.constant dense<0.000000e+00> : vector<1x8xf32>
    %75 = tpu.matmul %74, %63, %cst_20 {dimension_numbers = #tpu.dot_dimension_numbers<[1], [0], [0], [1], [0, 0, 1, 1], [], []>} : vector<1x17xf32>, vector<17x8xf32>, vector<1x8xf32> -> vector<1x8xf32>
    "tpu.trace_stop"() : () -> ()
    %76 = vector.extract_strided_slice %61 {offsets = [1, 0], sizes = [16, 8], strides = [1, 1]} : vector<17x8xf32> to vector<16x8xf32>
    %77 = vector.shape_cast %76 : vector<16x8xf32> to vector<2x8x8xf32>
    %78 = vector.extract_strided_slice %62 {offsets = [1, 0], sizes = [16, 8], strides = [1, 1]} : vector<17x8xf32> to vector<16x8xf32>
    %79 = vector.shape_cast %78 : vector<16x8xf32> to vector<2x8x8xf32>
    %80 = vector.extract_strided_slice %63 {offsets = [1, 0], sizes = [16, 8], strides = [1, 1]} : vector<17x8xf32> to vector<16x8xf32>
    %81 = vector.shape_cast %80 : vector<16x8xf32> to vector<2x8x8xf32>
    %82 = vector.extract_strided_slice %62 {offsets = [0, 0], sizes = [1, 8], strides = [1, 1]} : vector<17x8xf32> to vector<1x8xf32>
    %83 = vector.extract_strided_slice %63 {offsets = [0, 0], sizes = [1, 8], strides = [1, 1]} : vector<17x8xf32> to vector<1x8xf32>
    "tpu.trace_start"() <{level = 10 : i32, message = "rqd,rkd->rqk"}> : () -> ()
    %cst_21 = arith.constant dense<0.000000e+00> : vector<2x8x8xf32>
    %84 = tpu.matmul %77, %79, %cst_21 {dimension_numbers = #tpu.dot_dimension_numbers<[2], [2], [1], [1], [0, 0, 0, 1, 1, 1], [0], [0]>} : vector<2x8x8xf32>, vector<2x8x8xf32>, vector<2x8x8xf32> -> vector<2x8x8xf32>
    "tpu.trace_stop"() : () -> ()
    %85 = vector.shape_cast %82 : vector<1x8xf32> to vector<1x1x8xf32>
    %86 = vector.broadcast %85 : vector<1x1x8xf32> to vector<2x8x8xf32>
    %87 = arith.mulf %77, %86 : vector<2x8x8xf32>
    %cst_22 = arith.constant dense<0.000000e+00> : vector<2x8xf32>
    %88 = vector.multi_reduction <add>, %87, %cst_22 [2] : vector<2x8x8xf32> to vector<2x8xf32>
    %89 = vector.shape_cast %88 : vector<2x8xf32> to vector<2x8x1xf32>
    %cst_23 = arith.constant dense<0xFF800000> : vector<2x8xf32>
    %90 = vector.multi_reduction <maximumf>, %84, %cst_23 [2] : vector<2x8x8xf32> to vector<2x8xf32>
    %91 = vector.shape_cast %90 : vector<2x8xf32> to vector<2x8x1xf32>
    %92 = arith.maximumf %91, %89 : vector<2x8x1xf32>
    %93 = vector.broadcast %92 : vector<2x8x1xf32> to vector<2x8x8xf32>
    %94 = arith.subf %84, %93 : vector<2x8x8xf32>
    %95 = math.exp %94 : vector<2x8x8xf32>
    %96 = arith.subf %89, %92 : vector<2x8x1xf32>
    %97 = math.exp %96 : vector<2x8x1xf32>
    %cst_24 = arith.constant dense<0.000000e+00> : vector<2x8xf32>
    %98 = vector.multi_reduction <add>, %95, %cst_24 [2] : vector<2x8x8xf32> to vector<2x8xf32>
    %99 = vector.shape_cast %98 : vector<2x8xf32> to vector<2x8x1xf32>
    %100 = arith.addf %99, %97 : vector<2x8x1xf32>
    "tpu.trace_start"() <{level = 10 : i32, message = "rqk,rkd->rqd"}> : () -> ()
    %cst_25 = arith.constant dense<0.000000e+00> : vector<2x8x8xf32>
    %101 = tpu.matmul %95, %81, %cst_25 {dimension_numbers = #tpu.dot_dimension_numbers<[2], [1], [1], [2], [0, 0, 0, 1, 1, 2], [0], [0]>} : vector<2x8x8xf32>, vector<2x8x8xf32>, vector<2x8x8xf32> -> vector<2x8x8xf32>
    "tpu.trace_stop"() : () -> ()
    %102 = vector.shape_cast %83 : vector<1x8xf32> to vector<1x1x8xf32>
    %103 = vector.broadcast %97 : vector<2x8x1xf32> to vector<2x8x8xf32>
    %104 = vector.broadcast %102 : vector<1x1x8xf32> to vector<2x8x8xf32>
    %105 = arith.mulf %103, %104 : vector<2x8x8xf32>
    %106 = arith.addf %101, %105 : vector<2x8x8xf32>
    %107 = vector.broadcast %100 : vector<2x8x1xf32> to vector<2x8x8xf32>
    %108 = arith.divf %106, %107 : vector<2x8x8xf32>
    %109 = vector.shape_cast %108 : vector<2x8x8xf32> to vector<16x8xf32>
    %c0_26 = arith.constant 0 : index
    %c0_27 = arith.constant 0 : index
    %c8 = arith.constant 8 : index
    %110 = vector.load %arg2[%c0_26, %c0_27, %c8] : memref<1x17x32xf32, #tpu.memory_space<vmem>>, vector<1x1x8xf32>
    %111 = vector.shape_cast %110 : vector<1x1x8xf32> to vector<1x8xf32>
    %112 = vector.shape_cast %75 : vector<1x8xf32> to vector<1x1x8xf32>
    tpu.vector_store %arg2[%c0_26, %c0_27, %c8], %112 {strides = array<i32>} : memref<1x17x32xf32, #tpu.memory_space<vmem>>, vector<1x1x8xf32>,
    %c0_28 = arith.constant 0 : index
    %c1_29 = arith.constant 1 : index
    %c8_30 = arith.constant 8 : index
    %113 = vector.load %arg2[%c0_28, %c1_29, %c8_30] : memref<1x17x32xf32, #tpu.memory_space<vmem>>, vector<1x16x8xf32>
    %114 = vector.shape_cast %113 : vector<1x16x8xf32> to vector<16x8xf32>
    %115 = vector.shape_cast %109 : vector<16x8xf32> to vector<1x16x8xf32>
    tpu.vector_store %arg2[%c0_28, %c1_29, %c8_30], %115 {strides = array<i32>} : memref<1x17x32xf32, #tpu.memory_space<vmem>>, vector<1x16x8xf32>,
    %116 = vector.extract_strided_slice %1 {offsets = [0, 16], sizes = [17, 8], strides = [1, 1]} : vector<17x96xf32> to vector<17x8xf32>
    %cst_31 = arith.constant 0.353553385 : f32
    %117 = vector.broadcast %cst_31 : f32 to vector<17x8xf32>
    %118 = arith.mulf %116, %117 : vector<17x8xf32>
    %119 = vector.extract_strided_slice %1 {offsets = [0, 48], sizes = [17, 8], strides = [1, 1]} : vector<17x96xf32> to vector<17x8xf32>
    %120 = vector.extract_strided_slice %1 {offsets = [0, 80], sizes = [17, 8], strides = [1, 1]} : vector<17x96xf32> to vector<17x8xf32>
    %121 = vector.extract_strided_slice %118 {offsets = [0, 0], sizes = [1, 8], strides = [1, 1]} : vector<17x8xf32> to vector<1x8xf32>
    "tpu.trace_start"() <{level = 10 : i32, message = "qd,kd->qk"}> : () -> ()
    %cst_32 = arith.constant dense<0.000000e+00> : vector<1x17xf32>
    %122 = tpu.matmul %121, %119, %cst_32 {dimension_numbers = #tpu.dot_dimension_numbers<[1], [1], [0], [0], [0, 0, 1, 0], [], []>} : vector<1x8xf32>, vector<17x8xf32>, vector<1x17xf32> -> vector<1x17xf32>
    "tpu.trace_stop"() : () -> ()
    %cst_33 = arith.constant dense<0xFF800000> : vector<1xf32>
    %123 = vector.multi_reduction <maximumf>, %122, %cst_33 [1] : vector<1x17xf32> to vector<1xf32>
    %124 = vector.shape_cast %123 : vector<1xf32> to vector<1x1xf32>
    %125 = vector.broadcast %124 : vector<1x1xf32> to vector<1x17xf32>
    %126 = arith.subf %122, %125 : vector<1x17xf32>
    %127 = math.exp %126 : vector<1x17xf32>
    %cst_34 = arith.constant dense<0.000000e+00> : vector<1xf32>
    %128 = vector.multi_reduction <add>, %127, %cst_34 [1] : vector<1x17xf32> to vector<1xf32>
    %129 = vector.shape_cast %128 : vector<1xf32> to vector<1x1xf32>
    %130 = vector.broadcast %129 : vector<1x1xf32> to vector<1x17xf32>
    %131 = arith.divf %127, %130 : vector<1x17xf32>
    "tpu.trace_start"() <{level = 10 : i32, message = "qk,kd->qd"}> : () -> ()
    %cst_35 = arith.constant dense<0.000000e+00> : vector<1x8xf32>
    %132 = tpu.matmul %131, %120, %cst_35 {dimension_numbers = #tpu.dot_dimension_numbers<[1], [0], [0], [1], [0, 0, 1, 1], [], []>} : vector<1x17xf32>, vector<17x8xf32>, vector<1x8xf32> -> vector<1x8xf32>
    "tpu.trace_stop"() : () -> ()
    %133 = vector.extract_strided_slice %118 {offsets = [1, 0], sizes = [16, 8], strides = [1, 1]} : vector<17x8xf32> to vector<16x8xf32>
    %134 = vector.shape_cast %133 : vector<16x8xf32> to vector<2x8x8xf32>
    %135 = vector.extract_strided_slice %119 {offsets = [1, 0], sizes = [16, 8], strides = [1, 1]} : vector<17x8xf32> to vector<16x8xf32>
    %136 = vector.shape_cast %135 : vector<16x8xf32> to vector<2x8x8xf32>
    %137 = vector.extract_strided_slice %120 {offsets = [1, 0], sizes = [16, 8], strides = [1, 1]} : vector<17x8xf32> to vector<16x8xf32>
    %138 = vector.shape_cast %137 : vector<16x8xf32> to vector<2x8x8xf32>
    %139 = vector.extract_strided_slice %119 {offsets = [0, 0], sizes = [1, 8], strides = [1, 1]} : vector<17x8xf32> to vector<1x8xf32>
    %140 = vector.extract_strided_slice %120 {offsets = [0, 0], sizes = [1, 8], strides = [1, 1]} : vector<17x8xf32> to vector<1x8xf32>
    "tpu.trace_start"() <{level = 10 : i32, message = "rqd,rkd->rqk"}> : () -> ()
    %cst_36 = arith.constant dense<0.000000e+00> : vector<2x8x8xf32>
    %141 = tpu.matmul %134, %136, %cst_36 {dimension_numbers = #tpu.dot_dimension_numbers<[2], [2], [1], [1], [0, 0, 0, 1, 1, 1], [0], [0]>} : vector<2x8x8xf32>, vector<2x8x8xf32>, vector<2x8x8xf32> -> vector<2x8x8xf32>
    "tpu.trace_stop"() : () -> ()
    %142 = vector.shape_cast %139 : vector<1x8xf32> to vector<1x1x8xf32>
    %143 = vector.broadcast %142 : vector<1x1x8xf32> to vector<2x8x8xf32>
    %144 = arith.mulf %134, %143 : vector<2x8x8xf32>
    %cst_37 = arith.constant dense<0.000000e+00> : vector<2x8xf32>
    %145 = vector.multi_reduction <add>, %144, %cst_37 [2] : vector<2x8x8xf32> to vector<2x8xf32>
    %146 = vector.shape_cast %145 : vector<2x8xf32> to vector<2x8x1xf32>
    %cst_38 = arith.constant dense<0xFF800000> : vector<2x8xf32>
    %147 = vector.multi_reduction <maximumf>, %141, %cst_38 [2] : vector<2x8x8xf32> to vector<2x8xf32>
    %148 = vector.shape_cast %147 : vector<2x8xf32> to vector<2x8x1xf32>
    %149 = arith.maximumf %148, %146 : vector<2x8x1xf32>
    %150 = vector.broadcast %149 : vector<2x8x1xf32> to vector<2x8x8xf32>
    %151 = arith.subf %141, %150 : vector<2x8x8xf32>
    %152 = math.exp %151 : vector<2x8x8xf32>
    %153 = arith.subf %146, %149 : vector<2x8x1xf32>
    %154 = math.exp %153 : vector<2x8x1xf32>
    %cst_39 = arith.constant dense<0.000000e+00> : vector<2x8xf32>
    %155 = vector.multi_reduction <add>, %152, %cst_39 [2] : vector<2x8x8xf32> to vector<2x8xf32>
    %156 = vector.shape_cast %155 : vector<2x8xf32> to vector<2x8x1xf32>
    %157 = arith.addf %156, %154 : vector<2x8x1xf32>
    "tpu.trace_start"() <{level = 10 : i32, message = "rqk,rkd->rqd"}> : () -> ()
    %cst_40 = arith.constant dense<0.000000e+00> : vector<2x8x8xf32>
    %158 = tpu.matmul %152, %138, %cst_40 {dimension_numbers = #tpu.dot_dimension_numbers<[2], [1], [1], [2], [0, 0, 0, 1, 1, 2], [0], [0]>} : vector<2x8x8xf32>, vector<2x8x8xf32>, vector<2x8x8xf32> -> vector<2x8x8xf32>
    "tpu.trace_stop"() : () -> ()
    %159 = vector.shape_cast %140 : vector<1x8xf32> to vector<1x1x8xf32>
    %160 = vector.broadcast %154 : vector<2x8x1xf32> to vector<2x8x8xf32>
    %161 = vector.broadcast %159 : vector<1x1x8xf32> to vector<2x8x8xf32>
    %162 = arith.mulf %160, %161 : vector<2x8x8xf32>
    %163 = arith.addf %158, %162 : vector<2x8x8xf32>
    %164 = vector.broadcast %157 : vector<2x8x1xf32> to vector<2x8x8xf32>
    %165 = arith.divf %163, %164 : vector<2x8x8xf32>
    %166 = vector.shape_cast %165 : vector<2x8x8xf32> to vector<16x8xf32>
    %c0_41 = arith.constant 0 : index
    %c0_42 = arith.constant 0 : index
    %c16 = arith.constant 16 : index
    %167 = vector.load %arg2[%c0_41, %c0_42, %c16] : memref<1x17x32xf32, #tpu.memory_space<vmem>>, vector<1x1x8xf32>
    %168 = vector.shape_cast %167 : vector<1x1x8xf32> to vector<1x8xf32>
    %169 = vector.shape_cast %132 : vector<1x8xf32> to vector<1x1x8xf32>
    tpu.vector_store %arg2[%c0_41, %c0_42, %c16], %169 {strides = array<i32>} : memref<1x17x32xf32, #tpu.memory_space<vmem>>, vector<1x1x8xf32>,
    %c0_43 = arith.constant 0 : index
    %c1_44 = arith.constant 1 : index
    %c16_45 = arith.constant 16 : index
    %170 = vector.load %arg2[%c0_43, %c1_44, %c16_45] : memref<1x17x32xf32, #tpu.memory_space<vmem>>, vector<1x16x8xf32>
    %171 = vector.shape_cast %170 : vector<1x16x8xf32> to vector<16x8xf32>
    %172 = vector.shape_cast %166 : vector<16x8xf32> to vector<1x16x8xf32>
    tpu.vector_store %arg2[%c0_43, %c1_44, %c16_45], %172 {strides = array<i32>} : memref<1x17x32xf32, #tpu.memory_space<vmem>>, vector<1x16x8xf32>,
    %173 = vector.extract_strided_slice %1 {offsets = [0, 24], sizes = [17, 8], strides = [1, 1]} : vector<17x96xf32> to vector<17x8xf32>
    %cst_46 = arith.constant 0.353553385 : f32
    %174 = vector.broadcast %cst_46 : f32 to vector<17x8xf32>
    %175 = arith.mulf %173, %174 : vector<17x8xf32>
    %176 = vector.extract_strided_slice %1 {offsets = [0, 56], sizes = [17, 8], strides = [1, 1]} : vector<17x96xf32> to vector<17x8xf32>
    %177 = vector.extract_strided_slice %1 {offsets = [0, 88], sizes = [17, 8], strides = [1, 1]} : vector<17x96xf32> to vector<17x8xf32>
    %178 = vector.extract_strided_slice %175 {offsets = [0, 0], sizes = [1, 8], strides = [1, 1]} : vector<17x8xf32> to vector<1x8xf32>
    "tpu.trace_start"() <{level = 10 : i32, message = "qd,kd->qk"}> : () -> ()
    %cst_47 = arith.constant dense<0.000000e+00> : vector<1x17xf32>
    %179 = tpu.matmul %178, %176, %cst_47 {dimension_numbers = #tpu.dot_dimension_numbers<[1], [1], [0], [0], [0, 0, 1, 0], [], []>} : vector<1x8xf32>, vector<17x8xf32>, vector<1x17xf32> -> vector<1x17xf32>
    "tpu.trace_stop"() : () -> ()
    %cst_48 = arith.constant dense<0xFF800000> : vector<1xf32>
    %180 = vector.multi_reduction <maximumf>, %179, %cst_48 [1] : vector<1x17xf32> to vector<1xf32>
    %181 = vector.shape_cast %180 : vector<1xf32> to vector<1x1xf32>
    %182 = vector.broadcast %181 : vector<1x1xf32> to vector<1x17xf32>
    %183 = arith.subf %179, %182 : vector<1x17xf32>
    %184 = math.exp %183 : vector<1x17xf32>
    %cst_49 = arith.constant dense<0.000000e+00> : vector<1xf32>
    %185 = vector.multi_reduction <add>, %184, %cst_49 [1] : vector<1x17xf32> to vector<1xf32>
    %186 = vector.shape_cast %185 : vector<1xf32> to vector<1x1xf32>
    %187 = vector.broadcast %186 : vector<1x1xf32> to vector<1x17xf32>
    %188 = arith.divf %184, %187 : vector<1x17xf32>
    "tpu.trace_start"() <{level = 10 : i32, message = "qk,kd->qd"}> : () -> ()
    %cst_50 = arith.constant dense<0.000000e+00> : vector<1x8xf32>
    %189 = tpu.matmul %188, %177, %cst_50 {dimension_numbers = #tpu.dot_dimension_numbers<[1], [0], [0], [1], [0, 0, 1, 1], [], []>} : vector<1x17xf32>, vector<17x8xf32>, vector<1x8xf32> -> vector<1x8xf32>
    "tpu.trace_stop"() : () -> ()
    %190 = vector.extract_strided_slice %175 {offsets = [1, 0], sizes = [16, 8], strides = [1, 1]} : vector<17x8xf32> to vector<16x8xf32>
    %191 = vector.shape_cast %190 : vector<16x8xf32> to vector<2x8x8xf32>
    %192 = vector.extract_strided_slice %176 {offsets = [1, 0], sizes = [16, 8], strides = [1, 1]} : vector<17x8xf32> to vector<16x8xf32>
    %193 = vector.shape_cast %192 : vector<16x8xf32> to vector<2x8x8xf32>
    %194 = vector.extract_strided_slice %177 {offsets = [1, 0], sizes = [16, 8], strides = [1, 1]} : vector<17x8xf32> to vector<16x8xf32>
    %195 = vector.shape_cast %194 : vector<16x8xf32> to vector<2x8x8xf32>
    %196 = vector.extract_strided_slice %176 {offsets = [0, 0], sizes = [1, 8], strides = [1, 1]} : vector<17x8xf32> to vector<1x8xf32>
    %197 = vector.extract_strided_slice %177 {offsets = [0, 0], sizes = [1, 8], strides = [1, 1]} : vector<17x8xf32> to vector<1x8xf32>
    "tpu.trace_start"() <{level = 10 : i32, message = "rqd,rkd->rqk"}> : () -> ()
    %cst_51 = arith.constant dense<0.000000e+00> : vector<2x8x8xf32>
    %198 = tpu.matmul %191, %193, %cst_51 {dimension_numbers = #tpu.dot_dimension_numbers<[2], [2], [1], [1], [0, 0, 0, 1, 1, 1], [0], [0]>} : vector<2x8x8xf32>, vector<2x8x8xf32>, vector<2x8x8xf32> -> vector<2x8x8xf32>
    "tpu.trace_stop"() : () -> ()
    %199 = vector.shape_cast %196 : vector<1x8xf32> to vector<1x1x8xf32>
    %200 = vector.broadcast %199 : vector<1x1x8xf32> to vector<2x8x8xf32>
    %201 = arith.mulf %191, %200 : vector<2x8x8xf32>
    %cst_52 = arith.constant dense<0.000000e+00> : vector<2x8xf32>
    %202 = vector.multi_reduction <add>, %201, %cst_52 [2] : vector<2x8x8xf32> to vector<2x8xf32>
    %203 = vector.shape_cast %202 : vector<2x8xf32> to vector<2x8x1xf32>
    %cst_53 = arith.constant dense<0xFF800000> : vector<2x8xf32>
    %204 = vector.multi_reduction <maximumf>, %198, %cst_53 [2] : vector<2x8x8xf32> to vector<2x8xf32>
    %205 = vector.shape_cast %204 : vector<2x8xf32> to vector<2x8x1xf32>
    %206 = arith.maximumf %205, %203 : vector<2x8x1xf32>
    %207 = vector.broadcast %206 : vector<2x8x1xf32> to vector<2x8x8xf32>
    %208 = arith.subf %198, %207 : vector<2x8x8xf32>
    %209 = math.exp %208 : vector<2x8x8xf32>
    %210 = arith.subf %203, %206 : vector<2x8x1xf32>
    %211 = math.exp %210 : vector<2x8x1xf32>
    %cst_54 = arith.constant dense<0.000000e+00> : vector<2x8xf32>
    %212 = vector.multi_reduction <add>, %209, %cst_54 [2] : vector<2x8x8xf32> to vector<2x8xf32>
    %213 = vector.shape_cast %212 : vector<2x8xf32> to vector<2x8x1xf32>
    %214 = arith.addf %213, %211 : vector<2x8x1xf32>
    "tpu.trace_start"() <{level = 10 : i32, message = "rqk,rkd->rqd"}> : () -> ()
    %cst_55 = arith.constant dense<0.000000e+00> : vector<2x8x8xf32>
    %215 = tpu.matmul %209, %195, %cst_55 {dimension_numbers = #tpu.dot_dimension_numbers<[2], [1], [1], [2], [0, 0, 0, 1, 1, 2], [0], [0]>} : vector<2x8x8xf32>, vector<2x8x8xf32>, vector<2x8x8xf32> -> vector<2x8x8xf32>
    "tpu.trace_stop"() : () -> ()
    %216 = vector.shape_cast %197 : vector<1x8xf32> to vector<1x1x8xf32>
    %217 = vector.broadcast %211 : vector<2x8x1xf32> to vector<2x8x8xf32>
    %218 = vector.broadcast %216 : vector<1x1x8xf32> to vector<2x8x8xf32>
    %219 = arith.mulf %217, %218 : vector<2x8x8xf32>
    %220 = arith.addf %215, %219 : vector<2x8x8xf32>
    %221 = vector.broadcast %214 : vector<2x8x1xf32> to vector<2x8x8xf32>
    %222 = arith.divf %220, %221 : vector<2x8x8xf32>
    %223 = vector.shape_cast %222 : vector<2x8x8xf32> to vector<16x8xf32>
    %c0_56 = arith.constant 0 : index
    %c0_57 = arith.constant 0 : index
    %c24 = arith.constant 24 : index
    %224 = vector.load %arg2[%c0_56, %c0_57, %c24] : memref<1x17x32xf32, #tpu.memory_space<vmem>>, vector<1x1x8xf32>
    %225 = vector.shape_cast %224 : vector<1x1x8xf32> to vector<1x8xf32>
    %226 = vector.shape_cast %189 : vector<1x8xf32> to vector<1x1x8xf32>
    tpu.vector_store %arg2[%c0_56, %c0_57, %c24], %226 {strides = array<i32>} : memref<1x17x32xf32, #tpu.memory_space<vmem>>, vector<1x1x8xf32>,
    %c0_58 = arith.constant 0 : index
    %c1_59 = arith.constant 1 : index
    %c24_60 = arith.constant 24 : index
    %227 = vector.load %arg2[%c0_58, %c1_59, %c24_60] : memref<1x17x32xf32, #tpu.memory_space<vmem>>, vector<1x16x8xf32>
    %228 = vector.shape_cast %227 : vector<1x16x8xf32> to vector<16x8xf32>
    %229 = vector.shape_cast %223 : vector<16x8xf32> to vector<1x16x8xf32>
    tpu.vector_store %arg2[%c0_58, %c1_59, %c24_60], %229 {strides = array<i32>} : memref<1x17x32xf32, #tpu.memory_space<vmem>>, vector<1x16x8xf32>,
    return
  }
  func.func @transform_0(%arg0: i32) -> (i32, i32, i32) {
    %c0_i32 = arith.constant 0 : i32
    %c0_i32_0 = arith.constant 0 : i32
    %c0_i32_1 = arith.constant 0 : i32
    return %arg0, %c0_i32, %c0_i32_0 : i32, i32, i32
  }
  func.func @transform_1(%arg0: i32) -> (i32, i32, i32) {
    %c0_i32 = arith.constant 0 : i32
    %c0_i32_0 = arith.constant 0 : i32
    %c0_i32_1 = arith.constant 0 : i32
    return %arg0, %c0_i32, %c0_i32_0 : i32, i32, i32
  }
}

module attributes {stable_mosaic.version = 11 : i64} {
  func.func @_var_attn_kernel(%arg0: i32, %arg1: memref<1x17x96xf32, #tpu.memory_space<vmem>>, %arg2: memref<1x17x32xf32, #tpu.memory_space<vmem>>) attributes {dimension_semantics = [#tpu.dimension_semantics<parallel>], iteration_bounds = array<i64: 2>, scalar_prefetch = 0 : i64, scratch_operands = 0 : i64, tpu.core_type = #tpu.core_type<tc>, window_params = [{transform_indices = @transform_0, window_bounds = array<i64: 1, 17, 96>}, {transform_indices = @transform_1, window_bounds = array<i64: 1, 17, 32>}]} {
    %c0 = arith.constant 0 : index
    %c0_0 = arith.constant 0 : index
    %c0_1 = arith.constant 0 : index
    %0 = vector.load %arg1[%c0, %c0_0, %c0_1] : memref<1x17x96xf32, #tpu.memory_space<vmem>>, vector<1x17x96xf32>
    %1 = vector.shape_cast %0 : vector<1x17x96xf32> to vector<17x96xf32>
    %2 = vector.extract_strided_slice %1 {offsets = [0, 0], sizes = [17, 8], strides = [1, 1]} : vector<17x96xf32> to vector<17x8xf32>
    %cst = arith.constant 0.353553385 : f32
    %3 = vector.broadcast %cst : f32 to vector<17x8xf32>
    %4 = arith.mulf %2, %3 : vector<17x8xf32>
    %5 = vector.extract_strided_slice %1 {offsets = [0, 32], sizes = [17, 8], strides = [1, 1]} : vector<17x96xf32> to vector<17x8xf32>
    %6 = vector.extract_strided_slice %1 {offsets = [0, 64], sizes = [17, 8], strides = [1, 1]} : vector<17x96xf32> to vector<17x8xf32>
    %7 = vector.extract_strided_slice %4 {offsets = [0, 0], sizes = [1, 8], strides = [1, 1]} : vector<17x8xf32> to vector<1x8xf32>
    "tpu.trace_start"() <{level = 10 : i32, message = "qd,kd->qk"}> : () -> ()
    %cst_2 = arith.constant dense<0.000000e+00> : vector<1x17xf32>
    %8 = tpu.matmul %7, %5, %cst_2 {dimension_numbers = #tpu.dot_dimension_numbers<[1], [1], [0], [0], [0, 0, 1, 0], [], []>} : vector<1x8xf32>, vector<17x8xf32>, vector<1x17xf32> -> vector<1x17xf32>
    "tpu.trace_stop"() : () -> ()
    %cst_3 = arith.constant dense<0xFF800000> : vector<1xf32>
    %9 = vector.multi_reduction <maximumf>, %8, %cst_3 [1] : vector<1x17xf32> to vector<1xf32>
    %10 = vector.shape_cast %9 : vector<1xf32> to vector<1x1xf32>
    %11 = vector.broadcast %10 : vector<1x1xf32> to vector<1x17xf32>
    %12 = arith.subf %8, %11 : vector<1x17xf32>
    %13 = math.exp %12 : vector<1x17xf32>
    %cst_4 = arith.constant dense<0.000000e+00> : vector<1xf32>
    %14 = vector.multi_reduction <add>, %13, %cst_4 [1] : vector<1x17xf32> to vector<1xf32>
    %15 = vector.shape_cast %14 : vector<1xf32> to vector<1x1xf32>
    %16 = vector.broadcast %15 : vector<1x1xf32> to vector<1x17xf32>
    %17 = arith.divf %13, %16 : vector<1x17xf32>
    "tpu.trace_start"() <{level = 10 : i32, message = "qk,kd->qd"}> : () -> ()
    %cst_5 = arith.constant dense<0.000000e+00> : vector<1x8xf32>
    %18 = tpu.matmul %17, %6, %cst_5 {dimension_numbers = #tpu.dot_dimension_numbers<[1], [0], [0], [1], [0, 0, 1, 1], [], []>} : vector<1x17xf32>, vector<17x8xf32>, vector<1x8xf32> -> vector<1x8xf32>
    "tpu.trace_stop"() : () -> ()
    %19 = vector.extract_strided_slice %4 {offsets = [1, 0], sizes = [16, 8], strides = [1, 1]} : vector<17x8xf32> to vector<16x8xf32>
    %20 = vector.shape_cast %19 : vector<16x8xf32> to vector<2x8x8xf32>
    %21 = vector.extract_strided_slice %5 {offsets = [1, 0], sizes = [16, 8], strides = [1, 1]} : vector<17x8xf32> to vector<16x8xf32>
    %22 = vector.shape_cast %21 : vector<16x8xf32> to vector<2x8x8xf32>
    %23 = vector.extract_strided_slice %6 {offsets = [1, 0], sizes = [16, 8], strides = [1, 1]} : vector<17x8xf32> to vector<16x8xf32>
    %24 = vector.shape_cast %23 : vector<16x8xf32> to vector<2x8x8xf32>
    %25 = tpu.transpose %20, [1, 0, 2] : vector<2x8x8xf32> -> vector<8x2x8xf32>
    %26 = tpu.transpose %22, [1, 0, 2] : vector<2x8x8xf32> -> vector<8x2x8xf32>
    %27 = tpu.transpose %24, [1, 0, 2] : vector<2x8x8xf32> -> vector<8x2x8xf32>
    %28 = vector.extract_strided_slice %5 {offsets = [0, 0], sizes = [1, 8], strides = [1, 1]} : vector<17x8xf32> to vector<1x8xf32>
    %29 = vector.extract_strided_slice %6 {offsets = [0, 0], sizes = [1, 8], strides = [1, 1]} : vector<17x8xf32> to vector<1x8xf32>
    "tpu.trace_start"() <{level = 10 : i32, message = "rqd,rkd->rqk"}> : () -> ()
    %cst_6 = arith.constant dense<0.000000e+00> : vector<8x2x2xf32>
    %30 = tpu.matmul %25, %26, %cst_6 {dimension_numbers = #tpu.dot_dimension_numbers<[2], [2], [1], [1], [0, 0, 0, 1, 1, 1], [0], [0]>} : vector<8x2x8xf32>, vector<8x2x8xf32>, vector<8x2x2xf32> -> vector<8x2x2xf32>
    "tpu.trace_stop"() : () -> ()
    %31 = vector.shape_cast %28 : vector<1x8xf32> to vector<1x1x8xf32>
    %32 = vector.broadcast %31 : vector<1x1x8xf32> to vector<8x2x8xf32>
    %33 = arith.mulf %25, %32 : vector<8x2x8xf32>
    %cst_7 = arith.constant dense<0.000000e+00> : vector<8x2xf32>
    %34 = vector.multi_reduction <add>, %33, %cst_7 [2] : vector<8x2x8xf32> to vector<8x2xf32>
    %35 = vector.shape_cast %34 : vector<8x2xf32> to vector<8x2x1xf32>
    %cst_8 = arith.constant dense<0xFF800000> : vector<8x2xf32>
    %36 = vector.multi_reduction <maximumf>, %30, %cst_8 [2] : vector<8x2x2xf32> to vector<8x2xf32>
    %37 = vector.shape_cast %36 : vector<8x2xf32> to vector<8x2x1xf32>
    %38 = arith.maximumf %37, %35 : vector<8x2x1xf32>
    %39 = vector.broadcast %38 : vector<8x2x1xf32> to vector<8x2x2xf32>
    %40 = arith.subf %30, %39 : vector<8x2x2xf32>
    %41 = math.exp %40 : vector<8x2x2xf32>
    %42 = arith.subf %35, %38 : vector<8x2x1xf32>
    %43 = math.exp %42 : vector<8x2x1xf32>
    %cst_9 = arith.constant dense<0.000000e+00> : vector<8x2xf32>
    %44 = vector.multi_reduction <add>, %41, %cst_9 [2] : vector<8x2x2xf32> to vector<8x2xf32>
    %45 = vector.shape_cast %44 : vector<8x2xf32> to vector<8x2x1xf32>
    %46 = arith.addf %45, %43 : vector<8x2x1xf32>
    "tpu.trace_start"() <{level = 10 : i32, message = "rqk,rkd->rqd"}> : () -> ()
    %cst_10 = arith.constant dense<0.000000e+00> : vector<8x2x8xf32>
    %47 = tpu.matmul %41, %27, %cst_10 {dimension_numbers = #tpu.dot_dimension_numbers<[2], [1], [1], [2], [0, 0, 0, 1, 1, 2], [0], [0]>} : vector<8x2x2xf32>, vector<8x2x8xf32>, vector<8x2x8xf32> -> vector<8x2x8xf32>
    "tpu.trace_stop"() : () -> ()
    %48 = vector.shape_cast %29 : vector<1x8xf32> to vector<1x1x8xf32>
    %49 = vector.broadcast %43 : vector<8x2x1xf32> to vector<8x2x8xf32>
    %50 = vector.broadcast %48 : vector<1x1x8xf32> to vector<8x2x8xf32>
    %51 = arith.mulf %49, %50 : vector<8x2x8xf32>
    %52 = arith.addf %47, %51 : vector<8x2x8xf32>
    %53 = vector.broadcast %46 : vector<8x2x1xf32> to vector<8x2x8xf32>
    %54 = arith.divf %52, %53 : vector<8x2x8xf32>
    %55 = tpu.transpose %54, [1, 0, 2] : vector<8x2x8xf32> -> vector<2x8x8xf32>
    %56 = vector.shape_cast %55 : vector<2x8x8xf32> to vector<16x8xf32>
    %c0_11 = arith.constant 0 : index
    %c0_12 = arith.constant 0 : index
    %c0_13 = arith.constant 0 : index
    %57 = vector.load %arg2[%c0_11, %c0_12, %c0_13] : memref<1x17x32xf32, #tpu.memory_space<vmem>>, vector<1x1x8xf32>
    %58 = vector.shape_cast %57 : vector<1x1x8xf32> to vector<1x8xf32>
    %59 = vector.shape_cast %18 : vector<1x8xf32> to vector<1x1x8xf32>
    tpu.vector_store %arg2[%c0_11, %c0_12, %c0_13], %59 {strides = array<i32>} : memref<1x17x32xf32, #tpu.memory_space<vmem>>, vector<1x1x8xf32>,
    %c0_14 = arith.constant 0 : index
    %c1 = arith.constant 1 : index
    %c0_15 = arith.constant 0 : index
    %60 = vector.load %arg2[%c0_14, %c1, %c0_15] : memref<1x17x32xf32, #tpu.memory_space<vmem>>, vector<1x16x8xf32>
    %61 = vector.shape_cast %60 : vector<1x16x8xf32> to vector<16x8xf32>
    %62 = vector.shape_cast %56 : vector<16x8xf32> to vector<1x16x8xf32>
    tpu.vector_store %arg2[%c0_14, %c1, %c0_15], %62 {strides = array<i32>} : memref<1x17x32xf32, #tpu.memory_space<vmem>>, vector<1x16x8xf32>,
    %63 = vector.extract_strided_slice %1 {offsets = [0, 8], sizes = [17, 8], strides = [1, 1]} : vector<17x96xf32> to vector<17x8xf32>
    %cst_16 = arith.constant 0.353553385 : f32
    %64 = vector.broadcast %cst_16 : f32 to vector<17x8xf32>
    %65 = arith.mulf %63, %64 : vector<17x8xf32>
    %66 = vector.extract_strided_slice %1 {offsets = [0, 40], sizes = [17, 8], strides = [1, 1]} : vector<17x96xf32> to vector<17x8xf32>
    %67 = vector.extract_strided_slice %1 {offsets = [0, 72], sizes = [17, 8], strides = [1, 1]} : vector<17x96xf32> to vector<17x8xf32>
    %68 = vector.extract_strided_slice %65 {offsets = [0, 0], sizes = [1, 8], strides = [1, 1]} : vector<17x8xf32> to vector<1x8xf32>
    "tpu.trace_start"() <{level = 10 : i32, message = "qd,kd->qk"}> : () -> ()
    %cst_17 = arith.constant dense<0.000000e+00> : vector<1x17xf32>
    %69 = tpu.matmul %68, %66, %cst_17 {dimension_numbers = #tpu.dot_dimension_numbers<[1], [1], [0], [0], [0, 0, 1, 0], [], []>} : vector<1x8xf32>, vector<17x8xf32>, vector<1x17xf32> -> vector<1x17xf32>
    "tpu.trace_stop"() : () -> ()
    %cst_18 = arith.constant dense<0xFF800000> : vector<1xf32>
    %70 = vector.multi_reduction <maximumf>, %69, %cst_18 [1] : vector<1x17xf32> to vector<1xf32>
    %71 = vector.shape_cast %70 : vector<1xf32> to vector<1x1xf32>
    %72 = vector.broadcast %71 : vector<1x1xf32> to vector<1x17xf32>
    %73 = arith.subf %69, %72 : vector<1x17xf32>
    %74 = math.exp %73 : vector<1x17xf32>
    %cst_19 = arith.constant dense<0.000000e+00> : vector<1xf32>
    %75 = vector.multi_reduction <add>, %74, %cst_19 [1] : vector<1x17xf32> to vector<1xf32>
    %76 = vector.shape_cast %75 : vector<1xf32> to vector<1x1xf32>
    %77 = vector.broadcast %76 : vector<1x1xf32> to vector<1x17xf32>
    %78 = arith.divf %74, %77 : vector<1x17xf32>
    "tpu.trace_start"() <{level = 10 : i32, message = "qk,kd->qd"}> : () -> ()
    %cst_20 = arith.constant dense<0.000000e+00> : vector<1x8xf32>
    %79 = tpu.matmul %78, %67, %cst_20 {dimension_numbers = #tpu.dot_dimension_numbers<[1], [0], [0], [1], [0, 0, 1, 1], [], []>} : vector<1x17xf32>, vector<17x8xf32>, vector<1x8xf32> -> vector<1x8xf32>
    "tpu.trace_stop"() : () -> ()
    %80 = vector.extract_strided_slice %65 {offsets = [1, 0], sizes = [16, 8], strides = [1, 1]} : vector<17x8xf32> to vector<16x8xf32>
    %81 = vector.shape_cast %80 : vector<16x8xf32> to vector<2x8x8xf32>
    %82 = vector.extract_strided_slice %66 {offsets = [1, 0], sizes = [16, 8], strides = [1, 1]} : vector<17x8xf32> to vector<16x8xf32>
    %83 = vector.shape_cast %82 : vector<16x8xf32> to vector<2x8x8xf32>
    %84 = vector.extract_strided_slice %67 {offsets = [1, 0], sizes = [16, 8], strides = [1, 1]} : vector<17x8xf32> to vector<16x8xf32>
    %85 = vector.shape_cast %84 : vector<16x8xf32> to vector<2x8x8xf32>
    %86 = tpu.transpose %81, [1, 0, 2] : vector<2x8x8xf32> -> vector<8x2x8xf32>
    %87 = tpu.transpose %83, [1, 0, 2] : vector<2x8x8xf32> -> vector<8x2x8xf32>
    %88 = tpu.transpose %85, [1, 0, 2] : vector<2x8x8xf32> -> vector<8x2x8xf32>
    %89 = vector.extract_strided_slice %66 {offsets = [0, 0], sizes = [1, 8], strides = [1, 1]} : vector<17x8xf32> to vector<1x8xf32>
    %90 = vector.extract_strided_slice %67 {offsets = [0, 0], sizes = [1, 8], strides = [1, 1]} : vector<17x8xf32> to vector<1x8xf32>
    "tpu.trace_start"() <{level = 10 : i32, message = "rqd,rkd->rqk"}> : () -> ()
    %cst_21 = arith.constant dense<0.000000e+00> : vector<8x2x2xf32>
    %91 = tpu.matmul %86, %87, %cst_21 {dimension_numbers = #tpu.dot_dimension_numbers<[2], [2], [1], [1], [0, 0, 0, 1, 1, 1], [0], [0]>} : vector<8x2x8xf32>, vector<8x2x8xf32>, vector<8x2x2xf32> -> vector<8x2x2xf32>
    "tpu.trace_stop"() : () -> ()
    %92 = vector.shape_cast %89 : vector<1x8xf32> to vector<1x1x8xf32>
    %93 = vector.broadcast %92 : vector<1x1x8xf32> to vector<8x2x8xf32>
    %94 = arith.mulf %86, %93 : vector<8x2x8xf32>
    %cst_22 = arith.constant dense<0.000000e+00> : vector<8x2xf32>
    %95 = vector.multi_reduction <add>, %94, %cst_22 [2] : vector<8x2x8xf32> to vector<8x2xf32>
    %96 = vector.shape_cast %95 : vector<8x2xf32> to vector<8x2x1xf32>
    %cst_23 = arith.constant dense<0xFF800000> : vector<8x2xf32>
    %97 = vector.multi_reduction <maximumf>, %91, %cst_23 [2] : vector<8x2x2xf32> to vector<8x2xf32>
    %98 = vector.shape_cast %97 : vector<8x2xf32> to vector<8x2x1xf32>
    %99 = arith.maximumf %98, %96 : vector<8x2x1xf32>
    %100 = vector.broadcast %99 : vector<8x2x1xf32> to vector<8x2x2xf32>
    %101 = arith.subf %91, %100 : vector<8x2x2xf32>
    %102 = math.exp %101 : vector<8x2x2xf32>
    %103 = arith.subf %96, %99 : vector<8x2x1xf32>
    %104 = math.exp %103 : vector<8x2x1xf32>
    %cst_24 = arith.constant dense<0.000000e+00> : vector<8x2xf32>
    %105 = vector.multi_reduction <add>, %102, %cst_24 [2] : vector<8x2x2xf32> to vector<8x2xf32>
    %106 = vector.shape_cast %105 : vector<8x2xf32> to vector<8x2x1xf32>
    %107 = arith.addf %106, %104 : vector<8x2x1xf32>
    "tpu.trace_start"() <{level = 10 : i32, message = "rqk,rkd->rqd"}> : () -> ()
    %cst_25 = arith.constant dense<0.000000e+00> : vector<8x2x8xf32>
    %108 = tpu.matmul %102, %88, %cst_25 {dimension_numbers = #tpu.dot_dimension_numbers<[2], [1], [1], [2], [0, 0, 0, 1, 1, 2], [0], [0]>} : vector<8x2x2xf32>, vector<8x2x8xf32>, vector<8x2x8xf32> -> vector<8x2x8xf32>
    "tpu.trace_stop"() : () -> ()
    %109 = vector.shape_cast %90 : vector<1x8xf32> to vector<1x1x8xf32>
    %110 = vector.broadcast %104 : vector<8x2x1xf32> to vector<8x2x8xf32>
    %111 = vector.broadcast %109 : vector<1x1x8xf32> to vector<8x2x8xf32>
    %112 = arith.mulf %110, %111 : vector<8x2x8xf32>
    %113 = arith.addf %108, %112 : vector<8x2x8xf32>
    %114 = vector.broadcast %107 : vector<8x2x1xf32> to vector<8x2x8xf32>
    %115 = arith.divf %113, %114 : vector<8x2x8xf32>
    %116 = tpu.transpose %115, [1, 0, 2] : vector<8x2x8xf32> -> vector<2x8x8xf32>
    %117 = vector.shape_cast %116 : vector<2x8x8xf32> to vector<16x8xf32>
    %c0_26 = arith.constant 0 : index
    %c0_27 = arith.constant 0 : index
    %c8 = arith.constant 8 : index
    %118 = vector.load %arg2[%c0_26, %c0_27, %c8] : memref<1x17x32xf32, #tpu.memory_space<vmem>>, vector<1x1x8xf32>
    %119 = vector.shape_cast %118 : vector<1x1x8xf32> to vector<1x8xf32>
    %120 = vector.shape_cast %79 : vector<1x8xf32> to vector<1x1x8xf32>
    tpu.vector_store %arg2[%c0_26, %c0_27, %c8], %120 {strides = array<i32>} : memref<1x17x32xf32, #tpu.memory_space<vmem>>, vector<1x1x8xf32>,
    %c0_28 = arith.constant 0 : index
    %c1_29 = arith.constant 1 : index
    %c8_30 = arith.constant 8 : index
    %121 = vector.load %arg2[%c0_28, %c1_29, %c8_30] : memref<1x17x32xf32, #tpu.memory_space<vmem>>, vector<1x16x8xf32>
    %122 = vector.shape_cast %121 : vector<1x16x8xf32> to vector<16x8xf32>
    %123 = vector.shape_cast %117 : vector<16x8xf32> to vector<1x16x8xf32>
    tpu.vector_store %arg2[%c0_28, %c1_29, %c8_30], %123 {strides = array<i32>} : memref<1x17x32xf32, #tpu.memory_space<vmem>>, vector<1x16x8xf32>,
    %124 = vector.extract_strided_slice %1 {offsets = [0, 16], sizes = [17, 8], strides = [1, 1]} : vector<17x96xf32> to vector<17x8xf32>
    %cst_31 = arith.constant 0.353553385 : f32
    %125 = vector.broadcast %cst_31 : f32 to vector<17x8xf32>
    %126 = arith.mulf %124, %125 : vector<17x8xf32>
    %127 = vector.extract_strided_slice %1 {offsets = [0, 48], sizes = [17, 8], strides = [1, 1]} : vector<17x96xf32> to vector<17x8xf32>
    %128 = vector.extract_strided_slice %1 {offsets = [0, 80], sizes = [17, 8], strides = [1, 1]} : vector<17x96xf32> to vector<17x8xf32>
    %129 = vector.extract_strided_slice %126 {offsets = [0, 0], sizes = [1, 8], strides = [1, 1]} : vector<17x8xf32> to vector<1x8xf32>
    "tpu.trace_start"() <{level = 10 : i32, message = "qd,kd->qk"}> : () -> ()
    %cst_32 = arith.constant dense<0.000000e+00> : vector<1x17xf32>
    %130 = tpu.matmul %129, %127, %cst_32 {dimension_numbers = #tpu.dot_dimension_numbers<[1], [1], [0], [0], [0, 0, 1, 0], [], []>} : vector<1x8xf32>, vector<17x8xf32>, vector<1x17xf32> -> vector<1x17xf32>
    "tpu.trace_stop"() : () -> ()
    %cst_33 = arith.constant dense<0xFF800000> : vector<1xf32>
    %131 = vector.multi_reduction <maximumf>, %130, %cst_33 [1] : vector<1x17xf32> to vector<1xf32>
    %132 = vector.shape_cast %131 : vector<1xf32> to vector<1x1xf32>
    %133 = vector.broadcast %132 : vector<1x1xf32> to vector<1x17xf32>
    %134 = arith.subf %130, %133 : vector<1x17xf32>
    %135 = math.exp %134 : vector<1x17xf32>
    %cst_34 = arith.constant dense<0.000000e+00> : vector<1xf32>
    %136 = vector.multi_reduction <add>, %135, %cst_34 [1] : vector<1x17xf32> to vector<1xf32>
    %137 = vector.shape_cast %136 : vector<1xf32> to vector<1x1xf32>
    %138 = vector.broadcast %137 : vector<1x1xf32> to vector<1x17xf32>
    %139 = arith.divf %135, %138 : vector<1x17xf32>
    "tpu.trace_start"() <{level = 10 : i32, message = "qk,kd->qd"}> : () -> ()
    %cst_35 = arith.constant dense<0.000000e+00> : vector<1x8xf32>
    %140 = tpu.matmul %139, %128, %cst_35 {dimension_numbers = #tpu.dot_dimension_numbers<[1], [0], [0], [1], [0, 0, 1, 1], [], []>} : vector<1x17xf32>, vector<17x8xf32>, vector<1x8xf32> -> vector<1x8xf32>
    "tpu.trace_stop"() : () -> ()
    %141 = vector.extract_strided_slice %126 {offsets = [1, 0], sizes = [16, 8], strides = [1, 1]} : vector<17x8xf32> to vector<16x8xf32>
    %142 = vector.shape_cast %141 : vector<16x8xf32> to vector<2x8x8xf32>
    %143 = vector.extract_strided_slice %127 {offsets = [1, 0], sizes = [16, 8], strides = [1, 1]} : vector<17x8xf32> to vector<16x8xf32>
    %144 = vector.shape_cast %143 : vector<16x8xf32> to vector<2x8x8xf32>
    %145 = vector.extract_strided_slice %128 {offsets = [1, 0], sizes = [16, 8], strides = [1, 1]} : vector<17x8xf32> to vector<16x8xf32>
    %146 = vector.shape_cast %145 : vector<16x8xf32> to vector<2x8x8xf32>
    %147 = tpu.transpose %142, [1, 0, 2] : vector<2x8x8xf32> -> vector<8x2x8xf32>
    %148 = tpu.transpose %144, [1, 0, 2] : vector<2x8x8xf32> -> vector<8x2x8xf32>
    %149 = tpu.transpose %146, [1, 0, 2] : vector<2x8x8xf32> -> vector<8x2x8xf32>
    %150 = vector.extract_strided_slice %127 {offsets = [0, 0], sizes = [1, 8], strides = [1, 1]} : vector<17x8xf32> to vector<1x8xf32>
    %151 = vector.extract_strided_slice %128 {offsets = [0, 0], sizes = [1, 8], strides = [1, 1]} : vector<17x8xf32> to vector<1x8xf32>
    "tpu.trace_start"() <{level = 10 : i32, message = "rqd,rkd->rqk"}> : () -> ()
    %cst_36 = arith.constant dense<0.000000e+00> : vector<8x2x2xf32>
    %152 = tpu.matmul %147, %148, %cst_36 {dimension_numbers = #tpu.dot_dimension_numbers<[2], [2], [1], [1], [0, 0, 0, 1, 1, 1], [0], [0]>} : vector<8x2x8xf32>, vector<8x2x8xf32>, vector<8x2x2xf32> -> vector<8x2x2xf32>
    "tpu.trace_stop"() : () -> ()
    %153 = vector.shape_cast %150 : vector<1x8xf32> to vector<1x1x8xf32>
    %154 = vector.broadcast %153 : vector<1x1x8xf32> to vector<8x2x8xf32>
    %155 = arith.mulf %147, %154 : vector<8x2x8xf32>
    %cst_37 = arith.constant dense<0.000000e+00> : vector<8x2xf32>
    %156 = vector.multi_reduction <add>, %155, %cst_37 [2] : vector<8x2x8xf32> to vector<8x2xf32>
    %157 = vector.shape_cast %156 : vector<8x2xf32> to vector<8x2x1xf32>
    %cst_38 = arith.constant dense<0xFF800000> : vector<8x2xf32>
    %158 = vector.multi_reduction <maximumf>, %152, %cst_38 [2] : vector<8x2x2xf32> to vector<8x2xf32>
    %159 = vector.shape_cast %158 : vector<8x2xf32> to vector<8x2x1xf32>
    %160 = arith.maximumf %159, %157 : vector<8x2x1xf32>
    %161 = vector.broadcast %160 : vector<8x2x1xf32> to vector<8x2x2xf32>
    %162 = arith.subf %152, %161 : vector<8x2x2xf32>
    %163 = math.exp %162 : vector<8x2x2xf32>
    %164 = arith.subf %157, %160 : vector<8x2x1xf32>
    %165 = math.exp %164 : vector<8x2x1xf32>
    %cst_39 = arith.constant dense<0.000000e+00> : vector<8x2xf32>
    %166 = vector.multi_reduction <add>, %163, %cst_39 [2] : vector<8x2x2xf32> to vector<8x2xf32>
    %167 = vector.shape_cast %166 : vector<8x2xf32> to vector<8x2x1xf32>
    %168 = arith.addf %167, %165 : vector<8x2x1xf32>
    "tpu.trace_start"() <{level = 10 : i32, message = "rqk,rkd->rqd"}> : () -> ()
    %cst_40 = arith.constant dense<0.000000e+00> : vector<8x2x8xf32>
    %169 = tpu.matmul %163, %149, %cst_40 {dimension_numbers = #tpu.dot_dimension_numbers<[2], [1], [1], [2], [0, 0, 0, 1, 1, 2], [0], [0]>} : vector<8x2x2xf32>, vector<8x2x8xf32>, vector<8x2x8xf32> -> vector<8x2x8xf32>
    "tpu.trace_stop"() : () -> ()
    %170 = vector.shape_cast %151 : vector<1x8xf32> to vector<1x1x8xf32>
    %171 = vector.broadcast %165 : vector<8x2x1xf32> to vector<8x2x8xf32>
    %172 = vector.broadcast %170 : vector<1x1x8xf32> to vector<8x2x8xf32>
    %173 = arith.mulf %171, %172 : vector<8x2x8xf32>
    %174 = arith.addf %169, %173 : vector<8x2x8xf32>
    %175 = vector.broadcast %168 : vector<8x2x1xf32> to vector<8x2x8xf32>
    %176 = arith.divf %174, %175 : vector<8x2x8xf32>
    %177 = tpu.transpose %176, [1, 0, 2] : vector<8x2x8xf32> -> vector<2x8x8xf32>
    %178 = vector.shape_cast %177 : vector<2x8x8xf32> to vector<16x8xf32>
    %c0_41 = arith.constant 0 : index
    %c0_42 = arith.constant 0 : index
    %c16 = arith.constant 16 : index
    %179 = vector.load %arg2[%c0_41, %c0_42, %c16] : memref<1x17x32xf32, #tpu.memory_space<vmem>>, vector<1x1x8xf32>
    %180 = vector.shape_cast %179 : vector<1x1x8xf32> to vector<1x8xf32>
    %181 = vector.shape_cast %140 : vector<1x8xf32> to vector<1x1x8xf32>
    tpu.vector_store %arg2[%c0_41, %c0_42, %c16], %181 {strides = array<i32>} : memref<1x17x32xf32, #tpu.memory_space<vmem>>, vector<1x1x8xf32>,
    %c0_43 = arith.constant 0 : index
    %c1_44 = arith.constant 1 : index
    %c16_45 = arith.constant 16 : index
    %182 = vector.load %arg2[%c0_43, %c1_44, %c16_45] : memref<1x17x32xf32, #tpu.memory_space<vmem>>, vector<1x16x8xf32>
    %183 = vector.shape_cast %182 : vector<1x16x8xf32> to vector<16x8xf32>
    %184 = vector.shape_cast %178 : vector<16x8xf32> to vector<1x16x8xf32>
    tpu.vector_store %arg2[%c0_43, %c1_44, %c16_45], %184 {strides = array<i32>} : memref<1x17x32xf32, #tpu.memory_space<vmem>>, vector<1x16x8xf32>,
    %185 = vector.extract_strided_slice %1 {offsets = [0, 24], sizes = [17, 8], strides = [1, 1]} : vector<17x96xf32> to vector<17x8xf32>
    %cst_46 = arith.constant 0.353553385 : f32
    %186 = vector.broadcast %cst_46 : f32 to vector<17x8xf32>
    %187 = arith.mulf %185, %186 : vector<17x8xf32>
    %188 = vector.extract_strided_slice %1 {offsets = [0, 56], sizes = [17, 8], strides = [1, 1]} : vector<17x96xf32> to vector<17x8xf32>
    %189 = vector.extract_strided_slice %1 {offsets = [0, 88], sizes = [17, 8], strides = [1, 1]} : vector<17x96xf32> to vector<17x8xf32>
    %190 = vector.extract_strided_slice %187 {offsets = [0, 0], sizes = [1, 8], strides = [1, 1]} : vector<17x8xf32> to vector<1x8xf32>
    "tpu.trace_start"() <{level = 10 : i32, message = "qd,kd->qk"}> : () -> ()
    %cst_47 = arith.constant dense<0.000000e+00> : vector<1x17xf32>
    %191 = tpu.matmul %190, %188, %cst_47 {dimension_numbers = #tpu.dot_dimension_numbers<[1], [1], [0], [0], [0, 0, 1, 0], [], []>} : vector<1x8xf32>, vector<17x8xf32>, vector<1x17xf32> -> vector<1x17xf32>
    "tpu.trace_stop"() : () -> ()
    %cst_48 = arith.constant dense<0xFF800000> : vector<1xf32>
    %192 = vector.multi_reduction <maximumf>, %191, %cst_48 [1] : vector<1x17xf32> to vector<1xf32>
    %193 = vector.shape_cast %192 : vector<1xf32> to vector<1x1xf32>
    %194 = vector.broadcast %193 : vector<1x1xf32> to vector<1x17xf32>
    %195 = arith.subf %191, %194 : vector<1x17xf32>
    %196 = math.exp %195 : vector<1x17xf32>
    %cst_49 = arith.constant dense<0.000000e+00> : vector<1xf32>
    %197 = vector.multi_reduction <add>, %196, %cst_49 [1] : vector<1x17xf32> to vector<1xf32>
    %198 = vector.shape_cast %197 : vector<1xf32> to vector<1x1xf32>
    %199 = vector.broadcast %198 : vector<1x1xf32> to vector<1x17xf32>
    %200 = arith.divf %196, %199 : vector<1x17xf32>
    "tpu.trace_start"() <{level = 10 : i32, message = "qk,kd->qd"}> : () -> ()
    %cst_50 = arith.constant dense<0.000000e+00> : vector<1x8xf32>
    %201 = tpu.matmul %200, %189, %cst_50 {dimension_numbers = #tpu.dot_dimension_numbers<[1], [0], [0], [1], [0, 0, 1, 1], [], []>} : vector<1x17xf32>, vector<17x8xf32>, vector<1x8xf32> -> vector<1x8xf32>
    "tpu.trace_stop"() : () -> ()
    %202 = vector.extract_strided_slice %187 {offsets = [1, 0], sizes = [16, 8], strides = [1, 1]} : vector<17x8xf32> to vector<16x8xf32>
    %203 = vector.shape_cast %202 : vector<16x8xf32> to vector<2x8x8xf32>
    %204 = vector.extract_strided_slice %188 {offsets = [1, 0], sizes = [16, 8], strides = [1, 1]} : vector<17x8xf32> to vector<16x8xf32>
    %205 = vector.shape_cast %204 : vector<16x8xf32> to vector<2x8x8xf32>
    %206 = vector.extract_strided_slice %189 {offsets = [1, 0], sizes = [16, 8], strides = [1, 1]} : vector<17x8xf32> to vector<16x8xf32>
    %207 = vector.shape_cast %206 : vector<16x8xf32> to vector<2x8x8xf32>
    %208 = tpu.transpose %203, [1, 0, 2] : vector<2x8x8xf32> -> vector<8x2x8xf32>
    %209 = tpu.transpose %205, [1, 0, 2] : vector<2x8x8xf32> -> vector<8x2x8xf32>
    %210 = tpu.transpose %207, [1, 0, 2] : vector<2x8x8xf32> -> vector<8x2x8xf32>
    %211 = vector.extract_strided_slice %188 {offsets = [0, 0], sizes = [1, 8], strides = [1, 1]} : vector<17x8xf32> to vector<1x8xf32>
    %212 = vector.extract_strided_slice %189 {offsets = [0, 0], sizes = [1, 8], strides = [1, 1]} : vector<17x8xf32> to vector<1x8xf32>
    "tpu.trace_start"() <{level = 10 : i32, message = "rqd,rkd->rqk"}> : () -> ()
    %cst_51 = arith.constant dense<0.000000e+00> : vector<8x2x2xf32>
    %213 = tpu.matmul %208, %209, %cst_51 {dimension_numbers = #tpu.dot_dimension_numbers<[2], [2], [1], [1], [0, 0, 0, 1, 1, 1], [0], [0]>} : vector<8x2x8xf32>, vector<8x2x8xf32>, vector<8x2x2xf32> -> vector<8x2x2xf32>
    "tpu.trace_stop"() : () -> ()
    %214 = vector.shape_cast %211 : vector<1x8xf32> to vector<1x1x8xf32>
    %215 = vector.broadcast %214 : vector<1x1x8xf32> to vector<8x2x8xf32>
    %216 = arith.mulf %208, %215 : vector<8x2x8xf32>
    %cst_52 = arith.constant dense<0.000000e+00> : vector<8x2xf32>
    %217 = vector.multi_reduction <add>, %216, %cst_52 [2] : vector<8x2x8xf32> to vector<8x2xf32>
    %218 = vector.shape_cast %217 : vector<8x2xf32> to vector<8x2x1xf32>
    %cst_53 = arith.constant dense<0xFF800000> : vector<8x2xf32>
    %219 = vector.multi_reduction <maximumf>, %213, %cst_53 [2] : vector<8x2x2xf32> to vector<8x2xf32>
    %220 = vector.shape_cast %219 : vector<8x2xf32> to vector<8x2x1xf32>
    %221 = arith.maximumf %220, %218 : vector<8x2x1xf32>
    %222 = vector.broadcast %221 : vector<8x2x1xf32> to vector<8x2x2xf32>
    %223 = arith.subf %213, %222 : vector<8x2x2xf32>
    %224 = math.exp %223 : vector<8x2x2xf32>
    %225 = arith.subf %218, %221 : vector<8x2x1xf32>
    %226 = math.exp %225 : vector<8x2x1xf32>
    %cst_54 = arith.constant dense<0.000000e+00> : vector<8x2xf32>
    %227 = vector.multi_reduction <add>, %224, %cst_54 [2] : vector<8x2x2xf32> to vector<8x2xf32>
    %228 = vector.shape_cast %227 : vector<8x2xf32> to vector<8x2x1xf32>
    %229 = arith.addf %228, %226 : vector<8x2x1xf32>
    "tpu.trace_start"() <{level = 10 : i32, message = "rqk,rkd->rqd"}> : () -> ()
    %cst_55 = arith.constant dense<0.000000e+00> : vector<8x2x8xf32>
    %230 = tpu.matmul %224, %210, %cst_55 {dimension_numbers = #tpu.dot_dimension_numbers<[2], [1], [1], [2], [0, 0, 0, 1, 1, 2], [0], [0]>} : vector<8x2x2xf32>, vector<8x2x8xf32>, vector<8x2x8xf32> -> vector<8x2x8xf32>
    "tpu.trace_stop"() : () -> ()
    %231 = vector.shape_cast %212 : vector<1x8xf32> to vector<1x1x8xf32>
    %232 = vector.broadcast %226 : vector<8x2x1xf32> to vector<8x2x8xf32>
    %233 = vector.broadcast %231 : vector<1x1x8xf32> to vector<8x2x8xf32>
    %234 = arith.mulf %232, %233 : vector<8x2x8xf32>
    %235 = arith.addf %230, %234 : vector<8x2x8xf32>
    %236 = vector.broadcast %229 : vector<8x2x1xf32> to vector<8x2x8xf32>
    %237 = arith.divf %235, %236 : vector<8x2x8xf32>
    %238 = tpu.transpose %237, [1, 0, 2] : vector<8x2x8xf32> -> vector<2x8x8xf32>
    %239 = vector.shape_cast %238 : vector<2x8x8xf32> to vector<16x8xf32>
    %c0_56 = arith.constant 0 : index
    %c0_57 = arith.constant 0 : index
    %c24 = arith.constant 24 : index
    %240 = vector.load %arg2[%c0_56, %c0_57, %c24] : memref<1x17x32xf32, #tpu.memory_space<vmem>>, vector<1x1x8xf32>
    %241 = vector.shape_cast %240 : vector<1x1x8xf32> to vector<1x8xf32>
    %242 = vector.shape_cast %201 : vector<1x8xf32> to vector<1x1x8xf32>
    tpu.vector_store %arg2[%c0_56, %c0_57, %c24], %242 {strides = array<i32>} : memref<1x17x32xf32, #tpu.memory_space<vmem>>, vector<1x1x8xf32>,
    %c0_58 = arith.constant 0 : index
    %c1_59 = arith.constant 1 : index
    %c24_60 = arith.constant 24 : index
    %243 = vector.load %arg2[%c0_58, %c1_59, %c24_60] : memref<1x17x32xf32, #tpu.memory_space<vmem>>, vector<1x16x8xf32>
    %244 = vector.shape_cast %243 : vector<1x16x8xf32> to vector<16x8xf32>
    %245 = vector.shape_cast %239 : vector<16x8xf32> to vector<1x16x8xf32>
    tpu.vector_store %arg2[%c0_58, %c1_59, %c24_60], %245 {strides = array<i32>} : memref<1x17x32xf32, #tpu.memory_space<vmem>>, vector<1x16x8xf32>,
    return
  }
  func.func @transform_0(%arg0: i32) -> (i32, i32, i32) {
    %c0_i32 = arith.constant 0 : i32
    %c0_i32_0 = arith.constant 0 : i32
    %c0_i32_1 = arith.constant 0 : i32
    return %arg0, %c0_i32, %c0_i32_0 : i32, i32, i32
  }
  func.func @transform_1(%arg0: i32) -> (i32, i32, i32) {
    %c0_i32 = arith.constant 0 : i32
    %c0_i32_0 = arith.constant 0 : i32
    %c0_i32_1 = arith.constant 0 : i32
    return %arg0, %c0_i32, %c0_i32_0 : i32, i32, i32
  }
}

module attributes {stable_mosaic.version = 11 : i64} {
  func.func @_linear_kernel(%arg0: i32, %arg1: i32, %arg2: i32, %arg3: memref<34x32xf32, #tpu.memory_space<vmem>>, %arg4: memref<32x32xf32, #tpu.memory_space<vmem>>, %arg5: memref<1x32xf32, #tpu.memory_space<vmem>>, %arg6: memref<34x32xf32, #tpu.memory_space<vmem>>, %arg7: memref<34x32xf32, #tpu.memory_space<vmem>>, %arg8: memref<34x32xf32, #tpu.memory_space<vmem>>) attributes {dimension_semantics = [#tpu.dimension_semantics<parallel>, #tpu.dimension_semantics<parallel>, #tpu.dimension_semantics<arbitrary>], iteration_bounds = array<i64: 1, 1, 1>, scalar_prefetch = 0 : i64, scratch_operands = 1 : i64, tpu.core_type = #tpu.core_type<tc>, window_params = [{transform_indices = @transform_0, window_bounds = array<i64: 34, 32>}, {transform_indices = @transform_1, window_bounds = array<i64: 32, 32>}, {transform_indices = @transform_2, window_bounds = array<i64: 1, 32>}, {transform_indices = @transform_3, window_bounds = array<i64: 34, 32>}, {transform_indices = @transform_4, window_bounds = array<i64: 34, 32>}]} {
    %c0_i32 = arith.constant 0 : i32
    %0 = arith.cmpi eq, %arg2, %c0_i32 : i32
    %1 = arith.extui %0 : i1 to i32
    %c0_i32_0 = arith.constant 0 : i32
    %2 = arith.cmpi ne, %1, %c0_i32_0 : i32
    scf.if %2 {
      %cst_10 = arith.constant 0.000000e+00 : f32
      %12 = vector.broadcast %cst_10 : f32 to vector<34x32xf32>
      %c0_11 = arith.constant 0 : index
      %c0_12 = arith.constant 0 : index
      %13 = vector.load %arg8[%c0_11, %c0_12] : memref<34x32xf32, #tpu.memory_space<vmem>>, vector<34x32xf32>
      tpu.vector_store %arg8[%c0_11, %c0_12], %12 {strides = array<i32>} : memref<34x32xf32, #tpu.memory_space<vmem>>, vector<34x32xf32>,
    } else {
    }
    %c0 = arith.constant 0 : index
    %c0_1 = arith.constant 0 : index
    %3 = vector.load %arg8[%c0, %c0_1] : memref<34x32xf32, #tpu.memory_space<vmem>>, vector<34x32xf32>
    %c0_2 = arith.constant 0 : index
    %c0_3 = arith.constant 0 : index
    %4 = vector.load %arg3[%c0_2, %c0_3] : memref<34x32xf32, #tpu.memory_space<vmem>>, vector<34x32xf32>
    %c0_4 = arith.constant 0 : index
    %c0_5 = arith.constant 0 : index
    %5 = vector.load %arg4[%c0_4, %c0_5] : memref<32x32xf32, #tpu.memory_space<vmem>>, vector<32x32xf32>
    %cst = arith.constant dense<0.000000e+00> : vector<34x32xf32>
    %6 = tpu.matmul %4, %5, %cst {dimension_numbers = #tpu.dot_dimension_numbers<[1], [0], [0], [1], [0, 0, 1, 1], [], []>} : vector<34x32xf32>, vector<32x32xf32>, vector<34x32xf32> -> vector<34x32xf32>
    %7 = arith.addf %3, %6 : vector<34x32xf32>
    %c0_6 = arith.constant 0 : index
    %c0_7 = arith.constant 0 : index
    %8 = vector.load %arg8[%c0_6, %c0_7] : memref<34x32xf32, #tpu.memory_space<vmem>>, vector<34x32xf32>
    tpu.vector_store %arg8[%c0_6, %c0_7], %7 {strides = array<i32>} : memref<34x32xf32, #tpu.memory_space<vmem>>, vector<34x32xf32>,
    %c0_i32_8 = arith.constant 0 : i32
    %9 = arith.cmpi eq, %arg2, %c0_i32_8 : i32
    %10 = arith.extui %9 : i1 to i32
    %c0_i32_9 = arith.constant 0 : i32
    %11 = arith.cmpi ne, %10, %c0_i32_9 : i32
    scf.if %11 {
      %c0_10 = arith.constant 0 : index
      %c0_11 = arith.constant 0 : index
      %12 = vector.load %arg8[%c0_10, %c0_11] : memref<34x32xf32, #tpu.memory_space<vmem>>, vector<34x32xf32>
      %c0_12 = arith.constant 0 : index
      %c0_13 = arith.constant 0 : index
      %13 = vector.load %arg5[%c0_12, %c0_13] : memref<1x32xf32, #tpu.memory_space<vmem>>, vector<1x32xf32>
      %14 = vector.broadcast %13 : vector<1x32xf32> to vector<34x32xf32>
      %15 = arith.addf %12, %14 : vector<34x32xf32>
      %c0_14 = arith.constant 0 : index
      %c0_15 = arith.constant 0 : index
      %16 = vector.load %arg6[%c0_14, %c0_15] : memref<34x32xf32, #tpu.memory_space<vmem>>, vector<34x32xf32>
      %17 = arith.addf %15, %16 : vector<34x32xf32>
      %c0_16 = arith.constant 0 : index
      %c0_17 = arith.constant 0 : index
      %18 = vector.load %arg7[%c0_16, %c0_17] : memref<34x32xf32, #tpu.memory_space<vmem>>, vector<34x32xf32>
      tpu.vector_store %arg7[%c0_16, %c0_17], %17 {strides = array<i32>} : memref<34x32xf32, #tpu.memory_space<vmem>>, vector<34x32xf32>,
    } else {
    }
    return
  }
  func.func @transform_0(%arg0: i32, %arg1: i32, %arg2: i32) -> (i32, i32) {
    %c0_i32 = arith.constant 0 : i32
    return %arg0, %arg2 : i32, i32
  }
  func.func @transform_1(%arg0: i32, %arg1: i32, %arg2: i32) -> (i32, i32) {
    %c0_i32 = arith.constant 0 : i32
    return %arg2, %arg1 : i32, i32
  }
  func.func @transform_2(%arg0: i32, %arg1: i32, %arg2: i32) -> (i32, i32) {
    %c0_i32 = arith.constant 0 : i32
    %c0_i32_0 = arith.constant 0 : i32
    return %c0_i32, %arg1 : i32, i32
  }
  func.func @transform_3(%arg0: i32, %arg1: i32, %arg2: i32) -> (i32, i32) {
    %c0_i32 = arith.constant 0 : i32
    return %arg0, %arg1 : i32, i32
  }
  func.func @transform_4(%arg0: i32, %arg1: i32, %arg2: i32) -> (i32, i32) {
    %c0_i32 = arith.constant 0 : i32
    return %arg0, %arg1 : i32, i32
  }
}

module attributes {stable_mosaic.version = 11 : i64} {
  func.func @_ln_linear_kernel(%arg0: i32, %arg1: i32, %arg2: memref<34x32xf32, #tpu.memory_space<vmem>>, %arg3: memref<1x32xf32, #tpu.memory_space<vmem>>, %arg4: memref<1x32xf32, #tpu.memory_space<vmem>>, %arg5: memref<32x128xf32, #tpu.memory_space<vmem>>, %arg6: memref<1x128xf32, #tpu.memory_space<vmem>>, %arg7: memref<34x128xf32, #tpu.memory_space<vmem>>) attributes {dimension_semantics = [#tpu.dimension_semantics<parallel>, #tpu.dimension_semantics<parallel>], iteration_bounds = array<i64: 1, 1>, scalar_prefetch = 0 : i64, scratch_operands = 0 : i64, tpu.core_type = #tpu.core_type<tc>, window_params = [{transform_indices = @transform_0, window_bounds = array<i64: 34, 32>}, {pipeline_mode = #tpu.pipeline_mode<synchronous>, transform_indices = @transform_1, window_bounds = array<i64: 1, 32>}, {pipeline_mode = #tpu.pipeline_mode<synchronous>, transform_indices = @transform_2, window_bounds = array<i64: 1, 32>}, {transform_indices = @transform_3, window_bounds = array<i64: 32, 128>}, {transform_indices = @transform_4, window_bounds = array<i64: 1, 128>}, {transform_indices = @transform_5, window_bounds = array<i64: 34, 128>}]} {
    %c0 = arith.constant 0 : index
    %c0_0 = arith.constant 0 : index
    %0 = vector.load %arg2[%c0, %c0_0] : memref<34x32xf32, #tpu.memory_space<vmem>>, vector<34x32xf32>
    %cst = arith.constant dense<0.000000e+00> : vector<34xf32>
    %1 = vector.multi_reduction <add>, %0, %cst [1] : vector<34x32xf32> to vector<34xf32>
    %2 = vector.shape_cast %1 : vector<34xf32> to vector<34x1xf32>
    %cst_1 = arith.constant 3.200000e+01 : f32
    %3 = vector.broadcast %cst_1 : f32 to vector<34x1xf32>
    %4 = arith.divf %2, %3 : vector<34x1xf32>
    %5 = vector.broadcast %4 : vector<34x1xf32> to vector<34x32xf32>
    %6 = arith.subf %0, %5 : vector<34x32xf32>
    %7 = arith.mulf %6, %6 : vector<34x32xf32>
    %cst_2 = arith.constant dense<0.000000e+00> : vector<34xf32>
    %8 = vector.multi_reduction <add>, %7, %cst_2 [1] : vector<34x32xf32> to vector<34xf32>
    %9 = vector.shape_cast %8 : vector<34xf32> to vector<34x1xf32>
    %cst_3 = arith.constant 3.200000e+01 : f32
    %10 = vector.broadcast %cst_3 : f32 to vector<34x1xf32>
    %11 = arith.divf %9, %10 : vector<34x1xf32>
    %12 = vector.broadcast %4 : vector<34x1xf32> to vector<34x32xf32>
    %13 = arith.subf %0, %12 : vector<34x32xf32>
    %cst_4 = arith.constant 9.99999974E-6 : f32
    %14 = vector.broadcast %cst_4 : f32 to vector<34x1xf32>
    %15 = arith.addf %11, %14 : vector<34x1xf32>
    %16 = math.rsqrt %15 : vector<34x1xf32>
    %17 = vector.broadcast %16 : vector<34x1xf32> to vector<34x32xf32>
    %18 = arith.mulf %13, %17 : vector<34x32xf32>
    %c0_5 = arith.constant 0 : index
    %c0_6 = arith.constant 0 : index
    %19 = vector.load %arg3[%c0_5, %c0_6] : memref<1x32xf32, #tpu.memory_space<vmem>>, vector<1x32xf32>
    %20 = vector.broadcast %19 : vector<1x32xf32> to vector<34x32xf32>
    %21 = arith.mulf %18, %20 : vector<34x32xf32>
    %c0_7 = arith.constant 0 : index
    %c0_8 = arith.constant 0 : index
    %22 = vector.load %arg4[%c0_7, %c0_8] : memref<1x32xf32, #tpu.memory_space<vmem>>, vector<1x32xf32>
    %23 = vector.broadcast %22 : vector<1x32xf32> to vector<34x32xf32>
    %24 = arith.addf %21, %23 : vector<34x32xf32>
    %c0_9 = arith.constant 0 : index
    %c0_10 = arith.constant 0 : index
    %25 = vector.load %arg5[%c0_9, %c0_10] : memref<32x128xf32, #tpu.memory_space<vmem>>, vector<32x128xf32>
    %cst_11 = arith.constant dense<0.000000e+00> : vector<34x128xf32>
    %26 = tpu.matmul %24, %25, %cst_11 {dimension_numbers = #tpu.dot_dimension_numbers<[1], [0], [0], [1], [0, 0, 1, 1], [], []>} : vector<34x32xf32>, vector<32x128xf32>, vector<34x128xf32> -> vector<34x128xf32>
    %c0_12 = arith.constant 0 : index
    %c0_13 = arith.constant 0 : index
    %27 = vector.load %arg6[%c0_12, %c0_13] : memref<1x128xf32, #tpu.memory_space<vmem>>, vector<1x128xf32>
    %28 = vector.broadcast %27 : vector<1x128xf32> to vector<34x128xf32>
    %29 = arith.addf %26, %28 : vector<34x128xf32>
    %cst_14 = arith.constant 5.000000e-01 : f32
    %30 = vector.broadcast %cst_14 : f32 to vector<34x128xf32>
    %31 = arith.mulf %30, %29 : vector<34x128xf32>
    %cst_15 = arith.constant 0.707106769 : f32
    %32 = vector.broadcast %cst_15 : f32 to vector<34x128xf32>
    %33 = arith.mulf %29, %32 : vector<34x128xf32>
    %34 = math.erf %33 : vector<34x128xf32>
    %cst_16 = arith.constant 1.000000e+00 : f32
    %35 = vector.broadcast %cst_16 : f32 to vector<34x128xf32>
    %36 = arith.addf %35, %34 : vector<34x128xf32>
    %37 = arith.mulf %31, %36 : vector<34x128xf32>
    %c0_17 = arith.constant 0 : index
    %c0_18 = arith.constant 0 : index
    %38 = vector.load %arg7[%c0_17, %c0_18] : memref<34x128xf32, #tpu.memory_space<vmem>>, vector<34x128xf32>
    tpu.vector_store %arg7[%c0_17, %c0_18], %37 {strides = array<i32>} : memref<34x128xf32, #tpu.memory_space<vmem>>, vector<34x128xf32>,
    return
  }
  func.func @transform_0(%arg0: i32, %arg1: i32) -> (i32, i32) {
    %c0_i32 = arith.constant 0 : i32
    %c0_i32_0 = arith.constant 0 : i32
    return %arg0, %c0_i32 : i32, i32
  }
  func.func @transform_1(%arg0: i32, %arg1: i32) -> (i32, i32) {
    %c0_i32 = arith.constant 0 : i32
    %c0_i32_0 = arith.constant 0 : i32
    %c0_i32_1 = arith.constant 0 : i32
    return %c0_i32, %c0_i32_0 : i32, i32
  }
  func.func @transform_2(%arg0: i32, %arg1: i32) -> (i32, i32) {
    %c0_i32 = arith.constant 0 : i32
    %c0_i32_0 = arith.constant 0 : i32
    %c0_i32_1 = arith.constant 0 : i32
    return %c0_i32, %c0_i32_0 : i32, i32
  }
  func.func @transform_3(%arg0: i32, %arg1: i32) -> (i32, i32) {
    %c0_i32 = arith.constant 0 : i32
    %c0_i32_0 = arith.constant 0 : i32
    return %c0_i32, %arg1 : i32, i32
  }
  func.func @transform_4(%arg0: i32, %arg1: i32) -> (i32, i32) {
    %c0_i32 = arith.constant 0 : i32
    %c0_i32_0 = arith.constant 0 : i32
    return %c0_i32, %arg1 : i32, i32
  }
  func.func @transform_5(%arg0: i32, %arg1: i32) -> (i32, i32) {
    %c0_i32 = arith.constant 0 : i32
    return %arg0, %arg1 : i32, i32
  }
}

module attributes {stable_mosaic.version = 11 : i64} {
  func.func @_linear_kernel(%arg0: i32, %arg1: i32, %arg2: i32, %arg3: memref<34x128xf32, #tpu.memory_space<vmem>>, %arg4: memref<128x32xf32, #tpu.memory_space<vmem>>, %arg5: memref<1x32xf32, #tpu.memory_space<vmem>>, %arg6: memref<34x32xf32, #tpu.memory_space<vmem>>, %arg7: memref<34x32xf32, #tpu.memory_space<vmem>>, %arg8: memref<34x32xf32, #tpu.memory_space<vmem>>) attributes {dimension_semantics = [#tpu.dimension_semantics<parallel>, #tpu.dimension_semantics<parallel>, #tpu.dimension_semantics<arbitrary>], iteration_bounds = array<i64: 1, 1, 1>, scalar_prefetch = 0 : i64, scratch_operands = 1 : i64, tpu.core_type = #tpu.core_type<tc>, window_params = [{transform_indices = @transform_0, window_bounds = array<i64: 34, 128>}, {transform_indices = @transform_1, window_bounds = array<i64: 128, 32>}, {transform_indices = @transform_2, window_bounds = array<i64: 1, 32>}, {transform_indices = @transform_3, window_bounds = array<i64: 34, 32>}, {transform_indices = @transform_4, window_bounds = array<i64: 34, 32>}]} {
    %c0_i32 = arith.constant 0 : i32
    %0 = arith.cmpi eq, %arg2, %c0_i32 : i32
    %1 = arith.extui %0 : i1 to i32
    %c0_i32_0 = arith.constant 0 : i32
    %2 = arith.cmpi ne, %1, %c0_i32_0 : i32
    scf.if %2 {
      %cst_10 = arith.constant 0.000000e+00 : f32
      %12 = vector.broadcast %cst_10 : f32 to vector<34x32xf32>
      %c0_11 = arith.constant 0 : index
      %c0_12 = arith.constant 0 : index
      %13 = vector.load %arg8[%c0_11, %c0_12] : memref<34x32xf32, #tpu.memory_space<vmem>>, vector<34x32xf32>
      tpu.vector_store %arg8[%c0_11, %c0_12], %12 {strides = array<i32>} : memref<34x32xf32, #tpu.memory_space<vmem>>, vector<34x32xf32>,
    } else {
    }
    %c0 = arith.constant 0 : index
    %c0_1 = arith.constant 0 : index
    %3 = vector.load %arg8[%c0, %c0_1] : memref<34x32xf32, #tpu.memory_space<vmem>>, vector<34x32xf32>
    %c0_2 = arith.constant 0 : index
    %c0_3 = arith.constant 0 : index
    %4 = vector.load %arg3[%c0_2, %c0_3] : memref<34x128xf32, #tpu.memory_space<vmem>>, vector<34x128xf32>
    %c0_4 = arith.constant 0 : index
    %c0_5 = arith.constant 0 : index
    %5 = vector.load %arg4[%c0_4, %c0_5] : memref<128x32xf32, #tpu.memory_space<vmem>>, vector<128x32xf32>
    %cst = arith.constant dense<0.000000e+00> : vector<34x32xf32>
    %6 = tpu.matmul %4, %5, %cst {dimension_numbers = #tpu.dot_dimension_numbers<[1], [0], [0], [1], [0, 0, 1, 1], [], []>} : vector<34x128xf32>, vector<128x32xf32>, vector<34x32xf32> -> vector<34x32xf32>
    %7 = arith.addf %3, %6 : vector<34x32xf32>
    %c0_6 = arith.constant 0 : index
    %c0_7 = arith.constant 0 : index
    %8 = vector.load %arg8[%c0_6, %c0_7] : memref<34x32xf32, #tpu.memory_space<vmem>>, vector<34x32xf32>
    tpu.vector_store %arg8[%c0_6, %c0_7], %7 {strides = array<i32>} : memref<34x32xf32, #tpu.memory_space<vmem>>, vector<34x32xf32>,
    %c0_i32_8 = arith.constant 0 : i32
    %9 = arith.cmpi eq, %arg2, %c0_i32_8 : i32
    %10 = arith.extui %9 : i1 to i32
    %c0_i32_9 = arith.constant 0 : i32
    %11 = arith.cmpi ne, %10, %c0_i32_9 : i32
    scf.if %11 {
      %c0_10 = arith.constant 0 : index
      %c0_11 = arith.constant 0 : index
      %12 = vector.load %arg8[%c0_10, %c0_11] : memref<34x32xf32, #tpu.memory_space<vmem>>, vector<34x32xf32>
      %c0_12 = arith.constant 0 : index
      %c0_13 = arith.constant 0 : index
      %13 = vector.load %arg5[%c0_12, %c0_13] : memref<1x32xf32, #tpu.memory_space<vmem>>, vector<1x32xf32>
      %14 = vector.broadcast %13 : vector<1x32xf32> to vector<34x32xf32>
      %15 = arith.addf %12, %14 : vector<34x32xf32>
      %c0_14 = arith.constant 0 : index
      %c0_15 = arith.constant 0 : index
      %16 = vector.load %arg6[%c0_14, %c0_15] : memref<34x32xf32, #tpu.memory_space<vmem>>, vector<34x32xf32>
      %17 = arith.addf %15, %16 : vector<34x32xf32>
      %c0_16 = arith.constant 0 : index
      %c0_17 = arith.constant 0 : index
      %18 = vector.load %arg7[%c0_16, %c0_17] : memref<34x32xf32, #tpu.memory_space<vmem>>, vector<34x32xf32>
      tpu.vector_store %arg7[%c0_16, %c0_17], %17 {strides = array<i32>} : memref<34x32xf32, #tpu.memory_space<vmem>>, vector<34x32xf32>,
    } else {
    }
    return
  }
  func.func @transform_0(%arg0: i32, %arg1: i32, %arg2: i32) -> (i32, i32) {
    %c0_i32 = arith.constant 0 : i32
    return %arg0, %arg2 : i32, i32
  }
  func.func @transform_1(%arg0: i32, %arg1: i32, %arg2: i32) -> (i32, i32) {
    %c0_i32 = arith.constant 0 : i32
    return %arg2, %arg1 : i32, i32
  }
  func.func @transform_2(%arg0: i32, %arg1: i32, %arg2: i32) -> (i32, i32) {
    %c0_i32 = arith.constant 0 : i32
    %c0_i32_0 = arith.constant 0 : i32
    return %c0_i32, %arg1 : i32, i32
  }
  func.func @transform_3(%arg0: i32, %arg1: i32, %arg2: i32) -> (i32, i32) {
    %c0_i32 = arith.constant 0 : i32
    return %arg0, %arg1 : i32, i32
  }
  func.func @transform_4(%arg0: i32, %arg1: i32, %arg2: i32) -> (i32, i32) {
    %c0_i32 = arith.constant 0 : i32
    return %arg0, %arg1 : i32, i32
  }
}

</mosaic_0001>

<bundles_post_ra>
// kernel: _lambda_.8
= control target key start
LH: loop header
LB: loop body
LE: loop exit
PB: predicated region body
PF: predicated region fallthrough
CT: control target
= control target key end

     0   :  { %vm25_vm0 = vcmask 261120   ;;  %vm38_vm1 = vcmask 254976   ;;  %v307_v40 = vmov 0.0|0.0   ;;  %vm308_vm2 = vmmov 0   ;;  %s440_s0 = inlined_call_operand.vmem [shape: f32[34,32], index: 0, kind: input, shape index: {}]   ;;  %s441_s3 = inlined_call_operand.vmem [shape: f32[32,96], index: 3, kind: input, shape index: {}]   ;;  %s442_s1 = inlined_call_operand.vmem [shape: f32[1,32], index: 1, kind: input, shape index: {}]   ;;  %s443_s2 = inlined_call_operand.vmem [shape: f32[1,32], index: 2, kind: input, shape index: {}]   ;;  %s444_s4 = inlined_call_operand.vmem [shape: f32[1,96], index: 4, kind: input, shape index: {}]   ;;  %s445_s5 = inlined_call_operand.vmem [shape: f32[34,96], index: 5, kind: output, shape index: {}]  }
   0x1   :  { %v20_v0 = vld [vmem:[%s440_s0] sm:$0xff]  ;;  %v23_v1 = vld [vmem:[%s440_s0 + $0x18] sm:$0xff]  ;;  %v21_v2 = vld [vmem:[%s440_s0 + $0x8] sm:$0xff]  ;;  %284 = vmatprep.subr.bf16.mxu0 %v307_v40  ;;  %290 = vmatprep.subr.bf16.mxu1 %v307_v40  ;;  %v309_v42 = vmov 0.0   ;;  %vm233_vm3 = vcmask 785408   ;;  %vm238_vm4 = vcmask 779264  }
   0x2   :  { %v26_v3 = vsel %vm25_vm0, %v20_v0, 0.0  ;;  %v35_v4 = vsel %vm25_vm0, %v23_v1, 0.0  ;;  %v22_v5 = vld [vmem:[%s440_s0 + $0x10] sm:$0xff]  ;;  %v29_v6 = vsel %vm25_vm0, %v21_v2, 0.0  ;;  %v24_v8 = vld [vmem:[%s440_s0 + $0x20] sm:$0x3]  ;;  %269 = vmatprep.mubr.msk.f32.mxu0 %vm308_vm2, %v309_v42  ;;  %278 = vmatprep.mubr.msk.f32.mxu1 %vm308_vm2, %v309_v42 }
   0x3   :  { %27 = vadd.xlane.f32.xlu0 %v26_v3  ;;  %36 = vadd.xlane.f32.xlu1 %v35_v4  ;;  %v32_v7 = vsel %vm25_vm0, %v22_v5, 0.0  ;;  %v39_v9 = vsel %vm38_vm1, %v24_v8, 0.0  ;;  %v117_v35 = vld [vmem:[%s441_s3] sm:$0xff]  ;;  %v118_v36 = vld [vmem:[%s441_s3 + $0x8] sm:$0xff]  ;;  %v119_v38 = vld [vmem:[%s441_s3 + $0x10] sm:$0xff] }
   0x4   :  { %v285_v37 = vpack.c.bf16 %v118_v36, %v117_v35  ;;  %v120_v39 = vld [vmem:[%s441_s3 + $0x18] sm:$0xff]  ;;  %v244_v59 = vld [vmem:[%s442_s1] ss:$0 sm:$0xff] }
   0x5   :  { %v288_v41 = vpack.c.bf16 %v120_v39, %v119_v38  ;;  %v245_v61 = vld [vmem:[%s443_s2] ss:$0 sm:$0xff] }
   0x6   :  { %286 = vmatpush3.bf16.msra.mxu0 %v285_v37  ;;  %292 = vmatpush3.bf16.msra.mxu1 %v285_v37 }
   0x7   :  { %30 = vadd.xlane.f32.xlu0 %v29_v6  ;;  %33 = vadd.xlane.f32.xlu1 %v32_v7 }
   0x8   :  { %287 = vmatprep.subr.bf16.mxu0 %v307_v40  ;;  %291 = vmatprep.subr.bf16.mxu1 %v307_v40 }
   0xa   :  { %289 = vmatpush3.bf16.msra.mxu0 %v288_v41  ;;  %293 = vmatpush3.bf16.msra.mxu1 %v288_v41 }
   0xb   :  { %40 = vadd.xlane.f32.xlu0 %v39_v9 }
  0x90   :  { %v28_v10 = vpop.xlane.xlu0 %27  ;;  %v37_v11 = vpop.xlane.xlu1 %36 }
  0x91   :  { %v43_v12 = vmul.f32 0.03125, %v28_v10  ;;  %v46_v13 = vmul.f32 0.03125, %v37_v11 }
  0x93   :  { %v360_v14 = vsub.f32 %v20_v0, %v43_v12  ;;  %v362_v15 = vsub.f32 %v23_v1, %v46_v13 }
  0x94   :  { %v31_v16 = vpop.xlane.xlu0 %30  ;;  %v34_v17 = vpop.xlane.xlu1 %33 }
  0x95   :  { %v44_v18 = vmul.f32 0.03125, %v31_v16  ;;  %v45_v19 = vmul.f32 0.03125, %v34_v17  ;;  %v53_v20 = vmul.f32 %v360_v14, %v360_v14  ;;  %v56_v21 = vmul.f32 %v362_v15, %v362_v15  ;;  %v246_v16 = vld [vmem:[%s444_s4] ss:$0 sm:$0xff] }
  0x97   :  { %v368_v22 = vsub.f32 %v21_v2, %v44_v18  ;;  %v370_v23 = vsub.f32 %v22_v5, %v45_v19  ;;  %v58_v24 = vsel %vm25_vm0, %v53_v20, 0.0  ;;  %v67_v27 = vsel %vm25_vm0, %v56_v21, 0.0 }
  0x98   :  { %59 = vadd.xlane.f32.xlu1 %v58_v24  ;;  %v41_v25 = vpop.xlane.xlu0 %40 }
  0x99   :  { %v47_v26 = vmul.f32 0.03125, %v41_v25  ;;  %v54_v28 = vmul.f32 %v368_v22, %v368_v22  ;;  %v55_v29 = vmul.f32 %v370_v23, %v370_v23 }
  0x9b   :  { %v378_v30 = vsub.f32 %v24_v8, %v47_v26  ;;  %v61_v31 = vsel %vm25_vm0, %v54_v28, 0.0  ;;  %v64_v32 = vsel %vm25_vm0, %v55_v29, 0.0 }
  0x9c   :  { %68 = vadd.xlane.f32.xlu1 %v67_v27  ;;  %62 = vadd.xlane.f32.xlu0 %v61_v31 }
  0x9d   :  { %v57_v33 = vmul.f32 %v378_v30, %v378_v30 }
  0x9f   :  { %v70_v34 = vsel %vm38_vm1, %v57_v33, 0.0 }
  0xa0   :  { %65 = vadd.xlane.f32.xlu0 %v64_v32  ;;  %71 = vadd.xlane.f32.xlu1 %v70_v34 }
 0x125   :  { %v60_v43 = vpop.xlane.xlu1 %59 }
 0x126   :  { %v73_v44 = vmul.f32 0.03125, %v60_v43 }
 0x128   :  { %v78_v45 = vadd.f32 1e-05, %v73_v44 }
 0x129   :  { %v69_v46 = vpop.xlane.xlu1 %68  ;;  %v63_v47 = vpop.xlane.xlu0 %62 }
 0x12a   :  { %297 = vrsqrt.f32 %v78_v45  ;;  %v76_v48 = vmul.f32 0.03125, %v69_v46  ;;  %v74_v49 = vmul.f32 0.03125, %v63_v47 }
 0x12c   :  { %v81_v50 = vadd.f32 1e-05, %v76_v48  ;;  %v79_v51 = vadd.f32 1e-05, %v74_v49 }
 0x12d   :  { %v72_v52 = vpop.xlane.xlu1 %71  ;;  %v66_v53 = vpop.xlane.xlu0 %65 }
 0x12e   :  { %299 = vrsqrt.f32 %v81_v50  ;;  %v77_v54 = vmul.f32 0.03125, %v72_v52  ;;  %v75_v55 = vmul.f32 0.03125, %v66_v53 }
 0x12f   :  { %301 = vrsqrt.f32 %v79_v51 }
 0x130   :  { %v82_v56 = vadd.f32 1e-05, %v77_v54  ;;  %v80_v57 = vadd.f32 1e-05, %v75_v55 }
 0x132   :  { %303 = vrsqrt.f32 %v82_v56 }
 0x133   :  { %305 = vrsqrt.f32 %v80_v57 }
 0x134   :  { %v298_v58 = vpop.eup %297 }
 0x135   :  { %v88_v60 = vmul.f32 %v298_v58, %v360_v14 }
 0x137   :  { %v100_v62 = vmul.f32 %v244_v59, %v88_v60 }
 0x138   :  { %v300_v63 = vpop.eup %299 }
 0x139   :  { %v302_v0 = vpop.eup %301  ;;  %v112_v1 = vadd.f32 %v245_v61, %v100_v62  ;;  %v91_v2 = vmul.f32 %v300_v63, %v362_v15 }
 0x13a   :  { %v89_v3 = vmul.f32 %v302_v0, %v368_v22 }
 0x13b   :  { %270 = vmatmul.mubr.msk.f32.vlgmr.msra.gmra.mrb[0].mxu0 %vm25_vm0, %v112_v1  ;;  %v103_v4 = vmul.f32 %v244_v59, %v91_v2 }
 0x13c   :  { %v304_v5 = vpop.eup %303  ;;  %272 = vmatprep.mubr.msk.f32.mxu0 %vm308_vm2, %v309_v42  ;;  %v101_v6 = vmul.f32 %v244_v59, %v89_v3 }
 0x13d   :  { %v306_v7 = vpop.eup %305  ;;  %v115_v8 = vadd.f32 %v245_v61, %v103_v4  ;;  %v92_v9 = vmul.f32 %v304_v5, %v378_v30 }
 0x13e   :  { %v113_v10 = vadd.f32 %v245_v61, %v101_v6  ;;  %v90_v11 = vmul.f32 %v306_v7, %v370_v23 }
 0x13f   :  { %279 = vmatmul.mubr.msk.f32.vlgmr.msra.gmra.mrb[0].mxu1 %vm25_vm0, %v115_v8  ;;  %v104_v12 = vmul.f32 %v244_v59, %v92_v9 }
 0x140   :  { %273 = vmatmul.mubr.msk.f32.gmra.mrb[2].mxu0 %vm25_vm0, %v113_v10  ;;  %281 = vmatprep.mubr.msk.f32.mxu1 %vm308_vm2, %v309_v42  ;;  %v102_v13 = vmul.f32 %v244_v59, %v90_v11 }
 0x141   :  { %275 = vmatprep.mubr.msk.f32.mxu0 %vm308_vm2, %v309_v42  ;;  %v116_v14 = vadd.f32 %v245_v61, %v104_v12 }
 0x142   :  { %v114_v15 = vadd.f32 %v245_v61, %v102_v13 }
 0x143   :  { %282 = vmatmul.mubr.msk.f32.gmra.mrb[2].mxu1 %vm25_vm0, %v116_v14 }
 0x144   :  { %276 = vmatmul.mubr.msk.f32.gmra.mrb[4].mxu0 %vm25_vm0, %v114_v15 }
 0x20e   :  { %v209_v17 = vpop.f32.mrb[0].mxu0 }
 0x20f   :  { %v210_v18 = vadd.f32 %v246_v16, %v209_v17  ;;  %v271_v19 = vpop.f32.mrb[1].mxu0 }
 0x211   :  { %234 = vst.msk [vmem:[%s445_s5] sm:$0xff] %vm233_vm3, %v210_v18 }
 0x212   :  { %v224_v20 = vpop.f32.mrb[0].mxu1 }
 0x213   :  { %v214_v21 = vpop.f32.mrb[2].mxu0  ;;  %v225_v22 = vadd.f32 %v246_v16, %v224_v20  ;;  %v280_v23 = vpop.f32.mrb[1].mxu1 }
 0x214   :  { %v215_v24 = vadd.f32 %v246_v16, %v214_v21  ;;  %v274_v25 = vpop.f32.mrb[3].mxu0 }
 0x215   :  { %237 = vst.msk [vmem:[%s445_s5 + $0x18] sm:$0xff] %vm233_vm3, %v225_v22 }
 0x216   :  { %235 = vst.msk [vmem:[%s445_s5 + $0x8] sm:$0xff] %vm233_vm3, %v215_v24  ;;  %v229_v26 = vpop.f32.mrb[2].mxu1 }
 0x217   :  { %v219_v27 = vpop.f32.mrb[4].mxu0  ;;  %v230_v28 = vadd.f32 %v246_v16, %v229_v26  ;;  %v283_v29 = vpop.f32.mrb[3].mxu1 }
 0x218   :  { %v220_v30 = vadd.f32 %v246_v16, %v219_v27  ;;  %v277_v31 = vpop.f32.mrb[5].mxu0 }
 0x219   :  { %239 = vst.msk [vmem:[%s445_s5 + $0x20] sm:$0x3] %vm238_vm4, %v230_v28 }
 0x21a   :  { %236 = vst.msk [vmem:[%s445_s5 + $0x10] sm:$0xff] %vm233_vm3, %v220_v30 }

// kernel: _lambda_.10
= control target key start
LH: loop header
LB: loop body
LE: loop exit
PB: predicated region body
PF: predicated region fallthrough
CT: control target
= control target key end

     0   :  { %vm21_vm0 = vcmask 261120   ;;  %v249_v0 = vmov 0.0|0.0   ;;  %v250_v4 = vmov 0.0   ;;  %vm251_vm1 = vmmov 0   ;;  %s362_s1 = inlined_call_operand.vmem [shape: f32[32,32], index: 1, kind: input, shape index: {}]   ;;  %s363_s0 = inlined_call_operand.vmem [shape: f32[34,32], index: 0, kind: input, shape index: {}]   ;;  %s364_s2 = inlined_call_operand.vmem [shape: f32[1,32], index: 2, kind: input, shape index: {}]   ;;  %s365_s3 = inlined_call_operand.vmem [shape: f32[34,32], index: 3, kind: input, shape index: {}]   ;;  %s366_s4 = inlined_call_operand.vmem [shape: f32[34,32], index: 4, kind: output, shape index: {}]  }
   0x1   :  { %236 = vmatprep.subr.bf16.mxu0 %v249_v0  ;;  %v38_v1 = vld [vmem:[%s362_s1] sm:$0xff]  ;;  %v39_v2 = vld [vmem:[%s362_s1 + $0x8] sm:$0xff]  ;;  %242 = vmatprep.subr.bf16.mxu1 %v249_v0  ;;  %v40_v3 = vld [vmem:[%s362_s1 + $0x10] sm:$0xff]  ;;  %22 = vst.msk [vmem:[#allocation2] sm:$0xff] %vm21_vm0, %v250_v4  ;;  %vm26_vm2 = vcmask 254976  }
   0x2   :  { %23 = vst.msk [vmem:[#allocation2 + $0x8] sm:$0xff] %vm21_vm0, %v250_v4  ;;  %24 = vst.msk [vmem:[#allocation2 + $0x10] sm:$0xff] %vm21_vm0, %v250_v4  ;;  %v237_v5 = vpack.c.bf16 %v39_v2, %v38_v1  ;;  %v41_v6 = vld [vmem:[%s362_s1 + $0x18] sm:$0xff]  ;;  %221 = vmatprep.mubr.msk.f32.mxu0 %vm251_vm1, %v250_v4  ;;  %230 = vmatprep.mubr.msk.f32.mxu1 %vm251_vm1, %v250_v4  ;;  %v33_v8 = vld [vmem:[%s363_s0] sm:$0xff] }
   0x3   :  { %25 = vst.msk [vmem:[#allocation2 + $0x18] sm:$0xff] %vm21_vm0, %v250_v4  ;;  %v240_v7 = vpack.c.bf16 %v41_v6, %v40_v3  ;;  %v36_v9 = vld [vmem:[%s363_s0 + $0x18] sm:$0xff]  ;;  %v34_v10 = vld [vmem:[%s363_s0 + $0x8] sm:$0xff]  ;;  %v37_v11 = vld [vmem:[%s363_s0 + $0x20] sm:$0x3] }
   0x4   :  { %238 = vmatpush3.bf16.msra.mxu0 %v237_v5  ;;  %244 = vmatpush3.bf16.msra.mxu1 %v237_v5  ;;  %v35_v12 = vld [vmem:[%s363_s0 + $0x10] sm:$0xff]  ;;  %27 = vst.msk [vmem:[#allocation2 + $0x20] sm:$0x3] %vm26_vm2, %v250_v4  ;;  %v203_v30 = vld [vmem:[%s364_s2] ss:$0 sm:$0xff]  ;;  %v182_v37 = vld [vmem:[%s365_s3 + $0x18] sm:$0xff] }
   0x5   :  { %239 = vmatprep.subr.bf16.mxu0 %v249_v0  ;;  %243 = vmatprep.subr.bf16.mxu1 %v249_v0  ;;  %v179_v32 = vld [vmem:[%s365_s3] sm:$0xff]  ;;  %v180_v40 = vld [vmem:[%s365_s3 + $0x8] sm:$0xff]  ;;  %v181_v50 = vld [vmem:[%s365_s3 + $0x10] sm:$0xff] }
   0x6   :  { %v183_v45 = vld [vmem:[%s365_s3 + $0x20] sm:$0x3] }
   0x8   :  { %241 = vmatpush3.bf16.msra.mxu0 %v240_v7  ;;  %245 = vmatpush3.bf16.msra.mxu1 %v240_v7  ;;  %v28_v13 = vld [vmem:[#allocation2] sm:$0xff] }
   0x9   :  { %v29_v21 = vld [vmem:[#allocation2 + $0x8] sm:$0xff]  ;;  %v30_v29 = vld [vmem:[#allocation2 + $0x10] sm:$0xff] }
   0xa   :  { %v31_v14 = vld [vmem:[#allocation2 + $0x18] sm:$0xff] }
   0xb   :  { %222 = vmatmul.mubr.msk.f32.vlgmr.msra.gmra.mrb[0].mxu0 %vm21_vm0, %v33_v8  ;;  %231 = vmatmul.mubr.msk.f32.vlgmr.msra.gmra.mrb[0].mxu1 %vm21_vm0, %v36_v9  ;;  %v32_v22 = vld [vmem:[#allocation2 + $0x20] sm:$0x3] }
   0xc   :  { %224 = vmatprep.mubr.msk.f32.mxu0 %vm251_vm1, %v250_v4  ;;  %233 = vmatprep.mubr.msk.f32.mxu1 %vm251_vm1, %v250_v4 }
   0xf   :  { %225 = vmatmul.mubr.msk.f32.gmra.mrb[2].mxu0 %vm21_vm0, %v34_v10  ;;  %234 = vmatmul.mubr.msk.f32.gmra.mrb[2].mxu1 %vm21_vm0, %v37_v11 }
  0x10   :  { %227 = vmatprep.mubr.msk.f32.mxu0 %vm251_vm1, %v250_v4 }
  0x13   :  { %228 = vmatmul.mubr.msk.f32.gmra.mrb[4].mxu0 %vm21_vm0, %v35_v12 }
  0xde   :  { %v124_v15 = vpop.f32.mrb[0].mxu0  ;;  %v139_v16 = vpop.f32.mrb[0].mxu1 }
  0xdf   :  { %v148_v17 = vadd.f32 %v124_v15, %v28_v13  ;;  %v223_v18 = vpop.f32.mrb[1].mxu0  ;;  %v151_v19 = vadd.f32 %v139_v16, %v31_v14  ;;  %v232_v20 = vpop.f32.mrb[1].mxu1 }
  0xe1   :  { %153 = vst.msk [vmem:[#allocation2] sm:$0xff] %vm21_vm0, %v148_v17  ;;  %156 = vst.msk [vmem:[#allocation2 + $0x18] sm:$0xff] %vm21_vm0, %v151_v19 }
  0xe2   :  { %v129_v23 = vpop.f32.mrb[2].mxu0  ;;  %v144_v24 = vpop.f32.mrb[2].mxu1 }
  0xe3   :  { %v149_v25 = vadd.f32 %v129_v23, %v29_v21  ;;  %v226_v26 = vpop.f32.mrb[3].mxu0  ;;  %v152_v27 = vadd.f32 %v144_v24, %v32_v22  ;;  %v235_v28 = vpop.f32.mrb[3].mxu1 }
  0xe5   :  { %154 = vst.msk [vmem:[#allocation2 + $0x8] sm:$0xff] %vm21_vm0, %v149_v25 }
  0xe6   :  { %158 = vst.msk [vmem:[#allocation2 + $0x20] sm:$0x3] %vm26_vm2, %v152_v27  ;;  %v134_v31 = vpop.f32.mrb[4].mxu0 }
  0xe7   :  { %v150_v33 = vadd.f32 %v134_v31, %v30_v29  ;;  %v229_v34 = vpop.f32.mrb[5].mxu0 }
  0xe8   :  { %v162_v35 = vld [vmem:[#allocation2] sm:$0xff]  ;;  %v165_v36 = vld [vmem:[#allocation2 + $0x18] sm:$0xff] }
  0xe9   :  { %v174_v38 = vadd.f32 %v203_v30, %v162_v35  ;;  %v177_v39 = vadd.f32 %v203_v30, %v165_v36  ;;  %155 = vst.msk [vmem:[#allocation2 + $0x10] sm:$0xff] %vm21_vm0, %v150_v33 }
  0xeb   :  { %v184_v41 = vadd.f32 %v179_v32, %v174_v38  ;;  %v187_v42 = vadd.f32 %v182_v37, %v177_v39 }
  0xec   :  { %v163_v43 = vld [vmem:[#allocation2 + $0x8] sm:$0xff] }
  0xed   :  { %v166_v44 = vld [vmem:[#allocation2 + $0x20] sm:$0x3]  ;;  %v175_v46 = vadd.f32 %v203_v30, %v163_v43  ;;  %189 = vst.msk [vmem:[%s366_s4] sm:$0xff] %vm21_vm0, %v184_v41  ;;  %192 = vst.msk [vmem:[%s366_s4 + $0x18] sm:$0xff] %vm21_vm0, %v187_v42 }
  0xee   :  { %v178_v47 = vadd.f32 %v203_v30, %v166_v44 }
  0xef   :  { %v185_v48 = vadd.f32 %v180_v40, %v175_v46 }
  0xf0   :  { %v188_v49 = vadd.f32 %v183_v45, %v178_v47  ;;  %v164_v51 = vld [vmem:[#allocation2 + $0x10] sm:$0xff] }
  0xf1   :  { %190 = vst.msk [vmem:[%s366_s4 + $0x8] sm:$0xff] %vm21_vm0, %v185_v48  ;;  %v176_v52 = vadd.f32 %v203_v30, %v164_v51 }
  0xf2   :  { %193 = vst.msk [vmem:[%s366_s4 + $0x20] sm:$0x3] %vm26_vm2, %v188_v49 }
  0xf3   :  { %v186_v53 = vadd.f32 %v181_v50, %v176_v52 }
  0xf5   :  { %191 = vst.msk [vmem:[%s366_s4 + $0x10] sm:$0xff] %vm21_vm0, %v186_v53 }

// kernel: _lambda_.12
= control target key start
LH: loop header
LB: loop body
LE: loop exit
PB: predicated region body
PF: predicated region fallthrough
CT: control target
= control target key end

     0   :  { %s2890_s6 = smov 0   ;;  %s3366_s0 = inlined_call_operand.vmem [shape: f32[2,17,96], index: 0, kind: input, shape index: {}]   ;;  %s3367_s1 = inlined_call_operand.vmem [shape: f32[2,17,32], index: 1, kind: output, shape index: {}]  }
   0x1 LB: > { %s2424_s7 = sadd.s32 4294967295, %s2861_s6   ;;  %p2428_p0 = scmp.ge.s32.totalorder %s2861_s6, 1  ;;  %s2861_s6 = sphi %s2890_s6, %s11_s6  }
   0x2   : > { %p87_p1 = scmp.lt.s32.totalorder %s2861_s6, 3 }
   0x4   : > { %p88_p2 = pnand %p2428_p0, %p87_p1 }
   0x5   : > { %p107_p3 = scmp.lt.s32.totalorder (!%p88_p2), %s2424_s7, 1  ;;  %v2863_v0 = vmov (!%p88_p2), 0.0|0.0   ;;  %s2864_s12 = smov (!%p88_p2), 96   ;;  %vm2865_vm0 = vmmov (!%p88_p2), 0   ;;  %v2866_v4 = vmov (!%p88_p2), 0.0   ;;  %vm132_vm1 = vcmask (!%p88_p2), 64512  }
   0x6   : > { %91 = sbr.rel (%p88_p2) target bundleno = 4126 (0x101e), region = 24  ;;  %2697 = vmatprep.subr.bf16.mxu0 (!%p88_p2), %v2863_v0  ;;  %2701 = vmatprep.subr.bf16.mxu1 (!%p88_p2), %v2863_v0  ;;  %vm2925_vm2 = vmpackc.low (!%p88_p2), %vm132_vm1, %vm132_vm1  ;;  %vm212_vm3 = vcmask (!%p88_p2), 131072   ;;  %s2867_s13 = smov (!%p88_p2), 64   ;;  %vm311_vm4 = vcmask (!%p88_p2), 1046528   ;;  %v476_v28 = vlaneseq (!%p88_p2)  ;;  %vm236_vm5 = vcmask (!%p88_p2), 1040384  }
   0x7   : > { %2551 = vmatprep.mubr.msk.f32.mxu0 (!%p88_p2), %vm2865_vm0, %v2866_v4  ;;  %2560 = vmatprep.mubr.msk.f32.mxu1 (!%p88_p2), %vm2865_vm0, %v2866_v4  ;;  %vm232_vm6 = vcmask (!%p88_p2), 138240   ;;  %s2868_s14 = smov (!%p88_p2), 88   ;;  %s2869_s15 = smov (!%p88_p2), 120   ;;  %vm686_vm7 = vcmask (!%p88_p2), 57344   ;;  %vm1238_vm8 = vcmask (!%p88_p2), 122944   ;;  %vm1248_vm9 = vcmask (!%p88_p2), 130112  }
   0x8   : > { %v477_v29 = vshrl.u32 (!%p88_p2), %v476_v28, 7  ;;  %s2870_s19 = smov (!%p88_p2), 56   ;;  %s2871_s20 = smov (!%p88_p2), 80   ;;  %vm1797_vm10 = vcmask (!%p88_p2), 188544   ;;  %vm1807_vm11 = vcmask (!%p88_p2), 195712   ;;  %vm2356_vm12 = vcmask (!%p88_p2), 254144  }
   0x9   : > { %s2872_s21 = smov (!%p88_p2), 112   ;;  %s2873_s22 = smov (!%p88_p2), 48   ;;  %vm2366_vm13 = vcmask (!%p88_p2), 261312  }
   0xa   : > { %v478_v30 = vsub.s32 (!%p88_p2), 0, %v477_v29  ;;  %s2874_s23 = smov (!%p88_p2), 72   ;;  %s2875_s24 = smov (!%p88_p2), 104  }
   0xb   : > { %s2876_s25 = smov (!%p88_p2), 40   ;;  %s2877_s26 = smov (!%p88_p2), 8  }
   0xc   : > { %s2878_s27 = smov (!%p88_p2), 16   ;;  %s2879_s28 = smov (!%p88_p2), 24  }
   0xd   : > { %s3371_s7 = smov (!%p107_p3, %s2424_s7), 1 }
   0xe   : > { %s2725_s8 = smul.u32 24, %s3371_s7 }
  0x10   : > { %s111_s11 = scalar_lea.vmem %s3366_s0, %s2725_s8  ;;  %s2991_s18 = scalar_lea.vmem %s3367_s1, %s2725_s8 }
  0x11   : > { %v117_v1 = vld [vmem:[%s111_s11] sm:$0xff]  ;;  %v2908_v2 = vld [vmem:[%s111_s11 + $0x8] sm:$0xff]  ;;  %v2917_v5 = vld [vmem:[%s111_s11 + $0x10] sm:$0x1] }
  0x12   : > { %v2911_v3 = vpack.i.bf16 %v2908_v2, %v117_v1  ;;  %v2932_v12 = vmul.f32 0.35355338, %v117_v1  ;;  %v319_v16 = vrot.slane %v117_v1, 1  ;;  %v320_v17 = vrot.slane %v2908_v2, 1 }
  0x13   : > { %v2955_v31 = vrot.slane %v117_v1, %v478_v30  ;;  %v121_v34 = vmul.f32 0.35355338, %v2908_v2  ;;  %v322_v49 = vrot.slane %v2917_v5, 1  ;;  %v122_v53 = vmul.f32 0.35355338, %v2917_v5 }
  0x14   : > { %2752 = vrot.lane.b32.xlu0 %v2911_v3, %s2864_s12  ;;  %v2947_v18 = vsel %vm311_vm4, %v319_v16, %v320_v17  ;;  %v312_v36 = vrot.slane %v2932_v12, 1 }
  0x15   : > { %v313_v37 = vrot.slane %v121_v34, 1  ;;  %v3003_v51 = vsel %vm311_vm4, %v320_v17, %v322_v49  ;;  %v315_v54 = vrot.slane %v122_v53, 1 }
  0x17   : > { %v2968_v40 = vsel %vm311_vm4, %v312_v36, %v313_v37  ;;  %v3010_v55 = vsel %vm311_vm4, %v313_v37, %v315_v54 }
  0x18   : > { %130 = vrot.lane.b32.xlu0 %v2917_v5, %s2864_s12 }
  0x1c   : > { %2757 = vrot.lane.b32.xlu0 %v2911_v3, %s2867_s13 }
  0x20   : > { %324 = vrot.lane.b32.xlu0 %v2947_v18, %s2864_s12 }
  0x24   : > { %481 = vrot.lane.b32.xlu0 %v2955_v31, %s2864_s12 }
  0x86   : > { %v2753_v6 = vpop.permute.xlu0 %2752 }
  0x87   : > { %v2755_v7 = vunpack.i.h.bf16 %v2753_v6  ;;  %v2754_v8 = vunpack.i.l.bf16 %v2753_v6 }
  0x89   : > { %v2698_v10 = vpack.c.bf16 %v2755_v7, %v2754_v8 }
  0x8a   : > { %v131_v11 = vpop.permute.xlu0 %130 }
  0x8b   : > { %2700 = vmatpush3.bf16.xpose.msk.msra.mxu0 %vm2925_vm2, %v2698_v10 }
  0x8c   : > { %2549 = vmatprep.subr.mxu0 %v2866_v4 }
  0x8e   : > { %v2758_v24 = vpop.permute.xlu0 %2757 }
  0x8f   : > { %v2760_v25 = vunpack.i.h.bf16 %v2758_v24  ;;  %v2759_v26 = vunpack.i.l.bf16 %v2758_v24 }
  0x91   : > { %v2702_v27 = vpack.c.bf16 %v2760_v25, %v2759_v26 }
  0x92   : > { %v325_v38 = vpop.permute.xlu0 %324 }
  0x93   : > { %2550 = vmatpush3.xpose.msk.msra.mxu0 %vm132_vm1, %v131_v11  ;;  %2703 = vmatpush3.bf16.msra.mxu1 %v2702_v27 }
  0x94   : > { %2573 = vmatprep.subr.mxu0 %v2866_v4  ;;  %2558 = vmatprep.subr.mxu1 %v2866_v4 }
  0x96   : > { %2552 = vmatmul.mubr.msk.f32.vlgmr.msra.gmra.mrb[0].mxu0 %vm132_vm1, %v2932_v12  ;;  %v482_v41 = vpop.permute.xlu0 %481 }
  0x97   : > { %2575 = vmatprep.mubr.msk.f32.mxu0 %vm2865_vm0, %v2866_v4  ;;  %v2976_v42 = vmul.f32 %v482_v41, %v2968_v40  ;;  %v3013_v56 = vmul.f32 %v482_v41, %v3010_v55 }
  0x99   : > { %v486_v43 = vsel %vm132_vm1, %v2976_v42, 0.0  ;;  %v489_v57 = vsel %vm132_vm1, %v3013_v56, 0.0 }
  0x9a   : > { %487 = vadd.xlane.f32.xlu0 %v486_v43 }
  0xb0   : > { %522 = vrot.lane.b32.xlu0 %v2947_v18, %s2867_s13 }
  0xb4   : > { %696 = vrot.lane.b32.xlu0 %v2917_v5, %s2868_s14 }
  0xb8   : > { %690 = vrot.lane.b32.xlu0 %v2932_v12, %s2869_s15 }
 0x127   : > { %v2998_v50 = vpop.xlane.xlu0 %487 }
 0x12b   : > { %v523_v52 = vpop.permute.xlu0 %522 }
 0x12c   : > { %2574 = vmatpush3.msra.mxu0 %v523_v52 }
 0x12d   : > { %2704 = vmatprep.subr.bf16.mxu0 %v2863_v0 }
 0x12f   : > { %v697_v8 = vpop.permute.xlu0 %696 }
 0x133   : > { %v691_v10 = vpop.permute.xlu0 %690 }
 0x169   : > { %v208_v13 = vpop.f32.mrb[0].mxu0 }
 0x16a   : > { %v2553_v14 = vpop.f32.mrb[1].mxu0  ;;  %v213_v15 = vsel %vm212_vm3, %v208_v13, -inf }
 0x16b   : > { %214 = vmax.xlane.f32.xlu1 %v213_v15 }
 0x1f8   : > { %v215_v19 = vpop.xlane.xlu1 %214 }
 0x1f9   : > { %v216_v20 = vsub.f32 %v208_v13, %v215_v19 }
 0x1fb   : > { %v217_v21 = vmul.f32 1.442695, %v216_v20 }
 0x1fd   : > { %2791 = vpow2.f32 %v217_v21 }
 0x207   : > { %v2792_v22 = vpop.eup %2791 }
 0x208   : > { %v219_v23 = vsel %vm212_vm3, %v2792_v22, 0.0 }
 0x209   : > { %220 = vadd.xlane.f32.xlu1 %v219_v23 }
 0x21a   : > { %228 = vrot.lane.b32.xlu1 %v2917_v5, %s2867_s13 }
 0x296   : > { %v221_v32 = vpop.xlane.xlu1 %220 }
 0x297   : > { %2793 = vrcp.f32 %v221_v32 }
 0x29a   : > { %v229_v33 = vpop.permute.xlu1 %228 }
 0x29b   : > { %2559 = vmatpush3.msk.msra.mxu1 %vm236_vm5, %v229_v33 }
 0x29c   : > { %2563 = vmatprep.subr.mxu1 %v2866_v4 }
 0x2a1   : > { %v2794_v35 = vpop.eup %2793 }
 0x2a2   : > { %v223_v39 = vmul.f32 %v2794_v35, %v2792_v22 }
 0x2a4   : > { %2561 = vmatmul.mubr.msk.f32.vlgmr.msra.gmra.mrb[0].mxu1 %vm232_vm6, %v223_v39 }
 0x2a5   : > { %2564 = vmatpush3.xpose.msk.msra.mxu1 %vm132_vm1, %v325_v38  ;;  %2565 = vmatprep.mubr.msk.f32.mxu1 %vm2865_vm0, %v2866_v4 }
 0x2a6   : > { %2568 = vmatprep.subr.mxu1 %v2866_v4 }
 0x2a8   : > { %2566 = vmatmul.mubr.msk.f32.vlgmr.msra.gmra.mrb[2].mxu1 %vm132_vm1, %v2968_v40 }
 0x2a9   : > { %2570 = vmatprep.mubr.msk.f32.mxu1 %vm2865_vm0, %v2866_v4 }
 0x377   : > { %v305_v44 = vpop.f32.mrb[0].mxu1 }
 0x378   : > { %687 = vst.msk [vmem:[%s2991_s18] sm:$0x1] %vm686_vm7, %v305_v44  ;;  %v2562_v45 = vpop.f32.mrb[1].mxu1 }
 0x37b   : > { %v396_v46 = vpop.f32.mrb[2].mxu1 }
 0x37c   : > { %v2567_v47 = vpop.f32.mrb[3].mxu1  ;;  %v492_v48 = vsel %vm132_vm1, %v396_v46, -inf }
 0x37d   : > { %493 = vmax.xlane.f32.xlu1 %v492_v48 }
 0x38e   : > { %2762 = vrot.lane.b32.xlu1 %v2911_v3, %s2868_s14 }
 0x392   : > { %400 = vrot.lane.b32.xlu1 %v3003_v51, %s2864_s12 }
 0x3b6   : > { %490 = vadd.xlane.f32.xlu1 %v489_v57 }
 0x3c7   : > { %602 = vrot.lane.b32.xlu1 %v3003_v51, %s2867_s13 }
 0x3cb   : > { %791 = vrot.lane.b32.xlu1 %v2917_v5, %s2870_s19 }
 0x3cf   : > { %872 = vrot.lane.b32.xlu1 %v2947_v18, %s2868_s14 }
 0x3d3   : > { %1028 = vrot.lane.b32.xlu1 %v2976_v42, %s2869_s15 }
 0x40a   : > { %v494_v58 = vpop.xlane.xlu1 %493 }
 0x40b   : > { %v3026_v59 = vmax.f32 %v494_v58, %v2998_v50 }
 0x40d   : > { %v500_v60 = vsub.f32 %v396_v46, %v3026_v59 }
 0x40e   : > { %v2763_v61 = vpop.permute.xlu1 %2762 }
 0x40f   : > { %v502_v62 = vmul.f32 1.442695, %v500_v60  ;;  %v2765_v1 = vunpack.i.h.bf16 %v2763_v61  ;;  %v2764_v2 = vunpack.i.l.bf16 %v2763_v61 }
 0x411   : > { %2795 = vpow2.f32 %v502_v62  ;;  %v2705_v6 = vpack.c.bf16 %v2765_v1, %v2764_v2 }
 0x412   : > { %v401_v63 = vpop.permute.xlu1 %400 }
 0x413   : > { %2569 = vmatpush3.xpose.msk.msra.mxu1 %vm132_vm1, %v401_v63 }
 0x414   : > { %2578 = vmatprep.subr.mxu1 %v2866_v4 }
 0x416   : > { %2571 = vmatmul.mubr.msk.f32.vlgmr.msra.gmra.mrb[4].mxu1 %vm132_vm1, %v3010_v55 }
 0x417   : > { %2580 = vmatprep.mubr.msk.f32.mxu1 %vm2865_vm0, %v2866_v4 }
 0x41b   : > { %v3035_v7 = vpop.eup %2795 }
 0x41c   : > { %2576 = vmatmul.mubr.msk.f32.vlgmr.msra.gmra.mrb[2].mxu0 %vm132_vm1, %v3035_v7 }
 0x41d   : > { %2707 = vmatpush3.bf16.xpose.msk.msra.mxu0 %vm2925_vm2, %v2705_v6  ;;  %2589 = vmatprep.mubr.msk.f32.mxu0 %vm2865_vm0, %v2866_v4 }
 0x41e   : > { %2587 = vmatprep.subr.mxu0 %v2866_v4 }
 0x425   : > { %2588 = vmatpush3.xpose.msk.msra.mxu0 %vm132_vm1, %v697_v8 }
 0x426   : > { %2606 = vmatprep.subr.mxu0 %v2866_v4 }
 0x428   : > { %2590 = vmatmul.mubr.msk.f32.vlgmr.msra.gmra.mrb[4].mxu0 %vm132_vm1, %v691_v10 }
 0x429   : > { %2608 = vmatprep.mubr.msk.f32.mxu0 %vm2865_vm0, %v2866_v4 }
 0x443   : > { %v3049_v11 = vpop.xlane.xlu1 %490 }
 0x447   : > { %v603_v13 = vpop.permute.xlu1 %602 }
 0x448   : > { %2579 = vmatpush3.msra.mxu1 %v603_v13 }
 0x449   : > { %2708 = vmatprep.subr.bf16.mxu1 %v2863_v0 }
 0x44b   : > { %v792_v38 = vpop.permute.xlu1 %791 }
 0x44f   : > { %v873_v39 = vpop.permute.xlu1 %872 }
 0x453   : > { %v1029_v41 = vpop.permute.xlu1 %1028 }
 0x454   : > { %v1034_v43 = vsel %vm132_vm1, %v1029_v41, 0.0 }
 0x4e9   : > { %v472_v14 = vpop.f32.mrb[4].mxu1 }
 0x4ea   : > { %v2572_v15 = vpop.f32.mrb[5].mxu1  ;;  %v495_v22 = vsel %vm132_vm1, %v472_v14, -inf }
 0x4ef   : > { %v3052_v16 = vpop.f32.mrb[2].mxu0 }
 0x4f0   : > { %v2577_v17 = vpop.f32.mrb[3].mxu0 }
 0x4fb   : > { %v772_v19 = vpop.f32.mrb[4].mxu0 }
 0x4fc   : > { %v2591_v20 = vpop.f32.mrb[5].mxu0  ;;  %v776_v21 = vsel %vm212_vm3, %v772_v19, -inf }
 0x4fd   : > { %777 = vmax.xlane.f32.xlu0 %v776_v21 }
 0x501   : > { %496 = vmax.xlane.f32.xlu0 %v495_v22 }
 0x517   : > { %2767 = vrot.lane.b32.xlu0 %v2911_v3, %s2870_s19 }
 0x58a   : > { %v778_v23 = vpop.xlane.xlu0 %777 }
 0x58b   : > { %v779_v24 = vsub.f32 %v772_v19, %v778_v23 }
 0x58d   : > { %v780_v25 = vmul.f32 1.442695, %v779_v24 }
 0x58e   : > { %v497_v26 = vpop.xlane.xlu0 %496 }
 0x58f   : > { %2797 = vpow2.f32 %v780_v25  ;;  %v3059_v27 = vmax.f32 %v497_v26, %v3049_v11 }
 0x591   : > { %v501_v28 = vsub.f32 %v472_v14, %v3059_v27 }
 0x592   : > { %v2768_v30 = vpop.permute.xlu0 %2767 }
 0x593   : > { %v504_v29 = vmul.f32 1.442695, %v501_v28  ;;  %v2770_v33 = vunpack.i.h.bf16 %v2768_v30  ;;  %v2769_v34 = vunpack.i.l.bf16 %v2768_v30 }
 0x595   : > { %2799 = vpow2.f32 %v504_v29  ;;  %v2709_v36 = vpack.c.bf16 %v2770_v33, %v2769_v34 }
 0x599   : > { %v2798_v32 = vpop.eup %2797 }
 0x59a   : > { %v782_v35 = vsel %vm212_vm3, %v2798_v32, 0.0 }
 0x59b   : > { %783 = vadd.xlane.f32.xlu0 %v782_v35 }
 0x59f   : > { %v3063_v37 = vpop.eup %2799 }
 0x5a0   : > { %2581 = vmatmul.mubr.msk.f32.vlgmr.msra.gmra.mrb[6].mxu1 %vm132_vm1, %v3063_v37 }
 0x5a1   : > { %2710 = vmatpush3.bf16.msra.mxu1 %v2709_v36  ;;  %2598 = vmatprep.mubr.msk.f32.mxu1 %vm2865_vm0, %v2866_v4 }
 0x5a2   : > { %2596 = vmatprep.subr.mxu1 %v2866_v4 }
 0x5a5   : > { %2597 = vmatpush3.msk.msra.mxu1 %vm236_vm5, %v792_v38 }
 0x5a6   : > { %2601 = vmatprep.subr.mxu1 %v2866_v4 }
 0x5b1   : > { %870 = vrot.lane.b32.xlu0 %v2968_v40, %s2869_s15 }
 0x5d0   : > { %1035 = vadd.xlane.f32.xlu0 %v1034_v43 }
 0x5e6   : > { %1070 = vrot.lane.b32.xlu0 %v2947_v18, %s2870_s19 }
 0x5ea   : > { %1257 = vrot.lane.b32.xlu0 %v2917_v5, %s2871_s20 }
 0x5ee   : > { %950 = vrot.lane.b32.xlu0 %v3003_v51, %s2868_s14 }
 0x628   : > { %v784_v44 = vpop.xlane.xlu0 %783 }
 0x629   : > { %2801 = vrcp.f32 %v784_v44 }
 0x62c   : > { %v871_v47 = vpop.permute.xlu0 %870 }
 0x633   : > { %v2802_v45 = vpop.eup %2801 }
 0x634   : > { %v786_v46 = vmul.f32 %v2802_v45, %v2798_v32 }
 0x636   : > { %2599 = vmatmul.mubr.msk.f32.vlgmr.msra.gmra.mrb[8].mxu1 %vm232_vm6, %v786_v46 }
 0x637   : > { %2602 = vmatpush3.xpose.msk.msra.mxu1 %vm132_vm1, %v873_v39  ;;  %2603 = vmatprep.mubr.msk.f32.mxu1 %vm2865_vm0, %v2866_v4 }
 0x638   : > { %2611 = vmatprep.subr.mxu1 %v2866_v4 }
 0x63a   : > { %2604 = vmatmul.mubr.msk.f32.vlgmr.msra.gmra.mrb[10].mxu1 %vm132_vm1, %v871_v47 }
 0x63b   : > { %2613 = vmatprep.mubr.msk.f32.mxu1 %vm2865_vm0, %v2866_v4 }
 0x65d   : > { %v3094_v60 = vpop.xlane.xlu0 %1035 }
 0x661   : > { %v1071_v61 = vpop.permute.xlu0 %1070 }
 0x662   : > { %2612 = vmatpush3.msra.mxu1 %v1071_v61 }
 0x663   : > { %2711 = vmatprep.subr.bf16.mxu1 %v2863_v0 }
 0x665   : > { %v1258_v62 = vpop.permute.xlu0 %1257 }
 0x669   : > { %v951_v63 = vpop.permute.xlu0 %950 }
 0x66a   : > { %2607 = vmatpush3.xpose.msk.msra.mxu0 %vm132_vm1, %v951_v63 }
 0x66b   : > { %2616 = vmatprep.subr.mxu0 %v2866_v4 }
 0x673   : > { %v3085_v48 = vpop.f32.mrb[6].mxu1 }
 0x674   : > { %v2582_v49 = vpop.f32.mrb[7].mxu1 }
 0x709   : > { %v3091_v52 = vpop.f32.mrb[8].mxu1 }
 0x70a   : > { %v2600_v53 = vpop.f32.mrb[9].mxu1 }
 0x70d   : > { %v944_v54 = vpop.f32.mrb[10].mxu1 }
 0x70e   : > { %v2605_v57 = vpop.f32.mrb[11].mxu1  ;;  %v1040_v58 = vsel %vm132_vm1, %v944_v54, -inf }
 0x70f   : > { %1041 = vmax.xlane.f32.xlu1 %v1040_v58 }
 0x720   : > { %2772 = vrot.lane.b32.xlu1 %v2911_v3, %s2871_s20 }
 0x724   : > { %1251 = vrot.lane.b32.xlu1 %v2932_v12, %s2872_s21 }
 0x728   : > { %948 = vrot.lane.b32.xlu1 %v3010_v55, %s2869_s15 }
 0x72c   : > { %1030 = vrot.lane.b32.xlu1 %v3013_v56, %s2869_s15 }
 0x79c   : > { %v1042_v1 = vpop.xlane.xlu1 %1041 }
 0x79d   : > { %v3108_v2 = vmax.f32 %v1042_v1, %v3094_v60 }
 0x79f   : > { %v1048_v6 = vsub.f32 %v944_v54, %v3108_v2 }
 0x7a0   : > { %v2773_v8 = vpop.permute.xlu1 %2772 }
 0x7a1   : > { %v1050_v10 = vmul.f32 1.442695, %v1048_v6  ;;  %v2775_v14 = vunpack.i.h.bf16 %v2773_v8  ;;  %v2774_v15 = vunpack.i.l.bf16 %v2773_v8 }
 0x7a3   : > { %2803 = vpow2.f32 %v1050_v10  ;;  %v2712_v19 = vpack.c.bf16 %v2775_v14, %v2774_v15 }
 0x7a4   : > { %v1252_v13 = vpop.permute.xlu1 %1251 }
 0x7a8   : > { %v949_v17 = vpop.permute.xlu1 %948 }
 0x7a9   : > { %2609 = vmatmul.mubr.msk.f32.vlgmr.msra.gmra.mrb[6].mxu0 %vm132_vm1, %v949_v17 }
 0x7aa   : > { %2618 = vmatprep.mubr.msk.f32.mxu0 %vm2865_vm0, %v2866_v4 }
 0x7ac   : > { %v1031_v20 = vpop.permute.xlu1 %1030 }
 0x7ad   : > { %v3114_v21 = vpop.eup %2803  ;;  %v1037_v22 = vsel %vm132_vm1, %v1031_v20, 0.0 }
 0x7ae   : > { %2614 = vmatmul.mubr.msk.f32.vlgmr.msra.gmra.mrb[12].mxu1 %vm132_vm1, %v3114_v21  ;;  %1038 = vadd.xlane.f32.xlu1 %v1037_v22 }
 0x7af   : > { %2714 = vmatpush3.bf16.xpose.msk.msra.mxu1 %vm2925_vm2, %v2712_v19  ;;  %2627 = vmatprep.mubr.msk.f32.mxu1 %vm2865_vm0, %v2866_v4 }
 0x7b0   : > { %2625 = vmatprep.subr.mxu1 %v2866_v4 }
 0x7b7   : > { %2626 = vmatpush3.xpose.msk.msra.mxu1 %vm132_vm1, %v1258_v62 }
 0x7b8   : > { %2644 = vmatprep.subr.mxu1 %v2866_v4 }
 0x7ba   : > { %2628 = vmatmul.mubr.msk.f32.vlgmr.msra.gmra.mrb[14].mxu1 %vm132_vm1, %v1252_v13 }
 0x7bb   : > { %2646 = vmatprep.mubr.msk.f32.mxu1 %vm2865_vm0, %v2866_v4 }
 0x7bf   : > { %2777 = vrot.lane.b32.xlu1 %v2911_v3, %s2873_s22 }
 0x7c3   : > { %1352 = vrot.lane.b32.xlu1 %v2917_v5, %s2873_s22 }
 0x7c7   : > { %1431 = vrot.lane.b32.xlu1 %v2968_v40, %s2872_s21 }
 0x83b   : > { %v3141_v36 = vpop.xlane.xlu1 %1038 }
 0x83f   : > { %v2778_v53 = vpop.permute.xlu1 %2777 }
 0x840   : > { %v2780_v54 = vunpack.i.h.bf16 %v2778_v53  ;;  %v2779_v57 = vunpack.i.l.bf16 %v2778_v53 }
 0x842   : > { %v2716_v58 = vpack.c.bf16 %v2780_v54, %v2779_v57 }
 0x843   : > { %v1353_v61 = vpop.permute.xlu1 %1352 }
 0x847   : > { %v1432_v13 = vpop.permute.xlu1 %1431 }
 0x87c   : > { %v1022_v23 = vpop.f32.mrb[6].mxu0 }
 0x87d   : > { %v2610_v24 = vpop.f32.mrb[7].mxu0  ;;  %v1043_v32 = vsel %vm132_vm1, %v1022_v23, -inf }
 0x881   : > { %v3129_v25 = vpop.f32.mrb[12].mxu1 }
 0x882   : > { %v2615_v26 = vpop.f32.mrb[13].mxu1 }
 0x88d   : > { %v1333_v28 = vpop.f32.mrb[14].mxu1 }
 0x88e   : > { %v2629_v29 = vpop.f32.mrb[15].mxu1  ;;  %v1337_v30 = vsel %vm212_vm3, %v1333_v28, -inf }
 0x88f   : > { %1338 = vmax.xlane.f32.xlu0 %v1337_v30 }
 0x893   : > { %1044 = vmax.xlane.f32.xlu0 %v1043_v32 }
 0x8a9   : > { %1150 = vrot.lane.b32.xlu0 %v3003_v51, %s2870_s19 }
 0x91c   : > { %v1339_v33 = vpop.xlane.xlu0 %1338 }
 0x91d   : > { %v1340_v34 = vsub.f32 %v1333_v28, %v1339_v33 }
 0x91f   : > { %v1341_v35 = vmul.f32 1.442695, %v1340_v34 }
 0x920   : > { %v1045_v38 = vpop.xlane.xlu0 %1044 }
 0x921   : > { %2805 = vpow2.f32 %v1341_v35  ;;  %v3144_v39 = vmax.f32 %v1045_v38, %v3141_v36 }
 0x923   : > { %v1049_v41 = vsub.f32 %v1022_v23, %v3144_v39  ;;  %v1055_v43 = vsub.f32 %v3141_v36, %v3144_v39 }
 0x924   : > { %v1151_v44 = vpop.permute.xlu0 %1150 }
 0x925   : > { %v1052_v45 = vmul.f32 1.442695, %v1049_v41  ;;  %2617 = vmatpush3.msra.mxu0 %v1151_v44 }
 0x926   : > { %2715 = vmatprep.subr.bf16.mxu0 %v2863_v0 }
 0x927   : > { %2807 = vpow2.f32 %v1052_v45 }
 0x92b   : > { %v2806_v46 = vpop.eup %2805 }
 0x92c   : > { %v1343_v47 = vsel %vm212_vm3, %v2806_v46, 0.0 }
 0x92d   : > { %1344 = vadd.xlane.f32.xlu0 %v1343_v47 }
 0x931   : > { %v3151_v49 = vpop.eup %2807 }
 0x932   : > { %2619 = vmatmul.mubr.msk.f32.vlgmr.msra.gmra.mrb[8].mxu0 %vm132_vm1, %v3151_v49 }
 0x933   : > { %2636 = vmatprep.mubr.msk.f32.mxu0 %vm2865_vm0, %v2866_v4  ;;  %2717 = vmatpush3.bf16.msra.mxu0 %v2716_v58 }
 0x934   : > { %2634 = vmatprep.subr.mxu0 %v2866_v4 }
 0x937   : > { %2635 = vmatpush3.msk.msra.mxu0 %vm236_vm5, %v1353_v61 }
 0x938   : > { %2639 = vmatprep.subr.mxu0 %v2866_v4 }
 0x943   : > { %1433 = vrot.lane.b32.xlu0 %v2947_v18, %s2871_s20 }
 0x947   : > { %1587 = vrot.lane.b32.xlu0 %v2976_v42, %s2872_s21 }
 0x9ba   : > { %v1345_v62 = vpop.xlane.xlu0 %1344 }
 0x9bb   : > { %2809 = vrcp.f32 %v1345_v62 }
 0x9be   : > { %v1434_v63 = vpop.permute.xlu0 %1433 }
 0x9c2   : > { %v1588_v1 = vpop.permute.xlu0 %1587 }
 0x9c3   : > { %v1593_v6 = vsel %vm132_vm1, %v1588_v1, 0.0 }
 0x9c4   : > { %1594 = vadd.xlane.f32.xlu1 %v1593_v6 }
 0x9c5   : > { %v2810_v8 = vpop.eup %2809 }
 0x9c6   : > { %v1347_v10 = vmul.f32 %v2810_v8, %v2806_v46 }
 0x9c8   : > { %2637 = vmatmul.mubr.msk.f32.vlgmr.msra.gmra.mrb[10].mxu0 %vm232_vm6, %v1347_v10 }
 0x9c9   : > { %2640 = vmatpush3.xpose.msk.msra.mxu0 %vm132_vm1, %v1434_v63  ;;  %2641 = vmatprep.mubr.msk.f32.mxu0 %vm2865_vm0, %v2866_v4 }
 0x9ca   : > { %2649 = vmatprep.subr.mxu0 %v2866_v4 }
 0x9cc   : > { %2642 = vmatmul.mubr.msk.f32.vlgmr.msra.gmra.mrb[12].mxu0 %vm132_vm1, %v1432_v13 }
 0x9cd   : > { %2651 = vmatprep.mubr.msk.f32.mxu0 %vm2865_vm0, %v2866_v4 }
 0x9d5   : > { %2782 = vrot.lane.b32.xlu1 %v2911_v3, %s2874_s23 }
 0x9d9   : > { %1816 = vrot.lane.b32.xlu1 %v2917_v5, %s2874_s23 }
 0x9dd   : > { %1511 = vrot.lane.b32.xlu1 %v3003_v51, %s2871_s20 }
 0xa05   : > { %v3173_v14 = vpop.f32.mrb[8].mxu0 }
 0xa06   : > { %v2620_v15 = vpop.f32.mrb[9].mxu0 }
 0xa51   : > { %v3186_v24 = vpop.xlane.xlu1 %1594 }
 0xa55   : > { %v2783_v26 = vpop.permute.xlu1 %2782 }
 0xa56   : > { %v2785_v38 = vunpack.i.h.bf16 %v2783_v26  ;;  %v2784_v41 = vunpack.i.l.bf16 %v2783_v26 }
 0xa58   : > { %v2719_v45 = vpack.c.bf16 %v2785_v38, %v2784_v41 }
 0xa59   : > { %v1817_v28 = vpop.permute.xlu1 %1816 }
 0xa5d   : > { %v1512_v29 = vpop.permute.xlu1 %1511 }
 0xa5e   : > { %2645 = vmatpush3.xpose.msk.msra.mxu1 %vm132_vm1, %v1512_v29 }
 0xa5f   : > { %2654 = vmatprep.subr.mxu1 %v2866_v4 }
 0xa9b   : > { %v3181_v17 = vpop.f32.mrb[10].mxu0 }
 0xa9c   : > { %v2638_v19 = vpop.f32.mrb[11].mxu0 }
 0xa9f   : > { %v1505_v20 = vpop.f32.mrb[12].mxu0 }
 0xaa0   : > { %v2643_v22 = vpop.f32.mrb[13].mxu0  ;;  %v1599_v23 = vsel %vm132_vm1, %v1505_v20, -inf }
 0xaa1   : > { %1600 = vmax.xlane.f32.xlu0 %v1599_v23 }
 0xab7   : > { %1629 = vrot.lane.b32.xlu0 %v2947_v18, %s2873_s22 }
 0xabb   : > { %1810 = vrot.lane.b32.xlu0 %v2932_v12, %s2875_s24 }
 0xabf   : > { %1509 = vrot.lane.b32.xlu0 %v3010_v55, %s2872_s21 }
 0xac3   : > { %1589 = vrot.lane.b32.xlu0 %v3013_v56, %s2872_s21 }
 0xb2e   : > { %v1601_v30 = vpop.xlane.xlu0 %1600 }
 0xb2f   : > { %v3197_v32 = vmax.f32 %v1601_v30, %v3186_v24 }
 0xb31   : > { %v1607_v33 = vsub.f32 %v1505_v20, %v3197_v32 }
 0xb32   : > { %v1630_v12 = vpop.permute.xlu0 %1629 }
 0xb33   : > { %v1609_v34 = vmul.f32 1.442695, %v1607_v33  ;;  %2650 = vmatpush3.msra.mxu0 %v1630_v12 }
 0xb34   : > { %2718 = vmatprep.subr.bf16.mxu0 %v2863_v0 }
 0xb35   : > { %2811 = vpow2.f32 %v1609_v34 }
 0xb36   : > { %v1811_v35 = vpop.permute.xlu0 %1810 }
 0xb3a   : > { %v1510_v44 = vpop.permute.xlu0 %1509 }
 0xb3b   : > { %2647 = vmatmul.mubr.msk.f32.vlgmr.msra.gmra.mrb[16].mxu1 %vm132_vm1, %v1510_v44 }
 0xb3c   : > { %2656 = vmatprep.mubr.msk.f32.mxu1 %vm2865_vm0, %v2866_v4 }
 0xb3e   : > { %v1590_v46 = vpop.permute.xlu0 %1589 }
 0xb3f   : > { %v3204_v47 = vpop.eup %2811  ;;  %v1596_v53 = vsel %vm132_vm1, %v1590_v46, 0.0 }
 0xb40   : > { %2652 = vmatmul.mubr.msk.f32.vlgmr.msra.gmra.mrb[14].mxu0 %vm132_vm1, %v3204_v47  ;;  %1597 = vadd.xlane.f32.xlu0 %v1596_v53 }
 0xb41   : > { %2721 = vmatpush3.bf16.xpose.msk.msra.mxu0 %vm2925_vm2, %v2719_v45  ;;  %2665 = vmatprep.mubr.msk.f32.mxu0 %vm2865_vm0, %v2866_v4 }
 0xb42   : > { %2663 = vmatprep.subr.mxu0 %v2866_v4 }
 0xb49   : > { %2664 = vmatpush3.xpose.msk.msra.mxu0 %vm132_vm1, %v1817_v28 }
 0xb4a   : > { %2682 = vmatprep.subr.mxu0 %v2866_v4 }
 0xb4c   : > { %2666 = vmatmul.mubr.msk.f32.vlgmr.msra.gmra.mrb[16].mxu0 %vm132_vm1, %v1811_v35 }
 0xb4d   : > { %2684 = vmatprep.mubr.msk.f32.mxu0 %vm2865_vm0, %v2866_v4 }
 0xb56   : > { %2787 = vrot.lane.b32.xlu0 %v2911_v3, %s2876_s25 }
 0xb5a   : > { %2070 = vrot.lane.b32.xlu0 %v3003_v51, %s2874_s23 }
 0xbcd   : > { %v3237_v3 = vpop.xlane.xlu0 %1597 }
 0xbd1   : > { %v2788_v6 = vpop.permute.xlu0 %2787 }
 0xbd2   : > { %v2790_v26 = vunpack.i.h.bf16 %v2788_v6  ;;  %v2789_v28 = vunpack.i.l.bf16 %v2788_v6 }
 0xbd4   : > { %v2723_v33 = vpack.c.bf16 %v2790_v26, %v2789_v28 }
 0xbd5   : > { %v2071_v8 = vpop.permute.xlu0 %2070 }
 0xbd6   : > { %2683 = vmatpush3.xpose.msk.msra.mxu0 %vm132_vm1, %v2071_v8 }
 0xbd7   : > { %2692 = vmatprep.subr.mxu0 %v2866_v4 }
 0xc0e   : > { %v1583_v9 = vpop.f32.mrb[16].mxu1 }
 0xc0f   : > { %v2648_v54 = vpop.f32.mrb[17].mxu1  ;;  %v1602_v1 = vsel %vm132_vm1, %v1583_v9, -inf }
 0xc13   : > { %v3223_v57 = vpop.f32.mrb[14].mxu0 }
 0xc14   : > { %v2653_v58 = vpop.f32.mrb[15].mxu0 }
 0xc1f   : > { %v1892_v61 = vpop.f32.mrb[16].mxu0 }
 0xc20   : > { %v2667_v62 = vpop.f32.mrb[17].mxu0  ;;  %v1896_v63 = vsel %vm212_vm3, %v1892_v61, -inf }
 0xc21   : > { %1897 = vmax.xlane.f32.xlu1 %v1896_v63 }
 0xc25   : > { %1603 = vmax.xlane.f32.xlu1 %v1602_v1 }
 0xc36   : > { %1709 = vrot.lane.b32.xlu1 %v3003_v51, %s2873_s22 }
 0xc3a   : > { %1911 = vrot.lane.b32.xlu1 %v2917_v5, %s2876_s25 }
 0xc3e   : > { %1992 = vrot.lane.b32.xlu1 %v2947_v18, %s2874_s23 }
 0xc42   : > { %1990 = vrot.lane.b32.xlu1 %v2968_v40, %s2875_s24 }
 0xc46   : > { %2146 = vrot.lane.b32.xlu1 %v2976_v42, %s2875_s24 }
 0xcae   : > { %v1898_v10 = vpop.xlane.xlu1 %1897 }
 0xcaf   : > { %v1899_v13 = vsub.f32 %v1892_v61, %v1898_v10  ;;  %v1063_v10 = vsel %vm132_vm1, %v3151_v49, 0.0 }
 0xcb1   : > { %v1900_v5 = vmul.f32 1.442695, %v1899_v13  ;;  %v1054_v13 = vsub.f32 %v3094_v60, %v3108_v2 }
 0xcb2   : > { %v1604_v15 = vpop.xlane.xlu1 %1603 }
 0xcb3   : > { %2813 = vpow2.f32 %v1900_v5  ;;  %v3242_v19 = vmax.f32 %v1604_v15, %v3237_v3  ;;  %v1056_v5 = vmul.f32 1.442695, %v1054_v13 }
 0xcb5   : > { %v1608_v40 = vsub.f32 %v1583_v9, %v3242_v19 }
 0xcb6   : > { %v1710_v20 = vpop.permute.xlu1 %1709 }
 0xcb7   : > { %v1611_v42 = vmul.f32 1.442695, %v1608_v40  ;;  %2655 = vmatpush3.msra.mxu1 %v1710_v20 }
 0xcb8   : > { %2722 = vmatprep.subr.bf16.mxu1 %v2863_v0 }
 0xcb9   : > { %2815 = vpow2.f32 %v1611_v42 }
 0xcba   : > { %v1912_v22 = vpop.permute.xlu1 %1911 }
 0xcbd   : > { %v2814_v23 = vpop.eup %2813 }
 0xcbe   : > { %v1993_v29 = vpop.permute.xlu1 %1992  ;;  %v1902_v30 = vsel %vm212_vm3, %v2814_v23, 0.0 }
 0xcbf   : > { %1903 = vadd.xlane.f32.xlu0 %v1902_v30  ;;  %v1058_v30 = vmul.f32 1.442695, %v1055_v43 }
 0xcc2   : > { %v1991_v12 = vpop.permute.xlu1 %1990 }
 0xcc3   : > { %v2816_v34 = vpop.eup %2815 }
 0xcc4   : > { %2657 = vmatmul.mubr.msk.f32.vlgmr.msra.gmra.mrb[18].mxu1 %vm132_vm1, %v2816_v34  ;;  %v1622_v8 = vsel %vm132_vm1, %v2816_v34, 0.0 }
 0xcc5   : > { %2724 = vmatpush3.bf16.msra.mxu1 %v2723_v33  ;;  %2674 = vmatprep.mubr.msk.f32.mxu1 %vm2865_vm0, %v2866_v4  ;;  %v1613_v33 = vsub.f32 %v3186_v24, %v3197_v32 }
 0xcc6   : > { %v2147_v35 = vpop.permute.xlu1 %2146  ;;  %2672 = vmatprep.subr.mxu1 %v2866_v4 }
 0xcc7   : > { %v2152_v0 = vsel %vm132_vm1, %v2147_v35, 0.0 }
 0xcc8   : > { %2153 = vadd.xlane.f32.xlu1 %v2152_v0  ;;  %v1615_v0 = vmul.f32 1.442695, %v1613_v33 }
 0xcc9   : > { %2673 = vmatpush3.msk.msra.mxu1 %vm236_vm5, %v1912_v22 }
 0xcca   : > { %2677 = vmatprep.subr.mxu1 %v2866_v4 }
 0xcd5   : > { %2068 = vrot.lane.b32.xlu0 %v3010_v55, %s2875_s24 }
 0xcd9   : > { %2148 = vrot.lane.b32.xlu0 %v3013_v56, %s2875_s24 }
 0xd4c   : > { %v1904_v38 = vpop.xlane.xlu0 %1903 }
 0xd4d   : > { %2817 = vrcp.f32 %v1904_v38 }
 0xd4e   : > { %2819 = vpow2.f32 %v1056_v5 }
 0xd50   : > { %v2069_v41 = vpop.permute.xlu0 %2068 }
 0xd51   : > { %2685 = vmatmul.mubr.msk.f32.vlgmr.msra.gmra.mrb[18].mxu0 %vm132_vm1, %v2069_v41 }
 0xd52   : > { %2694 = vmatprep.mubr.msk.f32.mxu0 %vm2865_vm0, %v2866_v4 }
 0xd54   : > { %v2149_v44 = vpop.permute.xlu0 %2148 }
 0xd55   : > { %v2155_v45 = vsel %vm132_vm1, %v2149_v44, 0.0  ;;  %v2154_v2 = vpop.xlane.xlu1 %2153 }
 0xd56   : > { %2156 = vadd.xlane.f32.xlu0 %v2155_v45 }
 0xd57   : > { %v2818_v46 = vpop.eup %2817 }
 0xd58   : > { %v1906_v53 = vmul.f32 %v2818_v46, %v2814_v23  ;;  %v3291_v15 = vpop.eup %2819 }
 0xd59   : > { %v1068_v49 = vmul.f32 %v3291_v15, %v2955_v31 }
 0xd5a   : > { %2675 = vmatmul.mubr.msk.f32.vlgmr.msra.gmra.mrb[20].mxu1 %vm232_vm6, %v1906_v53 }
 0xd5b   : > { %2678 = vmatpush3.xpose.msk.msra.mxu1 %vm132_vm1, %v1993_v29  ;;  %2679 = vmatprep.mubr.msk.f32.mxu1 %vm2865_vm0, %v2866_v4 }
 0xd5c   : > { %2687 = vmatprep.subr.mxu1 %v2866_v4 }
 0xd5e   : > { %2680 = vmatmul.mubr.msk.f32.vlgmr.msra.gmra.mrb[22].mxu1 %vm132_vm1, %v1991_v12 }
 0xd5f   : > { %2689 = vmatprep.mubr.msk.f32.mxu1 %vm2865_vm0, %v2866_v4  ;;  %v1060_v4 = vsel %vm132_vm1, %v3114_v21, 0.0 }
 0xd97   : > { %v3270_v55 = vpop.f32.mrb[18].mxu1 }
 0xd98   : > { %v2658_v56 = vpop.f32.mrb[19].mxu1 }
 0xe24   : > { %v2142_v9 = vpop.f32.mrb[18].mxu0 }
 0xe25   : > { %v2161_v54 = vsel %vm132_vm1, %v2142_v9, -inf  ;;  %v2686_v58 = vpop.f32.mrb[19].mxu0 }
 0xe26   : > { %2162 = vmax.xlane.f32.xlu1 %v2161_v54  ;;  %v507_v58 = vsub.f32 %v3049_v11, %v3059_v27 }
 0xe2d   : > { %v3273_v61 = vpop.f32.mrb[20].mxu1 }
 0xe2e   : > { %v2676_v62 = vpop.f32.mrb[21].mxu1 }
 0xe2f   : > { %v510_v62 = vmul.f32 1.442695, %v507_v58 }
 0xe31   : > { %v2064_v63 = vpop.f32.mrb[22].mxu1 }
 0xe32   : > { %v2681_v1 = vpop.f32.mrb[23].mxu1  ;;  %v2158_v6 = vsel %vm132_vm1, %v2064_v63, -inf }
 0xe33   : > { %2159 = vmax.xlane.f32.xlu0 %v2158_v6  ;;  %v506_v1 = vsub.f32 %v2998_v50, %v3026_v59  ;;  %v515_v6 = vsel %vm132_vm1, %v3063_v37, 0.0 }
 0xe37   : > { %2268 = vrot.lane.b32.xlu1 %v3003_v51, %s2876_s25  ;;  %v1619_v51 = vsel %vm132_vm1, %v3204_v47, 0.0  ;;  %v2157_v47 = vpop.xlane.xlu0 %2156 }
 0xe49   : > { %2188 = vrot.lane.b32.xlu0 %v2947_v18, %s2876_s25  ;;  %v1614_v18 = vsub.f32 %v3237_v3, %v3242_v19 }
 0xe4b   : > { %v1617_v21 = vmul.f32 1.442695, %v1614_v18 }
 0xe4d   : > { %2821 = vpow2.f32 %v1617_v21 }
 0xe57   : > { %v3295_v40 = vpop.eup %2821 }
 0xe58   : > { %v1628_v60 = vmul.f32 %v3295_v40, %v2955_v31 }
 0xe5b   : > { %1061 = vadd.xlane.f32.xlu1 %v1060_v4  ;;  %v508_v4 = vmul.f32 1.442695, %v506_v1 }
 0xe5f   : > { %1623 = vadd.xlane.f32.xlu1 %v1622_v8 }
 0xe68   : > { %1064 = vadd.xlane.f32.xlu0 %v1063_v10 }
 0xe6c   : > { %1620 = vadd.xlane.f32.xlu0 %v1619_v51 }
 0xe82   : > { %1074 = vrot.lane.b32.xlu0 %v1068_v49, %s2870_s19 }
 0xe86   : > { %1713 = vrot.lane.b32.xlu0 %v1628_v60, %s2873_s22 }
 0xeb3   : > { %v2163_v3 = vpop.xlane.xlu1 %2162 }
 0xeb4   : > { %v2165_v19 = vmax.f32 %v2163_v3, %v2157_v47 }
 0xeb6   : > { %v2167_v20 = vsub.f32 %v2142_v9, %v2165_v19  ;;  %v2173_v43 = vsub.f32 %v2157_v47, %v2165_v19 }
 0xeb7   : > { %v2269_v42 = vpop.permute.xlu1 %2268 }
 0xeb8   : > { %v2170_v22 = vmul.f32 1.442695, %v2167_v20  ;;  %2693 = vmatpush3.msra.mxu0 %v2269_v42  ;;  %v2176_v45 = vmul.f32 1.442695, %v2173_v43 }
 0xeba   : > { %2823 = vpow2.f32 %v2170_v22 }
 0xec0   : > { %v2160_v23 = vpop.xlane.xlu0 %2159 }
 0xec1   : > { %v2164_v26 = vmax.f32 %v2160_v23, %v2154_v2 }
 0xec3   : > { %v2166_v28 = vsub.f32 %v2064_v63, %v2164_v26  ;;  %v2172_v38 = vsub.f32 %v2154_v2, %v2164_v26  ;;  %v512_v63 = vsel %vm132_vm1, %v3035_v7, 0.0 }
 0xec4   : > { %v2824_v29 = vpop.eup %2823  ;;  %v2189_v12 = vpop.permute.xlu0 %2188 }
 0xec5   : > { %v2168_v34 = vmul.f32 1.442695, %v2166_v28  ;;  %2695 = vmatmul.mubr.msk.f32.vlgmr.msra.gmra.mrb[20].mxu0 %vm132_vm1, %v2824_v29  ;;  %v2181_v35 = vsel %vm132_vm1, %v2824_v29, 0.0  ;;  %2688 = vmatpush3.msra.mxu1 %v2189_v12  ;;  %v2174_v41 = vmul.f32 1.442695, %v2172_v38 }
 0xec6   : > { %2182 = vadd.xlane.f32.xlu1 %v2181_v35 }
 0xec7   : > { %2825 = vpow2.f32 %v2168_v34 }
 0xec8   : > { %2827 = vpow2.f32 %v1058_v30 }
 0xec9   : > { %2829 = vpow2.f32 %v1615_v0 }
 0xeca   : > { %2831 = vpow2.f32 %v2174_v41 }
 0xecb   : > { %2833 = vpow2.f32 %v2176_v45 }
 0xecc   : > { %2835 = vpow2.f32 %v510_v62 }
 0xecd   : > { %2837 = vpow2.f32 %v508_v4 }
 0xed1   : > { %v2826_v36 = vpop.eup %2825 }
 0xed2   : > { %v2828_v39 = vpop.eup %2827  ;;  %2690 = vmatmul.mubr.msk.f32.vlgmr.msra.gmra.mrb[24].mxu1 %vm132_vm1, %v2826_v36  ;;  %v2178_v24 = vsel %vm132_vm1, %v2826_v36, 0.0 }
 0xed3   : > { %2179 = vadd.xlane.f32.xlu0 %v2178_v24  ;;  %v1069_v32 = vmul.f32 %v2828_v39, %v2955_v31  ;;  %v2830_v44 = vpop.eup %2829 }
 0xed4   : > { %v1627_v46 = vmul.f32 %v2830_v44, %v2955_v31  ;;  %v3313_v53 = vpop.eup %2831 }
 0xed5   : > { %v2186_v56 = vmul.f32 %v3313_v53, %v2955_v31  ;;  %v2834_v9 = vpop.eup %2833 }
 0xed6   : > { %v2187_v54 = vmul.f32 %v2834_v9, %v2955_v31  ;;  %v2836_v13 = vpop.eup %2835 }
 0xed7   : > { %1154 = vrot.lane.b32.xlu1 %v1069_v32, %s2870_s19  ;;  %v521_v27 = vmul.f32 %v2836_v13, %v2955_v31  ;;  %v2838_v50 = vpop.eup %2837 }
 0xed8   : > { %v520_v18 = vmul.f32 %v2838_v50, %v2955_v31 }
 0xedb   : > { %1633 = vrot.lane.b32.xlu1 %v1627_v46, %s2873_s22 }
 0xedf   : > { %2192 = vrot.lane.b32.xlu1 %v2186_v56, %s2876_s25 }
 0xee8   : > { %v1062_v10 = vpop.xlane.xlu1 %1061 }
 0xee9   : > { %2272 = vrot.lane.b32.xlu0 %v2187_v54, %s2876_s25  ;;  %v1066_v11 = vadd.f32 %v3291_v15, %v1062_v10 }
 0xeeb   : > { %2839 = vrcp.f32 %v1066_v11 }
 0xeec   : > { %v1624_v7 = vpop.xlane.xlu1 %1623 }
 0xeed   : > { %v1626_v59 = vadd.f32 %v3295_v40, %v1624_v7 }
 0xeef   : > { %2841 = vrcp.f32 %v1626_v59 }
 0xef5   : > { %v1065_v8 = vpop.xlane.xlu0 %1064  ;;  %v2840_v21 = vpop.eup %2839 }
 0xef6   : > { %v1067_v40 = vadd.f32 %v2828_v39, %v1065_v8 }
 0xef8   : > { %2843 = vrcp.f32 %v1067_v40 }
 0xef9   : > { %v1621_v51 = vpop.xlane.xlu0 %1620 }
 0xefd   : > { %v1075_v37 = vpop.permute.xlu0 %1074 }
 0xefe   : > { %v1147_v5 = vadd.f32 %v3129_v25, %v1075_v37  ;;  %v1625_v25 = vadd.f32 %v2830_v44, %v1621_v51 }
 0xf00   : > { %v1231_v15 = vmul.f32 %v2840_v21, %v1147_v5  ;;  %2845 = vrcp.f32 %v1625_v25 }
 0xf01   : > { %v1714_v49 = vpop.permute.xlu0 %1713 }
 0xf02   : > { %v1786_v60 = vadd.f32 %v3270_v55, %v1714_v49 }
 0xf03   : > { %513 = vadd.xlane.f32.xlu1 %v512_v63 }
 0xf08   : > { %516 = vadd.xlane.f32.xlu0 %v515_v6 }
 0xf14   : > { %606 = vrot.lane.b32.xlu1 %v521_v27, %s2867_s13 }
 0xf18   : > { %1235 = vrot.lane.b32.xlu1 %v3091_v52, %s2877_s26  ;;  %v2842_v52 = vpop.eup %2841 }
 0xf19   : > { %v1792_v2 = vmul.f32 %v2842_v52, %v1786_v60  ;;  %v2844_v19 = vpop.eup %2843 }
 0xf1a   : > { %v2846_v55 = vpop.eup %2845 }
 0xf1e   : > { %526 = vrot.lane.b32.xlu0 %v520_v18, %s2867_s13 }
 0xf22   : > { %1242 = vrot.lane.b32.xlu0 %v1231_v15, %s2877_s26 }
 0xf26   : > { %1794 = vrot.lane.b32.xlu0 %v3181_v17, %s2878_s27 }
 0xf2a   : > { %1803 = vrot.lane.b32.xlu0 %v1792_v2, %s2878_s27 }
 0xf53   : > { %v2183_v31 = vpop.xlane.xlu1 %2182 }
 0xf54   : > { %v2185_v26 = vadd.f32 %v2834_v9, %v2183_v31 }
 0xf56   : > { %2847 = vrcp.f32 %v2185_v26 }
 0xf57   : > { %v1155_v47 = vpop.permute.xlu1 %1154 }
 0xf58   : > { %v1227_v3 = vadd.f32 %v3173_v14, %v1155_v47 }
 0xf5a   : > { %v1233_v20 = vmul.f32 %v2844_v19, %v1227_v3 }
 0xf5b   : > { %v1634_v42 = vpop.permute.xlu1 %1633 }
 0xf5c   : > { %v1706_v22 = vadd.f32 %v3223_v57, %v1634_v42  ;;  %1244 = vrot.lane.b32.xlu1 %v1233_v20, %s2877_s26 }
 0xf5e   : > { %v1790_v23 = vmul.f32 %v2846_v55, %v1706_v22 }
 0xf5f   : > { %v2193_v28 = vpop.permute.xlu1 %2192 }
 0xf60   : > { %1801 = vrot.lane.b32.xlu1 %v1790_v23, %s2878_s27  ;;  %v2180_v17 = vpop.xlane.xlu0 %2179  ;;  %v2848_v36 = vpop.eup %2847 }
 0xf61   : > { %v2184_v0 = vadd.f32 %v3313_v53, %v2180_v17 }
 0xf64   : > { %2353 = vrot.lane.b32.xlu1 %v3273_v61, %s2879_s28  ;;  %v2273_v14 = vpop.permute.xlu0 %2272 }
 0xf90   : > { %v514_v29 = vpop.xlane.xlu1 %513 }
 0xf91   : > { %v518_v30 = vadd.f32 %v2838_v50, %v514_v29 }
 0xf93   : > { %2849 = vrcp.f32 %v518_v30 }
 0xf94   : > { %v607_v33 = vpop.permute.xlu1 %606 }
 0xf95   : > { %v517_v12 = vpop.xlane.xlu0 %516  ;;  %v679_v45 = vadd.f32 %v3085_v48, %v607_v33 }
 0xf96   : > { %v519_v57 = vadd.f32 %v2836_v13, %v517_v12 }
 0xf98   : > { %2851 = vrcp.f32 %v519_v57  ;;  %v1236_v34 = vpop.permute.xlu1 %1235  ;;  %v2344_v35 = vpop.f32.mrb[20].mxu0 }
 0xf99   : > { %1239 = vst.msk [vmem:[%s2991_s18] sm:$0x1] %vm1238_vm8, %v1236_v34  ;;  %v2345_v61 = vadd.f32 %v2344_v35, %v2273_v14  ;;  %v527_v38 = vpop.permute.xlu0 %526  ;;  %v2696_v41 = vpop.f32.mrb[21].mxu0  ;;  %2853 = vrcp.f32 %v2184_v0 }
 0xf9a   : > { %v599_v43 = vadd.f32 %v3052_v16, %v527_v38 }
 0xf9b   : > { %v2351_v39 = vmul.f32 %v2848_v36, %v2345_v61 }
 0xf9d   : > { %v2850_v24 = vpop.eup %2849  ;;  %v1243_v32 = vpop.permute.xlu0 %1242  ;;  %2362 = vrot.lane.b32.xlu1 %v2351_v39, %s2879_s28 }
 0xf9e   : > { %v683_v44 = vmul.f32 %v2850_v24, %v599_v43 }
 0xfa0   : > { %688 = vst.msk [vmem:[%s2991_s18 + $0x1] sm:$0xff] %vm132_vm1, %v683_v44 }
 0xfa1   : > { %1249 = vst.msk [vmem:[%s2991_s18 + $0x1] sm:$0xff] %vm1248_vm9, %v1243_v32  ;;  %v1795_v46 = vpop.permute.xlu0 %1794 }
 0xfa2   : > { %v2852_v53 = vpop.eup %2851  ;;  %1798 = vst.msk [vmem:[%s2991_s18] sm:$0x1] %vm1797_vm10, %v1795_v46 }
 0xfa3   : > { %v685_v16 = vmul.f32 %v2852_v53, %v679_v45  ;;  %v2854_v58 = vpop.eup %2853 }
 0xfa5   : > { %v2264_v56 = vpop.f32.mrb[24].mxu1  ;;  %689 = vst.msk [vmem:[%s2991_s18 + $0x9] sm:$0xff] %vm132_vm1, %v685_v16  ;;  %v1804_v63 = vpop.permute.xlu0 %1803 }
 0xfa6   : > { %v2265_v9 = vadd.f32 %v2264_v56, %v2193_v28  ;;  %v2691_v54 = vpop.f32.mrb[25].mxu1 }
 0xfa8   : > { %v2349_v62 = vmul.f32 %v2854_v58, %v2265_v9 }
 0xfaa   : > { %2360 = vrot.lane.b32.xlu0 %v2349_v62, %s2879_s28 }
 0xfce   : > { %v1245_v48 = vpop.permute.xlu1 %1244 }
 0xfcf   : > { %1250 = vst.msk [vmem:[%s2991_s18 + $0x9] sm:$0xff] %vm1248_vm9, %v1245_v48 }
 0xfd0   : > { %1809 = vst.msk [vmem:[%s2991_s18 + $0x9] sm:$0xff] %vm1807_vm11, %v1804_v63 }
 0xfd2   : > { %v1802_v1 = vpop.permute.xlu1 %1801 }
 0xfd3   : > { %1808 = vst.msk [vmem:[%s2991_s18 + $0x1] sm:$0xff] %vm1807_vm11, %v1802_v1 }
 0xfd6   : > { %v2354_v6 = vpop.permute.xlu1 %2353 }
 0xfd7   : > { %2357 = vst.msk [vmem:[%s2991_s18] sm:$0x1] %vm2356_vm12, %v2354_v6 }
0x100f   : > { %v2363_v4 = vpop.permute.xlu1 %2362 }
0x1010   : > { %2368 = vst.msk [vmem:[%s2991_s18 + $0x9] sm:$0xff] %vm2366_vm13, %v2363_v4 }
0x101c   : > { %v2361_v8 = vpop.permute.xlu0 %2360 }
0x101d   : > { %2367 = vst.msk [vmem:[%s2991_s18 + $0x1] sm:$0xff] %vm2366_vm13, %v2361_v8 }
0x101e PF: > { %s11_s6 = sadd.s32 1, %s2861_s6  }
0x101f   : > { %p8_p4 = scmp.ge.s32.totalorder %s11_s6, 4  }
0x1021   :  { %10 = sbr.rel (!%p8_p4) target bundleno = 1 (0x1), region = 54 }

// kernel: _lambda_.15
= control target key start
LH: loop header
LB: loop body
LE: loop exit
PB: predicated region body
PF: predicated region fallthrough
CT: control target
= control target key end

     0   :  { %vm21_vm0 = vcmask 261120   ;;  %v307_v0 = vmov 0.0|0.0   ;;  %v308_v4 = vmov 0.0   ;;  %vm309_vm1 = vmmov 0   ;;  %s461_s1 = inlined_call_operand.vmem [shape: f32[128,32], index: 1, kind: input, shape index: {}]   ;;  %s462_s0 = inlined_call_operand.vmem [shape: f32[34,128], index: 0, kind: input, shape index: {}]   ;;  %s463_s2 = inlined_call_operand.vmem [shape: f32[1,32], index: 2, kind: input, shape index: {}]   ;;  %s464_s3 = inlined_call_operand.vmem [shape: f32[34,32], index: 3, kind: input, shape index: {}]   ;;  %s465_s4 = inlined_call_operand.vmem [shape: f32[34,32], index: 4, kind: output, shape index: {}]  }
   0x1   :  { %264 = vmatprep.subr.bf16.mxu0 %v307_v0  ;;  %v38_v1 = vld [vmem:[%s461_s1] sm:$0xff]  ;;  %v39_v2 = vld [vmem:[%s461_s1 + $0x8] sm:$0xff]  ;;  %288 = vmatprep.subr.bf16.mxu1 %v307_v0  ;;  %v40_v3 = vld [vmem:[%s461_s1 + $0x10] sm:$0xff]  ;;  %22 = vst.msk [vmem:[#allocation2] sm:$0xff] %vm21_vm0, %v308_v4  ;;  %vm26_vm2 = vcmask 254976  }
   0x2   :  { %23 = vst.msk [vmem:[#allocation2 + $0x8] sm:$0xff] %vm21_vm0, %v308_v4  ;;  %24 = vst.msk [vmem:[#allocation2 + $0x10] sm:$0xff] %vm21_vm0, %v308_v4  ;;  %v265_v5 = vpack.c.bf16 %v39_v2, %v38_v1  ;;  %v41_v6 = vld [vmem:[%s461_s1 + $0x18] sm:$0xff]  ;;  %249 = vmatprep.mubr.msk.f32.mxu0 %vm309_vm1, %v308_v4  ;;  %258 = vmatprep.mubr.msk.f32.mxu1 %vm309_vm1, %v308_v4  ;;  %v42_v8 = vld [vmem:[%s461_s1 + $0x20] sm:$0xff] }
   0x3   :  { %25 = vst.msk [vmem:[#allocation2 + $0x18] sm:$0xff] %vm21_vm0, %v308_v4  ;;  %v268_v7 = vpack.c.bf16 %v41_v6, %v40_v3  ;;  %v43_v9 = vld [vmem:[%s461_s1 + $0x28] sm:$0xff]  ;;  %v44_v11 = vld [vmem:[%s461_s1 + $0x30] sm:$0xff]  ;;  %v45_v12 = vld [vmem:[%s461_s1 + $0x38] sm:$0xff] }
   0x4   :  { %266 = vmatpush3.bf16.msra.mxu0 %v265_v5  ;;  %296 = vmatpush3.bf16.msra.mxu1 %v265_v5  ;;  %v271_v10 = vpack.c.bf16 %v43_v9, %v42_v8  ;;  %v274_v13 = vpack.c.bf16 %v45_v12, %v44_v11  ;;  %v46_v14 = vld [vmem:[%s461_s1 + $0x40] sm:$0xff]  ;;  %v47_v15 = vld [vmem:[%s461_s1 + $0x48] sm:$0xff]  ;;  %v48_v17 = vld [vmem:[%s461_s1 + $0x50] sm:$0xff]  ;;  %27 = vst.msk [vmem:[#allocation2 + $0x20] sm:$0x3] %vm26_vm2, %v308_v4 }
   0x5   :  { %267 = vmatprep.subr.bf16.mxu0 %v307_v0  ;;  %289 = vmatprep.subr.bf16.mxu1 %v307_v0  ;;  %v277_v16 = vpack.c.bf16 %v47_v15, %v46_v14  ;;  %v49_v18 = vld [vmem:[%s461_s1 + $0x58] sm:$0xff]  ;;  %v50_v20 = vld [vmem:[%s461_s1 + $0x60] sm:$0xff]  ;;  %v51_v21 = vld [vmem:[%s461_s1 + $0x68] sm:$0xff] }
   0x6   :  { %v280_v19 = vpack.c.bf16 %v49_v18, %v48_v17  ;;  %v283_v22 = vpack.c.bf16 %v51_v21, %v50_v20  ;;  %v52_v23 = vld [vmem:[%s461_s1 + $0x70] sm:$0xff]  ;;  %v53_v24 = vld [vmem:[%s461_s1 + $0x78] sm:$0xff]  ;;  %v33_v26 = vld [vmem:[%s462_s0] sm:$0xff] }
   0x7   :  { %v286_v25 = vpack.c.bf16 %v53_v24, %v52_v23  ;;  %v36_v27 = vld [vmem:[%s462_s0 + $0x18] sm:$0xff]  ;;  %v34_v28 = vld [vmem:[%s462_s0 + $0x8] sm:$0xff]  ;;  %v37_v29 = vld [vmem:[%s462_s0 + $0x20] sm:$0x3] }
   0x8   :  { %269 = vmatpush3.bf16.msra.mxu0 %v268_v7  ;;  %297 = vmatpush3.bf16.msra.mxu1 %v268_v7  ;;  %v35_v30 = vld [vmem:[%s462_s0 + $0x10] sm:$0xff]  ;;  %v28_v31 = vld [vmem:[#allocation2] sm:$0xff]  ;;  %v179_v55 = vld [vmem:[%s464_s3 + $0x18] sm:$0xff] }
   0x9   :  { %270 = vmatprep.subr.bf16.mxu0 %v307_v0  ;;  %290 = vmatprep.subr.bf16.mxu1 %v307_v0  ;;  %v29_v39 = vld [vmem:[#allocation2 + $0x8] sm:$0xff]  ;;  %v30_v47 = vld [vmem:[#allocation2 + $0x10] sm:$0xff]  ;;  %v195_v48 = vld [vmem:[%s463_s2] ss:$0 sm:$0xff] }
   0xa   :  { %v31_v32 = vld [vmem:[#allocation2 + $0x18] sm:$0xff]  ;;  %v176_v50 = vld [vmem:[%s464_s3] sm:$0xff]  ;;  %v177_v58 = vld [vmem:[%s464_s3 + $0x8] sm:$0xff] }
   0xb   :  { %v32_v40 = vld [vmem:[#allocation2 + $0x20] sm:$0x3] }
   0xc   :  { %272 = vmatpush3.bf16.msra.mxu0 %v271_v10  ;;  %298 = vmatpush3.bf16.msra.mxu1 %v271_v10  ;;  %v180_v63 = vld [vmem:[%s464_s3 + $0x20] sm:$0x3] }
   0xd   :  { %273 = vmatprep.subr.bf16.mxu0 %v307_v0  ;;  %291 = vmatprep.subr.bf16.mxu1 %v307_v0 }
  0x10   :  { %275 = vmatpush3.bf16.msra.mxu0 %v274_v13  ;;  %299 = vmatpush3.bf16.msra.mxu1 %v274_v13 }
  0x11   :  { %276 = vmatprep.subr.bf16.mxu0 %v307_v0  ;;  %292 = vmatprep.subr.bf16.mxu1 %v307_v0 }
  0x14   :  { %278 = vmatpush3.bf16.msra.mxu0 %v277_v16  ;;  %300 = vmatpush3.bf16.msra.mxu1 %v277_v16 }
  0x15   :  { %279 = vmatprep.subr.bf16.mxu0 %v307_v0  ;;  %293 = vmatprep.subr.bf16.mxu1 %v307_v0 }
  0x18   :  { %281 = vmatpush3.bf16.msra.mxu0 %v280_v19  ;;  %301 = vmatpush3.bf16.msra.mxu1 %v280_v19 }
  0x19   :  { %282 = vmatprep.subr.bf16.mxu0 %v307_v0  ;;  %294 = vmatprep.subr.bf16.mxu1 %v307_v0 }
  0x1c   :  { %284 = vmatpush3.bf16.msra.mxu0 %v283_v22  ;;  %302 = vmatpush3.bf16.msra.mxu1 %v283_v22 }
  0x1d   :  { %285 = vmatprep.subr.bf16.mxu0 %v307_v0  ;;  %295 = vmatprep.subr.bf16.mxu1 %v307_v0 }
  0x20   :  { %287 = vmatpush3.bf16.msra.mxu0 %v286_v25  ;;  %303 = vmatpush3.bf16.msra.mxu1 %v286_v25 }
  0x23   :  { %250 = vmatmul.mubr.f32.vlgmr.msra.gmra.mrb[0].mxu0 %v33_v26  ;;  %259 = vmatmul.mubr.f32.vlgmr.msra.gmra.mrb[0].mxu1 %v36_v27 }
  0x24   :  { %252 = vmatprep.mubr.msk.f32.mxu0 %vm309_vm1, %v308_v4  ;;  %261 = vmatprep.mubr.msk.f32.mxu1 %vm309_vm1, %v308_v4 }
  0x27   :  { %253 = vmatmul.mubr.f32.gmra.mrb[2].mxu0 %v34_v28  ;;  %262 = vmatmul.mubr.f32.gmra.mrb[2].mxu1 %v37_v29 }
  0x28   :  { %255 = vmatprep.mubr.msk.f32.mxu0 %vm309_vm1, %v308_v4  ;;  %v178_v4 = vld [vmem:[%s464_s3 + $0x10] sm:$0xff] }
  0x2b   :  { %256 = vmatmul.mubr.f32.gmra.mrb[4].mxu0 %v35_v30 }
  0xf6   :  { %v120_v33 = vpop.f32.mrb[0].mxu0  ;;  %v135_v34 = vpop.f32.mrb[0].mxu1 }
  0xf7   :  { %v144_v35 = vadd.f32 %v120_v33, %v28_v31  ;;  %v251_v36 = vpop.f32.mrb[1].mxu0  ;;  %v147_v37 = vadd.f32 %v135_v34, %v31_v32  ;;  %v260_v38 = vpop.f32.mrb[1].mxu1 }
  0xf9   :  { %150 = vst.msk [vmem:[#allocation2] sm:$0xff] %vm21_vm0, %v144_v35  ;;  %153 = vst.msk [vmem:[#allocation2 + $0x18] sm:$0xff] %vm21_vm0, %v147_v37 }
  0xfa   :  { %v125_v41 = vpop.f32.mrb[2].mxu0  ;;  %v140_v42 = vpop.f32.mrb[2].mxu1 }
  0xfb   :  { %v145_v43 = vadd.f32 %v125_v41, %v29_v39  ;;  %v254_v44 = vpop.f32.mrb[3].mxu0  ;;  %v148_v45 = vadd.f32 %v140_v42, %v32_v40  ;;  %v263_v46 = vpop.f32.mrb[3].mxu1 }
  0xfd   :  { %151 = vst.msk [vmem:[#allocation2 + $0x8] sm:$0xff] %vm21_vm0, %v145_v43 }
  0xfe   :  { %155 = vst.msk [vmem:[#allocation2 + $0x20] sm:$0x3] %vm26_vm2, %v148_v45  ;;  %v130_v49 = vpop.f32.mrb[4].mxu0 }
  0xff   :  { %v146_v51 = vadd.f32 %v130_v49, %v30_v47  ;;  %v257_v52 = vpop.f32.mrb[5].mxu0 }
 0x100   :  { %v159_v53 = vld [vmem:[#allocation2] sm:$0xff]  ;;  %v162_v54 = vld [vmem:[#allocation2 + $0x18] sm:$0xff] }
 0x101   :  { %v171_v56 = vadd.f32 %v195_v48, %v159_v53  ;;  %v174_v57 = vadd.f32 %v195_v48, %v162_v54  ;;  %152 = vst.msk [vmem:[#allocation2 + $0x10] sm:$0xff] %vm21_vm0, %v146_v51 }
 0x103   :  { %v181_v59 = vadd.f32 %v176_v50, %v171_v56  ;;  %v184_v60 = vadd.f32 %v179_v55, %v174_v57 }
 0x104   :  { %v160_v61 = vld [vmem:[#allocation2 + $0x8] sm:$0xff] }
 0x105   :  { %v163_v62 = vld [vmem:[#allocation2 + $0x20] sm:$0x3]  ;;  %v172_v0 = vadd.f32 %v195_v48, %v160_v61  ;;  %186 = vst.msk [vmem:[%s465_s4] sm:$0xff] %vm21_vm0, %v181_v59  ;;  %189 = vst.msk [vmem:[%s465_s4 + $0x18] sm:$0xff] %vm21_vm0, %v184_v60 }
 0x106   :  { %v175_v1 = vadd.f32 %v195_v48, %v163_v62 }
 0x107   :  { %v182_v2 = vadd.f32 %v177_v58, %v172_v0 }
 0x108   :  { %v185_v3 = vadd.f32 %v180_v63, %v175_v1  ;;  %v161_v5 = vld [vmem:[#allocation2 + $0x10] sm:$0xff] }
 0x109   :  { %187 = vst.msk [vmem:[%s465_s4 + $0x8] sm:$0xff] %vm21_vm0, %v182_v2  ;;  %v173_v6 = vadd.f32 %v195_v48, %v161_v5 }
 0x10a   :  { %190 = vst.msk [vmem:[%s465_s4 + $0x20] sm:$0x3] %vm26_vm2, %v185_v3 }
 0x10b   :  { %v183_v7 = vadd.f32 %v178_v4, %v173_v6 }
 0x10d   :  { %188 = vst.msk [vmem:[%s465_s4 + $0x10] sm:$0xff] %vm21_vm0, %v183_v7 }

// kernel: _lambda_.14
= control target key start
LH: loop header
LB: loop body
LE: loop exit
PB: predicated region body
PF: predicated region fallthrough
CT: control target
= control target key end

     0   :  { %vm25_vm0 = vcmask 261120   ;;  %vm38_vm1 = vcmask 254976   ;;  %v340_v40 = vmov 0.0|0.0   ;;  %vm341_vm2 = vmmov 0   ;;  %s469_s0 = inlined_call_operand.vmem [shape: f32[34,32], index: 0, kind: input, shape index: {}]   ;;  %s470_s3 = inlined_call_operand.vmem [shape: f32[32,128], index: 3, kind: input, shape index: {}]   ;;  %s471_s1 = inlined_call_operand.vmem [shape: f32[1,32], index: 1, kind: input, shape index: {}]   ;;  %s472_s2 = inlined_call_operand.vmem [shape: f32[1,32], index: 2, kind: input, shape index: {}]   ;;  %s473_s4 = inlined_call_operand.vmem [shape: f32[1,128], index: 4, kind: input, shape index: {}]   ;;  %s474_s5 = inlined_call_operand.vmem [shape: f32[34,128], index: 5, kind: output, shape index: {}]  }
   0x1   :  { %v20_v0 = vld [vmem:[%s469_s0] sm:$0xff]  ;;  %v23_v1 = vld [vmem:[%s469_s0 + $0x18] sm:$0xff]  ;;  %v21_v2 = vld [vmem:[%s469_s0 + $0x8] sm:$0xff]  ;;  %307 = vmatprep.subr.bf16.mxu0 %v340_v40  ;;  %313 = vmatprep.subr.bf16.mxu1 %v340_v40  ;;  %v342_v42 = vmov 0.0  }
   0x2   :  { %v26_v3 = vsel %vm25_vm0, %v20_v0, 0.0  ;;  %v35_v4 = vsel %vm25_vm0, %v23_v1, 0.0  ;;  %v22_v5 = vld [vmem:[%s469_s0 + $0x10] sm:$0xff]  ;;  %v29_v6 = vsel %vm25_vm0, %v21_v2, 0.0  ;;  %v24_v8 = vld [vmem:[%s469_s0 + $0x20] sm:$0x3]  ;;  %292 = vmatprep.mubr.msk.f32.mxu0 %vm341_vm2, %v342_v42  ;;  %301 = vmatprep.mubr.msk.f32.mxu1 %vm341_vm2, %v342_v42 }
   0x3   :  { %27 = vadd.xlane.f32.xlu0 %v26_v3  ;;  %36 = vadd.xlane.f32.xlu1 %v35_v4  ;;  %v32_v7 = vsel %vm25_vm0, %v22_v5, 0.0  ;;  %v39_v9 = vsel %vm38_vm1, %v24_v8, 0.0  ;;  %v117_v35 = vld [vmem:[%s470_s3] sm:$0xff]  ;;  %v118_v36 = vld [vmem:[%s470_s3 + $0x8] sm:$0xff]  ;;  %v119_v38 = vld [vmem:[%s470_s3 + $0x10] sm:$0xff] }
   0x4   :  { %v308_v37 = vpack.c.bf16 %v118_v36, %v117_v35  ;;  %v120_v39 = vld [vmem:[%s470_s3 + $0x18] sm:$0xff]  ;;  %v267_v59 = vld [vmem:[%s471_s1] ss:$0 sm:$0xff] }
   0x5   :  { %v311_v41 = vpack.c.bf16 %v120_v39, %v119_v38  ;;  %v268_v61 = vld [vmem:[%s472_s2] ss:$0 sm:$0xff] }
   0x6   :  { %309 = vmatpush3.bf16.msra.mxu0 %v308_v37  ;;  %315 = vmatpush3.bf16.msra.mxu1 %v308_v37 }
   0x7   :  { %30 = vadd.xlane.f32.xlu0 %v29_v6  ;;  %33 = vadd.xlane.f32.xlu1 %v32_v7 }
   0x8   :  { %310 = vmatprep.subr.bf16.mxu0 %v340_v40  ;;  %314 = vmatprep.subr.bf16.mxu1 %v340_v40 }
   0xa   :  { %312 = vmatpush3.bf16.msra.mxu0 %v311_v41  ;;  %316 = vmatpush3.bf16.msra.mxu1 %v311_v41 }
   0xb   :  { %40 = vadd.xlane.f32.xlu0 %v39_v9 }
  0x90   :  { %v28_v10 = vpop.xlane.xlu0 %27  ;;  %v37_v11 = vpop.xlane.xlu1 %36 }
  0x91   :  { %v43_v12 = vmul.f32 0.03125, %v28_v10  ;;  %v46_v13 = vmul.f32 0.03125, %v37_v11 }
  0x93   :  { %v393_v14 = vsub.f32 %v20_v0, %v43_v12  ;;  %v395_v15 = vsub.f32 %v23_v1, %v46_v13 }
  0x94   :  { %v31_v16 = vpop.xlane.xlu0 %30  ;;  %v34_v17 = vpop.xlane.xlu1 %33 }
  0x95   :  { %v44_v18 = vmul.f32 0.03125, %v31_v16  ;;  %v45_v19 = vmul.f32 0.03125, %v34_v17  ;;  %v53_v20 = vmul.f32 %v393_v14, %v393_v14  ;;  %v56_v21 = vmul.f32 %v395_v15, %v395_v15  ;;  %v269_v16 = vld [vmem:[%s473_s4] ss:$0 sm:$0xff] }
  0x97   :  { %v401_v22 = vsub.f32 %v21_v2, %v44_v18  ;;  %v403_v23 = vsub.f32 %v22_v5, %v45_v19  ;;  %v58_v24 = vsel %vm25_vm0, %v53_v20, 0.0  ;;  %v67_v27 = vsel %vm25_vm0, %v56_v21, 0.0 }
  0x98   :  { %59 = vadd.xlane.f32.xlu1 %v58_v24  ;;  %v41_v25 = vpop.xlane.xlu0 %40 }
  0x99   :  { %v47_v26 = vmul.f32 0.03125, %v41_v25  ;;  %v54_v28 = vmul.f32 %v401_v22, %v401_v22  ;;  %v55_v29 = vmul.f32 %v403_v23, %v403_v23 }
  0x9b   :  { %v411_v30 = vsub.f32 %v24_v8, %v47_v26  ;;  %v61_v31 = vsel %vm25_vm0, %v54_v28, 0.0  ;;  %v64_v32 = vsel %vm25_vm0, %v55_v29, 0.0 }
  0x9c   :  { %68 = vadd.xlane.f32.xlu1 %v67_v27  ;;  %62 = vadd.xlane.f32.xlu0 %v61_v31 }
  0x9d   :  { %v57_v33 = vmul.f32 %v411_v30, %v411_v30 }
  0x9f   :  { %v70_v34 = vsel %vm38_vm1, %v57_v33, 0.0 }
  0xa0   :  { %65 = vadd.xlane.f32.xlu0 %v64_v32  ;;  %71 = vadd.xlane.f32.xlu1 %v70_v34 }
 0x125   :  { %v60_v43 = vpop.xlane.xlu1 %59 }
 0x126   :  { %v73_v44 = vmul.f32 0.03125, %v60_v43 }
 0x128   :  { %v78_v45 = vadd.f32 1e-05, %v73_v44 }
 0x129   :  { %v69_v46 = vpop.xlane.xlu1 %68  ;;  %v63_v47 = vpop.xlane.xlu0 %62 }
 0x12a   :  { %320 = vrsqrt.f32 %v78_v45  ;;  %v76_v48 = vmul.f32 0.03125, %v69_v46  ;;  %v74_v49 = vmul.f32 0.03125, %v63_v47 }
 0x12c   :  { %v81_v50 = vadd.f32 1e-05, %v76_v48  ;;  %v79_v51 = vadd.f32 1e-05, %v74_v49 }
 0x12d   :  { %v72_v52 = vpop.xlane.xlu1 %71  ;;  %v66_v53 = vpop.xlane.xlu0 %65 }
 0x12e   :  { %322 = vrsqrt.f32 %v81_v50  ;;  %v77_v54 = vmul.f32 0.03125, %v72_v52  ;;  %v75_v55 = vmul.f32 0.03125, %v66_v53 }
 0x12f   :  { %324 = vrsqrt.f32 %v79_v51 }
 0x130   :  { %v82_v56 = vadd.f32 1e-05, %v77_v54  ;;  %v80_v57 = vadd.f32 1e-05, %v75_v55 }
 0x132   :  { %326 = vrsqrt.f32 %v82_v56 }
 0x133   :  { %328 = vrsqrt.f32 %v80_v57 }
 0x134   :  { %v321_v58 = vpop.eup %320 }
 0x135   :  { %v88_v60 = vmul.f32 %v321_v58, %v393_v14 }
 0x137   :  { %v100_v62 = vmul.f32 %v267_v59, %v88_v60 }
 0x138   :  { %v323_v63 = vpop.eup %322 }
 0x139   :  { %v325_v0 = vpop.eup %324  ;;  %v112_v1 = vadd.f32 %v268_v61, %v100_v62  ;;  %v91_v2 = vmul.f32 %v323_v63, %v395_v15 }
 0x13a   :  { %v89_v3 = vmul.f32 %v325_v0, %v401_v22 }
 0x13b   :  { %293 = vmatmul.mubr.msk.f32.vlgmr.msra.gmra.mrb[0].mxu0 %vm25_vm0, %v112_v1  ;;  %v103_v4 = vmul.f32 %v267_v59, %v91_v2 }
 0x13c   :  { %v327_v5 = vpop.eup %326  ;;  %295 = vmatprep.mubr.msk.f32.mxu0 %vm341_vm2, %v342_v42  ;;  %v101_v6 = vmul.f32 %v267_v59, %v89_v3 }
 0x13d   :  { %v329_v7 = vpop.eup %328  ;;  %v115_v8 = vadd.f32 %v268_v61, %v103_v4  ;;  %v92_v9 = vmul.f32 %v327_v5, %v411_v30 }
 0x13e   :  { %v113_v10 = vadd.f32 %v268_v61, %v101_v6  ;;  %v90_v11 = vmul.f32 %v329_v7, %v403_v23 }
 0x13f   :  { %302 = vmatmul.mubr.msk.f32.vlgmr.msra.gmra.mrb[0].mxu1 %vm25_vm0, %v115_v8  ;;  %v104_v12 = vmul.f32 %v267_v59, %v92_v9 }
 0x140   :  { %296 = vmatmul.mubr.msk.f32.gmra.mrb[2].mxu0 %vm25_vm0, %v113_v10  ;;  %304 = vmatprep.mubr.msk.f32.mxu1 %vm341_vm2, %v342_v42  ;;  %v102_v13 = vmul.f32 %v267_v59, %v90_v11 }
 0x141   :  { %298 = vmatprep.mubr.msk.f32.mxu0 %vm341_vm2, %v342_v42  ;;  %v116_v14 = vadd.f32 %v268_v61, %v104_v12 }
 0x142   :  { %v114_v15 = vadd.f32 %v268_v61, %v102_v13 }
 0x143   :  { %305 = vmatmul.mubr.msk.f32.gmra.mrb[2].mxu1 %vm25_vm0, %v116_v14 }
 0x144   :  { %299 = vmatmul.mubr.msk.f32.gmra.mrb[4].mxu0 %vm25_vm0, %v114_v15 }
 0x20e   :  { %v209_v17 = vpop.f32.mrb[0].mxu0 }
 0x20f   :  { %v210_v18 = vadd.f32 %v269_v16, %v209_v17  ;;  %v294_v19 = vpop.f32.mrb[1].mxu0 }
 0x211   :  { %v238_v20 = vmul.f32 0.70710677, %v210_v18  ;;  %v233_v38 = vmul.f32 0.5, %v210_v18 }
 0x212   :  { %v224_v21 = vpop.f32.mrb[0].mxu1 }
 0x213   :  { %330 = verf.f32 %v238_v20  ;;  %v214_v22 = vpop.f32.mrb[2].mxu0  ;;  %v225_v23 = vadd.f32 %v269_v16, %v224_v21  ;;  %v303_v24 = vpop.f32.mrb[1].mxu1 }
 0x214   :  { %v215_v25 = vadd.f32 %v269_v16, %v214_v22  ;;  %v297_v26 = vpop.f32.mrb[3].mxu0 }
 0x215   :  { %v241_v27 = vmul.f32 0.70710677, %v225_v23  ;;  %v236_v43 = vmul.f32 0.5, %v225_v23 }
 0x216   :  { %v239_v28 = vmul.f32 0.70710677, %v215_v25  ;;  %v229_v29 = vpop.f32.mrb[2].mxu1  ;;  %v234_v45 = vmul.f32 0.5, %v215_v25 }
 0x217   :  { %332 = verf.f32 %v241_v27  ;;  %v219_v30 = vpop.f32.mrb[4].mxu0  ;;  %v230_v31 = vadd.f32 %v269_v16, %v229_v29  ;;  %v306_v32 = vpop.f32.mrb[3].mxu1 }
 0x218   :  { %334 = verf.f32 %v239_v28  ;;  %v220_v33 = vadd.f32 %v269_v16, %v219_v30  ;;  %v300_v34 = vpop.f32.mrb[5].mxu0 }
 0x219   :  { %v242_v35 = vmul.f32 0.70710677, %v230_v31  ;;  %v237_v51 = vmul.f32 0.5, %v230_v31 }
 0x21a   :  { %v240_v36 = vmul.f32 0.70710677, %v220_v33  ;;  %v235_v53 = vmul.f32 0.5, %v220_v33 }
 0x21b   :  { %336 = verf.f32 %v242_v35 }
 0x21c   :  { %338 = verf.f32 %v240_v36 }
 0x21d   :  { %v331_v37 = vpop.eup %330 }
 0x21e   :  { %v248_v39 = vadd.f32 1.0, %v331_v37 }
 0x220   :  { %v253_v40 = vmul.f32 %v248_v39, %v233_v38 }
 0x221   :  { %v333_v41 = vpop.eup %332 }
 0x222   :  { %v335_v42 = vpop.eup %334  ;;  %258 = vst [vmem:[%s474_s5] sm:$0xff] %v253_v40  ;;  %v251_v44 = vadd.f32 1.0, %v333_v41 }
 0x223   :  { %v249_v46 = vadd.f32 1.0, %v335_v42 }
 0x224   :  { %v256_v47 = vmul.f32 %v251_v44, %v236_v43 }
 0x225   :  { %v337_v48 = vpop.eup %336  ;;  %v254_v49 = vmul.f32 %v249_v46, %v234_v45 }
 0x226   :  { %v339_v50 = vpop.eup %338  ;;  %261 = vst [vmem:[%s474_s5 + $0x18] sm:$0xff] %v256_v47  ;;  %v252_v52 = vadd.f32 1.0, %v337_v48 }
 0x227   :  { %259 = vst [vmem:[%s474_s5 + $0x8] sm:$0xff] %v254_v49  ;;  %v250_v54 = vadd.f32 1.0, %v339_v50 }
 0x228   :  { %v257_v55 = vmul.f32 %v252_v52, %v237_v51 }
 0x229   :  { %v255_v56 = vmul.f32 %v250_v54, %v235_v53 }
 0x22a   :  { %262 = vst [vmem:[%s474_s5 + $0x20] sm:$0x3] %v257_v55 }
 0x22b   :  { %260 = vst [vmem:[%s474_s5 + $0x10] sm:$0xff] %v255_v56 }

// kernel: _lambda_.9
= control target key start
LH: loop header
LB: loop body
LE: loop exit
PB: predicated region body
PF: predicated region fallthrough
CT: control target
= control target key end

     0   :  { %s8774_s6 = smov 0   ;;  %s10568_s0 = inlined_call_operand.vmem [shape: f32[2,17,96], index: 0, kind: input, shape index: {}]   ;;  %s10569_s1 = inlined_call_operand.vmem [shape: f32[2,17,32], index: 1, kind: output, shape index: {}]  }
   0x1 LB: > { %s7717_s7 = sadd.s32 4294967295, %s8743_s6   ;;  %p7721_p0 = scmp.ge.s32.totalorder %s8743_s6, 1  ;;  %s8743_s6 = sphi %s8774_s6, %s11_s6  }
   0x2   : > { %p87_p1 = scmp.lt.s32.totalorder %s8743_s6, 3 }
   0x4   : > { %p88_p2 = pnand %p7721_p0, %p87_p1 }
   0x6   : > { %91 = sbr.rel (%p88_p2) target bundleno = 4253 (0x109d), region = 24 }
   0xd   : > { %p107_p3 = scmp.lt.s32.totalorder %s7717_s7, 1  ;;  %v10570_v0 = vmov 0.0|0.0   ;;  %s8746_s12 = smov 96   ;;  %vm8747_vm0 = vmmov 0   ;;  %v10572_v4 = vmov 0.0   ;;  %vm132_vm1 = vcmask 64512  }
   0xe   : > { %8430 = vmatprep.subr.bf16.mxu0 %v10570_v0  ;;  %8434 = vmatprep.subr.bf16.mxu1 %v10570_v0  ;;  %vm8811_vm2 = vmpackc.low %vm132_vm1, %vm132_vm1  ;;  %v328_v13 = vlaneseq  ;;  %vm311_vm3 = vcmask 1046528   ;;  %s8749_s13 = smov 64   ;;  %vm212_vm4 = vcmask 131072   ;;  %v8750_v26 = vmov 1983009808   ;;  %s8752_s14 = smov 120  }
   0xf   : > { %s10733_s7 = smov (!%p107_p3, %s7717_s7), 1  ;;  %8044 = vmatprep.mubr.msk.f32.mxu0 %vm8747_vm0, %v10572_v4  ;;  %8053 = vmatprep.mubr.msk.f32.mxu1 %vm8747_vm0, %v10572_v4  ;;  %v326_v27 = vunpack.c.l.s4 %v8750_v26  ;;  %v8751_v38 = vmov 1934713408   ;;  %vm1158_vm5 = vcmask 58368   ;;  %vm1183_vm6 = vcmask 9216   ;;  %s8753_s18 = smov 88  }
  0x10   : > { %s8458_s8 = smul.u32 24, %s10733_s7  ;;  %v329_v18 = vshrl.u32 %v328_v13, 7  ;;  %v357_v39 = vunpack.c.l.s4 %v8751_v38  ;;  %vm236_vm7 = vcmask 1040384   ;;  %vm232_vm8 = vcmask 138240   ;;  %s8754_s19 = smov 56  }
  0x11   : > { %v327_v28 = vunpack.c.0.s8 %v326_v27  ;;  %vm2012_vm9 = vcmask 57344   ;;  %vm1312_vm10 = vcmask 1041408   ;;  %vm1308_vm11 = vcmask 15360   ;;  %s8755_s20 = smov 80   ;;  %s8756_s21 = smov 112  }
  0x12   : > { %s8792_s11 = scalar_lea.vmem %s10568_s0, %s8458_s8  ;;  %v1144_v19 = vsub.s32 0, %v329_v18  ;;  %v358_v44 = vunpack.c.0.s8 %v357_v39  ;;  %s9021_s17 = scalar_lea.vmem %s10569_s1, %s8458_s8  ;;  %vm3885_vm12 = vcmask 122944   ;;  %vm5767_vm13 = vcmask 188544  }
  0x13   : > { %v117_v1 = vld [vmem:[%s8792_s11] sm:$0xff]  ;;  %v118_v2 = vld [vmem:[%s8792_s11 + $0x8] sm:$0xff]  ;;  %v8803_v5 = vld [vmem:[%s8792_s11 + $0x10] sm:$0x1]  ;;  %v8846_v30 = vsub.s32 %v327_v28, %v329_v18  ;;  %s8757_s22 = smov 48   ;;  %s8758_s23 = smov 72  }
  0x14   : > { %v8796_v3 = vpack.i.bf16 %v118_v2, %v117_v1  ;;  %v8818_v12 = vmul.f32 0.35355338, %v117_v1  ;;  %v319_v14 = vrot.slane %v117_v1, 1  ;;  %v320_v15 = vrot.slane %v118_v2, 1  ;;  %s8759_s24 = smov 104   ;;  %s8760_s25 = smov 40  }
  0x15   : > { %v322_v17 = vrot.slane %v8803_v5, 1  ;;  %v8837_v21 = vrot.slane %v117_v1, %v1144_v19  ;;  %v121_v35 = vmul.f32 0.35355338, %v118_v2  ;;  %v122_v36 = vmul.f32 0.35355338, %v8803_v5  ;;  %s8761_s26 = smov 8  }
  0x16   : > { %8487 = vrot.lane.b32.xlu0 %v8796_v3, %s8746_s12  ;;  %v8829_v16 = vsel %vm311_vm3, %v319_v14, %v320_v15  ;;  %v312_v32 = vrot.slane %v8818_v12, 1  ;;  %v8870_v50 = vsub.s32 %v358_v44, %v329_v18  ;;  %s8762_s27 = smov 16   ;;  %s8763_s28 = smov 24   ;;  %vm3895_vm14 = vcmask 130112  }
  0x17   : > { %v8835_v20 = vsel %vm311_vm3, %v320_v15, %v322_v17  ;;  %v313_v42 = vrot.slane %v121_v35, 1  ;;  %v315_v43 = vrot.slane %v122_v36, 1  ;;  %vm5777_vm15 = vcmask 195712  }
  0x19   : > { %v8865_v48 = vsel %vm311_vm3, %v312_v32, %v313_v42  ;;  %v8868_v49 = vsel %vm311_vm3, %v313_v42, %v315_v43 }
  0x1a   : > { %130 = vrot.lane.b32.xlu0 %v8803_v5, %s8746_s12  ;;  %v331_v52 = vrot.slane %v8865_v48, %v8846_v30  ;;  %v346_v53 = vrot.slane %v8868_v49, %v8846_v30  ;;  %v324_v54 = vcombine.high %v8865_v48, %v10572_v4  ;;  %v339_v55 = vcombine.high %v8868_v49, %v10572_v4 }
  0x1c   : > { %v355_v57 = vcombine.high %v331_v52, %v346_v53  ;;  %v338_v58 = vrot.slane %v324_v54, %v8846_v30  ;;  %v353_v59 = vrot.slane %v339_v55, %v8846_v30  ;;  %v354_v19 = vcombine.low %v331_v52, %v346_v53 }
  0x1e   : > { %8492 = vrot.lane.b32.xlu0 %v8796_v3, %s8749_s13  ;;  %v8891_v62 = vrot.slane %v355_v57, %v8870_v50  ;;  %v370_v63 = vcombine.low %v338_v58, %v353_v59  ;;  %v371_v2 = vcombine.high %v338_v58, %v353_v59 }
  0x20   : > { %v8897_v1 = vrot.slane %v370_v63, %v8870_v50 }
  0x22   : > { %390 = vrot.lane.b32.xlu0 %v8829_v16, %s8746_s12 }
  0x26   : > { %392 = vrot.lane.b32.xlu0 %v8835_v20, %s8746_s12 }
  0x2a   : > { %1147 = vrot.lane.b32.xlu0 %v8837_v21, %s8746_s12 }
  0x88   : > { %v8488_v6 = vpop.permute.xlu0 %8487 }
  0x89   : > { %v8490_v7 = vunpack.i.h.bf16 %v8488_v6  ;;  %v8489_v8 = vunpack.i.l.bf16 %v8488_v6 }
  0x8b   : > { %v8431_v10 = vpack.c.bf16 %v8490_v7, %v8489_v8  ;;  %v8910_v7 = vrot.slane %v371_v2, %v8870_v50 }
  0x8c   : > { %v131_v11 = vpop.permute.xlu0 %130 }
  0x8d   : > { %8433 = vmatpush3.bf16.xpose.msk.msra.mxu0 %vm8811_vm2, %v8431_v10  ;;  %v9010_v59 = vcombine.high %v8910_v7, %v10572_v4 }
  0x8e   : > { %8042 = vmatprep.subr.mxu0 %v10572_v4 }
  0x90   : > { %v8844_v25 = vpop.permute.xlu0 %8492 }
  0x91   : > { %v8495_v15 = vunpack.i.h.bf16 %v8844_v25  ;;  %v8494_v17 = vunpack.i.l.bf16 %v8844_v25 }
  0x93   : > { %v8435_v18 = vpack.c.bf16 %v8495_v15, %v8494_v17 }
  0x94   : > { %v391_v29 = vpop.permute.xlu0 %390 }
  0x95   : > { %8043 = vmatpush3.xpose.msk.msra.mxu0 %vm132_vm1, %v131_v11  ;;  %v396_v31 = vcombine.high %v391_v29, %v10572_v4  ;;  %v8851_v33 = vrot.slane %v391_v29, %v8846_v30  ;;  %8436 = vmatpush3.bf16.msra.mxu1 %v8435_v18 }
  0x96   : > { %8066 = vmatprep.subr.mxu0 %v10572_v4  ;;  %8051 = vmatprep.subr.mxu1 %v10572_v4 }
  0x97   : > { %v410_v37 = vrot.slane %v396_v31, %v8846_v30 }
  0x98   : > { %8045 = vmatmul.mubr.msk.f32.vlgmr.msra.gmra.mrb[0].mxu0 %vm132_vm1, %v8818_v12  ;;  %v393_v34 = vpop.permute.xlu0 %392 }
  0x99   : > { %8068 = vmatprep.mubr.msk.f32.mxu0 %vm8747_vm0, %v10572_v4  ;;  %v411_v40 = vcombine.high %v393_v34, %v10572_v4  ;;  %v8857_v41 = vrot.slane %v393_v34, %v8846_v30 }
  0x9b   : > { %v425_v45 = vrot.slane %v411_v40, %v8846_v30  ;;  %v426_v46 = vcombine.low %v8851_v33, %v8857_v41  ;;  %v427_v47 = vcombine.high %v8851_v33, %v8857_v41  ;;  %v8982_v41 = vcombine.high %v8891_v62, %v10572_v4 }
  0x9d   : > { %v442_v51 = vcombine.low %v410_v37, %v425_v45  ;;  %v8881_v56 = vrot.slane %v427_v47, %v8870_v50  ;;  %v443_v60 = vcombine.high %v410_v37, %v425_v45  ;;  %v434_v53 = vrot.slane %v426_v46, %v8870_v50 }
  0x9f   : > { %v8886_v61 = vrot.slane %v442_v51, %v8870_v50  ;;  %8067 = vmatpush3.xpose.msk.msra.mxu0 %vm132_vm1, %v8881_v56  ;;  %v8900_v6 = vrot.slane %v443_v60, %v8870_v50  ;;  %v458_v55 = vcombine.high %v434_v53, %v10572_v4  ;;  %v459_v33 = vcombine.high %v8881_v56, %v10572_v4 }
  0xa0   : > { %8076 = vmatprep.subr.mxu0 %v10572_v4  ;;  %v8994_v56 = vcombine.high %v8897_v1, %v10572_v4 }
  0xa1   : > { %v460_v46 = vcombine.high %v8886_v61, %v10572_v4  ;;  %v461_v58 = vcombine.high %v8900_v6, %v10572_v4 }
  0xa2   : > { %8069 = vmatmul.mubr.msk.f32.vlgmr.msra.gmra.mrb[2].mxu0 %vm132_vm1, %v8891_v62 }
  0xa3   : > { %8077 = vmatpush3.xpose.msk.msra.mxu0 %vm132_vm1, %v8886_v61  ;;  %8078 = vmatprep.mubr.msk.f32.mxu0 %vm8747_vm0, %v10572_v4 }
  0xa4   : > { %8086 = vmatprep.subr.mxu0 %v10572_v4 }
  0xa6   : > { %8079 = vmatmul.mubr.msk.f32.vlgmr.msra.gmra.mrb[4].mxu0 %vm132_vm1, %v8897_v1 }
  0xa7   : > { %8087 = vmatpush3.xpose.msk.msra.mxu0 %vm132_vm1, %v8900_v6  ;;  %8088 = vmatprep.mubr.msk.f32.mxu0 %vm8747_vm0, %v10572_v4 }
  0xa8   : > { %8096 = vmatprep.subr.mxu0 %v10572_v4 }
  0xaa   : > { %8089 = vmatmul.mubr.msk.f32.vlgmr.msra.gmra.mrb[6].mxu0 %vm132_vm1, %v8910_v7 }
  0xab   : > { %8098 = vmatprep.mubr.msk.f32.mxu0 %vm8747_vm0, %v10572_v4 }
 0x16b   : > { %v208_v22 = vpop.f32.mrb[0].mxu0 }
 0x16c   : > { %v8046_v23 = vpop.f32.mrb[1].mxu0  ;;  %v213_v24 = vsel %vm212_vm4, %v208_v22, -inf }
 0x16d   : > { %214 = vmax.xlane.f32.xlu1 %v213_v24  ;;  %v8928_v23 = vpop.permute.xlu0 %1147 }
 0x16e   : > { %v1152_v26 = vmul.f32 %v8928_v23, %v8891_v62  ;;  %v1154_v25 = vmul.f32 %v8928_v23, %v8897_v1  ;;  %v1156_v31 = vmul.f32 %v8928_v23, %v8910_v7 }
 0x170   : > { %v1165_v28 = vsel %vm1158_vm5, %v1152_v26, 0.0  ;;  %v1171_v29 = vsel %vm1158_vm5, %v1154_v25, 0.0  ;;  %v1177_v32 = vsel %vm1158_vm5, %v1156_v31, 0.0 }
 0x175   : > { %v8941_v34 = vpop.f32.mrb[2].mxu0 }
 0x176   : > { %v1190_v35 = vsel %vm1183_vm6, %v8941_v34, -inf  ;;  %v8070_v36 = vpop.f32.mrb[3].mxu0 }
 0x179   : > { %v8945_v37 = vpop.f32.mrb[4].mxu0 }
 0x17a   : > { %v1196_v38 = vsel %vm1183_vm6, %v8945_v37, -inf  ;;  %v8080_v39 = vpop.f32.mrb[5].mxu0 }
 0x17d   : > { %v8949_v40 = vpop.f32.mrb[6].mxu0 }
 0x17e   : > { %v1202_v42 = vsel %vm1183_vm6, %v8949_v40, -inf  ;;  %v8090_v43 = vpop.f32.mrb[7].mxu0 }
 0x1fa   : > { %v215_v8 = vpop.xlane.xlu1 %214 }
 0x1fb   : > { %v216_v10 = vsub.f32 %v208_v22, %v215_v8  ;;  %v362_v22 = vrot.slane %v354_v19, %v8870_v50 }
 0x1fd   : > { %v217_v11 = vmul.f32 1.442695, %v216_v10  ;;  %v1150_v24 = vmul.f32 %v8928_v23, %v362_v22  ;;  %v386_v52 = vcombine.high %v362_v22, %v10572_v4 }
 0x1ff   : > { %8526 = vpow2.f32 %v217_v11  ;;  %v1159_v27 = vsel %vm1158_vm5, %v1150_v24, 0.0  ;;  %v1151_v54 = vmul.f32 %v8928_v23, %v386_v52 }
 0x200   : > { %1160 = vadd.xlane.f32.xlu0 %v1159_v27 }
 0x201   : > { %v1162_v57 = vsel %vm1158_vm5, %v1151_v54, 0.0 }
 0x204   : > { %1166 = vadd.xlane.f32.xlu0 %v1165_v28 }
 0x208   : > { %1191 = vmax.xlane.f32.xlu0 %v1190_v35 }
 0x209   : > { %v8527_v13 = vpop.eup %8526 }
 0x20a   : > { %v219_v14 = vsel %vm212_vm4, %v8527_v13, 0.0 }
 0x20b   : > { %220 = vadd.xlane.f32.xlu1 %v219_v14 }
 0x20c   : > { %1197 = vmax.xlane.f32.xlu0 %v1196_v38 }
 0x210   : > { %1203 = vmax.xlane.f32.xlu0 %v1202_v42 }
 0x21c   : > { %228 = vrot.lane.b32.xlu1 %v8803_v5, %s8749_s13 }
 0x226   : > { %464 = vrot.lane.b32.xlu0 %v8835_v20, %s8749_s13 }
 0x22a   : > { %2016 = vrot.lane.b32.xlu0 %v8818_v12, %s8752_s14 }
 0x240   : > { %1172 = vadd.xlane.f32.xlu1 %v1171_v29 }
 0x244   : > { %1178 = vadd.xlane.f32.xlu1 %v1177_v32 }
 0x249   : > { %1163 = vadd.xlane.f32.xlu0 %v1162_v57 }
 0x28d   : > { %v9036_v14 = vpop.xlane.xlu0 %1160 }
 0x28e   : > { %10612 = vst [vmem:[#allocation2_spill] sm:$0xff] %v9036_v14 }
 0x291   : > { %v9038_v15 = vpop.xlane.xlu0 %1166 }
 0x292   : > { %10613 = vst [vmem:[#allocation3_spill] sm:$0xff] %v9038_v15 }
 0x295   : > { %v1192_v17 = vpop.xlane.xlu0 %1191 }
 0x296   : > { %v9047_v27 = vmax.f32 %v1192_v17, %v9038_v15 }
 0x298   : > { %v221_v44 = vpop.xlane.xlu1 %220  ;;  %10616 = vst [vmem:[#allocation6_spill] sm:$0xff] %v9047_v27  ;;  %v1218_v32 = vsub.f32 %v8941_v34, %v9047_v27 }
 0x299   : > { %8528 = vrcp.f32 %v221_v44  ;;  %v1198_v18 = vpop.xlane.xlu0 %1197 }
 0x29c   : > { %v229_v45 = vpop.permute.xlu1 %228 }
 0x29d   : > { %8052 = vmatpush3.msk.msra.mxu1 %vm236_vm7, %v229_v45  ;;  %v1204_v19 = vpop.xlane.xlu0 %1203  ;;  %v1228_v45 = vmul.f32 1.442695, %v1218_v32 }
 0x29e   : > { %8056 = vmatprep.subr.mxu1 %v10572_v4 }
 0x2a3   : > { %v8529_v47 = vpop.eup %8528 }
 0x2a4   : > { %v223_v51 = vmul.f32 %v8529_v47, %v8527_v13 }
 0x2a6   : > { %8054 = vmatmul.mubr.msk.f32.vlgmr.msra.gmra.mrb[0].mxu1 %vm232_vm8, %v223_v51 }
 0x2a7   : > { %8057 = vmatpush3.xpose.msk.msra.mxu1 %vm132_vm1, %v434_v53  ;;  %8058 = vmatprep.mubr.msk.f32.mxu1 %vm8747_vm0, %v10572_v4 }
 0x2a8   : > { %8061 = vmatprep.subr.mxu1 %v10572_v4 }
 0x2aa   : > { %8059 = vmatmul.mubr.msk.f32.vlgmr.msra.gmra.mrb[2].mxu1 %vm132_vm1, %v362_v22  ;;  %v465_v22 = vpop.permute.xlu0 %464 }
 0x2ab   : > { %8062 = vmatpush3.xpose.msk.msra.mxu1 %vm132_vm1, %v458_v55  ;;  %8063 = vmatprep.mubr.msk.f32.mxu1 %vm8747_vm0, %v10572_v4  ;;  %v490_v38 = vrot.slane %v465_v22, %v8846_v30  ;;  %v483_v54 = vcombine.high %v465_v22, %v10572_v4 }
 0x2ac   : > { %8071 = vmatprep.subr.mxu1 %v10572_v4 }
 0x2ae   : > { %8064 = vmatmul.mubr.msk.f32.vlgmr.msra.gmra.mrb[4].mxu1 %vm132_vm1, %v386_v52  ;;  %v9042_v26 = vpop.permute.xlu0 %2016 }
 0x2af   : > { %8072 = vmatpush3.xpose.msk.msra.mxu1 %vm132_vm1, %v459_v33  ;;  %8073 = vmatprep.mubr.msk.f32.mxu1 %vm8747_vm0, %v10572_v4 }
 0x2b0   : > { %8081 = vmatprep.subr.mxu1 %v10572_v4 }
 0x2b2   : > { %8074 = vmatmul.mubr.msk.f32.vlgmr.msra.gmra.mrb[6].mxu1 %vm132_vm1, %v8982_v41 }
 0x2b3   : > { %8082 = vmatpush3.xpose.msk.msra.mxu1 %vm132_vm1, %v460_v46  ;;  %8083 = vmatprep.mubr.msk.f32.mxu1 %vm8747_vm0, %v10572_v4 }
 0x2b4   : > { %8091 = vmatprep.subr.mxu1 %v10572_v4 }
 0x2b6   : > { %8084 = vmatmul.mubr.msk.f32.vlgmr.msra.gmra.mrb[8].mxu1 %vm132_vm1, %v8994_v56 }
 0x2b7   : > { %8092 = vmatpush3.xpose.msk.msra.mxu1 %vm132_vm1, %v461_v58  ;;  %8093 = vmatprep.mubr.msk.f32.mxu1 %vm8747_vm0, %v10572_v4 }
 0x2b8   : > { %8101 = vmatprep.subr.mxu1 %v10572_v4 }
 0x2ba   : > { %8094 = vmatmul.mubr.msk.f32.vlgmr.msra.gmra.mrb[10].mxu1 %vm132_vm1, %v9010_v59 }
 0x2bb   : > { %8103 = vmatprep.mubr.msk.f32.mxu1 %vm8747_vm0, %v10572_v4 }
 0x2cd   : > { %v9040_v24 = vpop.xlane.xlu1 %1172 }
 0x2ce   : > { %10614 = vst [vmem:[#allocation4_spill] sm:$0xff] %v9040_v24  ;;  %v9057_v35 = vmax.f32 %v1198_v18, %v9040_v24 }
 0x2d0   : > { %10619 = vst [vmem:[#allocation9_spill] sm:$0xff] %v9057_v35  ;;  %v1220_v51 = vsub.f32 %v8945_v37, %v9057_v35 }
 0x2d1   : > { %v9044_v25 = vpop.xlane.xlu1 %1178 }
 0x2d2   : > { %10615 = vst [vmem:[#allocation5_spill] sm:$0xff] %v9044_v25  ;;  %v9068_v34 = vmax.f32 %v1204_v19, %v9044_v25  ;;  %v1232_v46 = vmul.f32 1.442695, %v1220_v51 }
 0x2d4   : > { %10621 = vst [vmem:[#allocation11_spill] sm:$0xff] %v9068_v34  ;;  %v1222_v37 = vsub.f32 %v8949_v40, %v9068_v34 }
 0x2d6   : > { %v9049_v28 = vpop.xlane.xlu0 %1163 }
 0x2d7   : > { %10617 = vst [vmem:[#allocation7_spill] sm:$0xff] %v9049_v28 }
 0x379   : > { %v305_v60 = vpop.f32.mrb[0].mxu1 }
 0x37a   : > { %2013 = vst.msk [vmem:[%s9021_s17] sm:$0x1] %vm2012_vm9, %v305_v60  ;;  %v8055_v61 = vpop.f32.mrb[1].mxu1 }
 0x37b   : > { %v497_v61 = vrot.slane %v483_v54, %v8846_v30 }
 0x37d   : > { %v606_v62 = vpop.f32.mrb[2].mxu1 }
 0x37e   : > { %v8060_v63 = vpop.f32.mrb[3].mxu1  ;;  %v1184_v1 = vsel %vm1183_vm6, %v606_v62, -inf }
 0x37f   : > { %1185 = vmax.xlane.f32.xlu1 %v1184_v1  ;;  %v1236_v63 = vmul.f32 1.442695, %v1222_v37 }
 0x381   : > { %v682_v2 = vpop.f32.mrb[4].mxu1 }
 0x382   : > { %v1187_v6 = vsel %vm1183_vm6, %v682_v2, -inf  ;;  %v8065_v7 = vpop.f32.mrb[5].mxu1 }
 0x383   : > { %1188 = vmax.xlane.f32.xlu0 %v1187_v6 }
 0x385   : > { %v9032_v8 = vpop.f32.mrb[6].mxu1 }
 0x386   : > { %v8075_v10 = vpop.f32.mrb[7].mxu1 }
 0x389   : > { %v9034_v11 = vpop.f32.mrb[8].mxu1 }
 0x38a   : > { %v8085_v13 = vpop.f32.mrb[9].mxu1 }
 0x390   : > { %462 = vrot.lane.b32.xlu1 %v8829_v16, %s8749_s13 }
 0x394   : > { %8497 = vrot.lane.b32.xlu1 %v8796_v3, %s8753_s18 }
 0x398   : > { %2022 = vrot.lane.b32.xlu1 %v8803_v5, %s8753_s18 }
 0x40c   : > { %v1186_v29 = vpop.xlane.xlu1 %1185 }
 0x40d   : > { %v9052_v31 = vmax.f32 %v1186_v29, %v9036_v14 }
 0x40f   : > { %10618 = vst [vmem:[#allocation8_spill] sm:$0xff] %v9052_v31  ;;  %v1216_v36 = vsub.f32 %v606_v62, %v9052_v31 }
 0x410   : > { %v1189_v39 = vpop.xlane.xlu0 %1188  ;;  %v463_v42 = vpop.permute.xlu1 %462 }
 0x411   : > { %v1224_v43 = vmul.f32 1.442695, %v1216_v36  ;;  %v9062_v44 = vmax.f32 %v1189_v39, %v9049_v28  ;;  %v475_v47 = vrot.slane %v463_v42, %v8846_v30  ;;  %v468_v57 = vcombine.high %v463_v42, %v10572_v4  ;;  %v1138_v42 = vpop.f32.mrb[10].mxu1 }
 0x412   : > { %v1205_v51 = vsel %vm1183_vm6, %v1138_v42, -inf }
 0x413   : > { %10620 = vst [vmem:[#allocation10_spill] sm:$0xff] %v9062_v44  ;;  %8530 = vpow2.f32 %v1224_v43  ;;  %v1217_v52 = vsub.f32 %v682_v2, %v9062_v44  ;;  %v498_v53 = vcombine.low %v475_v47, %v490_v38  ;;  %v499_v58 = vcombine.high %v475_v47, %v490_v38  ;;  %v8095_v43 = vpop.f32.mrb[11].mxu1 }
 0x414   : > { %8532 = vpow2.f32 %v1228_v45  ;;  %v482_v62 = vrot.slane %v468_v57, %v8846_v30  ;;  %v8498_v18 = vpop.permute.xlu1 %8497  ;;  %v1193_v45 = vsel %vm1183_vm6, %v9032_v8, -inf  ;;  %v1199_v47 = vsel %vm1183_vm6, %v9034_v11, -inf }
 0x415   : > { %v1226_v55 = vmul.f32 1.442695, %v1217_v52  ;;  %v506_v33 = vrot.slane %v498_v53, %v8870_v50  ;;  %v513_v1 = vrot.slane %v499_v58, %v8870_v50  ;;  %v8500_v29 = vunpack.i.h.bf16 %v8498_v18  ;;  %1194 = vmax.xlane.f32.xlu0 %v1193_v45 }
 0x416   : > { %v514_v2 = vcombine.low %v482_v62, %v497_v61  ;;  %v515_v10 = vcombine.high %v482_v62, %v497_v61  ;;  %v8499_v32 = vunpack.i.l.bf16 %v8498_v18  ;;  %v1153_v62 = vmul.f32 %v8928_v23, %v8982_v41 }
 0x417   : > { %8534 = vpow2.f32 %v1226_v55  ;;  %v530_v60 = vcombine.high %v506_v33, %v10572_v4  ;;  %8097 = vmatpush3.msk.msra.mxu0 %vm1312_vm10, %v506_v33  ;;  %v531_v17 = vcombine.high %v513_v1, %v10572_v4 }
 0x418   : > { %8106 = vmatprep.subr.mxu0 %v10572_v4  ;;  %8536 = vpow2.f32 %v1232_v46  ;;  %v9097_v13 = vrot.slane %v514_v2, %v8870_v50  ;;  %v9113_v22 = vrot.slane %v515_v10, %v8870_v50  ;;  %v8438_v38 = vpack.c.bf16 %v8500_v29, %v8499_v32  ;;  %v2023_v39 = vpop.permute.xlu1 %2022 }
 0x419   : > { %8102 = vmatpush3.msk.msra.mxu1 %vm1312_vm10, %v530_v60  ;;  %8538 = vpow2.f32 %v1236_v63  ;;  %1200 = vmax.xlane.f32.xlu0 %v1199_v47  ;;  %v1168_v63 = vsel %vm1158_vm5, %v1153_v62, 0.0  ;;  %v1157_v10 = vmul.f32 %v8928_v23, %v9010_v59 }
 0x41a   : > { %8111 = vmatprep.subr.mxu1 %v10572_v4 }
 0x41d   : > { %v9084_v40 = vpop.eup %8530  ;;  %1206 = vmax.xlane.f32.xlu0 %v1205_v51 }
 0x41e   : > { %10622 = vst [vmem:[#allocation12_spill] sm:$0xff] %v9084_v40  ;;  %8099 = vmatmul.mubr.msk.f32.vlgmr.msra.gmra.mrb[8].mxu0 %vm1308_vm11, %v9084_v40  ;;  %v9091_v6 = vpop.eup %8532 }
 0x41f   : > { %8107 = vmatpush3.msk.msra.mxu0 %vm1312_vm10, %v513_v1  ;;  %8108 = vmatprep.mubr.msk.f32.mxu0 %vm8747_vm0, %v10572_v4  ;;  %10623 = vst [vmem:[#allocation13_spill] sm:$0xff] %v9091_v6  ;;  %v1155_v1 = vmul.f32 %v8928_v23, %v8994_v56 }
 0x420   : > { %8116 = vmatprep.subr.mxu0 %v10572_v4 }
 0x421   : > { %v9094_v7 = vpop.eup %8534  ;;  %v1174_v2 = vsel %vm1158_vm5, %v1155_v1, 0.0 }
 0x422   : > { %10624 = vst [vmem:[#allocation14_spill] sm:$0xff] %v9094_v7  ;;  %8104 = vmatmul.mubr.msk.f32.vlgmr.msra.gmra.mrb[12].mxu1 %vm1308_vm11, %v9094_v7  ;;  %8109 = vmatmul.mubr.msk.f32.vlgmr.msra.gmra.mrb[10].mxu0 %vm1308_vm11, %v9091_v6  ;;  %v9110_v19 = vpop.eup %8536 }
 0x423   : > { %8112 = vmatpush3.msk.msra.mxu1 %vm1312_vm10, %v531_v17  ;;  %8117 = vmatpush3.msk.msra.mxu0 %vm1312_vm10, %v9097_v13  ;;  %10625 = vst [vmem:[#allocation15_spill] sm:$0xff] %v9110_v19  ;;  %v9125_v36 = vpop.eup %8538  ;;  %v1180_v17 = vsel %vm1158_vm5, %v1157_v10, 0.0 }
 0x424   : > { %8118 = vmatprep.mubr.msk.f32.mxu0 %vm8747_vm0, %v10572_v4  ;;  %8126 = vmatprep.subr.mxu0 %v10572_v4  ;;  %10626 = vst [vmem:[#allocation16_spill] sm:$0xff] %v9125_v36 }
 0x425   : > { %8113 = vmatprep.mubr.msk.f32.mxu1 %vm8747_vm0, %v10572_v4  ;;  %8121 = vmatprep.subr.mxu1 %v10572_v4 }
 0x426   : > { %8119 = vmatmul.mubr.msk.f32.vlgmr.msra.gmra.mrb[12].mxu0 %vm1308_vm11, %v9110_v19 }
 0x427   : > { %8127 = vmatpush3.msk.msra.mxu0 %vm1312_vm10, %v9113_v22  ;;  %8128 = vmatprep.mubr.msk.f32.mxu0 %vm8747_vm0, %v10572_v4 }
 0x428   : > { %8437 = vmatprep.subr.bf16.mxu0 %v10570_v0 }
 0x42a   : > { %8129 = vmatmul.mubr.msk.f32.vlgmr.msra.gmra.mrb[14].mxu0 %vm1308_vm11, %v9125_v36 }
 0x42b   : > { %8142 = vmatprep.mubr.msk.f32.mxu0 %vm8747_vm0, %v10572_v4 }
 0x42e   : > { %8440 = vmatpush3.bf16.xpose.msk.msra.mxu0 %vm8811_vm2, %v8438_v38 }
 0x42f   : > { %8140 = vmatprep.subr.mxu0 %v10572_v4 }
 0x433   : > { %8502 = vrot.lane.b32.xlu0 %v8796_v3, %s8754_s19 }
 0x436   : > { %8141 = vmatpush3.xpose.msk.msra.mxu0 %vm132_vm1, %v2023_v39 }
 0x437   : > { %8159 = vmatprep.subr.mxu0 %v10572_v4  ;;  %2270 = vrot.lane.b32.xlu0 %v8835_v20, %s8753_s18 }
 0x439   : > { %8143 = vmatmul.mubr.msk.f32.vlgmr.msra.gmra.mrb[16].mxu0 %vm132_vm1, %v9042_v26 }
 0x43a   : > { %8161 = vmatprep.mubr.msk.f32.mxu0 %vm8747_vm0, %v10572_v4 }
 0x43b   : > { %2198 = vrot.lane.b32.xlu0 %v8868_v49, %s8752_s14 }
 0x4a2   : > { %v1195_v41 = vpop.xlane.xlu0 %1194 }
 0x4a6   : > { %v1201_v56 = vpop.xlane.xlu0 %1200 }
 0x4aa   : > { %v1207_v43 = vpop.xlane.xlu0 %1206 }
 0x4f1   : > { %v9151_v26 = vpop.f32.mrb[8].mxu0 }
 0x4f2   : > { %10627 = vst [vmem:[#allocation17_spill] sm:$0xff] %v9151_v26  ;;  %v8100_v52 = vpop.f32.mrb[9].mxu0 }
 0x4f5   : > { %v9153_v53 = vpop.f32.mrb[12].mxu1  ;;  %v9155_v54 = vpop.f32.mrb[10].mxu0 }
 0x4f6   : > { %10628 = vst [vmem:[#allocation18_spill] sm:$0xff] %v9153_v53  ;;  %10629 = vst [vmem:[#allocation19_spill] sm:$0xff] %v9155_v54  ;;  %v8105_v55 = vpop.f32.mrb[13].mxu1  ;;  %v8110_v57 = vpop.f32.mrb[11].mxu0 }
 0x4f7   : > { %v8503_v55 = vpop.permute.xlu0 %8502 }
 0x4f9   : > { %v9157_v33 = vpop.f32.mrb[12].mxu0 }
 0x4fa   : > { %10630 = vst [vmem:[#allocation20_spill] sm:$0xff] %v9157_v33  ;;  %v8120_v46 = vpop.f32.mrb[13].mxu0 }
 0x4fd   : > { %v9159_v37 = vpop.f32.mrb[14].mxu0 }
 0x4fe   : > { %10631 = vst [vmem:[#allocation21_spill] sm:$0xff] %v9159_v37  ;;  %v8130_v3 = vpop.f32.mrb[15].mxu0 }
 0x50c   : > { %v2098_v58 = vpop.f32.mrb[16].mxu0 }
 0x50d   : > { %v8144_v60 = vpop.f32.mrb[17].mxu0  ;;  %v2102_v61 = vsel %vm212_vm4, %v2098_v58, -inf }
 0x50e   : > { %2103 = vmax.xlane.f32.xlu1 %v2102_v61  ;;  %v2271_v61 = vpop.permute.xlu0 %2270 }
 0x512   : > { %1169 = vadd.xlane.f32.xlu1 %v1168_v63 }
 0x516   : > { %1175 = vadd.xlane.f32.xlu1 %v1174_v2  ;;  %v532_v2 = vcombine.high %v9097_v13, %v10572_v4  ;;  %v533_v13 = vcombine.high %v9113_v22, %v10572_v4  ;;  %v2289_v22 = vcombine.high %v2271_v61, %v10572_v4 }
 0x51a   : > { %1181 = vadd.xlane.f32.xlu1 %v1180_v17  ;;  %v8504_v17 = vunpack.i.l.bf16 %v8503_v55 }
 0x52b   : > { %2117 = vrot.lane.b32.xlu1 %v8803_v5, %s8754_s19 }
 0x52f   : > { %2268 = vrot.lane.b32.xlu1 %v8829_v16, %s8753_s18 }
 0x59b   : > { %v2104_v18 = vpop.xlane.xlu1 %2103 }
 0x59c   : > { %v2105_v29 = vsub.f32 %v2098_v58, %v2104_v18 }
 0x59e   : > { %v2106_v32 = vmul.f32 1.442695, %v2105_v29 }
 0x59f   : > { %v9175_v38 = vpop.xlane.xlu1 %1169 }
 0x5a0   : > { %10632 = vst [vmem:[#allocation22_spill] sm:$0xff] %v9175_v38  ;;  %8540 = vpow2.f32 %v2106_v32  ;;  %v9178_v23 = vmax.f32 %v1195_v41, %v9175_v38 }
 0x5a2   : > { %10633 = vst [vmem:[#allocation23_spill] sm:$0xff] %v9178_v23  ;;  %v1219_v59 = vsub.f32 %v9032_v8, %v9178_v23 }
 0x5a3   : > { %v9182_v39 = vpop.xlane.xlu1 %1175 }
 0x5a4   : > { %10634 = vst [vmem:[#allocation24_spill] sm:$0xff] %v9182_v39  ;;  %v1230_v45 = vmul.f32 1.442695, %v1219_v59  ;;  %v9185_v47 = vmax.f32 %v1201_v56, %v9182_v39 }
 0x5a6   : > { %10635 = vst [vmem:[#allocation25_spill] sm:$0xff] %v9185_v47  ;;  %8542 = vpow2.f32 %v1230_v45  ;;  %v1221_v51 = vsub.f32 %v9034_v11, %v9185_v47  ;;  %v2296_v11 = vrot.slane %v2271_v61, %v8846_v30 }
 0x5a7   : > { %v9189_v52 = vpop.xlane.xlu1 %1181 }
 0x5a8   : > { %10636 = vst [vmem:[#allocation26_spill] sm:$0xff] %v9189_v52  ;;  %v1234_v57 = vmul.f32 1.442695, %v1221_v51  ;;  %v9192_v46 = vmax.f32 %v1207_v43, %v9189_v52 }
 0x5aa   : > { %10637 = vst [vmem:[#allocation27_spill] sm:$0xff] %v9192_v46  ;;  %v9194_v3 = vpop.eup %8540  ;;  %8544 = vpow2.f32 %v1234_v57  ;;  %v1223_v8 = vsub.f32 %v1138_v42, %v9192_v46  ;;  %v8505_v42 = vunpack.i.h.bf16 %v8503_v55  ;;  %v2199_v55 = vpop.permute.xlu0 %2198 }
 0x5ab   : > { %v2108_v58 = vsel %vm212_vm4, %v9194_v3, 0.0  ;;  %v2118_v60 = vpop.permute.xlu1 %2117  ;;  %v2217_v57 = vcombine.high %v2199_v55, %v10572_v4 }
 0x5ac   : > { %v1238_v62 = vmul.f32 1.442695, %v1223_v8  ;;  %2109 = vadd.xlane.f32.xlu1 %v2108_v58  ;;  %v8442_v32 = vpack.c.bf16 %v8505_v42, %v8504_v17  ;;  %v2224_v8 = vrot.slane %v2199_v55, %v8846_v30  ;;  %v2303_v58 = vrot.slane %v2289_v22, %v8846_v30 }
 0x5ae   : > { %8546 = vpow2.f32 %v1238_v62 }
 0x5af   : > { %v2269_v63 = vpop.permute.xlu1 %2268 }
 0x5b0   : > { %v9200_v1 = vpop.eup %8542  ;;  %v2281_v10 = vrot.slane %v2269_v63, %v8846_v30  ;;  %v2274_v45 = vcombine.high %v2269_v63, %v10572_v4 }
 0x5b1   : > { %10638 = vst [vmem:[#allocation28_spill] sm:$0xff] %v9200_v1  ;;  %8114 = vmatmul.mubr.msk.f32.vlgmr.msra.gmra.mrb[14].mxu1 %vm1308_vm11, %v9200_v1 }
 0x5b2   : > { %8122 = vmatpush3.msk.msra.mxu1 %vm1312_vm10, %v532_v2  ;;  %8123 = vmatprep.mubr.msk.f32.mxu1 %vm8747_vm0, %v10572_v4  ;;  %v2304_v41 = vcombine.low %v2281_v10, %v2296_v11  ;;  %v2305_v18 = vcombine.high %v2281_v10, %v2296_v11  ;;  %v2231_v11 = vrot.slane %v2217_v57, %v8846_v30 }
 0x5b3   : > { %8131 = vmatprep.subr.mxu1 %v10572_v4 }
 0x5b4   : > { %v9211_v29 = vpop.eup %8544  ;;  %v2312_v56 = vrot.slane %v2304_v41, %v8870_v50  ;;  %v2319_v17 = vrot.slane %v2305_v18, %v8870_v50 }
 0x5b5   : > { %10639 = vst [vmem:[#allocation29_spill] sm:$0xff] %v9211_v29  ;;  %8124 = vmatmul.mubr.msk.f32.vlgmr.msra.gmra.mrb[16].mxu1 %vm1308_vm11, %v9211_v29 }
 0x5b6   : > { %8132 = vmatpush3.msk.msra.mxu1 %vm1312_vm10, %v533_v13  ;;  %8133 = vmatprep.mubr.msk.f32.mxu1 %vm8747_vm0, %v10572_v4  ;;  %v2336_v59 = vcombine.high %v2312_v56, %v10572_v4  ;;  %v2337_v18 = vcombine.high %v2319_v17, %v10572_v4 }
 0x5b7   : > { %8441 = vmatprep.subr.bf16.mxu1 %v10570_v0 }
 0x5b8   : > { %v9223_v43 = vpop.eup %8546  ;;  %8160 = vmatpush3.xpose.msk.msra.mxu0 %vm132_vm1, %v2336_v59 }
 0x5b9   : > { %10640 = vst [vmem:[#allocation30_spill] sm:$0xff] %v9223_v43  ;;  %8134 = vmatmul.mubr.msk.f32.vlgmr.msra.gmra.mrb[18].mxu1 %vm1308_vm11, %v9223_v43  ;;  %8169 = vmatprep.subr.mxu0 %v10572_v4 }
 0x5ba   : > { %8443 = vmatpush3.bf16.msra.mxu1 %v8442_v32  ;;  %8151 = vmatprep.mubr.msk.f32.mxu1 %vm8747_vm0, %v10572_v4 }
 0x5bb   : > { %8149 = vmatprep.subr.mxu1 %v10572_v4 }
 0x5bd   : > { %2196 = vrot.lane.b32.xlu1 %v8865_v48, %s8752_s14 }
 0x5be   : > { %8150 = vmatpush3.msk.msra.mxu1 %vm236_vm7, %v2118_v60  ;;  %v2288_v60 = vrot.slane %v2274_v45, %v8846_v30 }
 0x5bf   : > { %8154 = vmatprep.subr.mxu1 %v10572_v4 }
 0x5c0   : > { %v2320_v41 = vcombine.low %v2288_v60, %v2303_v58 }
 0x5c1   : > { %3020 = vrot.lane.b32.xlu1 %v8837_v21, %s8753_s18 }
 0x639   : > { %v2110_v51 = vpop.xlane.xlu1 %2109 }
 0x63a   : > { %8548 = vrcp.f32 %v2110_v51 }
 0x63d   : > { %v2197_v62 = vpop.permute.xlu1 %2196 }
 0x63e   : > { %v2202_v2 = vcombine.high %v2197_v62, %v10572_v4  ;;  %v2209_v61 = vrot.slane %v2197_v62, %v8846_v30 }
 0x640   : > { %v2216_v63 = vrot.slane %v2202_v2, %v8846_v30  ;;  %v2232_v10 = vcombine.low %v2209_v61, %v2224_v8  ;;  %v2233_v42 = vcombine.high %v2209_v61, %v2224_v8  ;;  %v2328_v8 = vrot.slane %v2320_v41, %v8870_v50 }
 0x641   : > { %v9249_v13 = vpop.permute.xlu1 %3020  ;;  %v2321_v61 = vcombine.high %v2288_v60, %v2303_v58 }
 0x642   : > { %v2240_v32 = vrot.slane %v2232_v10, %v8870_v50  ;;  %v2247_v59 = vrot.slane %v2233_v42, %v8870_v50  ;;  %v2248_v22 = vcombine.low %v2216_v63, %v2231_v11  ;;  %v2249_v45 = vcombine.high %v2216_v63, %v2231_v11 }
 0x643   : > { %v2338_v58 = vcombine.high %v2328_v8, %v10572_v4  ;;  %v2335_v41 = vrot.slane %v2321_v61, %v8870_v50 }
 0x644   : > { %v8549_v51 = vpop.eup %8548  ;;  %v9254_v55 = vcombine.high %v2240_v32, %v10572_v4  ;;  %v3023_v57 = vmul.f32 %v9249_v13, %v2240_v32  ;;  %v2256_v62 = vrot.slane %v2248_v22, %v8870_v50  ;;  %v9264_v11 = vcombine.high %v2247_v59, %v10572_v4 }
 0x645   : > { %v2112_v2 = vmul.f32 %v8549_v51, %v9194_v3  ;;  %v2263_v10 = vrot.slane %v2249_v45, %v8870_v50  ;;  %v3025_v42 = vmul.f32 %v9249_v13, %v2247_v59  ;;  %v2339_v51 = vcombine.high %v2335_v41, %v10572_v4 }
 0x646   : > { %8162 = vmatmul.mubr.msk.f32.vlgmr.msra.gmra.mrb[18].mxu0 %vm132_vm1, %v9254_v55  ;;  %v3027_v63 = vmul.f32 %v9249_v13, %v2256_v62  ;;  %v3031_v3 = vsel %vm1158_vm5, %v3023_v57, 0.0  ;;  %v9287_v22 = vcombine.high %v2256_v62, %v10572_v4  ;;  %v3026_v52 = vmul.f32 %v9249_v13, %v9264_v11 }
 0x647   : > { %8170 = vmatpush3.xpose.msk.msra.mxu0 %vm132_vm1, %v2337_v18  ;;  %8152 = vmatmul.mubr.msk.f32.vlgmr.msra.gmra.mrb[20].mxu1 %vm232_vm8, %v2112_v2  ;;  %v3037_v45 = vsel %vm1158_vm5, %v3025_v42, 0.0 }
 0x648   : > { %8155 = vmatpush3.xpose.msk.msra.mxu1 %vm132_vm1, %v2312_v56  ;;  %8171 = vmatprep.mubr.msk.f32.mxu0 %vm8747_vm0, %v10572_v4  ;;  %v3043_v60 = vsel %vm1158_vm5, %v3027_v63, 0.0  ;;  %v3029_v56 = vmul.f32 %v9249_v13, %v2263_v10 }
 0x649   : > { %8179 = vmatprep.subr.mxu0 %v10572_v4  ;;  %8156 = vmatprep.mubr.msk.f32.mxu1 %vm8747_vm0, %v10572_v4 }
 0x64a   : > { %8164 = vmatprep.subr.mxu1 %v10572_v4  ;;  %8172 = vmatmul.mubr.msk.f32.vlgmr.msra.gmra.mrb[20].mxu0 %vm132_vm1, %v9264_v11  ;;  %v3049_v57 = vsel %vm1158_vm5, %v3029_v56, 0.0 }
 0x64b   : > { %8180 = vmatpush3.xpose.msk.msra.mxu0 %vm132_vm1, %v2338_v58  ;;  %3032 = vadd.xlane.f32.xlu0 %v3031_v3 }
 0x64c   : > { %8157 = vmatmul.mubr.msk.f32.vlgmr.msra.gmra.mrb[22].mxu1 %vm132_vm1, %v2240_v32  ;;  %3044 = vadd.xlane.f32.xlu1 %v3043_v60 }
 0x64d   : > { %8165 = vmatpush3.xpose.msk.msra.mxu1 %vm132_vm1, %v2319_v17  ;;  %8181 = vmatprep.mubr.msk.f32.mxu0 %vm8747_vm0, %v10572_v4  ;;  %v9306_v17 = vcombine.high %v2263_v10, %v10572_v4 }
 0x64e   : > { %8189 = vmatprep.subr.mxu0 %v10572_v4  ;;  %8166 = vmatprep.mubr.msk.f32.mxu1 %vm8747_vm0, %v10572_v4 }
 0x64f   : > { %8174 = vmatprep.subr.mxu1 %v10572_v4  ;;  %8182 = vmatmul.mubr.msk.f32.vlgmr.msra.gmra.mrb[22].mxu0 %vm132_vm1, %v9287_v22 }
 0x650   : > { %8190 = vmatpush3.xpose.msk.msra.mxu0 %vm132_vm1, %v2339_v51  ;;  %3038 = vadd.xlane.f32.xlu0 %v3037_v45 }
 0x651   : > { %8167 = vmatmul.mubr.msk.f32.vlgmr.msra.gmra.mrb[24].mxu1 %vm132_vm1, %v2247_v59  ;;  %3050 = vadd.xlane.f32.xlu1 %v3049_v57 }
 0x652   : > { %8175 = vmatpush3.xpose.msk.msra.mxu1 %vm132_vm1, %v2328_v8  ;;  %8191 = vmatprep.mubr.msk.f32.mxu0 %vm8747_vm0, %v10572_v4 }
 0x653   : > { %8176 = vmatprep.mubr.msk.f32.mxu1 %vm8747_vm0, %v10572_v4  ;;  %8184 = vmatprep.subr.mxu1 %v10572_v4 }
 0x654   : > { %8192 = vmatmul.mubr.msk.f32.vlgmr.msra.gmra.mrb[24].mxu0 %vm132_vm1, %v9306_v17  ;;  %8199 = vmatprep.subr.mxu0 %v10572_v4 }
 0x655   : > { %8177 = vmatmul.mubr.msk.f32.vlgmr.msra.gmra.mrb[26].mxu1 %vm132_vm1, %v2256_v62  ;;  %8201 = vmatprep.mubr.msk.f32.mxu0 %vm8747_vm0, %v10572_v4 }
 0x656   : > { %8185 = vmatpush3.xpose.msk.msra.mxu1 %vm132_vm1, %v2335_v41  ;;  %8186 = vmatprep.mubr.msk.f32.mxu1 %vm8747_vm0, %v10572_v4 }
 0x657   : > { %8194 = vmatprep.subr.mxu1 %v10572_v4 }
 0x659   : > { %8187 = vmatmul.mubr.msk.f32.vlgmr.msra.gmra.mrb[28].mxu1 %vm132_vm1, %v2263_v10 }
 0x65a   : > { %8196 = vmatprep.mubr.msk.f32.mxu1 %vm8747_vm0, %v10572_v4 }
 0x684   : > { %v9326_v32 = vpop.f32.mrb[14].mxu1 }
 0x685   : > { %10641 = vst [vmem:[#allocation31_spill] sm:$0xff] %v9326_v32  ;;  %v8115_v59 = vpop.f32.mrb[15].mxu1 }
 0x688   : > { %v9328_v8 = vpop.f32.mrb[16].mxu1 }
 0x689   : > { %10642 = vst [vmem:[#allocation32_spill] sm:$0xff] %v9328_v8  ;;  %v8125_v62 = vpop.f32.mrb[17].mxu1 }
 0x68c   : > { %v9330_v18 = vpop.f32.mrb[18].mxu1 }
 0x68d   : > { %10643 = vst [vmem:[#allocation33_spill] sm:$0xff] %v9330_v18  ;;  %v8135_v2 = vpop.f32.mrb[19].mxu1 }
 0x719   : > { %v9332_v61 = vpop.f32.mrb[18].mxu0 }
 0x71a   : > { %v9334_v63 = vpop.f32.mrb[20].mxu1  ;;  %v8163_v3 = vpop.f32.mrb[19].mxu0 }
 0x71b   : > { %10644 = vst [vmem:[#allocation34_spill] sm:$0xff] %v9334_v63  ;;  %v8153_v58 = vpop.f32.mrb[21].mxu1 }
 0x71d   : > { %v9336_v60 = vpop.f32.mrb[20].mxu0 }
 0x71e   : > { %v8173_v10 = vpop.f32.mrb[21].mxu0 }
 0x71f   : > { %v2484_v42 = vpop.f32.mrb[22].mxu1 }
 0x720   : > { %v8158_v41 = vpop.f32.mrb[23].mxu1  ;;  %v3055_v56 = vsel %vm1183_vm6, %v2484_v42, -inf }
 0x721   : > { %3056 = vmax.xlane.f32.xlu1 %v3055_v56 }
 0x722   : > { %v9339_v45 = vpop.f32.mrb[22].mxu0 }
 0x723   : > { %v8183_v51 = vpop.f32.mrb[23].mxu0 }
 0x724   : > { %v2636_v57 = vpop.f32.mrb[24].mxu1  ;;  %v8734_v51 = vld [vmem:[%s8792_s11] sm:$0xff] }
 0x725   : > { %v8168_v59 = vpop.f32.mrb[25].mxu1  ;;  %v3061_v62 = vsel %vm1183_vm6, %v2636_v57, -inf }
 0x726   : > { %3062 = vmax.xlane.f32.xlu0 %v3061_v62  ;;  %v8735_v59 = vld [vmem:[%s8792_s11 + $0x8] sm:$0xff] }
 0x727   : > { %v9342_v2 = vpop.f32.mrb[24].mxu0  ;;  %v9350_v37 = vpack.i.bf16 %v8735_v59, %v8734_v51 }
 0x728   : > { %v2788_v3 = vpop.f32.mrb[26].mxu1  ;;  %v8193_v58 = vpop.f32.mrb[25].mxu0 }
 0x729   : > { %v8178_v10 = vpop.f32.mrb[27].mxu1  ;;  %v3067_v41 = vsel %vm1183_vm6, %v2788_v3, -inf  ;;  %v3058_v58 = vsel %vm1183_vm6, %v9332_v61, -inf }
 0x72a   : > { %3068 = vmax.xlane.f32.xlu0 %v3067_v41  ;;  %v3070_v10 = vsel %vm1183_vm6, %v9339_v45, -inf  ;;  %v3076_v41 = vsel %vm1183_vm6, %v9342_v2, -inf }
 0x72c   : > { %v2940_v0 = vpop.f32.mrb[28].mxu1 }
 0x72d   : > { %v8188_v56 = vpop.f32.mrb[29].mxu1  ;;  %v3073_v4 = vsel %vm1183_vm6, %v2940_v0, -inf }
 0x72e   : > { %3074 = vmax.xlane.f32.xlu0 %v3073_v4  ;;  %v3024_v4 = vmul.f32 %v9249_v13, %v9254_v55  ;;  %v9371_v55 = vpop.xlane.xlu1 %3044  ;;  %v9373_v56 = vpop.xlane.xlu0 %3032 }
 0x72f   : > { %10645 = vst [vmem:[#allocation35_spill] sm:$0xff] %v9371_v55 }
 0x730   : > { %v3034_v62 = vsel %vm1158_vm5, %v3024_v4, 0.0 }
 0x732   : > { %2340 = vrot.lane.b32.xlu1 %v8829_v16, %s8754_s19  ;;  %v9375_v51 = vpop.xlane.xlu1 %3050  ;;  %v9377_v4 = vpop.xlane.xlu0 %3038 }
 0x733   : > { %10646 = vst [vmem:[#allocation36_spill] sm:$0xff] %v9375_v51 }
 0x736   : > { %8507 = vrot.lane.b32.xlu1 %v9350_v37, %s8755_s20 }
 0x73a   : > { %3904 = vrot.lane.b32.xlu1 %v8803_v5, %s8755_s20  ;;  %v3064_v5 = vsel %vm1183_vm6, %v9336_v60, -inf }
 0x744   : > { %2342 = vrot.lane.b32.xlu0 %v8835_v20, %s8754_s19 }
 0x748   : > { %3898 = vrot.lane.b32.xlu0 %v8818_v12, %s8756_s21 }
 0x767   : > { %3035 = vadd.xlane.f32.xlu0 %v3034_v62 }
 0x76b   : > { %3059 = vmax.xlane.f32.xlu0 %v3058_v58 }
 0x76f   : > { %3065 = vmax.xlane.f32.xlu0 %v3064_v5 }
 0x773   : > { %3071 = vmax.xlane.f32.xlu0 %v3070_v10 }
 0x777   : > { %3077 = vmax.xlane.f32.xlu0 %v3076_v41 }
 0x78d   : > { %8512 = vrot.lane.b32.xlu0 %v9350_v37, %s8757_s22 }
 0x791   : > { %4152 = vrot.lane.b32.xlu0 %v8835_v20, %s8755_s20 }
 0x795   : > { %4080 = vrot.lane.b32.xlu0 %v8868_v49, %s8756_s21 }
 0x7ae   : > { %v3057_v59 = vpop.xlane.xlu1 %3056 }
 0x7af   : > { %v9380_v62 = vmax.f32 %v3057_v59, %v9373_v56 }
 0x7b1   : > { %v3087_v5 = vsub.f32 %v2484_v42, %v9380_v62  ;;  %v10649_v42 = vmov 0.0  }
 0x7b2   : > { %v2341_v54 = vpop.permute.xlu1 %2340 }
 0x7b3   : > { %v3063_v58 = vpop.xlane.xlu0 %3062  ;;  %v3095_v33 = vmul.f32 1.442695, %v3087_v5  ;;  %v2346_v63 = vcombine.high %v2341_v54, %v10649_v42 }
 0x7b4   : > { %v9384_v10 = vmax.f32 %v3063_v58, %v9377_v4  ;;  %v2353_v58 = vrot.slane %v2341_v54, %v8846_v30 }
 0x7b5   : > { %8550 = vpow2.f32 %v3095_v33  ;;  %v2360_v33 = vrot.slane %v2346_v63, %v8846_v30 }
 0x7b6   : > { %v3089_v41 = vsub.f32 %v2636_v57, %v9384_v10 }
 0x7b7   : > { %v3069_v18 = vpop.xlane.xlu0 %3068 }
 0x7b8   : > { %v9388_v8 = vmax.f32 %v3069_v18, %v9371_v55  ;;  %v3099_v53 = vmul.f32 1.442695, %v3089_v41 }
 0x7ba   : > { %10647 = vst [vmem:[#allocation37_spill] sm:$0xff] %v9388_v8  ;;  %v3091_v59 = vsub.f32 %v2788_v3, %v9388_v8  ;;  %8552 = vpow2.f32 %v3099_v53 }
 0x7bb   : > { %v3075_v32 = vpop.xlane.xlu0 %3074 }
 0x7bc   : > { %v9392_v26 = vmax.f32 %v3075_v32, %v9375_v51  ;;  %v3103_v25 = vmul.f32 1.442695, %v3091_v59 }
 0x7be   : > { %10648 = vst [vmem:[#allocation38_spill] sm:$0xff] %v9392_v26  ;;  %v3093_v5 = vsub.f32 %v2940_v0, %v9392_v26  ;;  %8554 = vpow2.f32 %v3103_v25 }
 0x7bf   : > { %v2343_v57 = vpop.permute.xlu0 %2342  ;;  %v9402_v54 = vpop.eup %8550 }
 0x7c0   : > { %v2361_v18 = vcombine.high %v2343_v57, %v10649_v42  ;;  %v2368_v41 = vrot.slane %v2343_v57, %v8846_v30  ;;  %v3107_v24 = vmul.f32 1.442695, %v3093_v5 }
 0x7c2   : > { %v2375_v3 = vrot.slane %v2361_v18, %v8846_v30  ;;  %v2376_v34 = vcombine.low %v2353_v58, %v2368_v41  ;;  %v2377_v32 = vcombine.high %v2353_v58, %v2368_v41  ;;  %8556 = vpow2.f32 %v3107_v24  ;;  %v8508_v24 = vpop.permute.xlu1 %8507 }
 0x7c3   : > { %v8510_v57 = vunpack.i.h.bf16 %v8508_v24  ;;  %v8509_v5 = vunpack.i.l.bf16 %v8508_v24  ;;  %v10650_v18 = vmov 0.0|0.0  }
 0x7c4   : > { %v2384_v35 = vrot.slane %v2376_v34, %v8870_v50  ;;  %v2391_v53 = vrot.slane %v2377_v32, %v8870_v50  ;;  %v2392_v59 = vcombine.low %v2360_v33, %v2375_v3  ;;  %v9412_v25 = vpop.eup %8552  ;;  %v2393_v34 = vcombine.high %v2360_v33, %v2375_v3  ;;  %v3899_v32 = vpop.permute.xlu0 %3898 }
 0x7c5   : > { %v8445_v33 = vpack.c.bf16 %v8510_v57, %v8509_v5 }
 0x7c6   : > { %v2408_v0 = vcombine.high %v2384_v35, %v10649_v42  ;;  %8195 = vmatpush3.msk.msra.mxu1 %vm1312_vm10, %v2384_v35  ;;  %v9418_v35 = vrot.slane %v2392_v59, %v8870_v50  ;;  %v9431_v58 = vrot.slane %v2393_v34, %v8870_v50  ;;  %v3905_v3 = vpop.permute.xlu1 %3904 }
 0x7c7   : > { %8197 = vmatmul.mubr.msk.f32.vlgmr.msra.gmra.mrb[30].mxu1 %vm1308_vm11, %v9402_v54  ;;  %8204 = vmatprep.subr.mxu1 %v10649_v42 }
 0x7c8   : > { %8200 = vmatpush3.msk.msra.mxu0 %vm1312_vm10, %v2408_v0  ;;  %8205 = vmatpush3.msk.msra.mxu1 %vm1312_vm10, %v2391_v53  ;;  %v9428_v63 = vpop.eup %8554 }
 0x7c9   : > { %8206 = vmatprep.mubr.msk.f32.mxu1 %vm8747_vm0, %v10649_v42  ;;  %8214 = vmatprep.subr.mxu1 %v10649_v42 }
 0x7ca   : > { %8209 = vmatprep.subr.mxu0 %v10649_v42 }
 0x7cb   : > { %8207 = vmatmul.mubr.msk.f32.vlgmr.msra.gmra.mrb[32].mxu1 %vm1308_vm11, %v9412_v25 }
 0x7cc   : > { %8215 = vmatpush3.msk.msra.mxu1 %vm1312_vm10, %v9418_v35  ;;  %8216 = vmatprep.mubr.msk.f32.mxu1 %vm8747_vm0, %v10649_v42  ;;  %v9440_v41 = vpop.eup %8556 }
 0x7cd   : > { %8224 = vmatprep.subr.mxu1 %v10649_v42 }
 0x7cf   : > { %8217 = vmatmul.mubr.msk.f32.vlgmr.msra.gmra.mrb[34].mxu1 %vm1308_vm11, %v9428_v63 }
 0x7d0   : > { %8225 = vmatpush3.msk.msra.mxu1 %vm1312_vm10, %v9431_v58  ;;  %8226 = vmatprep.mubr.msk.f32.mxu1 %vm8747_vm0, %v10649_v42 }
 0x7d1   : > { %8444 = vmatprep.subr.bf16.mxu1 %v10650_v18 }
 0x7d3   : > { %8227 = vmatmul.mubr.msk.f32.vlgmr.msra.gmra.mrb[36].mxu1 %vm1308_vm11, %v9440_v41 }
 0x7d4   : > { %8240 = vmatprep.mubr.msk.f32.mxu1 %vm8747_vm0, %v10649_v42 }
 0x7d7   : > { %8447 = vmatpush3.bf16.xpose.msk.msra.mxu1 %vm8811_vm2, %v8445_v33  ;;  %v2409_v33 = vcombine.high %v2391_v53, %v10649_v42 }
 0x7d8   : > { %8238 = vmatprep.subr.mxu1 %v10649_v42 }
 0x7df   : > { %8239 = vmatpush3.xpose.msk.msra.mxu1 %vm132_vm1, %v3905_v3 }
 0x7e0   : > { %8257 = vmatprep.subr.mxu1 %v10649_v42 }
 0x7e2   : > { %8241 = vmatmul.mubr.msk.f32.vlgmr.msra.gmra.mrb[38].mxu1 %vm132_vm1, %v3899_v32 }
 0x7e3   : > { %8259 = vmatprep.mubr.msk.f32.mxu1 %vm8747_vm0, %v10649_v42 }
 0x7f4   : > { %v9454_v59 = vpop.xlane.xlu0 %3035 }
 0x7f8   : > { %v3060_v0 = vpop.xlane.xlu0 %3059 }
 0x7f9   : > { %v9457_v34 = vmax.f32 %v3060_v0, %v9454_v59 }
 0x7fb   : > { %v3088_v24 = vsub.f32 %v9332_v61, %v9457_v34 }
 0x7fc   : > { %v3066_v11 = vpop.xlane.xlu0 %3065 }
 0x7fd   : > { %v3097_v57 = vmul.f32 1.442695, %v3088_v24 }
 0x7ff   : > { %8558 = vpow2.f32 %v3097_v57 }
 0x809   : > { %v9461_v5 = vpop.eup %8558 }
 0x80a   : > { %8202 = vmatmul.mubr.msk.f32.vlgmr.msra.gmra.mrb[26].mxu0 %vm1308_vm11, %v9461_v5 }
 0x80b   : > { %8210 = vmatpush3.msk.msra.mxu0 %vm1312_vm10, %v2409_v33  ;;  %8211 = vmatprep.mubr.msk.f32.mxu0 %vm8747_vm0, %v10649_v42 }
 0x80c   : > { %8219 = vmatprep.subr.mxu0 %v10649_v42 }
 0x89a   : > { %v9476_v61 = vpop.f32.mrb[30].mxu1 }
 0x89b   : > { %10651 = vst [vmem:[#allocation39_spill] sm:$0xff] %v9476_v61  ;;  %v8198_v53 = vpop.f32.mrb[31].mxu1 }
 0x89c   : > { %v3040_v53 = vsel %vm1158_vm5, %v3026_v52, 0.0 }
 0x89e   : > { %v9478_v3 = vpop.f32.mrb[32].mxu1 }
 0x89f   : > { %10652 = vst [vmem:[#allocation40_spill] sm:$0xff] %v9478_v3  ;;  %v8208_v32 = vpop.f32.mrb[33].mxu1 }
 0x8a0   : > { %v3028_v32 = vmul.f32 %v9249_v13, %v9287_v22 }
 0x8a2   : > { %v9480_v0 = vpop.f32.mrb[34].mxu1 }
 0x8a3   : > { %10653 = vst [vmem:[#allocation41_spill] sm:$0xff] %v9480_v0  ;;  %v8218_v24 = vpop.f32.mrb[35].mxu1 }
 0x8a4   : > { %v3046_v24 = vsel %vm1158_vm5, %v3028_v32, 0.0  ;;  %v3072_v32 = vpop.xlane.xlu0 %3071 }
 0x8a6   : > { %v9482_v57 = vpop.f32.mrb[36].mxu1 }
 0x8a7   : > { %10654 = vst [vmem:[#allocation42_spill] sm:$0xff] %v9482_v57  ;;  %v8228_v33 = vpop.f32.mrb[37].mxu1  ;;  %v3030_v57 = vmul.f32 %v9249_v13, %v9306_v17 }
 0x8a8   : > { %v9495_v33 = vld [vmem:[%s8792_s11 + $0x10] sm:$0x1] }
 0x8b5   : > { %v3980_v43 = vpop.f32.mrb[38].mxu1 }
 0x8b6   : > { %v8242_v28 = vpop.f32.mrb[39].mxu1  ;;  %v3984_v44 = vsel %vm212_vm4, %v3980_v43, -inf }
 0x8b7   : > { %3985 = vmax.xlane.f32.xlu1 %v3984_v44  ;;  %v3052_v28 = vsel %vm1158_vm5, %v3030_v57, 0.0 }
 0x8bb   : > { %3041 = vadd.xlane.f32.xlu1 %v3040_v53 }
 0x8bf   : > { %3047 = vadd.xlane.f32.xlu1 %v3046_v24 }
 0x8c3   : > { %3053 = vadd.xlane.f32.xlu1 %v3052_v28  ;;  %v3078_v28 = vpop.xlane.xlu0 %3077 }
 0x8d4   : > { %3999 = vrot.lane.b32.xlu1 %v9495_v33, %s8757_s22 }
 0x8d8   : > { %4150 = vrot.lane.b32.xlu1 %v8829_v16, %s8755_s20 }
 0x8dd   : > { %v9501_v44 = vpop.f32.mrb[26].mxu0 }
 0x8de   : > { %10655 = vst [vmem:[#allocation43_spill] sm:$0xff] %v9501_v44  ;;  %v8203_v52 = vpop.f32.mrb[27].mxu0 }
 0x944   : > { %v3986_v22 = vpop.xlane.xlu1 %3985 }
 0x945   : > { %v3987_v53 = vsub.f32 %v3980_v43, %v3986_v22 }
 0x947   : > { %v3988_v13 = vmul.f32 1.442695, %v3987_v53  ;;  %v8513_v53 = vpop.permute.xlu0 %8512 }
 0x948   : > { %v9503_v17 = vpop.xlane.xlu1 %3041 }
 0x949   : > { %8560 = vpow2.f32 %v3988_v13  ;;  %v9506_v57 = vmax.f32 %v3066_v11, %v9503_v17 }
 0x94b   : > { %v3090_v24 = vsub.f32 %v9336_v60, %v9506_v57 }
 0x94c   : > { %v9510_v0 = vpop.xlane.xlu1 %3047 }
 0x94d   : > { %v3101_v46 = vmul.f32 1.442695, %v3090_v24  ;;  %v9513_v52 = vmax.f32 %v3072_v32, %v9510_v0  ;;  %v4153_v24 = vpop.permute.xlu0 %4152 }
 0x94f   : > { %8562 = vpow2.f32 %v3101_v46  ;;  %v3092_v43 = vsub.f32 %v9339_v45, %v9513_v52  ;;  %v4178_v45 = vrot.slane %v4153_v24, %v8846_v30 }
 0x950   : > { %v9517_v22 = vpop.xlane.xlu1 %3053 }
 0x951   : > { %v3105_v13 = vmul.f32 1.442695, %v3092_v43  ;;  %v9520_v11 = vmax.f32 %v3078_v28, %v9517_v22  ;;  %v2410_v28 = vcombine.high %v9418_v35, %v10649_v42  ;;  %v2411_v35 = vcombine.high %v9431_v58, %v10649_v42 }
 0x952   : > { %v4171_v58 = vcombine.high %v4153_v24, %v10649_v42 }
 0x953   : > { %v9522_v44 = vpop.eup %8560  ;;  %8564 = vpow2.f32 %v3105_v13  ;;  %v3094_v60 = vsub.f32 %v9342_v2, %v9520_v11  ;;  %v8515_v2 = vunpack.i.h.bf16 %v8513_v53 }
 0x954   : > { %v3990_v32 = vsel %vm212_vm4, %v9522_v44, 0.0  ;;  %v4000_v46 = vpop.permute.xlu1 %3999 }
 0x955   : > { %v3109_v39 = vmul.f32 1.442695, %v3094_v60  ;;  %3991 = vadd.xlane.f32.xlu1 %v3990_v32 }
 0x957   : > { %8566 = vpow2.f32 %v3109_v39  ;;  %v8514_v39 = vunpack.i.l.bf16 %v8513_v53 }
 0x958   : > { %v4151_v43 = vpop.permute.xlu1 %4150 }
 0x959   : > { %v9529_v47 = vpop.eup %8562  ;;  %v4163_v13 = vrot.slane %v4151_v43, %v8846_v30  ;;  %v8449_v53 = vpack.c.bf16 %v8515_v2, %v8514_v39  ;;  %v4081_v2 = vpop.permute.xlu0 %4080  ;;  %v4156_v39 = vcombine.high %v4151_v43, %v10649_v42 }
 0x95a   : > { %8212 = vmatmul.mubr.msk.f32.vlgmr.msra.gmra.mrb[28].mxu0 %vm1308_vm11, %v9529_v47 }
 0x95b   : > { %8220 = vmatpush3.msk.msra.mxu0 %vm1312_vm10, %v2410_v28  ;;  %8221 = vmatprep.mubr.msk.f32.mxu0 %vm8747_vm0, %v10649_v42  ;;  %v4186_v60 = vcombine.low %v4163_v13, %v4178_v45  ;;  %v4187_v32 = vcombine.high %v4163_v13, %v4178_v45 }
 0x95c   : > { %8229 = vmatprep.subr.mxu0 %v10649_v42 }
 0x95d   : > { %v9540_v38 = vpop.eup %8564  ;;  %v4194_v23 = vrot.slane %v4186_v60, %v8870_v50  ;;  %v4099_v60 = vcombine.high %v4081_v2, %v10649_v42 }
 0x95e   : > { %8222 = vmatmul.mubr.msk.f32.vlgmr.msra.gmra.mrb[30].mxu0 %vm1308_vm11, %v9540_v38 }
 0x95f   : > { %8230 = vmatpush3.msk.msra.mxu0 %vm1312_vm10, %v2411_v35  ;;  %8231 = vmatprep.mubr.msk.f32.mxu0 %vm8747_vm0, %v10649_v42  ;;  %v4218_v45 = vcombine.high %v4194_v23, %v10649_v42  ;;  %v4106_v35 = vrot.slane %v4081_v2, %v8846_v30  ;;  %v4113_v24 = vrot.slane %v4099_v60, %v8846_v30 }
 0x960   : > { %8448 = vmatprep.subr.bf16.mxu0 %v10650_v18 }
 0x961   : > { %v9552_v28 = vpop.eup %8566  ;;  %8258 = vmatpush3.xpose.msk.msra.mxu1 %vm132_vm1, %v4218_v45 }
 0x962   : > { %8232 = vmatmul.mubr.msk.f32.vlgmr.msra.gmra.mrb[32].mxu0 %vm1308_vm11, %v9552_v28  ;;  %8267 = vmatprep.subr.mxu1 %v10649_v42 }
 0x963   : > { %8450 = vmatpush3.bf16.msra.mxu0 %v8449_v53  ;;  %8249 = vmatprep.mubr.msk.f32.mxu0 %vm8747_vm0, %v10649_v42  ;;  %v4185_v53 = vrot.slane %v4171_v58, %v8846_v30 }
 0x964   : > { %8247 = vmatprep.subr.mxu0 %v10649_v42 }
 0x966   : > { %4078 = vrot.lane.b32.xlu1 %v8865_v48, %s8756_s21 }
 0x967   : > { %8248 = vmatpush3.msk.msra.mxu0 %vm236_vm7, %v4000_v46  ;;  %v4170_v46 = vrot.slane %v4156_v39, %v8846_v30 }
 0x968   : > { %8252 = vmatprep.subr.mxu0 %v10649_v42 }
 0x969   : > { %v4202_v2 = vcombine.low %v4170_v46, %v4185_v53 }
 0x96a   : > { %4902 = vrot.lane.b32.xlu1 %v8837_v21, %s8755_s20 }
 0x96b   : > { %v4210_v7 = vrot.slane %v4202_v2, %v8870_v50 }
 0x9e2   : > { %v3992_v13 = vpop.xlane.xlu1 %3991 }
 0x9e3   : > { %8568 = vrcp.f32 %v3992_v13  ;;  %v4201_v13 = vrot.slane %v4187_v32, %v8870_v50 }
 0x9e6   : > { %v4079_v45 = vpop.permute.xlu1 %4078 }
 0x9e7   : > { %v4084_v36 = vcombine.high %v4079_v45, %v10649_v42  ;;  %v4091_v15 = vrot.slane %v4079_v45, %v8846_v30 }
 0x9e9   : > { %v4098_v27 = vrot.slane %v4084_v36, %v8846_v30  ;;  %v4114_v29 = vcombine.low %v4091_v15, %v4106_v35  ;;  %v4115_v43 = vcombine.high %v4091_v15, %v4106_v35  ;;  %v4219_v15 = vcombine.high %v4201_v13, %v10649_v42 }
 0x9ea   : > { %v9578_v19 = vpop.permute.xlu1 %4902  ;;  %v4203_v35 = vcombine.high %v4170_v46, %v4185_v53 }
 0x9eb   : > { %v4122_v58 = vrot.slane %v4114_v29, %v8870_v50  ;;  %v4130_v14 = vcombine.low %v4098_v27, %v4113_v24  ;;  %v4129_v39 = vrot.slane %v4115_v43, %v8870_v50  ;;  %v4131_v31 = vcombine.high %v4098_v27, %v4113_v24 }
 0x9ec   : > { %v4217_v46 = vrot.slane %v4203_v35, %v8870_v50 }
 0x9ed   : > { %v8569_v1 = vpop.eup %8568  ;;  %v9583_v45 = vcombine.high %v4122_v58, %v10649_v42  ;;  %v4905_v60 = vmul.f32 %v9578_v19, %v4122_v58  ;;  %v4138_v36 = vrot.slane %v4130_v14, %v8870_v50  ;;  %v9597_v14 = vcombine.high %v4129_v39, %v10649_v42 }
 0x9ee   : > { %v3994_v32 = vmul.f32 %v8569_v1, %v9522_v44  ;;  %v4907_v24 = vmul.f32 %v9578_v19, %v4129_v39  ;;  %v4145_v1 = vrot.slane %v4131_v31, %v8870_v50  ;;  %v4220_v44 = vcombine.high %v4210_v7, %v10649_v42 }
 0x9ef   : > { %8260 = vmatmul.mubr.msk.f32.vlgmr.msra.gmra.mrb[40].mxu1 %vm132_vm1, %v9583_v45  ;;  %v4913_v27 = vsel %vm1158_vm5, %v4905_v60, 0.0  ;;  %v4909_v29 = vmul.f32 %v9578_v19, %v4138_v36  ;;  %v9619_v43 = vcombine.high %v4138_v36, %v10649_v42  ;;  %v4221_v2 = vcombine.high %v4217_v46, %v10649_v42 }
 0x9f0   : > { %8268 = vmatpush3.xpose.msk.msra.mxu1 %vm132_vm1, %v4219_v15  ;;  %8250 = vmatmul.mubr.msk.f32.vlgmr.msra.gmra.mrb[34].mxu0 %vm232_vm8, %v3994_v32  ;;  %v4919_v31 = vsel %vm1158_vm5, %v4907_v24, 0.0 }
 0x9f1   : > { %8253 = vmatpush3.xpose.msk.msra.mxu0 %vm132_vm1, %v4194_v23  ;;  %8269 = vmatprep.mubr.msk.f32.mxu1 %vm8747_vm0, %v10649_v42  ;;  %v4925_v53 = vsel %vm1158_vm5, %v4909_v29, 0.0  ;;  %v4911_v23 = vmul.f32 %v9578_v19, %v4145_v1 }
 0x9f2   : > { %8277 = vmatprep.subr.mxu1 %v10649_v42  ;;  %4914 = vadd.xlane.f32.xlu0 %v4913_v27 }
 0x9f3   : > { %8254 = vmatprep.mubr.msk.f32.mxu0 %vm8747_vm0, %v10649_v42  ;;  %8262 = vmatprep.subr.mxu0 %v10649_v42 }
 0x9f4   : > { %8270 = vmatmul.mubr.msk.f32.vlgmr.msra.gmra.mrb[42].mxu1 %vm132_vm1, %v9597_v14  ;;  %8255 = vmatmul.mubr.msk.f32.vlgmr.msra.gmra.mrb[36].mxu0 %vm132_vm1, %v4122_v58  ;;  %v4931_v58 = vsel %vm1158_vm5, %v4911_v23, 0.0 }
 0x9f5   : > { %8278 = vmatpush3.xpose.msk.msra.mxu1 %vm132_vm1, %v4220_v44  ;;  %8263 = vmatpush3.xpose.msk.msra.mxu0 %vm132_vm1, %v4201_v13  ;;  %v9635_v13 = vcombine.high %v4145_v1, %v10649_v42 }
 0x9f6   : > { %4926 = vadd.xlane.f32.xlu1 %v4925_v53  ;;  %8279 = vmatprep.mubr.msk.f32.mxu1 %vm8747_vm0, %v10649_v42 }
 0x9f7   : > { %8287 = vmatprep.subr.mxu1 %v10649_v42  ;;  %4920 = vadd.xlane.f32.xlu0 %v4919_v31 }
 0x9f8   : > { %8264 = vmatprep.mubr.msk.f32.mxu0 %vm8747_vm0, %v10649_v42  ;;  %8272 = vmatprep.subr.mxu0 %v10649_v42 }
 0x9f9   : > { %8280 = vmatmul.mubr.msk.f32.vlgmr.msra.gmra.mrb[44].mxu1 %vm132_vm1, %v9619_v43  ;;  %8265 = vmatmul.mubr.msk.f32.vlgmr.msra.gmra.mrb[38].mxu0 %vm132_vm1, %v4129_v39 }
 0x9fa   : > { %8288 = vmatpush3.xpose.msk.msra.mxu1 %vm132_vm1, %v4221_v2  ;;  %8273 = vmatpush3.xpose.msk.msra.mxu0 %vm132_vm1, %v4210_v7 }
 0x9fb   : > { %4932 = vadd.xlane.f32.xlu1 %v4931_v58  ;;  %8289 = vmatprep.mubr.msk.f32.mxu1 %vm8747_vm0, %v10649_v42 }
 0x9fc   : > { %8274 = vmatprep.mubr.msk.f32.mxu0 %vm8747_vm0, %v10649_v42  ;;  %8282 = vmatprep.subr.mxu0 %v10649_v42 }
 0x9fd   : > { %8290 = vmatmul.mubr.msk.f32.vlgmr.msra.gmra.mrb[46].mxu1 %vm132_vm1, %v9635_v13  ;;  %8275 = vmatmul.mubr.msk.f32.vlgmr.msra.gmra.mrb[40].mxu0 %vm132_vm1, %v4138_v36 }
 0x9fe   : > { %8283 = vmatpush3.xpose.msk.msra.mxu0 %vm132_vm1, %v4217_v46  ;;  %8284 = vmatprep.mubr.msk.f32.mxu0 %vm8747_vm0, %v10649_v42 }
 0x9ff   : > { %8292 = vmatprep.subr.mxu0 %v10649_v42  ;;  %8297 = vmatprep.subr.mxu1 %v10649_v42 }
 0xa00   : > { %8299 = vmatprep.mubr.msk.f32.mxu1 %vm8747_vm0, %v10649_v42 }
 0xa01   : > { %8285 = vmatmul.mubr.msk.f32.vlgmr.msra.gmra.mrb[42].mxu0 %vm132_vm1, %v4145_v1 }
 0xa02   : > { %8294 = vmatprep.mubr.msk.f32.mxu0 %vm8747_vm0, %v10649_v42 }
 0xa2d   : > { %v9655_v7 = vpop.f32.mrb[28].mxu0 }
 0xa2e   : > { %10656 = vst [vmem:[#allocation44_spill] sm:$0xff] %v9655_v7  ;;  %v8213_v39 = vpop.f32.mrb[29].mxu0 }
 0xa31   : > { %v9657_v60 = vpop.f32.mrb[30].mxu0 }
 0xa32   : > { %10657 = vst [vmem:[#allocation45_spill] sm:$0xff] %v9657_v60  ;;  %v8223_v36 = vpop.f32.mrb[31].mxu0 }
 0xa35   : > { %v9659_v15 = vpop.f32.mrb[32].mxu0 }
 0xa36   : > { %10658 = vst [vmem:[#allocation46_spill] sm:$0xff] %v9659_v15  ;;  %v8233_v32 = vpop.f32.mrb[33].mxu0 }
 0xac2   : > { %v9661_v35 = vpop.f32.mrb[40].mxu1 }
 0xac3   : > { %v9663_v27 = vpop.f32.mrb[34].mxu0  ;;  %v8261_v29 = vpop.f32.mrb[41].mxu1 }
 0xac4   : > { %10659 = vst [vmem:[#allocation47_spill] sm:$0xff] %v9663_v27  ;;  %v8251_v24 = vpop.f32.mrb[35].mxu0 }
 0xac7   : > { %v4366_v44 = vpop.f32.mrb[36].mxu0  ;;  %v9665_v1 = vpop.f32.mrb[42].mxu1 }
 0xac8   : > { %v8256_v53 = vpop.f32.mrb[37].mxu0  ;;  %v8271_v46 = vpop.f32.mrb[43].mxu1  ;;  %v4937_v31 = vsel %vm1183_vm6, %v4366_v44, -inf }
 0xac9   : > { %4938 = vmax.xlane.f32.xlu1 %v4937_v31 }
 0xacc   : > { %v9668_v23 = vpop.f32.mrb[44].mxu1  ;;  %v4518_v2 = vpop.f32.mrb[38].mxu0 }
 0xacd   : > { %v8281_v58 = vpop.f32.mrb[45].mxu1  ;;  %v8266_v39 = vpop.f32.mrb[39].mxu0  ;;  %v4943_v36 = vsel %vm1183_vm6, %v4518_v2, -inf }
 0xace   : > { %4944 = vmax.xlane.f32.xlu0 %v4943_v36  ;;  %v4940_v58 = vsel %vm1183_vm6, %v9661_v35, -inf  ;;  %v4946_v39 = vsel %vm1183_vm6, %v9665_v1, -inf  ;;  %v4952_v36 = vsel %vm1183_vm6, %v9668_v23, -inf }
 0xad0   : > { %v9671_v32 = vpop.f32.mrb[46].mxu1  ;;  %v4670_v29 = vpop.f32.mrb[40].mxu0 }
 0xad1   : > { %v8291_v24 = vpop.f32.mrb[47].mxu1  ;;  %v8276_v27 = vpop.f32.mrb[41].mxu0  ;;  %v4949_v7 = vsel %vm1183_vm6, %v4670_v29, -inf }
 0xad2   : > { %4950 = vmax.xlane.f32.xlu0 %v4949_v7  ;;  %v4906_v7 = vmul.f32 %v9578_v19, %v9583_v45  ;;  %v9696_v45 = vpop.xlane.xlu1 %4926  ;;  %v9698_v24 = vpop.xlane.xlu0 %4914 }
 0xad3   : > { %10660 = vst [vmem:[#allocation48_spill] sm:$0xff] %v9696_v45  ;;  %10661 = vst [vmem:[#allocation49_spill] sm:$0xff] %v9698_v24 }
 0xad4   : > { %v4822_v53 = vpop.f32.mrb[42].mxu0  ;;  %v4916_v27 = vsel %vm1158_vm5, %v4906_v7, 0.0 }
 0xad5   : > { %v8286_v46 = vpop.f32.mrb[43].mxu0  ;;  %v4955_v31 = vsel %vm1183_vm6, %v4822_v53, -inf }
 0xad6   : > { %4956 = vmax.xlane.f32.xlu0 %v4955_v31  ;;  %v9700_v46 = vpop.xlane.xlu1 %4932  ;;  %v9702_v7 = vpop.xlane.xlu0 %4920 }
 0xad7   : > { %10662 = vst [vmem:[#allocation50_spill] sm:$0xff] %v9700_v46  ;;  %10663 = vst [vmem:[#allocation51_spill] sm:$0xff] %v9702_v7 }
 0xada   : > { %4222 = vrot.lane.b32.xlu1 %v8829_v16, %s8757_s22 }
 0xade   : > { %8517 = vrot.lane.b32.xlu1 %v9350_v37, %s8758_s23 }
 0xae2   : > { %5786 = vrot.lane.b32.xlu1 %v9495_v33, %s8758_s23 }
 0xaec   : > { %4224 = vrot.lane.b32.xlu0 %v8835_v20, %s8757_s22 }
 0xaf0   : > { %5780 = vrot.lane.b32.xlu0 %v8818_v12, %s8759_s24  ;;  %v4958_v12 = vsel %vm1183_vm6, %v9671_v32, -inf }
 0xb0f   : > { %4917 = vadd.xlane.f32.xlu0 %v4916_v27 }
 0xb13   : > { %4941 = vmax.xlane.f32.xlu0 %v4940_v58 }
 0xb17   : > { %4947 = vmax.xlane.f32.xlu0 %v4946_v39 }
 0xb1b   : > { %4953 = vmax.xlane.f32.xlu0 %v4952_v36 }
 0xb1f   : > { %4959 = vmax.xlane.f32.xlu0 %v4958_v12 }
 0xb35   : > { %8522 = vrot.lane.b32.xlu0 %v9350_v37, %s8760_s25 }
 0xb39   : > { %5881 = vrot.lane.b32.xlu0 %v9495_v33, %s8760_s25 }
 0xb3d   : > { %5962 = vrot.lane.b32.xlu0 %v8868_v49, %s8759_s24 }
 0xb56   : > { %v4939_v31 = vpop.xlane.xlu1 %4938 }
 0xb57   : > { %v9705_v27 = vmax.f32 %v4939_v31, %v9698_v24 }
 0xb59   : > { %10664 = vst [vmem:[#allocation52_spill] sm:$0xff] %v9705_v27  ;;  %v4969_v39 = vsub.f32 %v4366_v44, %v9705_v27 }
 0xb5a   : > { %v4223_v61 = vpop.permute.xlu1 %4222 }
 0xb5b   : > { %v4945_v58 = vpop.xlane.xlu0 %4944  ;;  %v4977_v40 = vmul.f32 1.442695, %v4969_v39  ;;  %v4228_v44 = vcombine.high %v4223_v61, %v10649_v42 }
 0xb5c   : > { %v9709_v36 = vmax.f32 %v4945_v58, %v9702_v7  ;;  %v4235_v58 = vrot.slane %v4223_v61, %v8846_v30 }
 0xb5d   : > { %8570 = vpow2.f32 %v4977_v40  ;;  %v4242_v40 = vrot.slane %v4228_v44, %v8846_v30 }
 0xb5e   : > { %10665 = vst [vmem:[#allocation53_spill] sm:$0xff] %v9709_v36  ;;  %v4971_v12 = vsub.f32 %v4518_v2, %v9709_v36  ;;  %v4908_v36 = vmul.f32 %v9578_v19, %v9597_v14 }
 0xb5f   : > { %v4951_v6 = vpop.xlane.xlu0 %4950 }
 0xb60   : > { %v9713_v15 = vmax.f32 %v4951_v6, %v9696_v45  ;;  %v4981_v60 = vmul.f32 1.442695, %v4971_v12 }
 0xb62   : > { %10666 = vst [vmem:[#allocation54_spill] sm:$0xff] %v9713_v15  ;;  %v4973_v31 = vsub.f32 %v4670_v29, %v9713_v15  ;;  %8572 = vpow2.f32 %v4981_v60 }
 0xb63   : > { %v4957_v3 = vpop.xlane.xlu0 %4956 }
 0xb64   : > { %v9717_v24 = vmax.f32 %v4957_v3, %v9700_v46  ;;  %v4985_v7 = vmul.f32 1.442695, %v4973_v31 }
 0xb66   : > { %10667 = vst [vmem:[#allocation55_spill] sm:$0xff] %v9717_v24  ;;  %v4975_v39 = vsub.f32 %v4822_v53, %v9717_v24  ;;  %8574 = vpow2.f32 %v4985_v7 }
 0xb67   : > { %v4225_v2 = vpop.permute.xlu0 %4224  ;;  %v9727_v61 = vpop.eup %8570 }
 0xb68   : > { %v4243_v6 = vcombine.high %v4225_v2, %v10649_v42  ;;  %v4250_v12 = vrot.slane %v4225_v2, %v8846_v30  ;;  %v4989_v46 = vmul.f32 1.442695, %v4975_v39 }
 0xb6a   : > { %v4257_v29 = vrot.slane %v4243_v6, %v8846_v30  ;;  %v4258_v45 = vcombine.low %v4235_v58, %v4250_v12  ;;  %v4259_v3 = vcombine.high %v4235_v58, %v4250_v12  ;;  %8576 = vpow2.f32 %v4989_v46  ;;  %v8518_v46 = vpop.permute.xlu1 %8517 }
 0xb6b   : > { %v8520_v2 = vunpack.i.h.bf16 %v8518_v46  ;;  %v8519_v39 = vunpack.i.l.bf16 %v8518_v46 }
 0xb6c   : > { %v4266_v15 = vrot.slane %v4258_v45, %v8870_v50  ;;  %v4273_v60 = vrot.slane %v4259_v3, %v8870_v50  ;;  %v4274_v31 = vcombine.low %v4242_v40, %v4257_v29  ;;  %v9737_v45 = vpop.eup %8572  ;;  %v4275_v7 = vcombine.high %v4242_v40, %v4257_v29  ;;  %v5781_v29 = vpop.permute.xlu0 %5780 }
 0xb6d   : > { %v8452_v12 = vpack.c.bf16 %v8520_v2, %v8519_v39 }
 0xb6e   : > { %v4290_v53 = vcombine.high %v4266_v15, %v10649_v42  ;;  %8293 = vmatpush3.msk.msra.mxu0 %vm1312_vm10, %v4266_v15  ;;  %v9743_v15 = vrot.slane %v4274_v31, %v8870_v50  ;;  %v9756_v58 = vrot.slane %v4275_v7, %v8870_v50  ;;  %v5787_v40 = vpop.permute.xlu1 %5786  ;;  %v4291_v2 = vcombine.high %v4273_v60, %v10649_v42 }
 0xb6f   : > { %8295 = vmatmul.mubr.msk.f32.vlgmr.msra.gmra.mrb[44].mxu0 %vm1308_vm11, %v9727_v61  ;;  %8302 = vmatprep.subr.mxu0 %v10649_v42 }
 0xb70   : > { %8298 = vmatpush3.msk.msra.mxu1 %vm1312_vm10, %v4290_v53  ;;  %8303 = vmatpush3.msk.msra.mxu0 %vm1312_vm10, %v4273_v60  ;;  %v9753_v44 = vpop.eup %8574 }
 0xb71   : > { %8304 = vmatprep.mubr.msk.f32.mxu0 %vm8747_vm0, %v10649_v42  ;;  %8312 = vmatprep.subr.mxu0 %v10649_v42 }
 0xb72   : > { %8307 = vmatprep.subr.mxu1 %v10649_v42 }
 0xb73   : > { %8305 = vmatmul.mubr.msk.f32.vlgmr.msra.gmra.mrb[46].mxu0 %vm1308_vm11, %v9737_v45 }
 0xb74   : > { %8313 = vmatpush3.msk.msra.mxu0 %vm1312_vm10, %v9743_v15  ;;  %8314 = vmatprep.mubr.msk.f32.mxu0 %vm8747_vm0, %v10649_v42  ;;  %v9765_v6 = vpop.eup %8576 }
 0xb75   : > { %8322 = vmatprep.subr.mxu0 %v10649_v42 }
 0xb77   : > { %8315 = vmatmul.mubr.msk.f32.vlgmr.msra.gmra.mrb[48].mxu0 %vm1308_vm11, %v9753_v44 }
 0xb78   : > { %8323 = vmatpush3.msk.msra.mxu0 %vm1312_vm10, %v9756_v58  ;;  %8324 = vmatprep.mubr.msk.f32.mxu0 %vm8747_vm0, %v10649_v42 }
 0xb79   : > { %8451 = vmatprep.subr.bf16.mxu0 %v10650_v18 }
 0xb7b   : > { %8325 = vmatmul.mubr.msk.f32.vlgmr.msra.gmra.mrb[50].mxu0 %vm1308_vm11, %v9765_v6 }
 0xb7c   : > { %8338 = vmatprep.mubr.msk.f32.mxu0 %vm8747_vm0, %v10649_v42 }
 0xb7f   : > { %8454 = vmatpush3.bf16.xpose.msk.msra.mxu0 %vm8811_vm2, %v8452_v12  ;;  %vm7659_vm2 = vcmask 261312  }
 0xb80   : > { %8336 = vmatprep.subr.mxu0 %v10649_v42 }
 0xb87   : > { %8337 = vmatpush3.xpose.msk.msra.mxu0 %vm132_vm1, %v5787_v40 }
 0xb88   : > { %8355 = vmatprep.subr.mxu0 %v10649_v42 }
 0xb8a   : > { %8339 = vmatmul.mubr.msk.f32.vlgmr.msra.gmra.mrb[52].mxu0 %vm132_vm1, %v5781_v29 }
 0xb8b   : > { %8357 = vmatprep.mubr.msk.f32.mxu0 %vm8747_vm0, %v10649_v42 }
 0xb9c   : > { %v9779_v3 = vpop.xlane.xlu0 %4917 }
 0xba0   : > { %v4942_v31 = vpop.xlane.xlu0 %4941 }
 0xba1   : > { %v9782_v53 = vmax.f32 %v4942_v31, %v9779_v3 }
 0xba3   : > { %v4970_v9 = vsub.f32 %v9661_v35, %v9782_v53 }
 0xba5   : > { %v4979_v7 = vmul.f32 1.442695, %v4970_v9 }
 0xba7   : > { %8578 = vpow2.f32 %v4979_v7 }
 0xbb1   : > { %v9786_v46 = vpop.eup %8578 }
 0xbb2   : > { %8300 = vmatmul.mubr.msk.f32.vlgmr.msra.gmra.mrb[48].mxu1 %vm1308_vm11, %v9786_v46 }
 0xbb3   : > { %8308 = vmatpush3.msk.msra.mxu1 %vm1312_vm10, %v4291_v2  ;;  %8309 = vmatprep.mubr.msk.f32.mxu1 %vm8747_vm0, %v10649_v42 }
 0xbb4   : > { %8317 = vmatprep.subr.mxu1 %v10649_v42 }
 0xc42   : > { %v9795_v39 = vpop.f32.mrb[44].mxu0 }
 0xc43   : > { %10668 = vst [vmem:[#allocation56_spill] sm:$0xff] %v9795_v39  ;;  %v8296_v12 = vpop.f32.mrb[45].mxu0  ;;  %v4922_v39 = vsel %vm1158_vm5, %v4908_v36, 0.0 }
 0xc44   : > { %v4910_v12 = vmul.f32 %v9578_v19, %v9619_v43 }
 0xc46   : > { %v9797_v35 = vpop.f32.mrb[46].mxu0 }
 0xc47   : > { %10669 = vst [vmem:[#allocation57_spill] sm:$0xff] %v9797_v35  ;;  %v8306_v40 = vpop.f32.mrb[47].mxu0 }
 0xc48   : > { %v4928_v40 = vsel %vm1158_vm5, %v4910_v12, 0.0 }
 0xc4a   : > { %v9799_v29 = vpop.f32.mrb[48].mxu0 }
 0xc4b   : > { %10670 = vst [vmem:[#allocation58_spill] sm:$0xff] %v9799_v29  ;;  %v8316_v31 = vpop.f32.mrb[49].mxu0 }
 0xc4c   : > { %v4912_v31 = vmul.f32 %v9578_v19, %v9635_v13  ;;  %v4948_v19 = vpop.xlane.xlu0 %4947 }
 0xc4e   : > { %v9801_v60 = vpop.f32.mrb[50].mxu0 }
 0xc4f   : > { %10671 = vst [vmem:[#allocation59_spill] sm:$0xff] %v9801_v60  ;;  %v8326_v9 = vpop.f32.mrb[51].mxu0 }
 0xc50   : > { %v4934_v9 = vsel %vm1158_vm5, %v4912_v31, 0.0  ;;  %v4954_v12 = vpop.xlane.xlu0 %4953 }
 0xc5d   : > { %v5862_v7 = vpop.f32.mrb[52].mxu0 }
 0xc5e   : > { %v5866_v2 = vsel %vm212_vm4, %v5862_v7, -inf  ;;  %v8340_v24 = vpop.f32.mrb[53].mxu0 }
 0xc5f   : > { %5867 = vmax.xlane.f32.xlu1 %v5866_v2 }
 0xc63   : > { %4923 = vadd.xlane.f32.xlu1 %v4922_v39 }
 0xc67   : > { %4929 = vadd.xlane.f32.xlu1 %v4928_v40 }
 0xc6b   : > { %4935 = vadd.xlane.f32.xlu1 %v4934_v9 }
 0xc7c   : > { %6032 = vrot.lane.b32.xlu1 %v8829_v16, %s8758_s23 }
 0xc80   : > { %6034 = vrot.lane.b32.xlu1 %v8835_v20, %s8758_s23 }
 0xc85   : > { %v9817_v14 = vpop.f32.mrb[48].mxu1 }
 0xc86   : > { %10672 = vst [vmem:[#allocation60_spill] sm:$0xff] %v9817_v14  ;;  %v8301_v24 = vpop.f32.mrb[49].mxu1 }
 0xcec   : > { %v5868_v43 = vpop.xlane.xlu1 %5867 }
 0xced   : > { %v5869_v13 = vsub.f32 %v5862_v7, %v5868_v43  ;;  %v4960_v7 = vpop.xlane.xlu0 %4959 }
 0xcef   : > { %v5870_v36 = vmul.f32 1.442695, %v5869_v13 }
 0xcf0   : > { %v9825_v39 = vpop.xlane.xlu1 %4923 }
 0xcf1   : > { %8580 = vpow2.f32 %v5870_v36  ;;  %v9828_v2 = vmax.f32 %v4948_v19, %v9825_v39 }
 0xcf3   : > { %v4972_v37 = vsub.f32 %v9665_v1, %v9828_v2 }
 0xcf4   : > { %v9832_v40 = vpop.xlane.xlu1 %4929 }
 0xcf5   : > { %v4983_v33 = vmul.f32 1.442695, %v4972_v37  ;;  %v9835_v31 = vmax.f32 %v4954_v12, %v9832_v40 }
 0xcf7   : > { %8582 = vpow2.f32 %v4983_v33  ;;  %v4974_v49 = vsub.f32 %v9668_v23, %v9835_v31  ;;  %v8523_v33 = vpop.permute.xlu0 %8522 }
 0xcf8   : > { %v9839_v9 = vpop.xlane.xlu1 %4935 }
 0xcf9   : > { %v4987_v24 = vmul.f32 1.442695, %v4974_v49  ;;  %v9842_v19 = vmax.f32 %v4960_v7, %v9839_v9  ;;  %v4292_v7 = vcombine.high %v9743_v15, %v10649_v42  ;;  %v4293_v15 = vcombine.high %v9756_v58, %v10649_v42 }
 0xcfb   : > { %v9844_v43 = vpop.eup %8580  ;;  %8584 = vpow2.f32 %v4987_v24  ;;  %v4976_v1 = vsub.f32 %v9671_v32, %v9842_v19  ;;  %v5882_v58 = vpop.permute.xlu0 %5881 }
 0xcfc   : > { %v5872_v13 = vsel %vm212_vm4, %v9844_v43, 0.0  ;;  %v6033_v36 = vpop.permute.xlu1 %6032 }
 0xcfd   : > { %v4991_v12 = vmul.f32 1.442695, %v4976_v1  ;;  %5873 = vadd.xlane.f32.xlu1 %v5872_v13  ;;  %v6045_v23 = vrot.slane %v6033_v36, %v8846_v30  ;;  %v8525_v13 = vunpack.i.h.bf16 %v8523_v33 }
 0xcff   : > { %8586 = vpow2.f32 %v4991_v12  ;;  %v8524_v12 = vunpack.i.l.bf16 %v8523_v33 }
 0xd00   : > { %v6035_v37 = vpop.permute.xlu1 %6034 }
 0xd01   : > { %v9851_v49 = vpop.eup %8582  ;;  %v6060_v24 = vrot.slane %v6035_v37, %v8846_v30  ;;  %v8456_v33 = vpack.c.bf16 %v8525_v13, %v8524_v12  ;;  %v6053_v13 = vcombine.high %v6035_v37, %v10649_v42 }
 0xd02   : > { %8310 = vmatmul.mubr.msk.f32.vlgmr.msra.gmra.mrb[50].mxu1 %vm1308_vm11, %v9851_v49 }
 0xd03   : > { %8318 = vmatpush3.msk.msra.mxu1 %vm1312_vm10, %v4292_v7  ;;  %8319 = vmatprep.mubr.msk.f32.mxu1 %vm8747_vm0, %v10649_v42  ;;  %v6068_v32 = vcombine.low %v6045_v23, %v6060_v24  ;;  %v6069_v1 = vcombine.high %v6045_v23, %v6060_v24  ;;  %v5963_v24 = vpop.permute.xlu0 %5962 }
 0xd04   : > { %8327 = vmatprep.subr.mxu1 %v10649_v42  ;;  %v5988_v12 = vrot.slane %v5963_v24, %v8846_v30 }
 0xd05   : > { %v9862_v60 = vpop.eup %8584  ;;  %v6076_v29 = vrot.slane %v6068_v32, %v8870_v50  ;;  %v6038_v32 = vcombine.high %v6033_v36, %v10649_v42  ;;  %v6083_v14 = vrot.slane %v6069_v1, %v8870_v50 }
 0xd06   : > { %8320 = vmatmul.mubr.msk.f32.vlgmr.msra.gmra.mrb[52].mxu1 %vm1308_vm11, %v9862_v60 }
 0xd07   : > { %8328 = vmatpush3.msk.msra.mxu1 %vm1312_vm10, %v4293_v15  ;;  %8329 = vmatprep.mubr.msk.f32.mxu1 %vm8747_vm0, %v10649_v42  ;;  %v6100_v23 = vcombine.high %v6076_v29, %v10649_v42  ;;  %v5981_v15 = vcombine.high %v5963_v24, %v10649_v42 }
 0xd08   : > { %8455 = vmatprep.subr.bf16.mxu1 %v10650_v18 }
 0xd09   : > { %v9874_v7 = vpop.eup %8586  ;;  %8356 = vmatpush3.xpose.msk.msra.mxu0 %vm132_vm1, %v6100_v23  ;;  %v5995_v36 = vrot.slane %v5981_v15, %v8846_v30 }
 0xd0a   : > { %8330 = vmatmul.mubr.msk.f32.vlgmr.msra.gmra.mrb[54].mxu1 %vm1308_vm11, %v9874_v7  ;;  %8365 = vmatprep.subr.mxu0 %v10649_v42 }
 0xd0b   : > { %8457 = vmatpush3.bf16.msra.mxu1 %v8456_v33  ;;  %8347 = vmatprep.mubr.msk.f32.mxu1 %vm8747_vm0, %v10649_v42  ;;  %v6067_v33 = vrot.slane %v6053_v13, %v8846_v30  ;;  %v6101_v13 = vcombine.high %v6083_v14, %v10649_v42 }
 0xd0c   : > { %8345 = vmatprep.subr.mxu1 %v10649_v42 }
 0xd0e   : > { %5960 = vrot.lane.b32.xlu1 %v8865_v48, %s8759_s24  ;;  %v6052_v48 = vrot.slane %v6038_v32, %v8846_v30 }
 0xd0f   : > { %8346 = vmatpush3.msk.msra.mxu1 %vm236_vm7, %v5882_v58 }
 0xd10   : > { %8350 = vmatprep.subr.mxu1 %v10649_v42  ;;  %v6084_v51 = vcombine.low %v6052_v48, %v6067_v33 }
 0xd12   : > { %6784 = vrot.lane.b32.xlu1 %v8837_v21, %s8758_s23 }
 0xd8a   : > { %v5874_v18 = vpop.xlane.xlu1 %5873 }
 0xd8b   : > { %8588 = vrcp.f32 %v5874_v18 }
 0xd8e   : > { %v5961_v23 = vpop.permute.xlu1 %5960 }
 0xd8f   : > { %v5966_v58 = vcombine.high %v5961_v23, %v10649_v42  ;;  %v5973_v35 = vrot.slane %v5961_v23, %v8846_v30 }
 0xd91   : > { %v5996_v27 = vcombine.low %v5973_v35, %v5988_v12  ;;  %v5980_v37 = vrot.slane %v5966_v58, %v8846_v30  ;;  %v5997_v18 = vcombine.high %v5973_v35, %v5988_v12  ;;  %v6092_v58 = vrot.slane %v6084_v51, %v8870_v50 }
 0xd92   : > { %v9901_v26 = vpop.permute.xlu1 %6784  ;;  %v6085_v35 = vcombine.high %v6052_v48, %v6067_v33 }
 0xd93   : > { %v6004_v24 = vrot.slane %v5996_v27, %v8870_v50  ;;  %v6011_v1 = vrot.slane %v5997_v18, %v8870_v50  ;;  %v6012_v8 = vcombine.low %v5980_v37, %v5995_v36  ;;  %v6013_v12 = vcombine.high %v5980_v37, %v5995_v36 }
 0xd94   : > { %v6102_v48 = vcombine.high %v6092_v58, %v10649_v42 }
 0xd95   : > { %v8589_v32 = vpop.eup %8588  ;;  %v6028_v55 = vcombine.high %v6004_v24, %v10649_v42  ;;  %v6787_v15 = vmul.f32 %v9901_v26, %v6004_v24  ;;  %v6020_v51 = vrot.slane %v6012_v8, %v8870_v50  ;;  %v6027_v8 = vrot.slane %v6013_v12, %v8870_v50 }
 0xd96   : > { %v5876_v23 = vmul.f32 %v8589_v32, %v9844_v43  ;;  %v6029_v32 = vcombine.high %v6011_v1, %v10649_v42 }
 0xd97   : > { %8358 = vmatmul.mubr.msk.f32.vlgmr.msra.gmra.mrb[54].mxu0 %vm132_vm1, %v6028_v55  ;;  %v6788_v27 = vmul.f32 %v9901_v26, %v6028_v55  ;;  %v6795_v18 = vsel %vm1158_vm5, %v6787_v15, 0.0  ;;  %v6789_v55 = vmul.f32 %v9901_v26, %v6011_v1  ;;  %v6791_v36 = vmul.f32 %v9901_v26, %v6020_v51 }
 0xd98   : > { %8366 = vmatpush3.xpose.msk.msra.mxu0 %vm132_vm1, %v6101_v13  ;;  %8348 = vmatmul.mubr.msk.f32.vlgmr.msra.gmra.mrb[56].mxu1 %vm232_vm8, %v5876_v23  ;;  %v6030_v37 = vcombine.high %v6020_v51, %v10649_v42  ;;  %v6031_v23 = vcombine.high %v6027_v8, %v10649_v42 }
 0xd99   : > { %8351 = vmatpush3.xpose.msk.msra.mxu1 %vm132_vm1, %v6076_v29  ;;  %8367 = vmatprep.mubr.msk.f32.mxu0 %vm8747_vm0, %v10649_v42  ;;  %v6798_v43 = vsel %vm1158_vm5, %v6788_v27, 0.0  ;;  %v6099_v29 = vrot.slane %v6085_v35, %v8870_v50  ;;  %v6801_v33 = vsel %vm1158_vm5, %v6789_v55, 0.0 }
 0xd9a   : > { %8375 = vmatprep.subr.mxu0 %v10649_v42  ;;  %6799 = vadd.xlane.f32.xlu1 %v6798_v43 }
 0xd9b   : > { %8352 = vmatprep.mubr.msk.f32.mxu1 %vm8747_vm0, %v10649_v42  ;;  %8360 = vmatprep.subr.mxu1 %v10649_v42  ;;  %v6103_v13 = vcombine.high %v6099_v29, %v10649_v42 }
 0xd9c   : > { %8368 = vmatmul.mubr.msk.f32.vlgmr.msra.gmra.mrb[56].mxu0 %vm132_vm1, %v6029_v32  ;;  %6796 = vadd.xlane.f32.xlu0 %v6795_v18 }
 0xd9d   : > { %8376 = vmatpush3.xpose.msk.msra.mxu0 %vm132_vm1, %v6102_v48  ;;  %8353 = vmatmul.mubr.msk.f32.vlgmr.msra.gmra.mrb[58].mxu1 %vm132_vm1, %v6004_v24  ;;  %v6793_v24 = vmul.f32 %v9901_v26, %v6027_v8 }
 0xd9e   : > { %8361 = vmatpush3.xpose.msk.msra.mxu1 %vm132_vm1, %v6083_v14  ;;  %8377 = vmatprep.mubr.msk.f32.mxu0 %vm8747_vm0, %v10649_v42  ;;  %v6807_v14 = vsel %vm1158_vm5, %v6791_v36, 0.0 }
 0xd9f   : > { %8385 = vmatprep.subr.mxu0 %v10649_v42  ;;  %6802 = vadd.xlane.f32.xlu1 %v6801_v33 }
 0xda0   : > { %8362 = vmatprep.mubr.msk.f32.mxu1 %vm8747_vm0, %v10649_v42  ;;  %8370 = vmatprep.subr.mxu1 %v10649_v42 }
 0xda1   : > { %8378 = vmatmul.mubr.msk.f32.vlgmr.msra.gmra.mrb[58].mxu0 %vm132_vm1, %v6030_v37  ;;  %8363 = vmatmul.mubr.msk.f32.vlgmr.msra.gmra.mrb[60].mxu1 %vm132_vm1, %v6011_v1  ;;  %v6813_v1 = vsel %vm1158_vm5, %v6793_v24, 0.0 }
 0xda2   : > { %8386 = vmatpush3.xpose.msk.msra.mxu0 %vm132_vm1, %v6103_v13  ;;  %8371 = vmatpush3.xpose.msk.msra.mxu1 %vm132_vm1, %v6092_v58 }
 0xda3   : > { %8387 = vmatprep.mubr.msk.f32.mxu0 %vm8747_vm0, %v10649_v42  ;;  %6808 = vadd.xlane.f32.xlu1 %v6807_v14 }
 0xda4   : > { %8372 = vmatprep.mubr.msk.f32.mxu1 %vm8747_vm0, %v10649_v42  ;;  %8380 = vmatprep.subr.mxu1 %v10649_v42 }
 0xda5   : > { %8388 = vmatmul.mubr.msk.f32.vlgmr.msra.gmra.mrb[60].mxu0 %vm132_vm1, %v6031_v23  ;;  %8373 = vmatmul.mubr.msk.f32.vlgmr.msra.gmra.mrb[62].mxu1 %vm132_vm1, %v6020_v51 }
 0xda6   : > { %8381 = vmatpush3.xpose.msk.msra.mxu1 %vm132_vm1, %v6099_v29  ;;  %8382 = vmatprep.mubr.msk.f32.mxu1 %vm8747_vm0, %v10649_v42  ;;  %v6790_v29 = vmul.f32 %v9901_v26, %v6029_v32 }
 0xda7   : > { %6814 = vadd.xlane.f32.xlu1 %v6813_v1  ;;  %8395 = vmatprep.subr.mxu0 %v10649_v42 }
 0xda8   : > { %8397 = vmatprep.mubr.msk.f32.mxu0 %vm8747_vm0, %v10649_v42  ;;  %8390 = vmatprep.subr.mxu1 %v10649_v42  ;;  %v6804_v36 = vsel %vm1158_vm5, %v6790_v29, 0.0 }
 0xda9   : > { %8383 = vmatmul.mubr.msk.f32.vlgmr.msra.gmra.mrb[64].mxu1 %vm132_vm1, %v6027_v8 }
 0xdaa   : > { %8392 = vmatprep.mubr.msk.f32.mxu1 %vm8747_vm0, %v10649_v42 }
 0xdd5   : > { %v9967_v15 = vpop.f32.mrb[50].mxu1 }
 0xdd6   : > { %v8311_v58 = vpop.f32.mrb[51].mxu1 }
 0xdd7   : > { %v6792_v58 = vmul.f32 %v9901_v26, %v6030_v37 }
 0xdd9   : > { %v9969_v27 = vpop.f32.mrb[52].mxu1  ;;  %v6810_v29 = vsel %vm1158_vm5, %v6792_v58, 0.0 }
 0xdda   : > { %v8321_v35 = vpop.f32.mrb[53].mxu1 }
 0xddd   : > { %v9971_v12 = vpop.f32.mrb[54].mxu1 }
 0xdde   : > { %v8331_v43 = vpop.f32.mrb[55].mxu1 }
 0xe6a   : > { %v9973_v18 = vpop.f32.mrb[54].mxu0 }
 0xe6b   : > { %v9975_v51 = vpop.f32.mrb[56].mxu1  ;;  %v6822_v55 = vsel %vm1183_vm6, %v9973_v18, -inf  ;;  %v8359_v48 = vpop.f32.mrb[55].mxu0 }
 0xe6c   : > { %v8349_v8 = vpop.f32.mrb[57].mxu1  ;;  %6823 = vmax.xlane.f32.xlu0 %v6822_v55 }
 0xe6f   : > { %v9980_v33 = vpop.f32.mrb[56].mxu0 }
 0xe70   : > { %v9983_v13 = vpop.f32.mrb[58].mxu1  ;;  %v8369_v14 = vpop.f32.mrb[57].mxu0  ;;  %6805 = vadd.xlane.f32.xlu0 %v6804_v36  ;;  %v6828_v1 = vsel %vm1183_vm6, %v9980_v33, -inf }
 0xe71   : > { %v8354_v24 = vpop.f32.mrb[59].mxu1 }
 0xe74   : > { %v9988_v35 = vpop.f32.mrb[58].mxu0  ;;  %v9990_v43 = vpop.f32.mrb[60].mxu1  ;;  %6829 = vmax.xlane.f32.xlu0 %v6828_v1 }
 0xe75   : > { %v8379_v32 = vpop.f32.mrb[59].mxu0  ;;  %v8364_v55 = vpop.f32.mrb[61].mxu1  ;;  %v6825_v48 = vsel %vm1183_vm6, %v9990_v43, -inf  ;;  %v6834_v1 = vsel %vm1183_vm6, %v9988_v35, -inf }
 0xe76   : > { %6826 = vmax.xlane.f32.xlu1 %v6825_v48  ;;  %v6794_v32 = vmul.f32 %v9901_v26, %v6031_v23  ;;  %v3135_v26 = vsel %vm1183_vm6, %v9402_v54, 0.0  ;;  %v3141_v23 = vsel %vm1183_vm6, %v9412_v25, 0.0  ;;  %v5017_v54 = vsel %vm1183_vm6, %v9727_v61, 0.0 }
 0xe77   : > { %v3150_v25 = vsel %vm1183_vm6, %v9540_v38, 0.0  ;;  %v5020_v61 = vsel %vm1183_vm6, %v9786_v46, 0.0 }
 0xe78   : > { %v9995_v8 = vpop.f32.mrb[60].mxu0  ;;  %v9997_v36 = vpop.f32.mrb[62].mxu1  ;;  %6811 = vadd.xlane.f32.xlu0 %v6810_v29  ;;  %v6816_v29 = vsel %vm1158_vm5, %v6794_v32, 0.0  ;;  %v3113_v32 = vsub.f32 %v9377_v4, %v9384_v10  ;;  %v3116_v4 = vsub.f32 %v9510_v0, %v9513_v52  ;;  %v5038_v10 = vsel %vm1183_vm6, %v9874_v7, 0.0 }
 0xe79   : > { %v8389_v14 = vpop.f32.mrb[61].mxu0  ;;  %v8374_v37 = vpop.f32.mrb[63].mxu1  ;;  %v6831_v24 = vsel %vm1183_vm6, %v9997_v36, -inf }
 0xe7a   : > { %6832 = vmax.xlane.f32.xlu1 %v6831_v24  ;;  %v6840_v14 = vsel %vm1183_vm6, %v9995_v8, -inf  ;;  %v6819_v37 = vsel %vm1183_vm6, %v9983_v13, -inf  ;;  %v3147_v24 = vsel %vm1183_vm6, %v9428_v63, 0.0  ;;  %v5023_v63 = vsel %vm1183_vm6, %v9737_v45, 0.0 }
 0xe7b   : > { %v5035_v45 = vsel %vm1183_vm6, %v9765_v6, 0.0  ;;  %v3129_v6 = vmul.f32 1.442695, %v3116_v4 }
 0xe7c   : > { %v10004_v55 = vpop.f32.mrb[64].mxu1  ;;  %6835 = vmax.xlane.f32.xlu0 %v6834_v1  ;;  %v3138_v1 = vsel %vm1183_vm6, %v9461_v5, 0.0  ;;  %v3111_v5 = vsub.f32 %v9373_v56, %v9380_v62  ;;  %v5026_v56 = vsel %vm1183_vm6, %v9851_v49, 0.0  ;;  %v3123_v62 = vmul.f32 1.442695, %v3113_v32 }
 0xe7d   : > { %v8384_v58 = vpop.f32.mrb[65].mxu1  ;;  %v6837_v48 = vsel %vm1183_vm6, %v10004_v55, -inf  ;;  %v3118_v49 = vsub.f32 %v9517_v22, %v9520_v11  ;;  %v4996_v22 = vsub.f32 %v9825_v39, %v9828_v2  ;;  %v5000_v2 = vsub.f32 %v9839_v9, %v9842_v19 }
 0xe7e   : > { %6838 = vmax.xlane.f32.xlu1 %v6837_v48  ;;  %v3119_v38 = vmul.f32 1.442695, %v3111_v5 }
 0xe80   : > { %6817 = vadd.xlane.f32.xlu0 %v6816_v29  ;;  %8590 = vpow2.f32 %v3119_v38 }
 0xe81   : > { %8592 = vpow2.f32 %v3123_v62 }
 0xe84   : > { %6841 = vmax.xlane.f32.xlu0 %v6840_v14 }
 0xe88   : > { %6820 = vmax.xlane.f32.xlu0 %v6819_v37 }
 0xe8f   : > { %6104 = vrot.lane.b32.xlu1 %v8829_v16, %s8760_s25  ;;  %v3153_v16 = vsel %vm1183_vm6, %v9440_v41, 0.0  ;;  %v3156_v41 = vsel %vm1183_vm6, %v9552_v28, 0.0  ;;  %v3114_v28 = vsub.f32 %v9503_v17, %v9506_v57  ;;  %v10059_v17 = vpop.eup %8590  ;;  %v3133_v57 = vmul.f32 1.442695, %v3118_v49 }
 0xe90   : > { %v3167_v0 = vmul.f32 %v10059_v17, %v8837_v21  ;;  %v10065_v52 = vpop.eup %8592 }
 0xe91   : > { %v3125_v46 = vmul.f32 1.442695, %v3114_v28  ;;  %v3169_v11 = vmul.f32 %v10065_v52, %v8837_v21 }
 0xe93   : > { %8594 = vpow2.f32 %v3125_v46 }
 0xe94   : > { %8596 = vpow2.f32 %v3129_v6 }
 0xe95   : > { %8598 = vpow2.f32 %v3133_v57 }
 0xe9d   : > { %v10072_v58 = vpop.eup %8594 }
 0xe9e   : > { %6106 = vrot.lane.b32.xlu0 %v8835_v20, %s8760_s25  ;;  %v3144_v20 = vsel %vm1183_vm6, %v9529_v47, 0.0  ;;  %v5029_v47 = vsel %vm1183_vm6, %v9753_v44, 0.0  ;;  %v5032_v44 = vsel %vm1183_vm6, %v9862_v60, 0.0  ;;  %v4994_v60 = vsub.f32 %v9779_v3, %v9782_v53  ;;  %v10079_v29 = vpop.eup %8596 }
 0xe9f   : > { %v5007_v3 = vmul.f32 1.442695, %v4996_v22  ;;  %v4998_v53 = vsub.f32 %v9832_v40, %v9835_v31  ;;  %v3170_v48 = vmul.f32 %v10072_v58, %v8837_v21  ;;  %v3172_v14 = vmul.f32 %v10079_v29, %v8837_v21  ;;  %v10086_v37 = vpop.eup %8598  ;;  %v6800_v31 = vpop.xlane.xlu1 %6799 }
 0xea0   : > { %v5003_v7 = vmul.f32 1.442695, %v4994_v60  ;;  %v5015_v40 = vmul.f32 1.442695, %v5000_v2 }
 0xea1   : > { %v5011_v39 = vmul.f32 1.442695, %v4998_v53 }
 0xea2   : > { %8600 = vpow2.f32 %v5003_v7 }
 0xea3   : > { %8602 = vpow2.f32 %v5007_v3 }
 0xea4   : > { %8604 = vpow2.f32 %v5011_v39 }
 0xea5   : > { %8606 = vpow2.f32 %v5015_v40 }
 0xeb3   : > { %3136 = vadd.xlane.f32.xlu1 %v3135_v26  ;;  %v3174_v26 = vmul.f32 %v10086_v37, %v8837_v21 }
 0xeb7   : > { %3142 = vadd.xlane.f32.xlu1 %v3141_v23  ;;  %v10091_v23 = vpop.eup %8600 }
 0xeb8   : > { %v5050_v9 = vmul.f32 %v10091_v23, %v8837_v21  ;;  %v10096_v19 = vpop.eup %8602 }
 0xebb   : > { %3148 = vadd.xlane.f32.xlu1 %v3147_v24  ;;  %v10098_v24 = vpop.xlane.xlu1 %6802 }
 0xebd   : > { %3139 = vadd.xlane.f32.xlu0 %v3138_v1  ;;  %v10101_v1 = vpop.xlane.xlu0 %6796 }
 0xebf   : > { %3154 = vadd.xlane.f32.xlu1 %v3153_v16  ;;  %v5052_v16 = vmul.f32 %v10096_v19, %v8837_v21 }
 0xec1   : > { %3145 = vadd.xlane.f32.xlu0 %v3144_v20  ;;  %v10105_v20 = vpop.eup %8604 }
 0xec2   : > { %v10112_v5 = vpop.eup %8606 }
 0xec3   : > { %5018 = vadd.xlane.f32.xlu1 %v5017_v54  ;;  %v10108_v54 = vpop.xlane.xlu1 %6808 }
 0xec5   : > { %3151 = vadd.xlane.f32.xlu0 %v3150_v25 }
 0xec7   : > { %5024 = vadd.xlane.f32.xlu1 %v5023_v63  ;;  %v10118_v62 = vpop.xlane.xlu1 %6814 }
 0xec9   : > { %3157 = vadd.xlane.f32.xlu0 %v3156_v41  ;;  %v5054_v41 = vmul.f32 %v10105_v20, %v8837_v21 }
 0xecb   : > { %5030 = vadd.xlane.f32.xlu1 %v5029_v47 }
 0xecd   : > { %5021 = vadd.xlane.f32.xlu0 %v5020_v61 }
 0xecf   : > { %5036 = vadd.xlane.f32.xlu1 %v5035_v45 }
 0xed1   : > { %5027 = vadd.xlane.f32.xlu0 %v5026_v56  ;;  %v5056_v56 = vmul.f32 %v10112_v5, %v8837_v21 }
 0xed5   : > { %5033 = vadd.xlane.f32.xlu0 %v5032_v44 }
 0xed9   : > { %5039 = vadd.xlane.f32.xlu0 %v5038_v10 }
 0xee0   : > { %3176 = vrot.lane.b32.xlu1 %v3167_v0, %s8754_s19 }
 0xee4   : > { %3336 = vrot.lane.b32.xlu1 %v3169_v11, %s8754_s19 }
 0xee8   : > { %3416 = vrot.lane.b32.xlu1 %v3170_v48, %s8754_s19 }
 0xeec   : > { %3576 = vrot.lane.b32.xlu1 %v3172_v14, %s8754_s19 }
 0xef0   : > { %3736 = vrot.lane.b32.xlu1 %v3174_v26, %s8754_s19 }
 0xef4   : > { %5138 = vrot.lane.b32.xlu1 %v5050_v9, %s8757_s22 }
 0xef8   : > { %5298 = vrot.lane.b32.xlu1 %v5052_v16, %s8757_s22 }
 0xef9   : > { %v6824_v25 = vpop.xlane.xlu0 %6823 }
 0xefa   : > { %v6844_v63 = vmax.f32 %v6824_v25, %v6800_v31 }
 0xefc   : > { %v6852_v47 = vsub.f32 %v9973_v18, %v6844_v63  ;;  %v6876_v61 = vsub.f32 %v6800_v31, %v6844_v63  ;;  %5458 = vrot.lane.b32.xlu1 %v5054_v41, %s8757_s22 }
 0xefd   : > { %v6806_v38 = vpop.xlane.xlu0 %6805 }
 0xefe   : > { %v6861_v32 = vmul.f32 1.442695, %v6852_v47  ;;  %v6885_v45 = vmul.f32 1.442695, %v6876_v61 }
 0xf00   : > { %8608 = vpow2.f32 %v6861_v32  ;;  %5618 = vrot.lane.b32.xlu1 %v5056_v56, %s8757_s22 }
 0xf01   : > { %8610 = vpow2.f32 %v6885_v45  ;;  %v6830_v28 = vpop.xlane.xlu0 %6829 }
 0xf02   : > { %v6846_v44 = vmax.f32 %v6830_v28, %v6806_v38 }
 0xf03   : > { %v6827_v46 = vpop.xlane.xlu1 %6826 }
 0xf04   : > { %v6854_v18 = vsub.f32 %v9980_v33, %v6846_v44  ;;  %v6878_v4 = vsub.f32 %v6806_v38, %v6846_v44  ;;  %v10147_v25 = vmax.f32 %v6827_v46, %v10098_v24 }
 0xf05   : > { %v6812_v10 = vpop.xlane.xlu0 %6811 }
 0xf06   : > { %v6865_v6 = vmul.f32 1.442695, %v6854_v18  ;;  %v6889_v49 = vmul.f32 1.442695, %v6878_v4  ;;  %v6853_v28 = vsub.f32 %v9990_v43, %v10147_v25 }
 0xf07   : > { %v6833_v57 = vpop.xlane.xlu1 %6832 }
 0xf08   : > { %8612 = vpow2.f32 %v6865_v6  ;;  %v10163_v44 = vmax.f32 %v6833_v57, %v10108_v54  ;;  %v6863_v43 = vmul.f32 1.442695, %v6853_v28 }
 0xf09   : > { %8614 = vpow2.f32 %v6889_v49  ;;  %v6836_v60 = vpop.xlane.xlu0 %6835 }
 0xf0a   : > { %v10122_v0 = vpop.eup %8608  ;;  %v6848_v7 = vmax.f32 %v6836_v60, %v6812_v10  ;;  %v6855_v57 = vsub.f32 %v9997_v36, %v10163_v44 }
 0xf0b   : > { %v10124_v22 = vpop.eup %8610  ;;  %v6839_v11 = vpop.xlane.xlu1 %6838  ;;  %v6902_v3 = vsel %vm1183_vm6, %v10122_v0, 0.0 }
 0xf0c   : > { %v6856_v53 = vsub.f32 %v9988_v35, %v6848_v7  ;;  %v6880_v33 = vsub.f32 %v6812_v10, %v6848_v7  ;;  %6903 = vadd.xlane.f32.xlu0 %v6902_v3  ;;  %v10130_v48 = vmax.f32 %v6839_v11, %v10118_v62  ;;  %v6932_v39 = vmul.f32 %v10124_v22, %v8837_v21 }
 0xf0d   : > { %v10134_v2 = vpop.xlane.xlu0 %6817  ;;  %v6867_v36 = vmul.f32 1.442695, %v6855_v57 }
 0xf0e   : > { %v6869_v14 = vmul.f32 1.442695, %v6856_v53  ;;  %v6893_v40 = vmul.f32 1.442695, %v6880_v33  ;;  %v6881_v31 = vsub.f32 %v10118_v62, %v10130_v48  ;;  %7020 = vrot.lane.b32.xlu1 %v6932_v39, %s8760_s25 }
 0xf0f   : > { %v6105_v38 = vpop.permute.xlu1 %6104 }
 0xf10   : > { %8616 = vpow2.f32 %v6869_v14  ;;  %v6110_v56 = vcombine.high %v6105_v38, %v10649_v42  ;;  %v6117_v46 = vrot.slane %v6105_v38, %v8846_v30 }
 0xf11   : > { %8618 = vpow2.f32 %v6893_v40  ;;  %v6842_v35 = vpop.xlane.xlu0 %6841 }
 0xf12   : > { %v10139_v26 = vpop.eup %8612  ;;  %v10142_v9 = vmax.f32 %v6842_v35, %v10134_v2  ;;  %v6124_v6 = vrot.slane %v6110_v56, %v8846_v30  ;;  %v6857_v35 = vsub.f32 %v10004_v55, %v10130_v48 }
 0xf13   : > { %v10144_v16 = vpop.eup %8614  ;;  %v6908_v63 = vsel %vm1183_vm6, %v10139_v26, 0.0 }
 0xf14   : > { %v6858_v41 = vsub.f32 %v9995_v8, %v10142_v9  ;;  %6909 = vadd.xlane.f32.xlu0 %v6908_v63  ;;  %v6934_v47 = vmul.f32 %v10144_v16, %v8837_v21  ;;  %v6871_v56 = vmul.f32 1.442695, %v6857_v35 }
 0xf15   : > { %v6821_v61 = vpop.xlane.xlu0 %6820 }
 0xf16   : > { %v6873_v32 = vmul.f32 1.442695, %v6858_v41  ;;  %7180 = vrot.lane.b32.xlu1 %v6934_v47, %s8760_s25  ;;  %v10157_v45 = vmax.f32 %v6821_v61, %v10101_v1 }
 0xf18   : > { %8620 = vpow2.f32 %v6873_v32  ;;  %v6851_v8 = vsub.f32 %v9983_v13, %v10157_v45  ;;  %v3112_v32 = vsub.f32 %v9454_v59, %v9457_v34  ;;  %v10673_v34 = vld [vmem:[#allocation37_spill] sm:$0xff] }
 0xf19   : > { %v6107_v18 = vpop.permute.xlu0 %6106 }
 0xf1a   : > { %v8617_v4 = vpop.eup %8616  ;;  %v6859_v10 = vmul.f32 1.442695, %v6851_v8  ;;  %v6125_v49 = vcombine.high %v6107_v18, %v10649_v42  ;;  %v6132_v60 = vrot.slane %v6107_v18, %v8846_v30  ;;  %v3121_v18 = vmul.f32 1.442695, %v3112_v32  ;;  %v10683_v32 = vld [vmem:[#allocation55_spill] sm:$0xff] }
 0xf1b   : > { %v10171_v7 = vpop.eup %8618  ;;  %v6914_v11 = vsel %vm1183_vm6, %v8617_v4, 0.0 }
 0xf1c   : > { %8622 = vpow2.f32 %v6859_v10  ;;  %v6139_v13 = vrot.slane %v6125_v49, %v8846_v30  ;;  %v6140_v3 = vcombine.low %v6117_v46, %v6132_v60  ;;  %v6141_v53 = vcombine.high %v6117_v46, %v6132_v60  ;;  %6915 = vadd.xlane.f32.xlu0 %v6914_v11  ;;  %v10676_v60 = vld [vmem:[#allocation36_spill] sm:$0xff] }
 0xf1d   : > { %v6936_v33 = vmul.f32 %v10171_v7, %v8837_v21  ;;  %8624 = vpow2.f32 %v6863_v43 }
 0xf1e   : > { %v6148_v39 = vrot.slane %v6140_v3, %v8870_v50  ;;  %v6155_v14 = vrot.slane %v6141_v53, %v8870_v50  ;;  %v6156_v40 = vcombine.low %v6124_v6, %v6139_v13  ;;  %v6157_v47 = vcombine.high %v6124_v6, %v6139_v13  ;;  %v10677_v13 = vld [vmem:[#allocation52_spill] sm:$0xff]  ;;  %v10678_v3 = vld [vmem:[#allocation49_spill] sm:$0xff] }
 0xf1f   : > { %7340 = vrot.lane.b32.xlu1 %v6936_v33, %s8760_s25  ;;  %8626 = vpow2.f32 %v6867_v36  ;;  %v4993_v53 = vsub.f32 %v10678_v3, %v10677_v13 }
 0xf20   : > { %v6172_v63 = vcombine.high %v6148_v39, %v10649_v42  ;;  %v6173_v41 = vcombine.high %v6155_v14, %v10649_v42  ;;  %8391 = vmatpush3.msk.msra.mxu1 %vm1312_vm10, %v6148_v39  ;;  %v6164_v61 = vrot.slane %v6156_v40, %v8870_v50  ;;  %v6171_v28 = vrot.slane %v6157_v47, %v8870_v50  ;;  %v10679_v39 = vld [vmem:[#allocation53_spill] sm:$0xff] }
 0xf21   : > { %8400 = vmatprep.subr.mxu1 %v10649_v42  ;;  %8628 = vpow2.f32 %v6871_v56  ;;  %v5001_v33 = vmul.f32 1.442695, %v4993_v53  ;;  %v6882_v53 = vsub.f32 %v10134_v2, %v10142_v9 }
 0xf22   : > { %v8621_v38 = vpop.eup %8620  ;;  %8396 = vmatpush3.msk.msra.mxu0 %vm1312_vm10, %v6172_v63  ;;  %v6174_v8 = vcombine.high %v6164_v61, %v10649_v42  ;;  %v6175_v6 = vcombine.high %v6171_v28, %v10649_v42  ;;  %8630 = vpow2.f32 %v3121_v18  ;;  %v10681_v63 = vld [vmem:[#allocation54_spill] sm:$0xff] }
 0xf23   : > { %8398 = vmatmul.mubr.msk.f32.vlgmr.msra.gmra.mrb[62].mxu0 %vm1308_vm11, %v10122_v0  ;;  %v6920_v55 = vsel %vm1183_vm6, %v8621_v38, 0.0  ;;  %8405 = vmatprep.subr.mxu0 %v10649_v42  ;;  %v10674_v0 = vld [vmem:[#allocation35_spill] sm:$0xff] }
 0xf24   : > { %6921 = vadd.xlane.f32.xlu0 %v6920_v55  ;;  %8406 = vmatpush3.msk.msra.mxu0 %vm1312_vm10, %v6173_v41  ;;  %v3115_v46 = vsub.f32 %v10674_v0, %v10673_v34  ;;  %v10682_v41 = vld [vmem:[#allocation48_spill] sm:$0xff]  ;;  %v10684_v55 = vld [vmem:[#allocation50_spill] sm:$0xff]  ;;  %v6875_v0 = vsub.f32 %v10101_v1, %v10157_v45 }
 0xf25   : > { %8407 = vmatprep.mubr.msk.f32.mxu0 %vm8747_vm0, %v10649_v42  ;;  %8415 = vmatprep.subr.mxu0 %v10649_v42  ;;  %v4997_v47 = vsub.f32 %v10682_v41, %v10681_v63  ;;  %v4999_v56 = vsub.f32 %v10684_v55, %v10683_v32 }
 0xf26   : > { %v8623_v59 = vpop.eup %8622  ;;  %v3127_v49 = vmul.f32 1.442695, %v3115_v46 }
 0xf27   : > { %8393 = vmatmul.mubr.msk.f32.vlgmr.msra.gmra.mrb[66].mxu1 %vm1308_vm11, %v8623_v59  ;;  %8408 = vmatmul.mubr.msk.f32.vlgmr.msra.gmra.mrb[64].mxu0 %vm1308_vm11, %v10139_v26  ;;  %v8625_v10 = vpop.eup %8624  ;;  %v10675_v26 = vld [vmem:[#allocation38_spill] sm:$0xff]  ;;  %v5013_v34 = vmul.f32 1.442695, %v4999_v56 }
 0xf28   : > { %8401 = vmatpush3.msk.msra.mxu1 %vm1312_vm10, %v6155_v14  ;;  %8402 = vmatprep.mubr.msk.f32.mxu1 %vm8747_vm0, %v10649_v42  ;;  %v3117_v43 = vsub.f32 %v10676_v60, %v10675_v26  ;;  %8632 = vpow2.f32 %v3127_v49  ;;  %v10680_v14 = vld [vmem:[#allocation51_spill] sm:$0xff]  ;;  %v6899_v49 = vsel %vm1183_vm6, %v8623_v59, 0.0  ;;  %v6877_v26 = vsub.f32 %v10098_v24, %v10147_v25 }
 0xf29   : > { %8416 = vmatpush3.msk.msra.mxu0 %vm1312_vm10, %v6174_v8  ;;  %8417 = vmatprep.mubr.msk.f32.mxu0 %vm8747_vm0, %v10649_v42  ;;  %v8627_v57 = vpop.eup %8626  ;;  %v4995_v40 = vsub.f32 %v10680_v14, %v10679_v39  ;;  %v6883_v60 = vmul.f32 1.442695, %v6875_v0  ;;  %v6879_v59 = vsub.f32 %v10108_v54, %v10163_v44 }
 0xf2a   : > { %8410 = vmatprep.subr.mxu1 %v10649_v42  ;;  %8425 = vmatprep.subr.mxu0 %v10649_v42  ;;  %v3131_v11 = vmul.f32 1.442695, %v3117_v43  ;;  %v6887_v13 = vmul.f32 1.442695, %v6877_v26 }
 0xf2b   : > { %8403 = vmatmul.mubr.msk.f32.vlgmr.msra.gmra.mrb[68].mxu1 %vm1308_vm11, %v8625_v10  ;;  %8418 = vmatmul.mubr.msk.f32.vlgmr.msra.gmra.mrb[66].mxu0 %vm1308_vm11, %v8617_v4  ;;  %v8629_v4 = vpop.eup %8628  ;;  %v5005_v35 = vmul.f32 1.442695, %v4995_v40  ;;  %v6891_v54 = vmul.f32 1.442695, %v6879_v59  ;;  %v6897_v40 = vmul.f32 1.442695, %v6882_v53 }
 0xf2c   : > { %8411 = vmatpush3.msk.msra.mxu1 %vm1312_vm10, %v6164_v61  ;;  %8412 = vmatprep.mubr.msk.f32.mxu1 %vm8747_vm0, %v10649_v42  ;;  %8634 = vpow2.f32 %v3131_v11  ;;  %v10237_v36 = vpop.eup %8630  ;;  %v6905_v11 = vsel %vm1183_vm6, %v8625_v10, 0.0  ;;  %v6911_v10 = vsel %vm1183_vm6, %v8627_v57, 0.0 }
 0xf2d   : > { %8426 = vmatpush3.msk.msra.mxu0 %vm1312_vm10, %v6175_v6  ;;  %8427 = vmatprep.mubr.msk.f32.mxu0 %vm8747_vm0, %v10649_v42  ;;  %8636 = vpow2.f32 %v5001_v33  ;;  %v3168_v61 = vmul.f32 %v10237_v36, %v8837_v21 }
 0xf2e   : > { %8420 = vmatprep.subr.mxu1 %v10649_v42  ;;  %8638 = vpow2.f32 %v5005_v35  ;;  %v6917_v35 = vsel %vm1183_vm6, %v8629_v4, 0.0 }
 0xf2f   : > { %8413 = vmatmul.mubr.msk.f32.vlgmr.msra.gmra.mrb[70].mxu1 %vm1308_vm11, %v8627_v57  ;;  %8428 = vmatmul.mubr.msk.f32.vlgmr.msra.gmra.mrb[68].mxu0 %vm1308_vm11, %v8621_v38 }
 0xf30   : > { %8421 = vmatpush3.msk.msra.mxu1 %vm1312_vm10, %v6171_v28  ;;  %8422 = vmatprep.mubr.msk.f32.mxu1 %vm8747_vm0, %v10649_v42  ;;  %v5009_v42 = vmul.f32 1.442695, %v4997_v47  ;;  %vm7649_vm0 = vcmask 254144  }
 0xf32   : > { %v10243_v38 = vpop.eup %8632  ;;  %8640 = vpow2.f32 %v5009_v42 }
 0xf33   : > { %8423 = vmatmul.mubr.msk.f32.vlgmr.msra.gmra.mrb[72].mxu1 %vm1308_vm11, %v8629_v4  ;;  %v3171_v28 = vmul.f32 %v10243_v38, %v8837_v21  ;;  %8642 = vpow2.f32 %v5013_v34 }
 0xf34   : > { %8644 = vpow2.f32 %v6883_v60  ;;  %v10685_v60 = vld [vmem:[#allocation39_spill] sm:$0xff] }
 0xf35   : > { %8646 = vpow2.f32 %v6887_v13 }
 0xf36   : > { %v10250_v8 = vpop.eup %8634  ;;  %8648 = vpow2.f32 %v6891_v54 }
 0xf37   : > { %v3173_v18 = vmul.f32 %v10250_v8, %v8837_v21  ;;  %v10257_v6 = vpop.eup %8636  ;;  %8650 = vpow2.f32 %v6897_v40 }
 0xf38   : > { %v5049_v1 = vmul.f32 %v10257_v6, %v8837_v21  ;;  %v10265_v45 = vpop.eup %8638 }
 0xf39   : > { %v5051_v24 = vmul.f32 %v10265_v45, %v8837_v21 }
 0xf3a   : > { %3256 = vrot.lane.b32.xlu0 %v3168_v61, %s8754_s19 }
 0xf3c   : > { %v10275_v25 = vpop.eup %8640 }
 0xf3d   : > { %v5053_v39 = vmul.f32 %v10275_v25, %v8837_v21  ;;  %v10287_v14 = vpop.eup %8642 }
 0xf3e   : > { %3496 = vrot.lane.b32.xlu0 %v3171_v28, %s8754_s19  ;;  %v5055_v57 = vmul.f32 %v10287_v14, %v8837_v21  ;;  %v10297_v63 = vpop.eup %8644 }
 0xf3f   : > { %v6931_v4 = vmul.f32 %v10297_v63, %v8837_v21  ;;  %v10304_v61 = vpop.eup %8646 }
 0xf40   : > { %v3137_v46 = vpop.xlane.xlu1 %3136  ;;  %v6933_v56 = vmul.f32 %v10304_v61, %v8837_v21  ;;  %v10313_v28 = vpop.eup %8648 }
 0xf41   : > { %v3159_v42 = vadd.f32 %v10059_v17, %v3137_v46  ;;  %v10316_v0 = vpop.eup %8650  ;;  %v6935_v17 = vmul.f32 %v10313_v28, %v8837_v21 }
 0xf42   : > { %3656 = vrot.lane.b32.xlu0 %v3173_v18, %s8754_s19 }
 0xf43   : > { %6900 = vadd.xlane.f32.xlu1 %v6899_v49  ;;  %8652 = vrcp.f32 %v3159_v42 }
 0xf44   : > { %v3143_v43 = vpop.xlane.xlu1 %3142 }
 0xf45   : > { %v3161_v32 = vadd.f32 %v10065_v52, %v3143_v43  ;;  %v6938_v52 = vmul.f32 %v10316_v0, %v8837_v21 }
 0xf46   : > { %5058 = vrot.lane.b32.xlu0 %v5049_v1, %s8757_s22 }
 0xf47   : > { %6906 = vadd.xlane.f32.xlu1 %v6905_v11  ;;  %8654 = vrcp.f32 %v3161_v32 }
 0xf48   : > { %v10271_v3 = vpop.xlane.xlu1 %3148 }
 0xf4a   : > { %5218 = vrot.lane.b32.xlu0 %v5051_v24, %s8757_s22  ;;  %v10281_v33 = vpop.xlane.xlu0 %3139  ;;  %v10686_v24 = vld [vmem:[#allocation40_spill] sm:$0xff] }
 0xf4b   : > { %6912 = vadd.xlane.f32.xlu1 %v6911_v10 }
 0xf4c   : > { %v10283_v44 = vpop.xlane.xlu1 %3154 }
 0xf4d   : > { %v8653_v13 = vpop.eup %8652 }
 0xf4e   : > { %5378 = vrot.lane.b32.xlu0 %v5053_v39, %s8757_s22  ;;  %v10291_v2 = vpop.xlane.xlu0 %3145 }
 0xf4f   : > { %6918 = vadd.xlane.f32.xlu1 %v6917_v35 }
 0xf50   : > { %v10293_v9 = vpop.xlane.xlu1 %5018 }
 0xf51   : > { %v8655_v10 = vpop.eup %8654 }
 0xf52   : > { %5538 = vrot.lane.b32.xlu0 %v5055_v57, %s8757_s22  ;;  %v3152_v41 = vpop.xlane.xlu0 %3151 }
 0xf53   : > { %v3164_v26 = vadd.f32 %v10079_v29, %v3152_v41 }
 0xf54   : > { %v10300_v47 = vpop.xlane.xlu1 %5024 }
 0xf55   : > { %8656 = vrcp.f32 %v3164_v26 }
 0xf56   : > { %6940 = vrot.lane.b32.xlu0 %v6931_v4, %s8760_s25  ;;  %v3158_v34 = vpop.xlane.xlu0 %3157  ;;  %v10687_v4 = vld [vmem:[#allocation45_spill] sm:$0xff] }
 0xf57   : > { %v3166_v1 = vadd.f32 %v10086_v37, %v3158_v34 }
 0xf58   : > { %v10309_v55 = vpop.xlane.xlu1 %5030 }
 0xf59   : > { %8658 = vrcp.f32 %v3166_v1  ;;  %v10689_v1 = vld [vmem:[#allocation60_spill] sm:$0xff] }
 0xf5a   : > { %7100 = vrot.lane.b32.xlu0 %v6933_v56, %s8760_s25  ;;  %v5022_v46 = vpop.xlane.xlu0 %5021 }
 0xf5b   : > { %v5042_v35 = vadd.f32 %v10091_v23, %v5022_v46 }
 0xf5c   : > { %v10318_v18 = vpop.xlane.xlu1 %5036 }
 0xf5d   : > { %8660 = vrcp.f32 %v5042_v35 }
 0xf5e   : > { %7260 = vrot.lane.b32.xlu0 %v6935_v17, %s8760_s25  ;;  %v5028_v59 = vpop.xlane.xlu0 %5027  ;;  %v10688_v17 = vld [vmem:[#allocation46_spill] sm:$0xff] }
 0xf5f   : > { %v5044_v57 = vadd.f32 %v10096_v19, %v5028_v59  ;;  %v8657_v56 = vpop.eup %8656 }
 0xf60   : > { %7500 = vrot.lane.b32.xlu1 %v6938_v52, %s8760_s25  ;;  %v3177_v49 = vpop.permute.xlu1 %3176 }
 0xf61   : > { %v3252_v43 = vadd.f32 %v10685_v60, %v3177_v49  ;;  %8662 = vrcp.f32 %v5044_v57 }
 0xf62   : > { %v5034_v37 = vpop.xlane.xlu0 %5033 }
 0xf63   : > { %v10330_v54 = vmul.f32 %v8653_v13, %v3252_v43  ;;  %v8659_v49 = vpop.eup %8658  ;;  %v5046_v26 = vadd.f32 %v10105_v20, %v5034_v37  ;;  %v10690_v37 = vld [vmem:[#allocation12_spill] sm:$0xff] }
 0xf64   : > { %v3337_v11 = vpop.permute.xlu1 %3336 }
 0xf65   : > { %v3412_v53 = vadd.f32 %v10686_v24, %v3337_v11  ;;  %8664 = vrcp.f32 %v5046_v26 }
 0xf66   : > { %v5040_v34 = vpop.xlane.xlu0 %5039 }
 0xf67   : > { %v10332_v39 = vmul.f32 %v8655_v10, %v3412_v53  ;;  %v5048_v23 = vadd.f32 %v10112_v5, %v5040_v34  ;;  %v8661_v59 = vpop.eup %8660  ;;  %v1264_v5 = vsel %vm1183_vm6, %v10690_v37, 0.0  ;;  %v10699_v37 = vld [vmem:[#allocation3_spill] sm:$0xff] }
 0xf68   : > { %v10334_v40 = vpop.permute.xlu1 %3416 }
 0xf69   : > { %v3831_v29 = vcombine.low %v10330_v54, %v10332_v39  ;;  %8666 = vrcp.f32 %v5048_v23  ;;  %v10693_v23 = vld [vmem:[#allocation28_spill] sm:$0xff]  ;;  %v5045_v54 = vadd.f32 %v10275_v25, %v10309_v55 }
 0xf6a   : > { %v10716_v25 = vld [vmem:[#allocation56_spill] sm:$0xff] }
 0xf6b   : > { %v8663_v53 = vpop.eup %8662 }
 0xf6c   : > { %v3577_v41 = vpop.permute.xlu1 %3576 }
 0xf6d   : > { %v3652_v42 = vadd.f32 %v10687_v4, %v3577_v41 }
 0xf6f   : > { %v10343_v60 = vmul.f32 %v8657_v56, %v3652_v42  ;;  %v10691_v42 = vld [vmem:[#allocation13_spill] sm:$0xff] }
 0xf70   : > { %v3737_v32 = vpop.permute.xlu1 %3736 }
 0xf71   : > { %v3812_v52 = vadd.f32 %v10688_v17, %v3737_v32  ;;  %v1270_v32 = vsel %vm1183_vm6, %v10691_v42, 0.0 }
 0xf73   : > { %v10345_v43 = vmul.f32 %v8659_v49, %v3812_v52  ;;  %v10692_v49 = vld [vmem:[#allocation14_spill] sm:$0xff] }
 0xf74   : > { %v5139_v19 = vpop.permute.xlu1 %5138  ;;  %v1267_v26 = vsel %vm1183_vm6, %v10692_v49, 0.0 }
 0xf75   : > { %v3855_v46 = vcombine.low %v10343_v60, %v10345_v43  ;;  %v5214_v11 = vadd.f32 %v10689_v1, %v5139_v19  ;;  %v10694_v1 = vld [vmem:[#allocation8_spill] sm:$0xff] }
 0xf77   : > { %v10352_v20 = vmul.f32 %v8661_v59, %v5214_v11  ;;  %v10695_v11 = vld [vmem:[#allocation2_spill] sm:$0xff] }
 0xf78   : > { %v5299_v13 = vpop.permute.xlu1 %5298 }
 0xf79   : > { %v5374_v24 = vadd.f32 %v9967_v15, %v5299_v13  ;;  %v8665_v15 = vpop.eup %8664  ;;  %v10696_v13 = vld [vmem:[#allocation15_spill] sm:$0xff] }
 0xf7a   : > { %v8667_v34 = vpop.eup %8666  ;;  %v1276_v59 = vsel %vm1183_vm6, %v10696_v13, 0.0  ;;  %v10706_v13 = vld [vmem:[#allocation26_spill] sm:$0xff] }
 0xf7b   : > { %v10354_v10 = vmul.f32 %v8663_v53, %v5374_v24  ;;  %v10697_v24 = vld [vmem:[#allocation29_spill] sm:$0xff] }
 0xf7c   : > { %v5459_v35 = vpop.permute.xlu1 %5458  ;;  %v1279_v53 = vsel %vm1183_vm6, %v10697_v24, 0.0 }
 0xf7d   : > { %v5721_v57 = vcombine.low %v10352_v20, %v10354_v10  ;;  %1265 = vadd.xlane.f32.xlu0 %v1264_v5  ;;  %v5534_v41 = vadd.f32 %v9969_v27, %v5459_v35  ;;  %v1273_v27 = vsel %vm1183_vm6, %v10693_v23, 0.0  ;;  %v10698_v35 = vld [vmem:[#allocation6_spill] sm:$0xff]  ;;  %v10703_v23 = vld [vmem:[#allocation25_spill] sm:$0xff]  ;;  %v10722_v20 = vld [vmem:[#allocation47_spill] sm:$0xff] }
 0xf7e   : > { %v1242_v5 = vsub.f32 %v10699_v37, %v10698_v35 }
 0xf7f   : > { %v10364_v17 = vmul.f32 %v8665_v15, %v5534_v41 }
 0xf80   : > { %v5619_v4 = vpop.permute.xlu1 %5618  ;;  %v1252_v15 = vmul.f32 1.442695, %v1242_v5 }
 0xf81   : > { %v5694_v56 = vadd.f32 %v9971_v12, %v5619_v4  ;;  %1271 = vadd.xlane.f32.xlu0 %v1270_v32  ;;  %v1240_v12 = vsub.f32 %v10695_v11, %v10694_v1  ;;  %v10700_v4 = vld [vmem:[#allocation16_spill] sm:$0xff]  ;;  %v6895_v32 = vmul.f32 1.442695, %v6881_v31 }
 0xf82   : > { %v1282_v42 = vsel %vm1183_vm6, %v10700_v4, 0.0 }
 0xf83   : > { %v10366_v52 = vmul.f32 %v8667_v34, %v5694_v56  ;;  %v1248_v41 = vmul.f32 1.442695, %v1240_v12  ;;  %v10701_v56 = vld [vmem:[#allocation23_spill] sm:$0xff]  ;;  %v10702_v34 = vld [vmem:[#allocation22_spill] sm:$0xff] }
 0xf84   : > { %1268 = vadd.xlane.f32.xlu1 %v1267_v26  ;;  %v1243_v49 = vsub.f32 %v10702_v34, %v10701_v56  ;;  %v10705_v12 = vld [vmem:[#allocation27_spill] sm:$0xff]  ;;  %v3160_v56 = vadd.f32 %v10237_v36, %v10281_v33  ;;  %v3162_v34 = vadd.f32 %v10072_v58, %v10291_v2  ;;  %v3165_v36 = vadd.f32 %v10250_v8, %v10283_v44  ;;  %v10707_v33 = vld [vmem:[#allocation44_spill] sm:$0xff] }
 0xf85   : > { %v5737_v19 = vcombine.low %v10364_v17, %v10366_v52  ;;  %1274 = vadd.xlane.f32.xlu0 %v1273_v27  ;;  %8668 = vpow2.f32 %v1248_v41  ;;  %v10704_v27 = vld [vmem:[#allocation24_spill] sm:$0xff]  ;;  %v3492_v2 = vadd.f32 %v10707_v33, %v10334_v40  ;;  %v5043_v8 = vadd.f32 %v10265_v45, %v10300_v47 }
 0xf86   : > { %8670 = vpow2.f32 %v6895_v32  ;;  %v1254_v26 = vmul.f32 1.442695, %v1243_v49  ;;  %v1245_v1 = vsub.f32 %v10704_v27, %v10703_v23  ;;  %v3163_v27 = vadd.f32 %v10243_v38, %v10271_v3 }
 0xf87   : > { %8672 = vpow2.f32 %v1252_v15  ;;  %v3838_v40 = vrot.slane %v3831_v29, %v8846_v30 }
 0xf88   : > { %1277 = vadd.xlane.f32.xlu1 %v1276_v59  ;;  %8674 = vpow2.f32 %v1254_v26  ;;  %v1258_v11 = vmul.f32 1.442695, %v1245_v1  ;;  %v1247_v59 = vsub.f32 %v10706_v13, %v10705_v12  ;;  %v10708_v12 = vld [vmem:[#allocation43_spill] sm:$0xff] }
 0xf89   : > { %1280 = vadd.xlane.f32.xlu0 %v1279_v53 }
 0xf8a   : > { %8676 = vpow2.f32 %v1258_v11  ;;  %v1262_v48 = vmul.f32 1.442695, %v1247_v59 }
 0xf8c   : > { %1283 = vadd.xlane.f32.xlu1 %v1282_v42  ;;  %8678 = vpow2.f32 %v1262_v48  ;;  %v5041_v48 = vadd.f32 %v10257_v6, %v10293_v9 }
 0xf8d   : > { %8680 = vrcp.f32 %v3160_v56  ;;  %v10711_v56 = vld [vmem:[#allocation41_spill] sm:$0xff] }
 0xf8e   : > { %8682 = vrcp.f32 %v3162_v34  ;;  %v10712_v34 = vld [vmem:[#allocation30_spill] sm:$0xff] }
 0xf8f   : > { %v10393_v24 = vpop.eup %8668  ;;  %8684 = vrcp.f32 %v3163_v27  ;;  %v1285_v45 = vsel %vm1183_vm6, %v10712_v34, 0.0  ;;  %v10713_v27 = vld [vmem:[#allocation42_spill] sm:$0xff] }
 0xf90   : > { %v10395_v62 = vpop.eup %8670  ;;  %v1296_v31 = vmul.f32 %v10393_v24, %v8837_v21  ;;  %8686 = vrcp.f32 %v3165_v36 }
 0xf91   : > { %v10399_v53 = vpop.eup %8672  ;;  %v6937_v35 = vmul.f32 %v10395_v62, %v8837_v21  ;;  %8688 = vrcp.f32 %v5041_v48 }
 0xf92   : > { %v1298_v37 = vmul.f32 %v10399_v53, %v8837_v21  ;;  %v10407_v5 = vpop.eup %8674  ;;  %8690 = vrcp.f32 %v5043_v8 }
 0xf93   : > { %v1299_v41 = vmul.f32 %v10407_v5, %v8837_v21 }
 0xf94   : > { %v10412_v4 = vpop.eup %8676 }
 0xf95   : > { %v1301_v32 = vmul.f32 %v10412_v4, %v8837_v21 }
 0xf96   : > { %v10419_v15 = vpop.eup %8678 }
 0xf97   : > { %v1303_v26 = vmul.f32 %v10419_v15, %v8837_v21  ;;  %v8681_v11 = vpop.eup %8680 }
 0xf98   : > { %v8683_v59 = vpop.eup %8682 }
 0xf99   : > { %v10414_v42 = vpop.xlane.xlu0 %6903  ;;  %v8685_v47 = vpop.eup %8684 }
 0xf9a   : > { %v8687_v33 = vpop.eup %8686 }
 0xf9d   : > { %1305 = vrot.lane.b32.xlu1 %v1296_v31, %s8749_s13  ;;  %v3822_v31 = vmul.f32 %v8683_v59, %v3492_v2 }
 0xf9f   : > { %7420 = vrot.lane.b32.xlu0 %v6937_v35, %s8760_s25  ;;  %v10709_v35 = vld [vmem:[#allocation10_spill] sm:$0xff] }
 0xfa1   : > { %1467 = vrot.lane.b32.xlu1 %v1298_v37, %s8749_s13  ;;  %v10425_v49 = vpop.xlane.xlu0 %6909  ;;  %v10710_v37 = vld [vmem:[#allocation7_spill] sm:$0xff] }
 0xfa5   : > { %1547 = vrot.lane.b32.xlu1 %v1299_v41, %s8749_s13  ;;  %v1241_v41 = vsub.f32 %v10710_v37, %v10709_v35 }
 0xfa7   : > { %v1250_v2 = vmul.f32 1.442695, %v1241_v41  ;;  %v10719_v41 = vld [vmem:[#allocation57_spill] sm:$0xff] }
 0xfa9   : > { %1707 = vrot.lane.b32.xlu1 %v1301_v32, %s8749_s13  ;;  %v10430_v23 = vpop.xlane.xlu0 %6915  ;;  %8692 = vpow2.f32 %v1250_v2 }
 0xfaa   : > { %8694 = vrcp.f32 %v5045_v54 }
 0xfad   : > { %1867 = vrot.lane.b32.xlu1 %v1303_v26, %s8749_s13 }
 0xfb1   : > { %v10437_v58 = vpop.xlane.xlu0 %6921 }
 0xfb5   : > { %v3257_v1 = vpop.permute.xlu0 %3256 }
 0xfb6   : > { %v3332_v13 = vadd.f32 %v10708_v12, %v3257_v1  ;;  %v10714_v1 = vld [vmem:[#allocation9_spill] sm:$0xff] }
 0xfb8   : > { %v3818_v38 = vmul.f32 %v8681_v11, %v3332_v13  ;;  %v10715_v11 = vld [vmem:[#allocation4_spill] sm:$0xff]  ;;  %v5047_v13 = vadd.f32 %v10287_v14, %v10318_v18  ;;  %v8689_v14 = vpop.eup %8688 }
 0xfb9   : > { %v3497_v3 = vpop.permute.xlu0 %3496  ;;  %v1244_v12 = vsub.f32 %v10715_v11, %v10714_v1  ;;  %v10721_v1 = vld [vmem:[#allocation59_spill] sm:$0xff] }
 0xfba   : > { %v3839_v44 = vcombine.low %v3818_v38, %v3822_v31  ;;  %v3572_v6 = vadd.f32 %v10711_v56, %v3497_v3  ;;  %v3862_v31 = vrot.slane %v3855_v46, %v8846_v30  ;;  %v10717_v3 = vld [vmem:[#allocation11_spill] sm:$0xff]  ;;  %8696 = vrcp.f32 %v5047_v13 }
 0xfbb   : > { %v1256_v8 = vmul.f32 1.442695, %v1244_v12 }
 0xfbc   : > { %v3846_v32 = vrot.slane %v3839_v44, %v8846_v30  ;;  %v3824_v39 = vmul.f32 %v8685_v47, %v3572_v6  ;;  %v10718_v44 = vld [vmem:[#allocation5_spill] sm:$0xff] }
 0xfbd   : > { %v3657_v9 = vpop.permute.xlu0 %3656  ;;  %v1246_v35 = vsub.f32 %v10718_v44, %v10717_v3  ;;  %8698 = vpow2.f32 %v1256_v8 }
 0xfbe   : > { %v3863_v26 = vcombine.low %v3838_v40, %v3846_v32  ;;  %v3732_v36 = vadd.f32 %v10713_v27, %v3657_v9  ;;  %1286 = vadd.xlane.f32.xlu0 %v1285_v45  ;;  %v8691_v32 = vpop.eup %8690  ;;  %v5728_v27 = vrot.slane %v5721_v57, %v8846_v30 }
 0xfbf   : > { %v1260_v46 = vmul.f32 1.442695, %v1246_v35  ;;  %v7021_v35 = vpop.permute.xlu1 %7020 }
 0xfc0   : > { %v3828_v29 = vmul.f32 %v8687_v33, %v3732_v36  ;;  %v3870_v60 = vrot.slane %v3863_v26, %v8870_v50  ;;  %v10720_v33 = vld [vmem:[#allocation58_spill] sm:$0xff]  ;;  %v10481_v26 = vpop.eup %8692 }
 0xfc1   : > { %v5059_v59 = vpop.permute.xlu0 %5058  ;;  %8700 = vpow2.f32 %v1260_v46  ;;  %v1297_v57 = vmul.f32 %v10481_v26, %v8837_v21 }
 0xfc2   : > { %v3847_v48 = vcombine.low %v3824_v39, %v3828_v29  ;;  %v5134_v55 = vadd.f32 %v10716_v25, %v5059_v59  ;;  %v8695_v39 = vpop.eup %8694 }
 0xfc4   : > { %v3854_v38 = vrot.slane %v3847_v48, %v8846_v30  ;;  %v5698_v56 = vmul.f32 %v8689_v14, %v5134_v55  ;;  %v8697_v12 = vpop.eup %8696  ;;  %v10723_v14 = vld [vmem:[#allocation34_spill] sm:$0xff] }
 0xfc5   : > { %v5219_v37 = vpop.permute.xlu0 %5218 }
 0xfc6   : > { %v3871_v18 = vcombine.low %v3854_v38, %v3862_v31  ;;  %v5294_v40 = vadd.f32 %v10719_v41, %v5219_v37  ;;  %v5744_v31 = vrot.slane %v5737_v19, %v8846_v30  ;;  %v7181_v37 = vpop.permute.xlu1 %7180 }
 0xfc7   : > { %v10487_v48 = vpop.eup %8698 }
 0xfc8   : > { %v5702_v6 = vmul.f32 %v8691_v32, %v5294_v40  ;;  %v3878_v43 = vrot.slane %v3871_v18, %v8870_v50  ;;  %v1300_v55 = vmul.f32 %v10487_v48, %v8837_v21  ;;  %v6924_v40 = vadd.f32 %v10124_v22, %v10414_v42 }
 0xfc9   : > { %v5379_v9 = vpop.permute.xlu0 %5378  ;;  %v6926_v32 = vadd.f32 %v10144_v16, %v10425_v49  ;;  %v6930_v22 = vadd.f32 %v10316_v0, %v10437_v58 }
 0xfca   : > { %v5713_v34 = vcombine.low %v5698_v56, %v5702_v6  ;;  %v3879_v45 = vcombine.low %v3870_v60, %v3878_v43  ;;  %v3880_v47 = vcombine.high %v3870_v60, %v3878_v43  ;;  %v5454_v2 = vadd.f32 %v10720_v33, %v5379_v9  ;;  %v7341_v18 = vpop.permute.xlu1 %7340 }
 0xfcb   : > { %v10497_v8 = vpop.eup %8700  ;;  %8702 = vrcp.f32 %v6924_v40  ;;  %v6928_v56 = vadd.f32 %v10171_v7, %v10430_v23 }
 0xfcc   : > { %v5720_v36 = vrot.slane %v5713_v34, %v8846_v30  ;;  %3889 = vrot.lane.b32.xlu1 %v3879_v45, %s8761_s26  ;;  %v5706_v13 = vmul.f32 %v8695_v39, %v5454_v2  ;;  %v1302_v17 = vmul.f32 %v10497_v8, %v8837_v21  ;;  %8704 = vrcp.f32 %v6926_v32 }
 0xfcd   : > { %v5539_v54 = vpop.permute.xlu0 %5538  ;;  %8706 = vrcp.f32 %v6928_v56 }
 0xfce   : > { %v5745_v29 = vcombine.low %v5720_v36, %v5728_v27  ;;  %v5614_v11 = vadd.f32 %v10721_v1, %v5539_v54 }
 0xfd0   : > { %v5710_v59 = vmul.f32 %v8697_v12, %v5614_v11  ;;  %5764 = vrot.lane.b32.xlu1 %v10722_v20, %s8762_s27  ;;  %v5752_v3 = vrot.slane %v5745_v29, %v8870_v50  ;;  %v6901_v41 = vpop.xlane.xlu1 %6900 }
 0xfd1   : > { %v6923_v6 = vadd.f32 %v10297_v63, %v6901_v41  ;;  %v6941_v42 = vpop.permute.xlu0 %6940 }
 0xfd2   : > { %v5729_v10 = vcombine.low %v5706_v13, %v5710_v59 }
 0xfd3   : > { %8708 = vrcp.f32 %v6923_v6 }
 0xfd4   : > { %v5736_v38 = vrot.slane %v5729_v10, %v8846_v30  ;;  %1387 = vrot.lane.b32.xlu0 %v1297_v57, %s8749_s13  ;;  %v6907_v21 = vpop.xlane.xlu1 %6906 }
 0xfd5   : > { %v6925_v60 = vadd.f32 %v10304_v61, %v6907_v21  ;;  %v8703_v16 = vpop.eup %8702  ;;  %v7101_v27 = vpop.permute.xlu0 %7100 }
 0xfd6   : > { %v5753_v25 = vcombine.low %v5736_v38, %v5744_v31 }
 0xfd7   : > { %8710 = vrcp.f32 %v6925_v60 }
 0xfd8   : > { %1627 = vrot.lane.b32.xlu0 %v1300_v55, %s8749_s13  ;;  %v5760_v44 = vrot.slane %v5753_v25, %v8870_v50  ;;  %v6913_v43 = vpop.xlane.xlu1 %6912  ;;  %8712 = vrcp.f32 %v6930_v22 }
 0xfd9   : > { %v6927_v32 = vadd.f32 %v10313_v28, %v6913_v43 }
 0xfda   : > { %v5762_v52 = vcombine.high %v5752_v3, %v5760_v44  ;;  %v5761_v19 = vcombine.low %v5752_v3, %v5760_v44 }
 0xfdb   : > { %8714 = vrcp.f32 %v6927_v32 }
 0xfdc   : > { %1787 = vrot.lane.b32.xlu0 %v1302_v17, %s8749_s13  ;;  %5773 = vrot.lane.b32.xlu1 %v5762_v52, %s8762_s27  ;;  %v6919_v49 = vpop.xlane.xlu1 %6918 }
 0xfdd   : > { %v6929_v56 = vadd.f32 %v10395_v62, %v6919_v49 }
 0xfdf   : > { %8716 = vrcp.f32 %v6929_v56  ;;  %v10729_v56 = vld [vmem:[#allocation20_spill] sm:$0xff] }
 0xfe0   : > { %3882 = vrot.lane.b32.xlu0 %v10723_v14, %s8761_s26  ;;  %v7501_v59 = vpop.permute.xlu1 %7500 }
 0xfe4   : > { %3891 = vrot.lane.b32.xlu0 %v3880_v47, %s8761_s26  ;;  %v8705_v47 = vpop.eup %8704 }
 0xfe5   : > { %v8707_v2 = vpop.eup %8706 }
 0xfe6   : > { %v8709_v54 = vpop.eup %8708 }
 0xfe7   : > { %v8711_v13 = vpop.eup %8710 }
 0xfe8   : > { %5771 = vrot.lane.b32.xlu0 %v5761_v19, %s8762_s27 }
 0xfec   : > { %7646 = vrot.lane.b32.xlu0 %v9975_v51, %s8763_s28 }
 0xff6   : > { %v7095_v51 = vpop.f32.mrb[62].mxu0 }
 0xff7   : > { %v7096_v46 = vadd.f32 %v7095_v51, %v7021_v35  ;;  %v8399_v9 = vpop.f32.mrb[63].mxu0  ;;  %v8713_v35 = vpop.eup %8712 }
 0xff9   : > { %v7582_v34 = vmul.f32 %v8703_v16, %v7096_v46 }
 0xffa   : > { %v7015_v7 = vpop.f32.mrb[66].mxu1  ;;  %v7255_v63 = vpop.f32.mrb[64].mxu0 }
 0xffb   : > { %v7256_v23 = vadd.f32 %v7255_v63, %v7181_v37  ;;  %v8394_v45 = vpop.f32.mrb[67].mxu1  ;;  %v8409_v61 = vpop.f32.mrb[65].mxu0  ;;  %v7016_v36 = vadd.f32 %v7015_v7, %v6941_v42 }
 0xffc   : > { %v7261_v37 = vpop.permute.xlu0 %7260  ;;  %v8715_v63 = vpop.eup %8714  ;;  %v10724_v45 = vld [vmem:[#allocation17_spill] sm:$0xff] }
 0xffd   : > { %v7586_v33 = vmul.f32 %v8705_v47, %v7256_v23  ;;  %v7580_v20 = vmul.f32 %v8709_v54, %v7016_v36  ;;  %v8717_v43 = vpop.eup %8716 }
 0xffe   : > { %v7175_v0 = vpop.f32.mrb[68].mxu1  ;;  %v7415_v58 = vpop.f32.mrb[66].mxu0 }
 0xfff   : > { %v7603_v39 = vcombine.low %v7582_v34, %v7586_v33  ;;  %v7176_v29 = vadd.f32 %v7175_v0, %v7101_v27  ;;  %v7416_v1 = vadd.f32 %v7415_v58, %v7341_v18  ;;  %v8404_v11 = vpop.f32.mrb[69].mxu1  ;;  %v8419_v12 = vpop.f32.mrb[67].mxu0 }
0x1001   : > { %v7584_v10 = vmul.f32 %v8711_v13, %v7176_v29  ;;  %v7590_v57 = vmul.f32 %v8707_v2, %v7416_v1  ;;  %v7610_v17 = vrot.slane %v7603_v39, %v8846_v30  ;;  %v10725_v2 = vld [vmem:[#allocation19_spill] sm:$0xff] }
0x1002   : > { %v7335_v31 = vpop.f32.mrb[70].mxu1  ;;  %v7575_v38 = vpop.f32.mrb[68].mxu0 }
0x1003   : > { %v7595_v25 = vcombine.low %v7580_v20, %v7584_v10  ;;  %v7576_v55 = vadd.f32 %v7575_v38, %v7501_v59  ;;  %v8414_v3 = vpop.f32.mrb[71].mxu1  ;;  %v8429_v44 = vpop.f32.mrb[69].mxu0  ;;  %v7336_v16 = vadd.f32 %v7335_v31, %v7261_v37 }
0x1004   : > { %v10726_v44 = vld [vmem:[#allocation31_spill] sm:$0xff] }
0x1005   : > { %v7602_v52 = vrot.slane %v7595_v25, %v8846_v30  ;;  %v7594_v19 = vmul.f32 %v8713_v35, %v7576_v55  ;;  %v7588_v62 = vmul.f32 %v8715_v63, %v7336_v16  ;;  %v10731_v16 = vld [vmem:[#allocation21_spill] sm:$0xff] }
0x1006   : > { %v7495_v14 = vpop.f32.mrb[72].mxu1 }
0x1007   : > { %v7627_v18 = vcombine.low %v7602_v52, %v7610_v17  ;;  %v7619_v41 = vcombine.low %v7590_v57, %v7594_v19  ;;  %v8424_v40 = vpop.f32.mrb[73].mxu1  ;;  %v10727_v17 = vld [vmem:[#allocation18_spill] sm:$0xff] }
0x1009   : > { %v7626_v36 = vrot.slane %v7619_v41, %v8846_v30  ;;  %v7634_v29 = vrot.slane %v7627_v18, %v8870_v50  ;;  %v10728_v18 = vld [vmem:[#allocation32_spill] sm:$0xff] }
0x100a   : > { %v1266_v21 = vpop.xlane.xlu0 %1265 }
0x100b   : > { %v1288_v60 = vadd.f32 %v10393_v24, %v1266_v21 }
0x100d   : > { %8718 = vrcp.f32 %v1288_v60 }
0x100e   : > { %v1272_v6 = vpop.xlane.xlu0 %1271 }
0x100f   : > { %v1290_v42 = vadd.f32 %v10399_v53, %v1272_v6 }
0x1011   : > { %v1269_v22 = vpop.xlane.xlu1 %1268  ;;  %8720 = vrcp.f32 %v1290_v42 }
0x1012   : > { %v1275_v51 = vpop.xlane.xlu0 %1274  ;;  %v1289_v59 = vadd.f32 %v10481_v26, %v1269_v22  ;;  %v10730_v22 = vld [vmem:[#allocation33_spill] sm:$0xff] }
0x1013   : > { %v1291_v20 = vadd.f32 %v10407_v5, %v1275_v51 }
0x1014   : > { %8722 = vrcp.f32 %v1289_v59 }
0x1015   : > { %v1278_v46 = vpop.xlane.xlu1 %1277  ;;  %8724 = vrcp.f32 %v1291_v20 }
0x1016   : > { %v1281_v9 = vpop.xlane.xlu0 %1280  ;;  %v1292_v57 = vadd.f32 %v10487_v48, %v1278_v46 }
0x1017   : > { %v8719_v61 = vpop.eup %8718  ;;  %v1293_v31 = vadd.f32 %v10412_v4, %v1281_v9 }
0x1018   : > { %8726 = vrcp.f32 %v1292_v57 }
0x1019   : > { %v1284_v34 = vpop.xlane.xlu1 %1283  ;;  %8728 = vrcp.f32 %v1293_v31 }
0x101a   : > { %v7421_v7 = vpop.permute.xlu0 %7420  ;;  %v1294_v38 = vadd.f32 %v10497_v8, %v1284_v34 }
0x101b   : > { %v7496_v28 = vadd.f32 %v7495_v14, %v7421_v7  ;;  %v8721_v58 = vpop.eup %8720 }
0x101d   : > { %v7592_v49 = vmul.f32 %v8717_v43, %v7496_v28  ;;  %v1306_v23 = vpop.permute.xlu1 %1305 }
0x101e   : > { %v1383_v24 = vadd.f32 %v10724_v45, %v1306_v23  ;;  %v8723_v26 = vpop.eup %8722 }
0x101f   : > { %v7611_v47 = vcombine.low %v7588_v62, %v7592_v49  ;;  %v8725_v19 = vpop.eup %8724 }
0x1020   : > { %v1947_v27 = vmul.f32 %v8719_v61, %v1383_v24 }
0x1021   : > { %v7618_v53 = vrot.slane %v7611_v47, %v8846_v30  ;;  %v1468_v33 = vpop.permute.xlu1 %1467 }
0x1022   : > { %v1543_v0 = vadd.f32 %v10725_v2, %v1468_v33  ;;  %v8727_v40 = vpop.eup %8726 }
0x1023   : > { %v7635_v54 = vcombine.low %v7618_v53, %v7626_v36  ;;  %v8729_v60 = vpop.eup %8728 }
0x1024   : > { %v1951_v39 = vmul.f32 %v8721_v58, %v1543_v0 }
0x1025   : > { %v7642_v1 = vrot.slane %v7635_v54, %v8870_v50  ;;  %v1548_v10 = vpop.permute.xlu1 %1547 }
0x1026   : > { %v1962_v11 = vcombine.low %v1947_v27, %v1951_v39  ;;  %v1623_v35 = vadd.f32 %v10726_v44, %v1548_v10 }
0x1027   : > { %v7644_v12 = vcombine.high %v7634_v29, %v7642_v1  ;;  %v7643_v13 = vcombine.low %v7634_v29, %v7642_v1 }
0x1028   : > { %v1953_v48 = vmul.f32 %v8725_v19, %v1623_v35 }
0x1029   : > { %7655 = vrot.lane.b32.xlu0 %v7644_v12, %s8763_s28  ;;  %7653 = vrot.lane.b32.xlu1 %v7643_v13, %s8763_s28  ;;  %v1708_v55 = vpop.permute.xlu1 %1707 }
0x102a   : > { %v1783_v41 = vadd.f32 %v10728_v18, %v1708_v55 }
0x102c   : > { %v1957_v63 = vmul.f32 %v8729_v60, %v1783_v41 }
0x102d   : > { %v1868_v37 = vpop.permute.xlu1 %1867 }
0x102e   : > { %v1943_v51 = vadd.f32 %v10730_v22, %v1868_v37 }
0x103e   : > { %v3890_v21 = vpop.permute.xlu1 %3889 }
0x1042   : > { %v5765_v45 = vpop.permute.xlu1 %5764 }
0x104b   : > { %v1287_v25 = vpop.xlane.xlu0 %1286 }
0x104c   : > { %v1295_v3 = vadd.f32 %v10419_v15, %v1287_v25  ;;  %v1969_v15 = vrot.slane %v1962_v11, %v8846_v30 }
0x104e   : > { %8730 = vrcp.f32 %v1295_v3 }
0x104f   : > { %8732 = vrcp.f32 %v1294_v38  ;;  %v1388_v5 = vpop.permute.xlu0 %1387 }
0x1050   : > { %v1463_v52 = vadd.f32 %v10727_v17, %v1388_v5 }
0x1052   : > { %v1949_v4 = vmul.f32 %v8723_v26, %v1463_v52 }
0x1053   : > { %v1628_v14 = vpop.permute.xlu0 %1627 }
0x1054   : > { %v1970_v8 = vcombine.low %v1949_v4, %v1953_v48  ;;  %v1703_v6 = vadd.f32 %v10729_v56, %v1628_v14 }
0x1056   : > { %v1977_v32 = vrot.slane %v1970_v8, %v8846_v30  ;;  %v1955_v43 = vmul.f32 %v8727_v40, %v1703_v6 }
0x1057   : > { %v1788_v42 = vpop.permute.xlu0 %1787 }
0x1058   : > { %v8731_v46 = vpop.eup %8730  ;;  %v1994_v9 = vcombine.low %v1969_v15, %v1977_v32  ;;  %v1863_v34 = vadd.f32 %v10731_v16, %v1788_v42 }
0x1059   : > { %v8733_v7 = vpop.eup %8732  ;;  %v1961_v28 = vmul.f32 %v8731_v46, %v1943_v51 }
0x105a   : > { %v1959_v62 = vmul.f32 %v8733_v7, %v1863_v34  ;;  %v2001_v53 = vrot.slane %v1994_v9, %v8870_v50 }
0x105b   : > { %v1986_v49 = vcombine.low %v1957_v63, %v1961_v28  ;;  %v3883_v23 = vpop.permute.xlu0 %3882 }
0x105c   : > { %v1978_v24 = vcombine.low %v1955_v43, %v1959_v62  ;;  %3886 = vst.msk [vmem:[%s9021_s17] sm:$0x1] %vm3885_vm12, %v3883_v23 }
0x105d   : > { %v1993_v61 = vrot.slane %v1986_v49, %v8846_v30  ;;  %5768 = vst.msk [vmem:[%s9021_s17] sm:$0x1] %vm5767_vm13, %v5765_v45 }
0x105e   : > { %v1985_v47 = vrot.slane %v1978_v24, %v8846_v30  ;;  %v5774_v30 = vpop.permute.xlu1 %5773 }
0x105f   : > { %v3892_v27 = vpop.permute.xlu0 %3891 }
0x1060   : > { %v2002_v36 = vcombine.low %v1985_v47, %v1993_v61 }
0x1062   : > { %v2009_v33 = vrot.slane %v2002_v36, %v8870_v50 }
0x1063   : > { %v5772_v2 = vpop.permute.xlu0 %5771 }
0x1064   : > { %v2010_v0 = vcombine.low %v2001_v53, %v2009_v33  ;;  %v2011_v58 = vcombine.high %v2001_v53, %v2009_v33 }
0x1066   : > { %2014 = vst.msk [vmem:[%s9021_s17 + $0x1] sm:$0xff] %vm132_vm1, %v2010_v0  ;;  %2015 = vst.msk [vmem:[%s9021_s17 + $0x9] sm:$0xff] %vm132_vm1, %v2011_v58 }
0x1067   : > { %3897 = vst.msk [vmem:[%s9021_s17 + $0x9] sm:$0xff] %vm3895_vm14, %v3892_v27  ;;  %3896 = vst.msk [vmem:[%s9021_s17 + $0x1] sm:$0xff] %vm3895_vm14, %v3890_v21  ;;  %v7647_v54 = vpop.permute.xlu0 %7646 }
0x1068   : > { %5778 = vst.msk [vmem:[%s9021_s17 + $0x1] sm:$0xff] %vm5777_vm15, %v5772_v2  ;;  %5779 = vst.msk [vmem:[%s9021_s17 + $0x9] sm:$0xff] %vm5777_vm15, %v5774_v30 }
0x1069   : > { %7650 = vst.msk [vmem:[%s9021_s17] sm:$0x1] %vm7649_vm0, %v7647_v54 }
0x109b   : > { %v7656_v50 = vpop.permute.xlu0 %7655  ;;  %v7654_v39 = vpop.permute.xlu1 %7653 }
0x109c   : > { %7661 = vst.msk [vmem:[%s9021_s17 + $0x9] sm:$0xff] %vm7659_vm2, %v7656_v50  ;;  %7660 = vst.msk [vmem:[%s9021_s17 + $0x1] sm:$0xff] %vm7659_vm2, %v7654_v39 }
0x109d PF: > { %s11_s6 = sadd.s32 1, %s8743_s6  }
0x109e   : > { %p8_p4 = scmp.ge.s32.totalorder %s11_s6, 4  }
0x10a0   :  { %10 = sbr.rel (!%p8_p4) target bundleno = 1 (0x1), region = 54 }

</bundles_post_ra>
